<compile_context>
chip_gen: v6e
topology: v6e:2x2x1
jax: 0.10.0
libtpu: 0.0.40
codegen_flags: <defaults>
</compile_context>

<pallas_src>
import numpy as np

import jax
import jax.numpy as jnp
from jax import lax
from jax.experimental import pallas as pl
from jax.experimental.pallas import tpu as pltpu


BT = 16  # images per grid step (batch tile)


# ---------------------------------------------------------------------------
# Fused kernel (BT images per grid step)
# ---------------------------------------------------------------------------
def _fused_kernel(x_ref, b1m_ref, b1b_ref, b2m_ref, b2b_ref, sc1_ref, sc2_ref,
                  sel_ref, w1_ref, fb1_ref, w2_ref, fb2_ref, o_ref):
    f32 = jnp.float32
    M = x_ref.shape[0]          # BT*28 rows (images stacked on sublanes)
    L0 = M - 4                  # rows carrying conv1 output (valid: h<=23/img)

    # ---- conv1 + bias + ReLU: one K-folded matmul (L0,140)x(140,120) --------
    xcat = jnp.concatenate([x_ref[p:p + L0, :] for p in range(5)], axis=1)
    y1 = jnp.dot(xcat, b1m_ref[...], preferred_element_type=f32)
    y1 = jnp.maximum(y1 + b1b_ref[...], 0.0)                    # (L0, 120)

    # ---- maxpool 2x2 #1: row/lane max + lane compaction 120->60 -------------
    rmax = jnp.maximum(y1[0:L0 - 1, :], y1[1:L0, :])            # (L0-1, 120)
    cmax = jnp.maximum(rmax[:, 0:119], rmax[:, 1:120])          # (L0-1, 119)
    p1 = jnp.dot(cmax, sc1_ref[...], preferred_element_type=f32)  # (L0-1, 60)
    # valid pooled rows live at even row offsets (r = b*28 + 2*i, i<=11)

    # ---- conv2 + bias + ReLU: K-folded matmul (L2,300)x(300,80) -------------
    L1 = L0 - 1
    L2 = L1 - 8
    pcat = jnp.concatenate([p1[2 * p:2 * p + L2, :] for p in range(5)], axis=1)
    y2 = jnp.dot(pcat, b2m_ref[...], preferred_element_type=f32)
    y2 = jnp.maximum(y2 + b2b_ref[...], 0.0)                    # (L2, 80)
    # valid conv2 rows live at r = b*28 + 2*h, h<=7

    # ---- maxpool 2x2 #2: row(+2)/lane max + lane compaction 80->40 ----------
    rmax2 = jnp.maximum(y2[0:L2 - 2, :], y2[2:L2, :])           # (L2-2, 80)
    cmax2 = jnp.maximum(rmax2[:, 0:79], rmax2[:, 1:80])         # (L2-2, 79)
    p2 = jnp.dot(cmax2, sc2_ref[...], preferred_element_type=f32)  # (L2-2, 40)
    # valid pooled rows live at r = b*28 + 4*t, t<=3

    # ---- fc1 + ReLU: gather 4 valid rows/image into lanes, one matmul -------
    a2f = jnp.concatenate(
        [jnp.dot(sel_ref[t], p2, preferred_element_type=f32) for t in range(4)],
        axis=1)                                                 # (BT, 160)
    h = jnp.maximum(
        jnp.dot(a2f, w1_ref[...], preferred_element_type=f32) + fb1_ref[...],
        0.0)                                                    # (BT, 100)

    # ---- fc2 + log_softmax --------------------------------------------------
    logits = jnp.dot(h, w2_ref[...], preferred_element_type=f32) + fb2_ref[...]
    m = jnp.max(logits, axis=-1, keepdims=True)
    s = logits - m
    lse = jnp.log(jnp.sum(jnp.exp(s), axis=-1, keepdims=True))
    o_ref[...] = (s - lse).astype(o_ref.dtype)                  # (BT, 10)


def forward(prep, x):
    """x: (N, 1, 28, 28) float32 -> (N, 10) log-probs. One fused Pallas call."""
    (B1cat, b1row, B2cat, b2row, Sc1, Sc2, sel, W1f, fb1row, W2f, fb2row) = prep
    N = x.shape[0]
    n_pad = -(-N // BT) * BT
    if n_pad != N:
        x = jnp.pad(x, ((0, n_pad - N), (0, 0), (0, 0), (0, 0)))
    x2 = x.reshape(n_pad * 28, 28)          # images stacked on the sublane axis

    out = pl.pallas_call(
        _fused_kernel,
        out_shape=jax.ShapeDtypeStruct((n_pad, 10), jnp.float32),
        grid=(n_pad // BT,),
        in_specs=[
            pl.BlockSpec((BT * 28, 28), lambda n: (n, 0)),
            pl.BlockSpec(B1cat.shape, lambda n: (0, 0)),
            pl.BlockSpec(b1row.shape, lambda n: (0, 0)),
            pl.BlockSpec(B2cat.shape, lambda n: (0, 0)),
            pl.BlockSpec(b2row.shape, lambda n: (0, 0)),
            pl.BlockSpec(Sc1.shape, lambda n: (0, 0)),
            pl.BlockSpec(Sc2.shape, lambda n: (0, 0)),
            pl.BlockSpec(sel.shape, lambda n: (0, 0, 0)),
            pl.BlockSpec(W1f.shape, lambda n: (0, 0)),
            pl.BlockSpec(fb1row.shape, lambda n: (0, 0)),
            pl.BlockSpec(W2f.shape, lambda n: (0, 0)),
            pl.BlockSpec(fb2row.shape, lambda n: (0, 0)),
        ],
        out_specs=pl.BlockSpec((BT, 10), lambda n: (n, 0)),
        compiler_params=pltpu.CompilerParams(
            dimension_semantics=("parallel",)),
    )(x2, B1cat, b1row, B2cat, b2row, Sc1, Sc2, sel, W1f, fb1row, W2f, fb2row)
    return out[:N]


# ---------------------------------------------------------------------------
# One-time parameter preparation (init-time; NOT in the per-call path)
# ---------------------------------------------------------------------------
def prepare_params(params):
    """Repack PyTorch-layout params into K-folded banded / blocked matrices."""
    w1, b1, w2, b2, fw1, fb1, fw2, fb2 = (np.asarray(p, np.float32) for p in params)

    # conv1 banded weights, K-folded over the 5 H-taps: (5*28, 5*24)
    B1cat = np.zeros((5 * 28, 5 * 24), np.float32)
    for co in range(5):
        for p in range(5):
            for j in range(24):
                for q in range(5):
                    B1cat[p * 28 + j + q, co * 24 + j] = w1[co, 0, p, q]
    b1row = np.repeat(b1, 24)[None, :]                     # (1, 120)

    # conv2 banded weights, K-folded: (5*60, 10*8)
    B2cat = np.zeros((5 * 60, 10 * 8), np.float32)
    for co in range(10):
        for ci in range(5):
            for p in range(5):
                for j in range(8):
                    for q in range(5):
                        B2cat[p * 60 + ci * 12 + j + q, co * 8 + j] = w2[co, ci, p, q]
    b2row = np.repeat(b2, 8)[None, :]                      # (1, 80)

    # max-pool even-column compaction (selection) matrices
    Sc1 = np.zeros((119, 60), np.float32)
    for c in range(60):
        Sc1[(c // 12) * 24 + (c % 12) * 2, c] = 1.0
    Sc2 = np.zeros((79, 40), np.float32)
    for c in range(40):
        Sc2[(c // 4) * 8 + (c % 4) * 2, c] = 1.0

    # fc1 row-gather selectors: pick the 4 valid pooled rows (b*28 + 4t) per
    # image out of the (BT*28-15)-row pool2 block.
    L4 = BT * 28 - 15
    sel = np.zeros((4, BT, L4), np.float32)
    for t in range(4):
        for b in range(BT):
            sel[t, b, b * 28 + 4 * t] = 1.0

    # fc1 weights repacked: gathered-activation lane index t*40 + co*4 + w
    # corresponds to torch flatten index co*16 + t*4 + w.
    W1f = np.zeros((160, 100), np.float32)
    for t in range(4):
        for co in range(10):
            for w in range(4):
                W1f[t * 40 + co * 4 + w, :] = fw1[:, co * 16 + t * 4 + w]
    fb1row = fb1[None, :]                                  # (1, 100)

    W2f = np.ascontiguousarray(fw2.T)                      # (100, 10)
    fb2row = fb2[None, :]                                  # (1, 10)

    return tuple(jnp.asarray(a) for a in
                 (B1cat, b1row, B2cat, b2row, Sc1, Sc2, sel,
                  W1f, fb1row, W2f, fb2row))


# ---------------------------------------------------------------------------
# Pure-JAX reference (same math, no Pallas) for the correctness check
# ---------------------------------------------------------------------------
def forward_ref(params, x):
    w1, b1, w2, b2, fw1, fb1, fw2, fb2 = params

    def conv(x, w, b):
        y = lax.conv_general_dilated(x, w, (1, 1), 'VALID',
                                     dimension_numbers=('NCHW', 'OIHW', 'NCHW'))
        return y + b[None, :, None, None]

    def pool(x):
        N, C, H, W = x.shape
        return jnp.max(x.reshape(N, C, H // 2, 2, W // 2, 2), axis=(3, 5))

    x = jax.nn.relu(conv(x, w1, b1))
    x = pool(x)
    x = jax.nn.relu(conv(x, w2, b2))
    x = pool(x)
    x = x.reshape(-1, 160)
    x = jax.nn.relu(x @ fw1.T + fb1)
    x = x @ fw2.T + fb2
    return jax.nn.log_softmax(x, axis=1)


def init_params(key):
    ks = jax.random.split(key, 8)

    def u(k, shape, fan_in):
        bound = 1.0 / jnp.sqrt(fan_in)
        return jax.random.uniform(k, shape, jnp.float32, -bound, bound)

    w1 = u(ks[0], (5, 1, 5, 5), 1 * 5 * 5)
    b1 = u(ks[1], (5,), 1 * 5 * 5)
    w2 = u(ks[2], (10, 5, 5, 5), 5 * 5 * 5)
    b2 = u(ks[3], (10,), 5 * 5 * 5)
    fw1 = u(ks[4], (100, 160), 160)
    fb1 = u(ks[5], (100,), 160)
    fw2 = u(ks[6], (10, 100), 100)
    fb2 = u(ks[7], (10,), 100)
    return (w1, b1, w2, b2, fw1, fb1, fw2, fb2)


if __name__ == "__main__":
    key = jax.random.PRNGKey(0)
    kp, kx = jax.random.split(key)
    params = init_params(kp)
    prep = prepare_params(params)        # one-time weight repacking

    # forward implies 28x28 single-channel input so the 4*4*10 flatten holds.
    x = jax.random.normal(kx, (2, 1, 28, 28), dtype=jnp.float32)

    out = jax.jit(forward)(prep, x)
    out = jax.block_until_ready(out)

    ref = forward_ref(params, x)
    assert out.shape == (2, 10)
    err = float(jnp.max(jnp.abs(out - ref)))
    assert err < 2e-2, f"max abs diff {err}"
    print("KERNEL_OK")
</pallas_src>

<mosaic_0001>
module attributes {stable_mosaic.version = 11 : i64} {
  func.func @_fused_kernel(%arg0: i32, %arg1: memref<448x28xf32, #tpu.memory_space<vmem>>, %arg2: memref<140x120xf32, #tpu.memory_space<vmem>>, %arg3: memref<1x120xf32, #tpu.memory_space<vmem>>, %arg4: memref<300x80xf32, #tpu.memory_space<vmem>>, %arg5: memref<1x80xf32, #tpu.memory_space<vmem>>, %arg6: memref<119x60xf32, #tpu.memory_space<vmem>>, %arg7: memref<79x40xf32, #tpu.memory_space<vmem>>, %arg8: memref<4x16x433xf32, #tpu.memory_space<vmem>>, %arg9: memref<160x100xf32, #tpu.memory_space<vmem>>, %arg10: memref<1x100xf32, #tpu.memory_space<vmem>>, %arg11: memref<100x10xf32, #tpu.memory_space<vmem>>, %arg12: memref<1x10xf32, #tpu.memory_space<vmem>>, %arg13: memref<16x10xf32, #tpu.memory_space<vmem>>) attributes {dimension_semantics = [#tpu.dimension_semantics<parallel>], iteration_bounds = array<i64: 1>, scalar_prefetch = 0 : i64, scratch_operands = 0 : i64, tpu.core_type = #tpu.core_type<tc>, window_params = [{transform_indices = @transform_0, window_bounds = array<i64: 448, 28>}, {pipeline_mode = #tpu.pipeline_mode<synchronous>, transform_indices = @transform_1, window_bounds = array<i64: 140, 120>}, {pipeline_mode = #tpu.pipeline_mode<synchronous>, transform_indices = @transform_2, window_bounds = array<i64: 1, 120>}, {pipeline_mode = #tpu.pipeline_mode<synchronous>, transform_indices = @transform_3, window_bounds = array<i64: 300, 80>}, {pipeline_mode = #tpu.pipeline_mode<synchronous>, transform_indices = @transform_4, window_bounds = array<i64: 1, 80>}, {pipeline_mode = #tpu.pipeline_mode<synchronous>, transform_indices = @transform_5, window_bounds = array<i64: 119, 60>}, {pipeline_mode = #tpu.pipeline_mode<synchronous>, transform_indices = @transform_6, window_bounds = array<i64: 79, 40>}, {pipeline_mode = #tpu.pipeline_mode<synchronous>, transform_indices = @transform_7, window_bounds = array<i64: 4, 16, 433>}, {pipeline_mode = #tpu.pipeline_mode<synchronous>, transform_indices = @transform_8, window_bounds = array<i64: 160, 100>}, {pipeline_mode = #tpu.pipeline_mode<synchronous>, transform_indices = @transform_9, window_bounds = array<i64: 1, 100>}, {pipeline_mode = #tpu.pipeline_mode<synchronous>, transform_indices = @transform_10, window_bounds = array<i64: 100, 10>}, {pipeline_mode = #tpu.pipeline_mode<synchronous>, transform_indices = @transform_11, window_bounds = array<i64: 1, 10>}, {transform_indices = @transform_12, window_bounds = array<i64: 16, 10>}]} {
    %c0 = arith.constant 0 : index
    %c0_0 = arith.constant 0 : index
    %0 = vector.load %arg1[%c0, %c0_0] : memref<448x28xf32, #tpu.memory_space<vmem>>, vector<444x28xf32>
    %c1 = arith.constant 1 : index
    %c0_1 = arith.constant 0 : index
    %1 = vector.load %arg1[%c1, %c0_1] : memref<448x28xf32, #tpu.memory_space<vmem>>, vector<444x28xf32>
    %c2 = arith.constant 2 : index
    %c0_2 = arith.constant 0 : index
    %2 = vector.load %arg1[%c2, %c0_2] : memref<448x28xf32, #tpu.memory_space<vmem>>, vector<444x28xf32>
    %c3 = arith.constant 3 : index
    %c0_3 = arith.constant 0 : index
    %3 = vector.load %arg1[%c3, %c0_3] : memref<448x28xf32, #tpu.memory_space<vmem>>, vector<444x28xf32>
    %c4 = arith.constant 4 : index
    %c0_4 = arith.constant 0 : index
    %4 = vector.load %arg1[%c4, %c0_4] : memref<448x28xf32, #tpu.memory_space<vmem>>, vector<444x28xf32>
    %5 = tpu.concatenate %0, %1, %2, %3, %4 in 1 : vector<444x28xf32>, vector<444x28xf32>, vector<444x28xf32>, vector<444x28xf32>, vector<444x28xf32> -> vector<444x140xf32>
    %c0_5 = arith.constant 0 : index
    %c0_6 = arith.constant 0 : index
    %6 = vector.load %arg2[%c0_5, %c0_6] : memref<140x120xf32, #tpu.memory_space<vmem>>, vector<140x120xf32>
    %cst = arith.constant dense<0.000000e+00> : vector<444x120xf32>
    %7 = tpu.matmul %5, %6, %cst {dimension_numbers = #tpu.dot_dimension_numbers<[1], [0], [0], [1], [0, 0, 1, 1], [], []>} : vector<444x140xf32>, vector<140x120xf32>, vector<444x120xf32> -> vector<444x120xf32>
    %c0_7 = arith.constant 0 : index
    %c0_8 = arith.constant 0 : index
    %8 = vector.load %arg3[%c0_7, %c0_8] : memref<1x120xf32, #tpu.memory_space<vmem>>, vector<1x120xf32>
    %9 = vector.broadcast %8 : vector<1x120xf32> to vector<444x120xf32>
    %10 = arith.addf %7, %9 : vector<444x120xf32>
    %cst_9 = arith.constant 0.000000e+00 : f32
    %11 = vector.broadcast %cst_9 : f32 to vector<444x120xf32>
    %12 = arith.maximumf %10, %11 : vector<444x120xf32>
    %13 = vector.extract_strided_slice %12 {offsets = [0, 0], sizes = [443, 120], strides = [1, 1]} : vector<444x120xf32> to vector<443x120xf32>
    %14 = vector.extract_strided_slice %12 {offsets = [1, 0], sizes = [443, 120], strides = [1, 1]} : vector<444x120xf32> to vector<443x120xf32>
    %15 = arith.maximumf %13, %14 : vector<443x120xf32>
    %16 = vector.extract_strided_slice %15 {offsets = [0, 0], sizes = [443, 119], strides = [1, 1]} : vector<443x120xf32> to vector<443x119xf32>
    %17 = vector.extract_strided_slice %15 {offsets = [0, 1], sizes = [443, 119], strides = [1, 1]} : vector<443x120xf32> to vector<443x119xf32>
    %18 = arith.maximumf %16, %17 : vector<443x119xf32>
    %c0_10 = arith.constant 0 : index
    %c0_11 = arith.constant 0 : index
    %19 = vector.load %arg6[%c0_10, %c0_11] : memref<119x60xf32, #tpu.memory_space<vmem>>, vector<119x60xf32>
    %cst_12 = arith.constant dense<0.000000e+00> : vector<443x60xf32>
    %20 = tpu.matmul %18, %19, %cst_12 {dimension_numbers = #tpu.dot_dimension_numbers<[1], [0], [0], [1], [0, 0, 1, 1], [], []>} : vector<443x119xf32>, vector<119x60xf32>, vector<443x60xf32> -> vector<443x60xf32>
    %21 = vector.extract_strided_slice %20 {offsets = [0, 0], sizes = [435, 60], strides = [1, 1]} : vector<443x60xf32> to vector<435x60xf32>
    %22 = vector.extract_strided_slice %20 {offsets = [2, 0], sizes = [435, 60], strides = [1, 1]} : vector<443x60xf32> to vector<435x60xf32>
    %23 = vector.extract_strided_slice %20 {offsets = [4, 0], sizes = [435, 60], strides = [1, 1]} : vector<443x60xf32> to vector<435x60xf32>
    %24 = vector.extract_strided_slice %20 {offsets = [6, 0], sizes = [435, 60], strides = [1, 1]} : vector<443x60xf32> to vector<435x60xf32>
    %25 = vector.extract_strided_slice %20 {offsets = [8, 0], sizes = [435, 60], strides = [1, 1]} : vector<443x60xf32> to vector<435x60xf32>
    %26 = tpu.concatenate %21, %22, %23, %24, %25 in 1 : vector<435x60xf32>, vector<435x60xf32>, vector<435x60xf32>, vector<435x60xf32>, vector<435x60xf32> -> vector<435x300xf32>
    %c0_13 = arith.constant 0 : index
    %c0_14 = arith.constant 0 : index
    %27 = vector.load %arg4[%c0_13, %c0_14] : memref<300x80xf32, #tpu.memory_space<vmem>>, vector<300x80xf32>
    %cst_15 = arith.constant dense<0.000000e+00> : vector<435x80xf32>
    %28 = tpu.matmul %26, %27, %cst_15 {dimension_numbers = #tpu.dot_dimension_numbers<[1], [0], [0], [1], [0, 0, 1, 1], [], []>} : vector<435x300xf32>, vector<300x80xf32>, vector<435x80xf32> -> vector<435x80xf32>
    %c0_16 = arith.constant 0 : index
    %c0_17 = arith.constant 0 : index
    %29 = vector.load %arg5[%c0_16, %c0_17] : memref<1x80xf32, #tpu.memory_space<vmem>>, vector<1x80xf32>
    %30 = vector.broadcast %29 : vector<1x80xf32> to vector<435x80xf32>
    %31 = arith.addf %28, %30 : vector<435x80xf32>
    %cst_18 = arith.constant 0.000000e+00 : f32
    %32 = vector.broadcast %cst_18 : f32 to vector<435x80xf32>
    %33 = arith.maximumf %31, %32 : vector<435x80xf32>
    %34 = vector.extract_strided_slice %33 {offsets = [0, 0], sizes = [433, 80], strides = [1, 1]} : vector<435x80xf32> to vector<433x80xf32>
    %35 = vector.extract_strided_slice %33 {offsets = [2, 0], sizes = [433, 80], strides = [1, 1]} : vector<435x80xf32> to vector<433x80xf32>
    %36 = arith.maximumf %34, %35 : vector<433x80xf32>
    %37 = vector.extract_strided_slice %36 {offsets = [0, 0], sizes = [433, 79], strides = [1, 1]} : vector<433x80xf32> to vector<433x79xf32>
    %38 = vector.extract_strided_slice %36 {offsets = [0, 1], sizes = [433, 79], strides = [1, 1]} : vector<433x80xf32> to vector<433x79xf32>
    %39 = arith.maximumf %37, %38 : vector<433x79xf32>
    %c0_19 = arith.constant 0 : index
    %c0_20 = arith.constant 0 : index
    %40 = vector.load %arg7[%c0_19, %c0_20] : memref<79x40xf32, #tpu.memory_space<vmem>>, vector<79x40xf32>
    %cst_21 = arith.constant dense<0.000000e+00> : vector<433x40xf32>
    %41 = tpu.matmul %39, %40, %cst_21 {dimension_numbers = #tpu.dot_dimension_numbers<[1], [0], [0], [1], [0, 0, 1, 1], [], []>} : vector<433x79xf32>, vector<79x40xf32>, vector<433x40xf32> -> vector<433x40xf32>
    %c0_22 = arith.constant 0 : index
    %c0_23 = arith.constant 0 : index
    %c0_24 = arith.constant 0 : index
    %42 = vector.load %arg8[%c0_22, %c0_23, %c0_24] : memref<4x16x433xf32, #tpu.memory_space<vmem>>, vector<1x16x433xf32>
    %43 = vector.shape_cast %42 : vector<1x16x433xf32> to vector<16x433xf32>
    %cst_25 = arith.constant dense<0.000000e+00> : vector<16x40xf32>
    %44 = tpu.matmul %43, %41, %cst_25 {dimension_numbers = #tpu.dot_dimension_numbers<[1], [0], [0], [1], [0, 0, 1, 1], [], []>} : vector<16x433xf32>, vector<433x40xf32>, vector<16x40xf32> -> vector<16x40xf32>
    %c1_26 = arith.constant 1 : index
    %c0_27 = arith.constant 0 : index
    %c0_28 = arith.constant 0 : index
    %45 = vector.load %arg8[%c1_26, %c0_27, %c0_28] : memref<4x16x433xf32, #tpu.memory_space<vmem>>, vector<1x16x433xf32>
    %46 = vector.shape_cast %45 : vector<1x16x433xf32> to vector<16x433xf32>
    %cst_29 = arith.constant dense<0.000000e+00> : vector<16x40xf32>
    %47 = tpu.matmul %46, %41, %cst_29 {dimension_numbers = #tpu.dot_dimension_numbers<[1], [0], [0], [1], [0, 0, 1, 1], [], []>} : vector<16x433xf32>, vector<433x40xf32>, vector<16x40xf32> -> vector<16x40xf32>
    %c2_30 = arith.constant 2 : index
    %c0_31 = arith.constant 0 : index
    %c0_32 = arith.constant 0 : index
    %48 = vector.load %arg8[%c2_30, %c0_31, %c0_32] : memref<4x16x433xf32, #tpu.memory_space<vmem>>, vector<1x16x433xf32>
    %49 = vector.shape_cast %48 : vector<1x16x433xf32> to vector<16x433xf32>
    %cst_33 = arith.constant dense<0.000000e+00> : vector<16x40xf32>
    %50 = tpu.matmul %49, %41, %cst_33 {dimension_numbers = #tpu.dot_dimension_numbers<[1], [0], [0], [1], [0, 0, 1, 1], [], []>} : vector<16x433xf32>, vector<433x40xf32>, vector<16x40xf32> -> vector<16x40xf32>
    %c3_34 = arith.constant 3 : index
    %c0_35 = arith.constant 0 : index
    %c0_36 = arith.constant 0 : index
    %51 = vector.load %arg8[%c3_34, %c0_35, %c0_36] : memref<4x16x433xf32, #tpu.memory_space<vmem>>, vector<1x16x433xf32>
    %52 = vector.shape_cast %51 : vector<1x16x433xf32> to vector<16x433xf32>
    %cst_37 = arith.constant dense<0.000000e+00> : vector<16x40xf32>
    %53 = tpu.matmul %52, %41, %cst_37 {dimension_numbers = #tpu.dot_dimension_numbers<[1], [0], [0], [1], [0, 0, 1, 1], [], []>} : vector<16x433xf32>, vector<433x40xf32>, vector<16x40xf32> -> vector<16x40xf32>
    %54 = tpu.concatenate %44, %47, %50, %53 in 1 : vector<16x40xf32>, vector<16x40xf32>, vector<16x40xf32>, vector<16x40xf32> -> vector<16x160xf32>
    %c0_38 = arith.constant 0 : index
    %c0_39 = arith.constant 0 : index
    %55 = vector.load %arg9[%c0_38, %c0_39] : memref<160x100xf32, #tpu.memory_space<vmem>>, vector<160x100xf32>
    %cst_40 = arith.constant dense<0.000000e+00> : vector<16x100xf32>
    %56 = tpu.matmul %54, %55, %cst_40 {dimension_numbers = #tpu.dot_dimension_numbers<[1], [0], [0], [1], [0, 0, 1, 1], [], []>} : vector<16x160xf32>, vector<160x100xf32>, vector<16x100xf32> -> vector<16x100xf32>
    %c0_41 = arith.constant 0 : index
    %c0_42 = arith.constant 0 : index
    %57 = vector.load %arg10[%c0_41, %c0_42] : memref<1x100xf32, #tpu.memory_space<vmem>>, vector<1x100xf32>
    %58 = vector.broadcast %57 : vector<1x100xf32> to vector<16x100xf32>
    %59 = arith.addf %56, %58 : vector<16x100xf32>
    %cst_43 = arith.constant 0.000000e+00 : f32
    %60 = vector.broadcast %cst_43 : f32 to vector<16x100xf32>
    %61 = arith.maximumf %59, %60 : vector<16x100xf32>
    %c0_44 = arith.constant 0 : index
    %c0_45 = arith.constant 0 : index
    %62 = vector.load %arg11[%c0_44, %c0_45] : memref<100x10xf32, #tpu.memory_space<vmem>>, vector<100x10xf32>
    %cst_46 = arith.constant dense<0.000000e+00> : vector<16x10xf32>
    %63 = tpu.matmul %61, %62, %cst_46 {dimension_numbers = #tpu.dot_dimension_numbers<[1], [0], [0], [1], [0, 0, 1, 1], [], []>} : vector<16x100xf32>, vector<100x10xf32>, vector<16x10xf32> -> vector<16x10xf32>
    %c0_47 = arith.constant 0 : index
    %c0_48 = arith.constant 0 : index
    %64 = vector.load %arg12[%c0_47, %c0_48] : memref<1x10xf32, #tpu.memory_space<vmem>>, vector<1x10xf32>
    %65 = vector.broadcast %64 : vector<1x10xf32> to vector<16x10xf32>
    %66 = arith.addf %63, %65 : vector<16x10xf32>
    %cst_49 = arith.constant dense<0xFF800000> : vector<16xf32>
    %67 = vector.multi_reduction <maximumf>, %66, %cst_49 [1] : vector<16x10xf32> to vector<16xf32>
    %68 = vector.shape_cast %67 : vector<16xf32> to vector<16x1xf32>
    %69 = vector.broadcast %68 : vector<16x1xf32> to vector<16x10xf32>
    %70 = arith.subf %66, %69 : vector<16x10xf32>
    %71 = math.exp %70 : vector<16x10xf32>
    %cst_50 = arith.constant dense<0.000000e+00> : vector<16xf32>
    %72 = vector.multi_reduction <add>, %71, %cst_50 [1] : vector<16x10xf32> to vector<16xf32>
    %73 = vector.shape_cast %72 : vector<16xf32> to vector<16x1xf32>
    %74 = math.log %73 : vector<16x1xf32>
    %75 = vector.broadcast %74 : vector<16x1xf32> to vector<16x10xf32>
    %76 = arith.subf %70, %75 : vector<16x10xf32>
    %c0_51 = arith.constant 0 : index
    %c0_52 = arith.constant 0 : index
    %77 = vector.load %arg13[%c0_51, %c0_52] : memref<16x10xf32, #tpu.memory_space<vmem>>, vector<16x10xf32>
    tpu.vector_store %arg13[%c0_51, %c0_52], %76 {strides = array<i32>} : memref<16x10xf32, #tpu.memory_space<vmem>>, vector<16x10xf32>,
    return
  }
  func.func @transform_0(%arg0: i32) -> (i32, i32) {
    %c0_i32 = arith.constant 0 : i32
    %c0_i32_0 = arith.constant 0 : i32
    return %arg0, %c0_i32 : i32, i32
  }
  func.func @transform_1(%arg0: i32) -> (i32, i32) {
    %c0_i32 = arith.constant 0 : i32
    %c0_i32_0 = arith.constant 0 : i32
    %c0_i32_1 = arith.constant 0 : i32
    return %c0_i32, %c0_i32_0 : i32, i32
  }
  func.func @transform_2(%arg0: i32) -> (i32, i32) {
    %c0_i32 = arith.constant 0 : i32
    %c0_i32_0 = arith.constant 0 : i32
    %c0_i32_1 = arith.constant 0 : i32
    return %c0_i32, %c0_i32_0 : i32, i32
  }
  func.func @transform_3(%arg0: i32) -> (i32, i32) {
    %c0_i32 = arith.constant 0 : i32
    %c0_i32_0 = arith.constant 0 : i32
    %c0_i32_1 = arith.constant 0 : i32
    return %c0_i32, %c0_i32_0 : i32, i32
  }
  func.func @transform_4(%arg0: i32) -> (i32, i32) {
    %c0_i32 = arith.constant 0 : i32
    %c0_i32_0 = arith.constant 0 : i32
    %c0_i32_1 = arith.constant 0 : i32
    return %c0_i32, %c0_i32_0 : i32, i32
  }
  func.func @transform_5(%arg0: i32) -> (i32, i32) {
    %c0_i32 = arith.constant 0 : i32
    %c0_i32_0 = arith.constant 0 : i32
    %c0_i32_1 = arith.constant 0 : i32
    return %c0_i32, %c0_i32_0 : i32, i32
  }
  func.func @transform_6(%arg0: i32) -> (i32, i32) {
    %c0_i32 = arith.constant 0 : i32
    %c0_i32_0 = arith.constant 0 : i32
    %c0_i32_1 = arith.constant 0 : i32
    return %c0_i32, %c0_i32_0 : i32, i32
  }
  func.func @transform_7(%arg0: i32) -> (i32, i32, i32) {
    %c0_i32 = arith.constant 0 : i32
    %c0_i32_0 = arith.constant 0 : i32
    %c0_i32_1 = arith.constant 0 : i32
    %c0_i32_2 = arith.constant 0 : i32
    return %c0_i32, %c0_i32_0, %c0_i32_1 : i32, i32, i32
  }
  func.func @transform_8(%arg0: i32) -> (i32, i32) {
    %c0_i32 = arith.constant 0 : i32
    %c0_i32_0 = arith.constant 0 : i32
    %c0_i32_1 = arith.constant 0 : i32
    return %c0_i32, %c0_i32_0 : i32, i32
  }
  func.func @transform_9(%arg0: i32) -> (i32, i32) {
    %c0_i32 = arith.constant 0 : i32
    %c0_i32_0 = arith.constant 0 : i32
    %c0_i32_1 = arith.constant 0 : i32
    return %c0_i32, %c0_i32_0 : i32, i32
  }
  func.func @transform_10(%arg0: i32) -> (i32, i32) {
    %c0_i32 = arith.constant 0 : i32
    %c0_i32_0 = arith.constant 0 : i32
    %c0_i32_1 = arith.constant 0 : i32
    return %c0_i32, %c0_i32_0 : i32, i32
  }
  func.func @transform_11(%arg0: i32) -> (i32, i32) {
    %c0_i32 = arith.constant 0 : i32
    %c0_i32_0 = arith.constant 0 : i32
    %c0_i32_1 = arith.constant 0 : i32
    return %c0_i32, %c0_i32_0 : i32, i32
  }
  func.func @transform_12(%arg0: i32) -> (i32, i32) {
    %c0_i32 = arith.constant 0 : i32
    %c0_i32_0 = arith.constant 0 : i32
    return %arg0, %c0_i32 : i32, i32
  }
}

</mosaic_0001>

<bundles_post_ra>
// kernel: forward.1
= control target key start
LH: loop header
LB: loop body
LE: loop exit
PB: predicated region body
PF: predicated region fallthrough
CT: control target
= control target key end

     0   :  { %v9240_v3 = vmov 0.0   ;;  %s9241_s15 = smov 84   ;;  %s9242_s16 = smov 28   ;;  %vm1583_vm0 = vcmask 1043456   ;;  %vm1470_vm1 = vcmask 97280   ;;  %vm1217_vm2 = vcmask 228352   ;;  %s14142_s0 = inlined_call_operand.vmem [shape: f32[448,28], index: 0, kind: input, shape index: {}]   ;;  %s14143_s1 = inlined_call_operand.vmem [shape: f32[140,120], index: 1, kind: input, shape index: {}]   ;;  %s14144_s5 = inlined_call_operand.vmem [shape: f32[119,60], index: 5, kind: input, shape index: {}]   ;;  %s14145_s2 = inlined_call_operand.vmem [shape: f32[1,120], index: 2, kind: input, shape index: {}]   ;;  %s14146_s3 = inlined_call_operand.vmem [shape: f32[300,80], index: 3, kind: input, shape index: {}]   ;;  %s14147_s6 = inlined_call_operand.vmem [shape: f32[79,40], index: 6, kind: input, shape index: {}]   ;;  %s14148_s4 = inlined_call_operand.vmem [shape: f32[1,80], index: 4, kind: input, shape index: {}]   ;;  %s14149_s7 = inlined_call_operand.vmem [shape: f32[4,16,433], index: 7, kind: input, shape index: {}]   ;;  %s14150_s8 = inlined_call_operand.vmem [shape: f32[160,100], index: 8, kind: input, shape index: {}]   ;;  %s14151_s10 = inlined_call_operand.vmem [shape: f32[100,10], index: 10, kind: input, shape index: {}]   ;;  %s14152_s9 = inlined_call_operand.vmem [shape: f32[1,100], index: 9, kind: input, shape index: {}]   ;;  %s14153_s11 = inlined_call_operand.vmem [shape: f32[1,10], index: 11, kind: input, shape index: {}]   ;;  %s14154_s12 = inlined_call_operand.vmem [shape: f32[16,10], index: 12, kind: output, shape index: {}]  }
   0x1   :  { %v209_v0 = vld [vmem:[%s14142_s0 + $0x3] sm:$0xff]  ;;  %v210_v1 = vld [vmem:[%s14142_s0 + $0xb] sm:$0xff]  ;;  %1587 = vmatprep.subr.mxu0 %v9240_v3  ;;  %v100_v12 = vld [vmem:[%s14142_s0 + $0x19] sm:$0xff]  ;;  %s9243_s23 = smov 112   ;;  %s9244_s24 = smov 56   ;;  %vm1274_vm3 = vcmask 457728  }
   0x2   :  { %v97_v2 = vld [vmem:[%s14142_s0 + $0x1] sm:$0xff]  ;;  %v8415_v4 = vpack.i.bf16 %v210_v1, %v209_v0  ;;  %v98_v5 = vld [vmem:[%s14142_s0 + $0x9] sm:$0xff]  ;;  %v99_v11 = vld [vmem:[%s14142_s0 + $0x11] sm:$0xff]  ;;  %vm1331_vm4 = vcmask 687104   ;;  %vm1388_vm5 = vcmask 916480   ;;  %vm2044_vm6 = vcmask 1046528  }
   0x3   :  { %v153_v6 = vld [vmem:[%s14142_s0 + $0x2] sm:$0xff]  ;;  %v8405_v7 = vpack.i.bf16 %v98_v5, %v97_v2  ;;  %v154_v8 = vld [vmem:[%s14142_s0 + $0xa] sm:$0xff]  ;;  %v8420_v13 = vpack.i.bf16 %v100_v12, %v99_v11  ;;  %v211_v14 = vld [vmem:[%s14142_s0 + $0x13] sm:$0xff]  ;;  %vm2563_vm7 = vcmask 973824   ;;  %vm9246_vm8 = vmmov 0   ;;  %s9248_s25 = smov 120  }
   0x4   :  { %8416 = vrot.lane.b32.xlu1 %v8415_v4, %s9241_s15  ;;  %v265_v9 = vld [vmem:[%s14142_s0 + $0x4] sm:$0xff]  ;;  %v8410_v10 = vpack.i.bf16 %v154_v8, %v153_v6  ;;  %v212_v15 = vld [vmem:[%s14142_s0 + $0x1b] sm:$0xff]  ;;  %v266_v16 = vld [vmem:[%s14142_s0 + $0xc] sm:$0xff]  ;;  %vm3685_vm9 = vcmask 1041408   ;;  %vm3135_vm10 = vcmask 1045504   ;;  %vm4395_vm11 = vcmask 359424  }
   0x5   :  { %8406 = vrot.lane.b32.xlu0 %v8405_v7, %s9242_s16  ;;  %v155_v17 = vld [vmem:[%s14142_s0 + $0x12] sm:$0xff]  ;;  %v156_v18 = vld [vmem:[%s14142_s0 + $0x1a] sm:$0xff]  ;;  %v8430_v19 = vpack.i.bf16 %v212_v15, %v211_v14  ;;  %v157_v22 = vld [vmem:[%s14142_s0 + $0x22] sm:$0xff]  ;;  %vm4239_vm12 = vcmask 424960   ;;  %vm4127_vm13 = vcmask 490496   ;;  %vm4183_vm14 = vcmask 982016  }
   0x6   :  { %v8425_v20 = vpack.i.bf16 %v156_v18, %v155_v17  ;;  %v268_v21 = vld [vmem:[%s14142_s0 + $0x1c] sm:$0xff]  ;;  %v158_v23 = vld [vmem:[%s14142_s0 + $0x2a] sm:$0xff]  ;;  %v267_v24 = vld [vmem:[%s14142_s0 + $0x14] sm:$0xff]  ;;  %vm5803_vm15 = vcmask 646144   ;;  %s9251_s28 = smov 80  }
   0x7   :  { %v101_v25 = vld [vmem:[%s14142_s0 + $0x21] sm:$0xff]  ;;  %v102_v26 = vld [vmem:[%s14142_s0 + $0x29] sm:$0xff]  ;;  %v8440_v27 = vpack.i.bf16 %v158_v23, %v157_v22  ;;  %v103_v33 = vld [vmem:[%s14142_s0 + $0x31] sm:$0xff] }
   0x8   :  { %1049 = vrot.lane.b32.xlu1 %v265_v9, %s9243_s23  ;;  %v8435_v28 = vpack.i.bf16 %v102_v26, %v101_v25  ;;  %v213_v29 = vld [vmem:[%s14142_s0 + $0x23] sm:$0xff]  ;;  %v214_v30 = vld [vmem:[%s14142_s0 + $0x2b] sm:$0xff]  ;;  %v104_v34 = vld [vmem:[%s14142_s0 + $0x39] sm:$0xff] }
   0x9   :  { %8411 = vrot.lane.b32.xlu0 %v8410_v10, %s9244_s24  ;;  %v269_v31 = vld [vmem:[%s14142_s0 + $0x24] sm:$0xff]  ;;  %v8445_v32 = vpack.i.bf16 %v214_v30, %v213_v29  ;;  %v1460_v35 = vld [vmem:[%s14143_s1 + $0x78] sm:$0xff]  ;;  %v1459_v36 = vld [vmem:[%s14143_s1 + $0x70] sm:$0xff]  ;;  %v8450_v38 = vpack.i.bf16 %v104_v34, %v103_v33 }
   0xa   :  { %1588 = vmatpush1.msra.mxu0 %v1460_v35  ;;  %v1458_v37 = vld [vmem:[%s14143_s1 + $0x68] sm:$0xff]  ;;  %v215_v39 = vld [vmem:[%s14142_s0 + $0x33] sm:$0xff]  ;;  %v216_v40 = vld [vmem:[%s14142_s0 + $0x3b] sm:$0xff] }
   0xb   :  { %1589 = vmatprep.subr.mxu0 %v9240_v3  ;;  %v1457_v41 = vld [vmem:[%s14143_s1 + $0x60] sm:$0xff]  ;;  %v270_v42 = vld [vmem:[%s14142_s0 + $0x2c] sm:$0xff]  ;;  %v1456_v45 = vld [vmem:[%s14143_s1 + $0x58] sm:$0xff]  ;;  %v8460_v46 = vpack.i.bf16 %v216_v40, %v215_v39 }
   0xc   :  { %8421 = vrot.lane.b32.xlu1 %v8420_v13, %s9242_s16  ;;  %1590 = vmatpush1.msra.mxu0 %v1459_v36  ;;  %v159_v43 = vld [vmem:[%s14142_s0 + $0x32] sm:$0xff]  ;;  %v160_v44 = vld [vmem:[%s14142_s0 + $0x3a] sm:$0xff]  ;;  %v1454_v49 = vld [vmem:[%s14143_s1 + $0x48] sm:$0xff] }
   0xd   :  { %1051 = vrot.lane.b32.xlu0 %v266_v16, %s9243_s23  ;;  %1591 = vmatprep.subr.mxu0 %v9240_v3  ;;  %v8455_v47 = vpack.i.bf16 %v160_v44, %v159_v43  ;;  %v1455_v48 = vld [vmem:[%s14143_s1 + $0x50] sm:$0xff]  ;;  %v272_v50 = vld [vmem:[%s14142_s0 + $0x3c] sm:$0xff]  ;;  %v1450_v63 = vld [vmem:[%s14143_s1 + $0x28] sm:$0xff] }
   0xe   :  { %1592 = vmatpush1.msra.mxu0 %v1458_v37  ;;  %v161_v51 = vld [vmem:[%s14142_s0 + $0x42] sm:$0xff]  ;;  %v162_v52 = vld [vmem:[%s14142_s0 + $0x4a] sm:$0xff]  ;;  %v271_v54 = vld [vmem:[%s14142_s0 + $0x34] sm:$0xff] }
   0xf   :  { %1593 = vmatprep.subr.mxu0 %v9240_v3  ;;  %v1453_v53 = vld [vmem:[%s14143_s1 + $0x40] sm:$0xff]  ;;  %v106_v56 = vld [vmem:[%s14142_s0 + $0x49] sm:$0xff]  ;;  %v1452_v57 = vld [vmem:[%s14143_s1 + $0x38] sm:$0xff]  ;;  %v8470_v58 = vpack.i.bf16 %v162_v52, %v161_v51 }
  0x10   :  { %8431 = vrot.lane.b32.xlu1 %v8430_v19, %s9241_s15  ;;  %1594 = vmatpush1.msra.mxu0 %v1457_v41  ;;  %v105_v55 = vld [vmem:[%s14142_s0 + $0x41] sm:$0xff]  ;;  %v1451_v60 = vld [vmem:[%s14143_s1 + $0x30] sm:$0xff]  ;;  %v108_v4 = vld [vmem:[%s14142_s0 + $0x59] sm:$0xff] }
  0x11   :  { %8426 = vrot.lane.b32.xlu0 %v8425_v20, %s9244_s24  ;;  %1595 = vmatprep.subr.mxu0 %v9240_v3  ;;  %v8465_v59 = vpack.i.bf16 %v106_v56, %v105_v55  ;;  %v217_v61 = vld [vmem:[%s14142_s0 + $0x43] sm:$0xff]  ;;  %v218_v62 = vld [vmem:[%s14142_s0 + $0x4b] sm:$0xff]  ;;  %v1448_v6 = vld [vmem:[%s14143_s1 + $0x18] sm:$0xff] }
  0x12   :  { %1596 = vmatpush1.msra.mxu0 %v1456_v45  ;;  %v273_v0 = vld [vmem:[%s14142_s0 + $0x44] sm:$0xff]  ;;  %v8475_v1 = vpack.i.bf16 %v218_v62, %v217_v61  ;;  %v107_v2 = vld [vmem:[%s14142_s0 + $0x51] sm:$0xff]  ;;  %v220_v9 = vld [vmem:[%s14142_s0 + $0x5b] sm:$0xff] }
  0x13   :  { %1597 = vmatprep.subr.mxu0 %v9240_v3  ;;  %v1449_v5 = vld [vmem:[%s14143_s1 + $0x20] sm:$0xff]  ;;  %v8480_v7 = vpack.i.bf16 %v108_v4, %v107_v2  ;;  %v219_v8 = vld [vmem:[%s14142_s0 + $0x53] sm:$0xff]  ;;  %v1446_v14 = vld [vmem:[%s14143_s1 + $0x8] sm:$0xff] }
  0x14   :  { %1055 = vrot.lane.b32.xlu1 %v268_v21, %s9243_s23  ;;  %1598 = vmatpush1.msra.mxu0 %v1455_v48  ;;  %v1447_v10 = vld [vmem:[%s14143_s1 + $0x10] sm:$0xff]  ;;  %v164_v13 = vld [vmem:[%s14142_s0 + $0x5a] sm:$0xff]  ;;  %v8490_v15 = vpack.i.bf16 %v220_v9, %v219_v8  ;;  %v1462_v18 = vld [vmem:[%s14143_s1 + $0x88] sm:$0xf] }
  0x15   :  { %1053 = vrot.lane.b32.xlu0 %v267_v24, %s9243_s23  ;;  %1599 = vmatprep.subr.mxu0 %v9240_v3  ;;  %v274_v11 = vld [vmem:[%s14142_s0 + $0x4c] sm:$0xff]  ;;  %v1445_v17 = vld [vmem:[%s14143_s1] sm:$0xff]  ;;  %v275_v23 = vld [vmem:[%s14142_s0 + $0x54] sm:$0xff] }
  0x16   :  { %1600 = vmatpush1.msra.mxu0 %v1454_v49  ;;  %v163_v12 = vld [vmem:[%s14142_s0 + $0x52] sm:$0xff]  ;;  %v276_v19 = vld [vmem:[%s14142_s0 + $0x5c] sm:$0xff]  ;;  %v166_v21 = vld [vmem:[%s14142_s0 + $0x6a] sm:$0xff] }
  0x17   :  { %1601 = vmatprep.subr.mxu0 %v9240_v3  ;;  %v8485_v16 = vpack.i.bf16 %v164_v13, %v163_v12  ;;  %v165_v20 = vld [vmem:[%s14142_s0 + $0x62] sm:$0xff]  ;;  %v222_v29 = vld [vmem:[%s14142_s0 + $0x6b] sm:$0xff]  ;;  %v112_v33 = vld [vmem:[%s14142_s0 + $0x79] sm:$0xff] }
  0x18   :  { %8441 = vrot.lane.b32.xlu1 %v8440_v27, %s9244_s24  ;;  %1602 = vmatpush1.msra.mxu0 %v1453_v53  ;;  %v1461_v22 = vld [vmem:[%s14143_s1 + $0x80] sm:$0xff]  ;;  %v110_v25 = vld [vmem:[%s14142_s0 + $0x69] sm:$0xff]  ;;  %v8500_v26 = vpack.i.bf16 %v166_v21, %v165_v20  ;;  %v223_v35 = vld [vmem:[%s14142_s0 + $0x73] sm:$0xff] }
  0x19   :  { %8436 = vrot.lane.b32.xlu0 %v8435_v28, %s9242_s16  ;;  %1603 = vmatprep.subr.mxu0 %v9240_v3  ;;  %v109_v24 = vld [vmem:[%s14142_s0 + $0x61] sm:$0xff]  ;;  %v278_v37 = vld [vmem:[%s14142_s0 + $0x6c] sm:$0xff]  ;;  %v279_v45 = vld [vmem:[%s14142_s0 + $0x74] sm:$0xff] }
  0x1a   :  { %1604 = vmatpush1.msra.mxu0 %v1452_v57  ;;  %v8495_v27 = vpack.i.bf16 %v110_v25, %v109_v24  ;;  %v221_v28 = vld [vmem:[%s14142_s0 + $0x63] sm:$0xff]  ;;  %v224_v36 = vld [vmem:[%s14142_s0 + $0x7b] sm:$0xff]  ;;  %v226_v51 = vld [vmem:[%s14142_s0 + $0x8b] sm:$0xff] }
  0x1b   :  { %1605 = vmatprep.subr.mxu0 %v9240_v3  ;;  %v277_v30 = vld [vmem:[%s14142_s0 + $0x64] sm:$0xff]  ;;  %v168_v39 = vld [vmem:[%s14142_s0 + $0x7a] sm:$0xff]  ;;  %v8520_v40 = vpack.i.bf16 %v224_v36, %v223_v35  ;;  %v119_v13 = vld [vmem:[%s14142_s0 + $0xb1] sm:$0xff] }
  0x1c   :  { %1057 = vrot.lane.b32.xlu1 %v269_v31, %s9243_s23  ;;  %1606 = vmatpush1.msra.mxu0 %v1451_v60  ;;  %v8505_v31 = vpack.i.bf16 %v222_v29, %v221_v28  ;;  %v169_v43 = vld [vmem:[%s14142_s0 + $0x82] sm:$0xff]  ;;  %v170_v44 = vld [vmem:[%s14142_s0 + $0x8a] sm:$0xff]  ;;  %v116_v55 = vld [vmem:[%s14142_s0 + $0x99] sm:$0xff] }
  0x1d   :  { %8446 = vrot.lane.b32.xlu0 %v8445_v32, %s9241_s15  ;;  %1607 = vmatprep.subr.mxu0 %v9240_v3  ;;  %v111_v32 = vld [vmem:[%s14142_s0 + $0x71] sm:$0xff]  ;;  %v8530_v48 = vpack.i.bf16 %v170_v44, %v169_v43  ;;  %v281_v52 = vld [vmem:[%s14142_s0 + $0x84] sm:$0xff]  ;;  %v172_v61 = vld [vmem:[%s14142_s0 + $0x9a] sm:$0xff] }
  0x1e   :  { %1608 = vmatpush1.msra.mxu0 %v1450_v63  ;;  %v8510_v34 = vpack.i.bf16 %v112_v33, %v111_v32  ;;  %v227_v57 = vld [vmem:[%s14142_s0 + $0x93] sm:$0xff]  ;;  %v174_v2 = vld [vmem:[%s14142_s0 + $0xaa] sm:$0xff]  ;;  %v177_v24 = vld [vmem:[%s14142_s0 + $0xc2] sm:$0xff] }
  0x1f   :  { %1609 = vmatprep.subr.mxu0 %v9240_v3  ;;  %v171_v60 = vld [vmem:[%s14142_s0 + $0x92] sm:$0xff]  ;;  %v229_v9 = vld [vmem:[%s14142_s0 + $0xa3] sm:$0xff]  ;;  %v176_v20 = vld [vmem:[%s14142_s0 + $0xba] sm:$0xff] }
  0x20   :  { %8451 = vrot.lane.b32.xlu1 %v8450_v38, %s9242_s16  ;;  %1610 = vmatpush1.msra.mxu0 %v1449_v5  ;;  %v167_v38 = vld [vmem:[%s14142_s0 + $0x72] sm:$0xff]  ;;  %v8545_v63 = vpack.i.bf16 %v172_v61, %v171_v60  ;;  %v117_v5 = vld [vmem:[%s14142_s0 + $0xa1] sm:$0xff]  ;;  %v178_v25 = vld [vmem:[%s14142_s0 + $0xca] sm:$0xff] }
  0x21   :  { %1059 = vrot.lane.b32.xlu0 %v270_v42, %s9243_s23  ;;  %1611 = vmatprep.subr.mxu0 %v9240_v3  ;;  %v8515_v41 = vpack.i.bf16 %v168_v39, %v167_v38  ;;  %v280_v42 = vld [vmem:[%s14142_s0 + $0x7c] sm:$0xff]  ;;  %v283_v4 = vld [vmem:[%s14142_s0 + $0x94] sm:$0xff]  ;;  %v122_v29 = vld [vmem:[%s14142_s0 + $0xc9] sm:$0xff] }
  0x22   :  { %1612 = vmatpush1.msra.mxu0 %v1448_v6  ;;  %v118_v6 = vld [vmem:[%s14142_s0 + $0xa9] sm:$0xff]  ;;  %v121_v28 = vld [vmem:[%s14142_s0 + $0xc1] sm:$0xff] }
  0x23   :  { %1613 = vmatprep.subr.mxu0 %v9240_v3  ;;  %v8555_v8 = vpack.i.bf16 %v118_v6, %v117_v5  ;;  %v8585_v35 = vpack.i.bf16 %v122_v29, %v121_v28  ;;  %v42_v36 = vld [vmem:[%s14142_s0 + $0x8] sm:$0xff]  ;;  %v180_v5 = vld [vmem:[%s14142_s0 + $0xda] sm:$0xff] }
  0x24   :  { %8461 = vrot.lane.b32.xlu1 %v8460_v46, %s9241_s15  ;;  %1614 = vmatpush1.msra.mxu0 %v1447_v10  ;;  %v113_v46 = vld [vmem:[%s14142_s0 + $0x81] sm:$0xff]  ;;  %v230_v10 = vld [vmem:[%s14142_s0 + $0xab] sm:$0xff] }
  0x25   :  { %8456 = vrot.lane.b32.xlu0 %v8455_v47, %s9244_s24  ;;  %1615 = vmatprep.subr.mxu0 %v9240_v3  ;;  %v114_v47 = vld [vmem:[%s14142_s0 + $0x89] sm:$0xff]  ;;  %v8565_v12 = vpack.i.bf16 %v230_v10, %v229_v9  ;;  %v125_v28 = vld [vmem:[%s14142_s0 + $0xe1] sm:$0xff] }
  0x26   :  { %1616 = vmatpush1.msra.mxu0 %v1446_v14  ;;  %v8525_v49 = vpack.i.bf16 %v114_v47, %v113_v46  ;;  %v120_v14 = vld [vmem:[%s14142_s0 + $0xb9] sm:$0xff]  ;;  %v233_v38 = vld [vmem:[%s14142_s0 + $0xc3] sm:$0xff]  ;;  %v234_v39 = vld [vmem:[%s14142_s0 + $0xcb] sm:$0xff] }
  0x27   :  { %1617 = vmatprep.subr.mxu0 %v9240_v3  ;;  %v289_v46 = vld [vmem:[%s14142_s0 + $0xc4] sm:$0xff]  ;;  %v8595_v47 = vpack.i.bf16 %v234_v39, %v233_v38 }
  0x28   :  { %1063 = vrot.lane.b32.xlu1 %v272_v50, %s9243_s23  ;;  %1618 = vmatpush1.msra.mxu0 %v1445_v17  ;;  %v225_v50 = vld [vmem:[%s14142_s0 + $0x83] sm:$0xff]  ;;  %v232_v17 = vld [vmem:[%s14142_s0 + $0xbb] sm:$0xff] }
  0x29   :  { %1061 = vrot.lane.b32.xlu0 %v271_v54, %s9243_s23  ;;  %1647 = vmatprep.subr.mxu0 %v9240_v3  ;;  %v8535_v53 = vpack.i.bf16 %v226_v51, %v225_v50  ;;  %v115_v54 = vld [vmem:[%s14142_s0 + $0x91] sm:$0xff]  ;;  %v126_v29 = vld [vmem:[%s14142_s0 + $0xe9] sm:$0xff] }
  0x2a   :  { %7254 = vmatpush2.msk.msra.mxu0 %vm1583_vm0, %v1462_v18  ;;  %v8540_v56 = vpack.i.bf16 %v116_v55, %v115_v54  ;;  %v286_v18 = vld [vmem:[%s14142_s0 + $0xac] sm:$0xff]  ;;  %v8615_v38 = vpack.i.bf16 %v126_v29, %v125_v28  ;;  %v295_v28 = vld [vmem:[%s14142_s0 + $0xf4] sm:$0xff]  ;;  %v129_v29 = vld [vmem:[%s14142_s0 + $0x101] sm:$0xff] }
  0x2b   :  { %1649 = vmatprep.subr.mxu0 %v9240_v3 }
  0x2c   :  { %8471 = vrot.lane.b32.xlu1 %v8470_v58, %s9244_s24  ;;  %1650 = vmatpush2.msra.mxu0 %v1461_v22  ;;  %v228_v58 = vld [vmem:[%s14142_s0 + $0x9b] sm:$0xff] }
  0x2d   :  { %8466 = vrot.lane.b32.xlu0 %v8465_v59, %s9242_s16  ;;  %8002 = vmatprep.subr.mxu0 %v9240_v3  ;;  %v282_v59 = vld [vmem:[%s14142_s0 + $0x8c] sm:$0xff]  ;;  %v8550_v62 = vpack.i.bf16 %v228_v58, %v227_v57 }
  0x2e   :  { %v43_v58 = vld [vmem:[%s14142_s0 + $0x10] sm:$0xff] }
  0x30   :  { %1065 = vrot.lane.b32.xlu1 %v273_v0, %s9243_s23  ;;  %v284_v0 = vld [vmem:[%s14142_s0 + $0x9c] sm:$0xff] }
  0x31   :  { %8476 = vrot.lane.b32.xlu0 %v8475_v1, %s9241_s15  ;;  %v173_v1 = vld [vmem:[%s14142_s0 + $0xa2] sm:$0xff] }
  0x34   :  { %8481 = vrot.lane.b32.xlu1 %v8480_v7, %s9242_s16  ;;  %v8560_v7 = vpack.i.bf16 %v174_v2, %v173_v1  ;;  %v290_v2 = vld [vmem:[%s14142_s0 + $0xcc] sm:$0xff] }
  0x35   :  { %1067 = vrot.lane.b32.xlu0 %v274_v11, %s9243_s23  ;;  %v285_v11 = vld [vmem:[%s14142_s0 + $0xa4] sm:$0xff] }
  0x38   :  { %8491 = vrot.lane.b32.xlu1 %v8490_v15, %s9241_s15  ;;  %v8570_v15 = vpack.i.bf16 %v120_v14, %v119_v13 }
  0x39   :  { %8486 = vrot.lane.b32.xlu0 %v8485_v16, %s9244_s24  ;;  %v231_v16 = vld [vmem:[%s14142_s0 + $0xb3] sm:$0xff] }
  0x3a   :  { %v8580_v21 = vpack.i.bf16 %v232_v17, %v231_v16 }
  0x3c   :  { %1071 = vrot.lane.b32.xlu1 %v276_v19, %s9243_s23  ;;  %v175_v19 = vld [vmem:[%s14142_s0 + $0xb2] sm:$0xff] }
  0x3d   :  { %1069 = vrot.lane.b32.xlu0 %v275_v23, %s9243_s23  ;;  %v8575_v22 = vpack.i.bf16 %v176_v20, %v175_v19  ;;  %v288_v23 = vld [vmem:[%s14142_s0 + $0xbc] sm:$0xff] }
  0x40   :  { %8501 = vrot.lane.b32.xlu1 %v8500_v26, %s9244_s24 }
  0x41   :  { %8496 = vrot.lane.b32.xlu0 %v8495_v27, %s9242_s16  ;;  %v287_v27 = vld [vmem:[%s14142_s0 + $0xb4] sm:$0xff] }
  0x44   :  { %1073 = vrot.lane.b32.xlu1 %v277_v30, %s9243_s23 }
  0x45   :  { %8506 = vrot.lane.b32.xlu0 %v8505_v31, %s9241_s15  ;;  %v8590_v31 = vpack.i.bf16 %v178_v25, %v177_v24  ;;  %v181_v24 = vld [vmem:[%s14142_s0 + $0xe2] sm:$0xff]  ;;  %v182_v25 = vld [vmem:[%s14142_s0 + $0xea] sm:$0xff] }
  0x48   :  { %8511 = vrot.lane.b32.xlu1 %v8510_v34, %s9242_s16  ;;  %v41_v34 = vld [vmem:[%s14142_s0] sm:$0xff] }
  0x49   :  { %1075 = vrot.lane.b32.xlu0 %v278_v37, %s9243_s23 }
  0x4c   :  { %8521 = vrot.lane.b32.xlu1 %v8520_v40, %s9241_s15 }
  0x4d   :  { %8516 = vrot.lane.b32.xlu0 %v8515_v41, %s9244_s24 }
  0x50   :  { %1079 = vrot.lane.b32.xlu1 %v280_v42, %s9243_s23 }
  0x51   :  { %1077 = vrot.lane.b32.xlu0 %v279_v45, %s9243_s23 }
  0x54   :  { %8531 = vrot.lane.b32.xlu1 %v8530_v48, %s9244_s24  ;;  %v123_v48 = vld [vmem:[%s14142_s0 + $0xd1] sm:$0xff] }
  0x55   :  { %8526 = vrot.lane.b32.xlu0 %v8525_v49, %s9242_s16  ;;  %v124_v49 = vld [vmem:[%s14142_s0 + $0xd9] sm:$0xff] }
  0x56   :  { %v8600_v61 = vpack.i.bf16 %v124_v49, %v123_v48  ;;  %v293_v49 = vld [vmem:[%s14142_s0 + $0xe4] sm:$0xff] }
  0x58   :  { %1081 = vrot.lane.b32.xlu1 %v281_v52, %s9243_s23 }
  0x59   :  { %8536 = vrot.lane.b32.xlu0 %v8535_v53, %s9241_s15 }
  0x5c   :  { %8541 = vrot.lane.b32.xlu1 %v8540_v56, %s9242_s16 }
  0x5d   :  { %1083 = vrot.lane.b32.xlu0 %v282_v59, %s9243_s23  ;;  %v44_v59 = vld [vmem:[%s14142_s0 + $0x18] sm:$0xff] }
  0x60   :  { %8551 = vrot.lane.b32.xlu1 %v8550_v62, %s9241_s15 }
  0x61   :  { %8546 = vrot.lane.b32.xlu0 %v8545_v63, %s9244_s24  ;;  %v235_v63 = vld [vmem:[%s14142_s0 + $0xd3] sm:$0xff] }
  0x64   :  { %1087 = vrot.lane.b32.xlu1 %v284_v0, %s9243_s23  ;;  %v236_v0 = vld [vmem:[%s14142_s0 + $0xdb] sm:$0xff] }
  0x65   :  { %1085 = vrot.lane.b32.xlu0 %v283_v4, %s9243_s23  ;;  %v179_v4 = vld [vmem:[%s14142_s0 + $0xd2] sm:$0xff]  ;;  %v8610_v13 = vpack.i.bf16 %v236_v0, %v235_v63 }
  0x66   :  { %v239_v0 = vld [vmem:[%s14142_s0 + $0xf3] sm:$0xff] }
  0x68   :  { %8561 = vrot.lane.b32.xlu1 %v8560_v7, %s9244_s24 }
  0x69   :  { %8556 = vrot.lane.b32.xlu0 %v8555_v8, %s9242_s16 }
  0x6c   :  { %1089 = vrot.lane.b32.xlu1 %v285_v11, %s9243_s23 }
  0x6d   :  { %8566 = vrot.lane.b32.xlu0 %v8565_v12, %s9241_s15 }
  0x70   :  { %8571 = vrot.lane.b32.xlu1 %v8570_v15, %s9242_s16  ;;  %v8605_v15 = vpack.i.bf16 %v180_v5, %v179_v4  ;;  %v294_v4 = vld [vmem:[%s14142_s0 + $0xec] sm:$0xff] }
  0x71   :  { %1091 = vrot.lane.b32.xlu0 %v286_v18, %s9243_s23  ;;  %v183_v5 = vld [vmem:[%s14142_s0 + $0xf2] sm:$0xff] }
  0x74   :  { %8581 = vrot.lane.b32.xlu1 %v8580_v21, %s9241_s15 }
  0x75   :  { %8576 = vrot.lane.b32.xlu0 %v8575_v22, %s9244_s24  ;;  %v292_v22 = vld [vmem:[%s14142_s0 + $0xdc] sm:$0xff] }
  0x76   :  { %v8417_v26 = vpop.permute.xlu1 %8416 }
  0x77   :  { %v8407_v30 = vpop.permute.xlu0 %8406  ;;  %v8418_v43 = vunpack.i.l.bf16 %v8417_v26  ;;  %v8419_v53 = vunpack.i.h.bf16 %v8417_v26 }
  0x78   :  { %1095 = vrot.lane.b32.xlu1 %v288_v23, %s9243_s23  ;;  %v8409_v32 = vunpack.i.h.bf16 %v8407_v30  ;;  %v8408_v33 = vunpack.i.l.bf16 %v8407_v30 }
  0x79   :  { %1093 = vrot.lane.b32.xlu0 %v287_v27, %s9243_s23  ;;  %v291_v27 = vld [vmem:[%s14142_s0 + $0xd4] sm:$0xff] }
  0x7a   :  { %v1050_v37 = vpop.permute.xlu1 %1049  ;;  %v1218_v44 = vsel %vm1217_vm2, %v41_v34, %v8408_v33  ;;  %v1219_v45 = vsel %vm1217_vm2, %v42_v36, %v8409_v32 }
  0x7b   :  { %v8412_v40 = vpop.permute.xlu0 %8411  ;;  %7255 = vmatprep.mubr.msk.f32.mxu0 %vm1470_vm1, %v1050_v37 }
  0x7c   :  { %v8414_v41 = vunpack.i.h.bf16 %v8412_v40  ;;  %v8413_v42 = vunpack.i.l.bf16 %v8412_v40  ;;  %8591 = vrot.lane.b32.xlu1 %v8590_v31, %s9244_s24  ;;  %v45_v31 = vld [vmem:[%s14142_s0 + $0x20] sm:$0xff] }
  0x7d   :  { %8586 = vrot.lane.b32.xlu0 %v8585_v35, %s9242_s16  ;;  %v8620_v35 = vpack.i.bf16 %v182_v25, %v181_v24  ;;  %v185_v25 = vld [vmem:[%s14142_s0 + $0x102] sm:$0xff] }
  0x7e   :  { %v8422_v50 = vpop.permute.xlu1 %8421  ;;  %v1275_v51 = vsel %vm1274_vm3, %v1218_v44, %v8413_v42  ;;  %v1276_v52 = vsel %vm1274_vm3, %v1219_v45, %v8414_v41  ;;  %v237_v41 = vld [vmem:[%s14142_s0 + $0xe3] sm:$0xff]  ;;  %v238_v42 = vld [vmem:[%s14142_s0 + $0xeb] sm:$0xff] }
  0x7f   :  { %v8424_v54 = vunpack.i.h.bf16 %v8422_v50  ;;  %v8423_v55 = vunpack.i.l.bf16 %v8422_v50  ;;  %v1052_v56 = vpop.permute.xlu0 %1051  ;;  %v1332_v57 = vsel %vm1331_vm4, %v1275_v51, %v8418_v43  ;;  %v1333_v62 = vsel %vm1331_vm4, %v1276_v52, %v8419_v53  ;;  %v127_v51 = vld [vmem:[%s14142_s0 + $0xf1] sm:$0xff]  ;;  %v128_v52 = vld [vmem:[%s14142_s0 + $0xf9] sm:$0xff] }
  0x80   :  { %1097 = vrot.lane.b32.xlu1 %v289_v46, %s9243_s23  ;;  %v1389_v60 = vsel %vm1388_vm5, %v1332_v57, %v1050_v37  ;;  %v1390_v12 = vsel %vm1388_vm5, %v1333_v62, %v1052_v56  ;;  %v46_v37 = vld [vmem:[%s14142_s0 + $0x28] sm:$0xff]  ;;  %v8625_v50 = vpack.i.bf16 %v238_v42, %v237_v41  ;;  %v8630_v63 = vpack.i.bf16 %v128_v52, %v127_v51  ;;  %v131_v52 = vld [vmem:[%s14142_s0 + $0x111] sm:$0xff] }
  0x81   :  { %8596 = vrot.lane.b32.xlu0 %v8595_v47, %s9241_s15  ;;  %1652 = vmatmul.mubr.f32.vlgmr.msra.gmra.mxu0 %v1389_v60  ;;  %v1220_v6 = vsel %vm1217_vm2, %v43_v58, %v8423_v55  ;;  %v1221_v7 = vsel %vm1217_vm2, %v44_v59, %v8424_v54  ;;  %v47_v60 = vld [vmem:[%s14142_s0 + $0x30] sm:$0xff]  ;;  %v241_v42 = vld [vmem:[%s14142_s0 + $0x103] sm:$0xff] }
  0x82   :  { %7256 = vmatprep.mubr.msk.f32.mxu0 %vm1470_vm1, %v1052_v56  ;;  %v8432_v1 = vpop.permute.xlu1 %8431 }
  0x83   :  { %v8433_v8 = vunpack.i.l.bf16 %v8432_v1  ;;  %v8427_v9 = vpop.permute.xlu0 %8426  ;;  %v8434_v14 = vunpack.i.h.bf16 %v8432_v1  ;;  %v240_v1 = vld [vmem:[%s14142_s0 + $0xfb] sm:$0xff] }
  0x84   :  { %v8429_v10 = vunpack.i.h.bf16 %v8427_v9  ;;  %v8428_v11 = vunpack.i.l.bf16 %v8427_v9  ;;  %8601 = vrot.lane.b32.xlu1 %v8600_v61, %s9242_s16  ;;  %v48_v61 = vld [vmem:[%s14142_s0 + $0x38] sm:$0xff] }
  0x85   :  { %1099 = vrot.lane.b32.xlu0 %v290_v2, %s9243_s23  ;;  %1657 = vmatmul.mubr.f32.gmra.mxu0 %v1390_v12 }
  0x86   :  { %v1056_v16 = vpop.permute.xlu1 %1055  ;;  %v1277_v17 = vsel %vm1274_vm3, %v1220_v6, %v8428_v11  ;;  %v1278_v18 = vsel %vm1274_vm3, %v1221_v7, %v8429_v10  ;;  %v184_v6 = vld [vmem:[%s14142_s0 + $0xfa] sm:$0xff] }
  0x87   :  { %v1054_v19 = vpop.permute.xlu0 %1053  ;;  %v1334_v20 = vsel %vm1331_vm4, %v1277_v17, %v8433_v8  ;;  %v1335_v23 = vsel %vm1331_vm4, %v1278_v18, %v8434_v14  ;;  %v8640_v14 = vpack.i.bf16 %v240_v1, %v239_v0  ;;  %v243_v1 = vld [vmem:[%s14142_s0 + $0x113] sm:$0xff] }
  0x88   :  { %7257 = vmatprep.mubr.msk.f32.mxu0 %vm1470_vm1, %v1054_v19  ;;  %8611 = vrot.lane.b32.xlu1 %v8610_v13, %s9241_s15  ;;  %v1391_v21 = vsel %vm1388_vm5, %v1334_v20, %v1054_v19  ;;  %v1392_v34 = vsel %vm1388_vm5, %v1335_v23, %v1056_v16  ;;  %v296_v23 = vld [vmem:[%s14142_s0 + $0xfc] sm:$0xff] }
  0x89   :  { %8606 = vrot.lane.b32.xlu0 %v8605_v15, %s9244_s24  ;;  %1662 = vmatmul.mubr.f32.gmra.mxu0 %v1391_v21 }
  0x8a   :  { %7258 = vmatprep.mubr.msk.f32.mxu0 %vm1470_vm1, %v1056_v16  ;;  %v8442_v26 = vpop.permute.xlu1 %8441  ;;  %v8635_v16 = vpack.i.bf16 %v184_v6, %v183_v5  ;;  %v298_v5 = vld [vmem:[%s14142_s0 + $0x10c] sm:$0xff] }
  0x8b   :  { %v8437_v30 = vpop.permute.xlu0 %8436  ;;  %v8443_v36 = vunpack.i.l.bf16 %v8442_v26  ;;  %v8444_v43 = vunpack.i.h.bf16 %v8442_v26  ;;  %v186_v26 = vld [vmem:[%s14142_s0 + $0x10a] sm:$0xff]  ;;  %v187_v6 = vld [vmem:[%s14142_s0 + $0x112] sm:$0xff] }
  0x8c   :  { %v8439_v32 = vunpack.i.h.bf16 %v8437_v30  ;;  %v8438_v33 = vunpack.i.l.bf16 %v8437_v30  ;;  %1103 = vrot.lane.b32.xlu1 %v292_v22, %s9243_s23  ;;  %v130_v30 = vld [vmem:[%s14142_s0 + $0x109] sm:$0xff] }
  0x8d   :  { %1101 = vrot.lane.b32.xlu0 %v291_v27, %s9243_s23  ;;  %1667 = vmatmul.mubr.f32.gmra.mxu0 %v1392_v34 }
  0x8e   :  { %v1222_v39 = vsel %vm1217_vm2, %v45_v31, %v8438_v33  ;;  %v1058_v40 = vpop.permute.xlu1 %1057  ;;  %v1223_v45 = vsel %vm1217_vm2, %v46_v37, %v8439_v32  ;;  %v49_v32 = vld [vmem:[%s14142_s0 + $0x40] sm:$0xff] }
  0x8f   :  { %v8447_v44 = vpop.permute.xlu0 %8446  ;;  %7259 = vmatprep.mubr.msk.f32.mxu0 %vm1470_vm1, %v1058_v40  ;;  %v1279_v48 = vsel %vm1274_vm3, %v1222_v39, %v8443_v36  ;;  %v1280_v59 = vsel %vm1274_vm3, %v1223_v45, %v8444_v43  ;;  %v8650_v36 = vpack.i.bf16 %v186_v26, %v185_v25  ;;  %v8645_v39 = vpack.i.bf16 %v130_v30, %v129_v29  ;;  %v242_v43 = vld [vmem:[%s14142_s0 + $0x10b] sm:$0xff]  ;;  %v189_v26 = vld [vmem:[%s14142_s0 + $0x122] sm:$0xff]  ;;  %v299_v29 = vld [vmem:[%s14142_s0 + $0x114] sm:$0xff] }
  0x90   :  { %v8449_v46 = vunpack.i.h.bf16 %v8447_v44  ;;  %v8448_v47 = vunpack.i.l.bf16 %v8447_v44  ;;  %8621 = vrot.lane.b32.xlu1 %v8620_v35, %s9244_s24  ;;  %v8655_v51 = vpack.i.bf16 %v242_v43, %v241_v42  ;;  %v133_v30 = vld [vmem:[%s14142_s0 + $0x121] sm:$0xff] }
  0x91   :  { %8616 = vrot.lane.b32.xlu0 %v8615_v38, %s9242_s16  ;;  %v50_v38 = vld [vmem:[%s14142_s0 + $0x48] sm:$0xff] }
  0x92   :  { %v8452_v53 = vpop.permute.xlu1 %8451  ;;  %v1336_v54 = vsel %vm1331_vm4, %v1279_v48, %v8448_v47  ;;  %v1337_v62 = vsel %vm1331_vm4, %v1280_v59, %v8449_v46  ;;  %v245_v43 = vld [vmem:[%s14142_s0 + $0x123] sm:$0xff] }
  0x93   :  { %v8454_v55 = vunpack.i.h.bf16 %v8452_v53  ;;  %v8453_v56 = vunpack.i.l.bf16 %v8452_v53  ;;  %v1060_v57 = vpop.permute.xlu0 %1059  ;;  %v1393_v58 = vsel %vm1388_vm5, %v1336_v54, %v1058_v40  ;;  %v132_v53 = vld [vmem:[%s14142_s0 + $0x119] sm:$0xff] }
  0x94   :  { %1672 = vmatmul.mubr.f32.gmra.mxu0 %v1393_v58  ;;  %1105 = vrot.lane.b32.xlu1 %v293_v49, %s9243_s23  ;;  %v1394_v11 = vsel %vm1388_vm5, %v1337_v62, %v1060_v57  ;;  %v52_v62 = vld [vmem:[%s14142_s0 + $0x58] sm:$0xff]  ;;  %v8660_v0 = vpack.i.bf16 %v132_v53, %v131_v52  ;;  %v301_v52 = vld [vmem:[%s14142_s0 + $0x124] sm:$0xff] }
  0x95   :  { %8626 = vrot.lane.b32.xlu0 %v8625_v50, %s9241_s15  ;;  %7260 = vmatprep.mubr.msk.f32.mxu0 %vm1470_vm1, %v1060_v57  ;;  %v1224_v7 = vsel %vm1217_vm2, %v47_v60, %v8453_v56  ;;  %v1225_v8 = vsel %vm1217_vm2, %v48_v61, %v8454_v55  ;;  %v297_v50 = vld [vmem:[%s14142_s0 + $0x104] sm:$0xff]  ;;  %v51_v61 = vld [vmem:[%s14142_s0 + $0x50] sm:$0xff] }
  0x96   :  { %v8462_v2 = vpop.permute.xlu1 %8461  ;;  %v135_v53 = vld [vmem:[%s14142_s0 + $0x131] sm:$0xff] }
  0x97   :  { %v8463_v9 = vunpack.i.l.bf16 %v8462_v2  ;;  %v8457_v10 = vpop.permute.xlu0 %8456  ;;  %v8464_v15 = vunpack.i.h.bf16 %v8462_v2  ;;  %v244_v2 = vld [vmem:[%s14142_s0 + $0x11b] sm:$0xff] }
  0x98   :  { %v8459_v12 = vunpack.i.h.bf16 %v8457_v10  ;;  %v8458_v13 = vunpack.i.l.bf16 %v8457_v10  ;;  %1677 = vmatmul.mubr.f32.gmra.mxu0 %v1394_v11  ;;  %8631 = vrot.lane.b32.xlu1 %v8630_v63, %s9242_s16 }
  0x99   :  { %1107 = vrot.lane.b32.xlu0 %v294_v4, %s9243_s23 }
  0x9a   :  { %v1064_v17 = vpop.permute.xlu1 %1063  ;;  %v1281_v18 = vsel %vm1274_vm3, %v1224_v7, %v8458_v13  ;;  %v1282_v19 = vsel %vm1274_vm3, %v1225_v8, %v8459_v12  ;;  %v188_v7 = vld [vmem:[%s14142_s0 + $0x11a] sm:$0xff] }
  0x9b   :  { %v1062_v20 = vpop.permute.xlu0 %1061  ;;  %v1338_v21 = vsel %vm1331_vm4, %v1281_v18, %v8463_v9  ;;  %v1339_v24 = vsel %vm1331_vm4, %v1282_v19, %v8464_v15  ;;  %v8670_v15 = vpack.i.bf16 %v244_v2, %v243_v1  ;;  %v247_v2 = vld [vmem:[%s14142_s0 + $0x133] sm:$0xff] }
  0x9c   :  { %7261 = vmatprep.mubr.msk.f32.mxu0 %vm1470_vm1, %v1062_v20  ;;  %8641 = vrot.lane.b32.xlu1 %v8640_v14, %s9241_s15  ;;  %v1395_v22 = vsel %vm1388_vm5, %v1338_v21, %v1062_v20  ;;  %v1396_v35 = vsel %vm1388_vm5, %v1339_v24, %v1064_v17  ;;  %v300_v24 = vld [vmem:[%s14142_s0 + $0x11c] sm:$0xff] }
  0x9d   :  { %8636 = vrot.lane.b32.xlu0 %v8635_v16, %s9244_s24  ;;  %1682 = vmatmul.mubr.f32.gmra.mxu0 %v1395_v22 }
  0x9e   :  { %7262 = vmatprep.mubr.msk.f32.mxu0 %vm1470_vm1, %v1064_v17  ;;  %v8472_v27 = vpop.permute.xlu1 %8471  ;;  %v8665_v17 = vpack.i.bf16 %v188_v7, %v187_v6  ;;  %v302_v6 = vld [vmem:[%s14142_s0 + $0x12c] sm:$0xff] }
  0x9f   :  { %v8467_v31 = vpop.permute.xlu0 %8466  ;;  %v8473_v37 = vunpack.i.l.bf16 %v8472_v27  ;;  %v8474_v44 = vunpack.i.h.bf16 %v8472_v27  ;;  %v190_v27 = vld [vmem:[%s14142_s0 + $0x12a] sm:$0xff]  ;;  %v191_v7 = vld [vmem:[%s14142_s0 + $0x132] sm:$0xff] }
  0xa0   :  { %v8469_v33 = vunpack.i.h.bf16 %v8467_v31  ;;  %v8468_v34 = vunpack.i.l.bf16 %v8467_v31  ;;  %1111 = vrot.lane.b32.xlu1 %v296_v23, %s9243_s23  ;;  %v134_v31 = vld [vmem:[%s14142_s0 + $0x129] sm:$0xff] }
  0xa1   :  { %1109 = vrot.lane.b32.xlu0 %v295_v28, %s9243_s23  ;;  %1687 = vmatmul.mubr.f32.gmra.mxu0 %v1396_v35 }
  0xa2   :  { %v1226_v40 = vsel %vm1217_vm2, %v49_v32, %v8468_v34  ;;  %v1066_v41 = vpop.permute.xlu1 %1065  ;;  %v1227_v46 = vsel %vm1217_vm2, %v50_v38, %v8469_v33  ;;  %v53_v33 = vld [vmem:[%s14142_s0 + $0x60] sm:$0xff] }
  0xa3   :  { %v8477_v45 = vpop.permute.xlu0 %8476  ;;  %7263 = vmatprep.mubr.msk.f32.mxu0 %vm1470_vm1, %v1066_v41  ;;  %v1283_v49 = vsel %vm1274_vm3, %v1226_v40, %v8473_v37  ;;  %v1284_v60 = vsel %vm1274_vm3, %v1227_v46, %v8474_v44  ;;  %v8680_v37 = vpack.i.bf16 %v190_v27, %v189_v26  ;;  %v8675_v40 = vpack.i.bf16 %v134_v31, %v133_v30  ;;  %v246_v44 = vld [vmem:[%s14142_s0 + $0x12b] sm:$0xff]  ;;  %v304_v26 = vld [vmem:[%s14142_s0 + $0x13c] sm:$0xff]  ;;  %v303_v30 = vld [vmem:[%s14142_s0 + $0x134] sm:$0xff] }
  0xa4   :  { %v8479_v47 = vunpack.i.h.bf16 %v8477_v45  ;;  %v8478_v48 = vunpack.i.l.bf16 %v8477_v45  ;;  %8651 = vrot.lane.b32.xlu1 %v8650_v36, %s9244_s24  ;;  %v193_v27 = vld [vmem:[%s14142_s0 + $0x142] sm:$0xff] }
  0xa5   :  { %8646 = vrot.lane.b32.xlu0 %v8645_v39, %s9242_s16  ;;  %v54_v39 = vld [vmem:[%s14142_s0 + $0x68] sm:$0xff] }
  0xa6   :  { %v8482_v54 = vpop.permute.xlu1 %8481  ;;  %v1340_v55 = vsel %vm1331_vm4, %v1283_v49, %v8478_v48  ;;  %v1341_v63 = vsel %vm1331_vm4, %v1284_v60, %v8479_v47  ;;  %v137_v31 = vld [vmem:[%s14142_s0 + $0x141] sm:$0xff] }
  0xa7   :  { %v8484_v56 = vunpack.i.h.bf16 %v8482_v54  ;;  %v8483_v57 = vunpack.i.l.bf16 %v8482_v54  ;;  %v1068_v58 = vpop.permute.xlu0 %1067  ;;  %v1397_v59 = vsel %vm1388_vm5, %v1340_v55, %v1066_v41  ;;  %v136_v54 = vld [vmem:[%s14142_s0 + $0x139] sm:$0xff] }
  0xa8   :  { %1692 = vmatmul.mubr.f32.gmra.mxu0 %v1397_v59  ;;  %1113 = vrot.lane.b32.xlu1 %v297_v50, %s9243_s23  ;;  %v1398_v12 = vsel %vm1388_vm5, %v1341_v63, %v1068_v58  ;;  %v56_v63 = vld [vmem:[%s14142_s0 + $0x78] sm:$0xff]  ;;  %v8690_v1 = vpack.i.bf16 %v136_v54, %v135_v53  ;;  %v305_v53 = vld [vmem:[%s14142_s0 + $0x144] sm:$0xff] }
  0xa9   :  { %8656 = vrot.lane.b32.xlu0 %v8655_v51, %s9241_s15  ;;  %7264 = vmatprep.mubr.msk.f32.mxu0 %vm1470_vm1, %v1068_v58  ;;  %v1228_v8 = vsel %vm1217_vm2, %v51_v61, %v8483_v57  ;;  %v1229_v9 = vsel %vm1217_vm2, %v52_v62, %v8484_v56  ;;  %v8685_v51 = vpack.i.bf16 %v246_v44, %v245_v43  ;;  %v55_v62 = vld [vmem:[%s14142_s0 + $0x70] sm:$0xff]  ;;  %v249_v44 = vld [vmem:[%s14142_s0 + $0x143] sm:$0xff] }
  0xaa   :  { %v8492_v4 = vpop.permute.xlu1 %8491  ;;  %v139_v54 = vld [vmem:[%s14142_s0 + $0x151] sm:$0xff] }
  0xab   :  { %v8493_v10 = vunpack.i.l.bf16 %v8492_v4  ;;  %v8487_v11 = vpop.permute.xlu0 %8486  ;;  %v8494_v16 = vunpack.i.h.bf16 %v8492_v4  ;;  %v248_v4 = vld [vmem:[%s14142_s0 + $0x13b] sm:$0xff] }
  0xac   :  { %v8489_v13 = vunpack.i.h.bf16 %v8487_v11  ;;  %v8488_v14 = vunpack.i.l.bf16 %v8487_v11  ;;  %1697 = vmatmul.mubr.f32.gmra.mxu0 %v1398_v12  ;;  %8661 = vrot.lane.b32.xlu1 %v8660_v0, %s9242_s16 }
  0xad   :  { %1115 = vrot.lane.b32.xlu0 %v298_v5, %s9243_s23 }
  0xae   :  { %v1072_v18 = vpop.permute.xlu1 %1071  ;;  %v1285_v19 = vsel %vm1274_vm3, %v1228_v8, %v8488_v14  ;;  %v1286_v20 = vsel %vm1274_vm3, %v1229_v9, %v8489_v13  ;;  %v192_v8 = vld [vmem:[%s14142_s0 + $0x13a] sm:$0xff] }
  0xaf   :  { %v1070_v21 = vpop.permute.xlu0 %1069  ;;  %v1342_v22 = vsel %vm1331_vm4, %v1285_v19, %v8493_v10  ;;  %v1343_v25 = vsel %vm1331_vm4, %v1286_v20, %v8494_v16  ;;  %v8700_v16 = vpack.i.bf16 %v248_v4, %v247_v2  ;;  %v251_v4 = vld [vmem:[%s14142_s0 + $0x153] sm:$0xff] }
  0xb0   :  { %7265 = vmatprep.mubr.msk.f32.mxu0 %vm1470_vm1, %v1070_v21  ;;  %8671 = vrot.lane.b32.xlu1 %v8670_v15, %s9241_s15  ;;  %v1399_v23 = vsel %vm1388_vm5, %v1342_v22, %v1070_v21  ;;  %v1400_v36 = vsel %vm1388_vm5, %v1343_v25, %v1072_v18 }
  0xb1   :  { %8666 = vrot.lane.b32.xlu0 %v8665_v17, %s9244_s24  ;;  %1702 = vmatmul.mubr.f32.gmra.mxu0 %v1399_v23 }
  0xb2   :  { %7266 = vmatprep.mubr.msk.f32.mxu0 %vm1470_vm1, %v1072_v18  ;;  %v8502_v28 = vpop.permute.xlu1 %8501  ;;  %v8695_v18 = vpack.i.bf16 %v192_v8, %v191_v7  ;;  %v306_v7 = vld [vmem:[%s14142_s0 + $0x14c] sm:$0xff] }
  0xb3   :  { %v8497_v32 = vpop.permute.xlu0 %8496  ;;  %v8503_v38 = vunpack.i.l.bf16 %v8502_v28  ;;  %v8504_v45 = vunpack.i.h.bf16 %v8502_v28  ;;  %v194_v28 = vld [vmem:[%s14142_s0 + $0x14a] sm:$0xff]  ;;  %v195_v8 = vld [vmem:[%s14142_s0 + $0x152] sm:$0xff] }
  0xb4   :  { %v8499_v34 = vunpack.i.h.bf16 %v8497_v32  ;;  %v8498_v35 = vunpack.i.l.bf16 %v8497_v32  ;;  %1119 = vrot.lane.b32.xlu1 %v300_v24, %s9243_s23  ;;  %v138_v32 = vld [vmem:[%s14142_s0 + $0x149] sm:$0xff] }
  0xb5   :  { %1117 = vrot.lane.b32.xlu0 %v299_v29, %s9243_s23  ;;  %1707 = vmatmul.mubr.f32.gmra.mxu0 %v1400_v36 }
  0xb6   :  { %v1230_v41 = vsel %vm1217_vm2, %v53_v33, %v8498_v35  ;;  %v1074_v42 = vpop.permute.xlu1 %1073  ;;  %v1231_v47 = vsel %vm1217_vm2, %v54_v39, %v8499_v34  ;;  %v57_v34 = vld [vmem:[%s14142_s0 + $0x80] sm:$0xff] }
  0xb7   :  { %v8507_v46 = vpop.permute.xlu0 %8506  ;;  %7267 = vmatprep.mubr.msk.f32.mxu0 %vm1470_vm1, %v1074_v42  ;;  %v1287_v50 = vsel %vm1274_vm3, %v1230_v41, %v8503_v38  ;;  %v1288_v61 = vsel %vm1274_vm3, %v1231_v47, %v8504_v45  ;;  %v8710_v38 = vpack.i.bf16 %v194_v28, %v193_v27  ;;  %v8705_v41 = vpack.i.bf16 %v138_v32, %v137_v31  ;;  %v250_v45 = vld [vmem:[%s14142_s0 + $0x14b] sm:$0xff]  ;;  %v308_v27 = vld [vmem:[%s14142_s0 + $0x15c] sm:$0xff]  ;;  %v307_v31 = vld [vmem:[%s14142_s0 + $0x154] sm:$0xff] }
  0xb8   :  { %v8509_v48 = vunpack.i.h.bf16 %v8507_v46  ;;  %v8508_v49 = vunpack.i.l.bf16 %v8507_v46  ;;  %8681 = vrot.lane.b32.xlu1 %v8680_v37, %s9244_s24  ;;  %v197_v28 = vld [vmem:[%s14142_s0 + $0x162] sm:$0xff] }
  0xb9   :  { %8676 = vrot.lane.b32.xlu0 %v8675_v40, %s9242_s16  ;;  %v58_v40 = vld [vmem:[%s14142_s0 + $0x88] sm:$0xff] }
  0xba   :  { %v8512_v55 = vpop.permute.xlu1 %8511  ;;  %v1344_v56 = vsel %vm1331_vm4, %v1287_v50, %v8508_v49  ;;  %v1345_v0 = vsel %vm1331_vm4, %v1288_v61, %v8509_v48  ;;  %v141_v32 = vld [vmem:[%s14142_s0 + $0x161] sm:$0xff] }
  0xbb   :  { %v8514_v57 = vunpack.i.h.bf16 %v8512_v55  ;;  %v8513_v58 = vunpack.i.l.bf16 %v8512_v55  ;;  %v1076_v59 = vpop.permute.xlu0 %1075  ;;  %v1401_v60 = vsel %vm1388_vm5, %v1344_v56, %v1074_v42  ;;  %v140_v55 = vld [vmem:[%s14142_s0 + $0x159] sm:$0xff] }
  0xbc   :  { %1712 = vmatmul.mubr.f32.gmra.mxu0 %v1401_v60  ;;  %1121 = vrot.lane.b32.xlu1 %v301_v52, %s9243_s23  ;;  %v1402_v13 = vsel %vm1388_vm5, %v1345_v0, %v1076_v59  ;;  %v8715_v52 = vpack.i.bf16 %v250_v45, %v249_v44  ;;  %v60_v0 = vld [vmem:[%s14142_s0 + $0x98] sm:$0xff]  ;;  %v8720_v2 = vpack.i.bf16 %v140_v55, %v139_v54  ;;  %v253_v45 = vld [vmem:[%s14142_s0 + $0x163] sm:$0xff] }
  0xbd   :  { %8686 = vrot.lane.b32.xlu0 %v8685_v51, %s9241_s15  ;;  %7268 = vmatprep.mubr.msk.f32.mxu0 %vm1470_vm1, %v1076_v59  ;;  %v1232_v9 = vsel %vm1217_vm2, %v55_v62, %v8513_v58  ;;  %v1233_v10 = vsel %vm1217_vm2, %v56_v63, %v8514_v57  ;;  %v59_v63 = vld [vmem:[%s14142_s0 + $0x90] sm:$0xff]  ;;  %v309_v54 = vld [vmem:[%s14142_s0 + $0x164] sm:$0xff] }
  0xbe   :  { %v8522_v5 = vpop.permute.xlu1 %8521  ;;  %v143_v55 = vld [vmem:[%s14142_s0 + $0x171] sm:$0xff] }
  0xbf   :  { %v8523_v11 = vunpack.i.l.bf16 %v8522_v5  ;;  %v8517_v12 = vpop.permute.xlu0 %8516  ;;  %v8524_v17 = vunpack.i.h.bf16 %v8522_v5  ;;  %v252_v5 = vld [vmem:[%s14142_s0 + $0x15b] sm:$0xff] }
  0xc0   :  { %v8519_v14 = vunpack.i.h.bf16 %v8517_v12  ;;  %v8518_v15 = vunpack.i.l.bf16 %v8517_v12  ;;  %1717 = vmatmul.mubr.f32.gmra.mxu0 %v1402_v13  ;;  %8691 = vrot.lane.b32.xlu1 %v8690_v1, %s9242_s16 }
  0xc1   :  { %1123 = vrot.lane.b32.xlu0 %v302_v6, %s9243_s23 }
  0xc2   :  { %v1080_v19 = vpop.permute.xlu1 %1079  ;;  %v1289_v20 = vsel %vm1274_vm3, %v1232_v9, %v8518_v15  ;;  %v1290_v21 = vsel %vm1274_vm3, %v1233_v10, %v8519_v14  ;;  %v196_v9 = vld [vmem:[%s14142_s0 + $0x15a] sm:$0xff] }
  0xc3   :  { %v1078_v22 = vpop.permute.xlu0 %1077  ;;  %v1346_v23 = vsel %vm1331_vm4, %v1289_v20, %v8523_v11  ;;  %v1347_v25 = vsel %vm1331_vm4, %v1290_v21, %v8524_v17  ;;  %v8730_v17 = vpack.i.bf16 %v252_v5, %v251_v4  ;;  %v255_v5 = vld [vmem:[%s14142_s0 + $0x173] sm:$0xff] }
  0xc4   :  { %7269 = vmatprep.mubr.msk.f32.mxu0 %vm1470_vm1, %v1078_v22  ;;  %v1403_v24 = vsel %vm1388_vm5, %v1346_v23, %v1078_v22  ;;  %8701 = vrot.lane.b32.xlu1 %v8700_v16, %s9241_s15  ;;  %v1404_v37 = vsel %vm1388_vm5, %v1347_v25, %v1080_v19 }
  0xc5   :  { %8696 = vrot.lane.b32.xlu0 %v8695_v18, %s9244_s24  ;;  %1722 = vmatmul.mubr.f32.gmra.mxu0 %v1403_v24 }
  0xc6   :  { %7270 = vmatprep.mubr.msk.f32.mxu0 %vm1470_vm1, %v1080_v19  ;;  %v8532_v29 = vpop.permute.xlu1 %8531  ;;  %v8725_v19 = vpack.i.bf16 %v196_v9, %v195_v8  ;;  %v310_v8 = vld [vmem:[%s14142_s0 + $0x16c] sm:$0xff] }
  0xc7   :  { %v8527_v33 = vpop.permute.xlu0 %8526  ;;  %v8533_v39 = vunpack.i.l.bf16 %v8532_v29  ;;  %v8534_v46 = vunpack.i.h.bf16 %v8532_v29  ;;  %v198_v29 = vld [vmem:[%s14142_s0 + $0x16a] sm:$0xff]  ;;  %v199_v9 = vld [vmem:[%s14142_s0 + $0x172] sm:$0xff] }
  0xc8   :  { %v8529_v35 = vunpack.i.h.bf16 %v8527_v33  ;;  %v8528_v36 = vunpack.i.l.bf16 %v8527_v33  ;;  %1127 = vrot.lane.b32.xlu1 %v304_v26, %s9243_s23  ;;  %v142_v33 = vld [vmem:[%s14142_s0 + $0x169] sm:$0xff] }
  0xc9   :  { %1125 = vrot.lane.b32.xlu0 %v303_v30, %s9243_s23  ;;  %1727 = vmatmul.mubr.f32.gmra.mxu0 %v1404_v37 }
  0xca   :  { %v1234_v42 = vsel %vm1217_vm2, %v57_v34, %v8528_v36  ;;  %v1082_v43 = vpop.permute.xlu1 %1081  ;;  %v1235_v48 = vsel %vm1217_vm2, %v58_v40, %v8529_v35  ;;  %v61_v35 = vld [vmem:[%s14142_s0 + $0xa0] sm:$0xff] }
  0xcb   :  { %v8537_v47 = vpop.permute.xlu0 %8536  ;;  %7271 = vmatprep.mubr.msk.f32.mxu0 %vm1470_vm1, %v1082_v43  ;;  %v1291_v51 = vsel %vm1274_vm3, %v1234_v42, %v8533_v39  ;;  %v1292_v62 = vsel %vm1274_vm3, %v1235_v48, %v8534_v46  ;;  %v8740_v39 = vpack.i.bf16 %v198_v29, %v197_v28  ;;  %v8735_v42 = vpack.i.bf16 %v142_v33, %v141_v32  ;;  %v254_v46 = vld [vmem:[%s14142_s0 + $0x16b] sm:$0xff]  ;;  %v312_v28 = vld [vmem:[%s14142_s0 + $0x17c] sm:$0xff]  ;;  %v311_v32 = vld [vmem:[%s14142_s0 + $0x174] sm:$0xff] }
  0xcc   :  { %v8539_v49 = vunpack.i.h.bf16 %v8537_v47  ;;  %v8538_v50 = vunpack.i.l.bf16 %v8537_v47  ;;  %8711 = vrot.lane.b32.xlu1 %v8710_v38, %s9244_s24  ;;  %v201_v29 = vld [vmem:[%s14142_s0 + $0x182] sm:$0xff] }
  0xcd   :  { %8706 = vrot.lane.b32.xlu0 %v8705_v41, %s9242_s16  ;;  %v62_v41 = vld [vmem:[%s14142_s0 + $0xa8] sm:$0xff] }
  0xce   :  { %v8542_v56 = vpop.permute.xlu1 %8541  ;;  %v1348_v57 = vsel %vm1331_vm4, %v1291_v51, %v8538_v50  ;;  %v1349_v1 = vsel %vm1331_vm4, %v1292_v62, %v8539_v49  ;;  %v145_v33 = vld [vmem:[%s14142_s0 + $0x181] sm:$0xff] }
  0xcf   :  { %v8544_v58 = vunpack.i.h.bf16 %v8542_v56  ;;  %v8543_v59 = vunpack.i.l.bf16 %v8542_v56  ;;  %v1084_v60 = vpop.permute.xlu0 %1083  ;;  %v1405_v61 = vsel %vm1388_vm5, %v1348_v57, %v1082_v43  ;;  %v144_v56 = vld [vmem:[%s14142_s0 + $0x179] sm:$0xff] }
  0xd0   :  { %1732 = vmatmul.mubr.f32.gmra.mxu0 %v1405_v61  ;;  %1129 = vrot.lane.b32.xlu1 %v305_v53, %s9243_s23  ;;  %v1406_v14 = vsel %vm1388_vm5, %v1349_v1, %v1084_v60  ;;  %v8745_v53 = vpack.i.bf16 %v254_v46, %v253_v45  ;;  %v64_v1 = vld [vmem:[%s14142_s0 + $0xb8] sm:$0xff]  ;;  %v8750_v4 = vpack.i.bf16 %v144_v56, %v143_v55  ;;  %v257_v46 = vld [vmem:[%s14142_s0 + $0x183] sm:$0xff] }
  0xd1   :  { %8716 = vrot.lane.b32.xlu0 %v8715_v52, %s9241_s15  ;;  %7272 = vmatprep.mubr.msk.f32.mxu0 %vm1470_vm1, %v1084_v60  ;;  %v1236_v10 = vsel %vm1217_vm2, %v59_v63, %v8543_v59  ;;  %v1237_v11 = vsel %vm1217_vm2, %v60_v0, %v8544_v58  ;;  %v63_v0 = vld [vmem:[%s14142_s0 + $0xb0] sm:$0xff]  ;;  %v313_v55 = vld [vmem:[%s14142_s0 + $0x184] sm:$0xff] }
  0xd2   :  { %v8552_v6 = vpop.permute.xlu1 %8551  ;;  %v147_v56 = vld [vmem:[%s14142_s0 + $0x191] sm:$0xff] }
  0xd3   :  { %v8553_v12 = vunpack.i.l.bf16 %v8552_v6  ;;  %v8547_v13 = vpop.permute.xlu0 %8546  ;;  %v8554_v18 = vunpack.i.h.bf16 %v8552_v6  ;;  %v256_v6 = vld [vmem:[%s14142_s0 + $0x17b] sm:$0xff] }
  0xd4   :  { %v8549_v15 = vunpack.i.h.bf16 %v8547_v13  ;;  %v8548_v16 = vunpack.i.l.bf16 %v8547_v13  ;;  %1737 = vmatmul.mubr.f32.gmra.mxu0 %v1406_v14  ;;  %8721 = vrot.lane.b32.xlu1 %v8720_v2, %s9242_s16 }
  0xd5   :  { %1131 = vrot.lane.b32.xlu0 %v306_v7, %s9243_s23 }
  0xd6   :  { %v1088_v20 = vpop.permute.xlu1 %1087  ;;  %v1293_v21 = vsel %vm1274_vm3, %v1236_v10, %v8548_v16  ;;  %v1294_v22 = vsel %vm1274_vm3, %v1237_v11, %v8549_v15  ;;  %v200_v10 = vld [vmem:[%s14142_s0 + $0x17a] sm:$0xff] }
  0xd7   :  { %v1086_v23 = vpop.permute.xlu0 %1085  ;;  %v1350_v24 = vsel %vm1331_vm4, %v1293_v21, %v8553_v12  ;;  %v1351_v26 = vsel %vm1331_vm4, %v1294_v22, %v8554_v18  ;;  %v8760_v18 = vpack.i.bf16 %v256_v6, %v255_v5  ;;  %v259_v6 = vld [vmem:[%s14142_s0 + $0x193] sm:$0xff] }
  0xd8   :  { %7273 = vmatprep.mubr.msk.f32.mxu0 %vm1470_vm1, %v1086_v23  ;;  %v1407_v25 = vsel %vm1388_vm5, %v1350_v24, %v1086_v23  ;;  %8731 = vrot.lane.b32.xlu1 %v8730_v17, %s9241_s15  ;;  %v1408_v38 = vsel %vm1388_vm5, %v1351_v26, %v1088_v20 }
  0xd9   :  { %8726 = vrot.lane.b32.xlu0 %v8725_v19, %s9244_s24  ;;  %1742 = vmatmul.mubr.f32.gmra.mxu0 %v1407_v25 }
  0xda   :  { %7274 = vmatprep.mubr.msk.f32.mxu0 %vm1470_vm1, %v1088_v20  ;;  %v8562_v30 = vpop.permute.xlu1 %8561  ;;  %v8755_v20 = vpack.i.bf16 %v200_v10, %v199_v9  ;;  %v314_v9 = vld [vmem:[%s14142_s0 + $0x18c] sm:$0xff] }
  0xdb   :  { %v8557_v34 = vpop.permute.xlu0 %8556  ;;  %v8563_v40 = vunpack.i.l.bf16 %v8562_v30  ;;  %v8564_v47 = vunpack.i.h.bf16 %v8562_v30  ;;  %v202_v30 = vld [vmem:[%s14142_s0 + $0x18a] sm:$0xff]  ;;  %v203_v10 = vld [vmem:[%s14142_s0 + $0x192] sm:$0xff] }
  0xdc   :  { %v8559_v36 = vunpack.i.h.bf16 %v8557_v34  ;;  %v8558_v37 = vunpack.i.l.bf16 %v8557_v34  ;;  %1135 = vrot.lane.b32.xlu1 %v308_v27, %s9243_s23  ;;  %v146_v34 = vld [vmem:[%s14142_s0 + $0x189] sm:$0xff] }
  0xdd   :  { %1133 = vrot.lane.b32.xlu0 %v307_v31, %s9243_s23  ;;  %1747 = vmatmul.mubr.f32.gmra.mxu0 %v1408_v38 }
  0xde   :  { %v1238_v43 = vsel %vm1217_vm2, %v61_v35, %v8558_v37  ;;  %v1090_v44 = vpop.permute.xlu1 %1089  ;;  %v1239_v49 = vsel %vm1217_vm2, %v62_v41, %v8559_v36  ;;  %v65_v36 = vld [vmem:[%s14142_s0 + $0xc0] sm:$0xff] }
  0xdf   :  { %v8567_v48 = vpop.permute.xlu0 %8566  ;;  %7275 = vmatprep.mubr.msk.f32.mxu0 %vm1470_vm1, %v1090_v44  ;;  %v1295_v52 = vsel %vm1274_vm3, %v1238_v43, %v8563_v40  ;;  %v1296_v63 = vsel %vm1274_vm3, %v1239_v49, %v8564_v47  ;;  %v8770_v40 = vpack.i.bf16 %v202_v30, %v201_v29  ;;  %v8765_v43 = vpack.i.bf16 %v146_v34, %v145_v33  ;;  %v258_v47 = vld [vmem:[%s14142_s0 + $0x18b] sm:$0xff]  ;;  %v316_v29 = vld [vmem:[%s14142_s0 + $0x19c] sm:$0xff]  ;;  %v315_v33 = vld [vmem:[%s14142_s0 + $0x194] sm:$0xff] }
  0xe0   :  { %v8569_v50 = vunpack.i.h.bf16 %v8567_v48  ;;  %v8568_v51 = vunpack.i.l.bf16 %v8567_v48  ;;  %8741 = vrot.lane.b32.xlu1 %v8740_v39, %s9244_s24  ;;  %v205_v30 = vld [vmem:[%s14142_s0 + $0x1a2] sm:$0xff] }
  0xe1   :  { %8736 = vrot.lane.b32.xlu0 %v8735_v42, %s9242_s16  ;;  %v66_v42 = vld [vmem:[%s14142_s0 + $0xc8] sm:$0xff] }
  0xe2   :  { %v8572_v57 = vpop.permute.xlu1 %8571  ;;  %v1352_v58 = vsel %vm1331_vm4, %v1295_v52, %v8568_v51  ;;  %v1353_v2 = vsel %vm1331_vm4, %v1296_v63, %v8569_v50  ;;  %v149_v34 = vld [vmem:[%s14142_s0 + $0x1a1] sm:$0xff] }
  0xe3   :  { %v8574_v59 = vunpack.i.h.bf16 %v8572_v57  ;;  %v8573_v60 = vunpack.i.l.bf16 %v8572_v57  ;;  %v1092_v61 = vpop.permute.xlu0 %1091  ;;  %v1409_v62 = vsel %vm1388_vm5, %v1352_v58, %v1090_v44  ;;  %v148_v57 = vld [vmem:[%s14142_s0 + $0x199] sm:$0xff] }
  0xe4   :  { %1752 = vmatmul.mubr.f32.gmra.mxu0 %v1409_v62  ;;  %1137 = vrot.lane.b32.xlu1 %v309_v54, %s9243_s23  ;;  %v1410_v15 = vsel %vm1388_vm5, %v1353_v2, %v1092_v61  ;;  %v8775_v54 = vpack.i.bf16 %v258_v47, %v257_v46  ;;  %v68_v2 = vld [vmem:[%s14142_s0 + $0xd8] sm:$0xff]  ;;  %v8780_v5 = vpack.i.bf16 %v148_v57, %v147_v56  ;;  %v261_v47 = vld [vmem:[%s14142_s0 + $0x1a3] sm:$0xff] }
  0xe5   :  { %8746 = vrot.lane.b32.xlu0 %v8745_v53, %s9241_s15  ;;  %7276 = vmatprep.mubr.msk.f32.mxu0 %vm1470_vm1, %v1092_v61  ;;  %v1240_v11 = vsel %vm1217_vm2, %v63_v0, %v8573_v60  ;;  %v1241_v12 = vsel %vm1217_vm2, %v64_v1, %v8574_v59  ;;  %v67_v1 = vld [vmem:[%s14142_s0 + $0xd0] sm:$0xff]  ;;  %v317_v56 = vld [vmem:[%s14142_s0 + $0x1a4] sm:$0xff] }
  0xe6   :  { %v8582_v7 = vpop.permute.xlu1 %8581  ;;  %v151_v57 = vld [vmem:[%s14142_s0 + $0x1b1] sm:$0xff] }
  0xe7   :  { %v8583_v13 = vunpack.i.l.bf16 %v8582_v7  ;;  %v8577_v14 = vpop.permute.xlu0 %8576  ;;  %v8584_v19 = vunpack.i.h.bf16 %v8582_v7  ;;  %v260_v7 = vld [vmem:[%s14142_s0 + $0x19b] sm:$0xff] }
  0xe8   :  { %v8579_v16 = vunpack.i.h.bf16 %v8577_v14  ;;  %v8578_v17 = vunpack.i.l.bf16 %v8577_v14  ;;  %1757 = vmatmul.mubr.f32.gmra.mxu0 %v1410_v15  ;;  %8751 = vrot.lane.b32.xlu1 %v8750_v4, %s9242_s16 }
  0xe9   :  { %1139 = vrot.lane.b32.xlu0 %v310_v8, %s9243_s23 }
  0xea   :  { %v1096_v21 = vpop.permute.xlu1 %1095  ;;  %v1297_v22 = vsel %vm1274_vm3, %v1240_v11, %v8578_v17  ;;  %v1298_v23 = vsel %vm1274_vm3, %v1241_v12, %v8579_v16  ;;  %v204_v11 = vld [vmem:[%s14142_s0 + $0x19a] sm:$0xff] }
  0xeb   :  { %v1094_v24 = vpop.permute.xlu0 %1093  ;;  %v1354_v25 = vsel %vm1331_vm4, %v1297_v22, %v8583_v13  ;;  %v1355_v27 = vsel %vm1331_vm4, %v1298_v23, %v8584_v19  ;;  %v8790_v19 = vpack.i.bf16 %v260_v7, %v259_v6  ;;  %v263_v7 = vld [vmem:[%s14142_s0 + $0x1b3] sm:$0xff] }
  0xec   :  { %7277 = vmatprep.mubr.msk.f32.mxu0 %vm1470_vm1, %v1094_v24  ;;  %v1411_v26 = vsel %vm1388_vm5, %v1354_v25, %v1094_v24  ;;  %8761 = vrot.lane.b32.xlu1 %v8760_v18, %s9241_s15  ;;  %v1412_v39 = vsel %vm1388_vm5, %v1355_v27, %v1096_v21 }
  0xed   :  { %8756 = vrot.lane.b32.xlu0 %v8755_v20, %s9244_s24  ;;  %1762 = vmatmul.mubr.f32.gmra.mxu0 %v1411_v26 }
  0xee   :  { %7278 = vmatprep.mubr.msk.f32.mxu0 %vm1470_vm1, %v1096_v21  ;;  %v8592_v31 = vpop.permute.xlu1 %8591  ;;  %v8785_v21 = vpack.i.bf16 %v204_v11, %v203_v10  ;;  %v318_v10 = vld [vmem:[%s14142_s0 + $0x1ac] sm:$0xff] }
  0xef   :  { %v8587_v35 = vpop.permute.xlu0 %8586  ;;  %v8593_v41 = vunpack.i.l.bf16 %v8592_v31  ;;  %v8594_v48 = vunpack.i.h.bf16 %v8592_v31  ;;  %v206_v31 = vld [vmem:[%s14142_s0 + $0x1aa] sm:$0xff]  ;;  %v207_v11 = vld [vmem:[%s14142_s0 + $0x1b2] sm:$0xff] }
  0xf0   :  { %v8589_v37 = vunpack.i.h.bf16 %v8587_v35  ;;  %v8588_v38 = vunpack.i.l.bf16 %v8587_v35  ;;  %1143 = vrot.lane.b32.xlu1 %v312_v28, %s9243_s23  ;;  %v150_v35 = vld [vmem:[%s14142_s0 + $0x1a9] sm:$0xff] }
  0xf1   :  { %1141 = vrot.lane.b32.xlu0 %v311_v32, %s9243_s23  ;;  %1767 = vmatmul.mubr.f32.gmra.mxu0 %v1412_v39 }
  0xf2   :  { %v1242_v44 = vsel %vm1217_vm2, %v65_v36, %v8588_v38  ;;  %v1098_v45 = vpop.permute.xlu1 %1097  ;;  %v1243_v50 = vsel %vm1217_vm2, %v66_v42, %v8589_v37  ;;  %v69_v37 = vld [vmem:[%s14142_s0 + $0xe0] sm:$0xff] }
  0xf3   :  { %v8597_v49 = vpop.permute.xlu0 %8596  ;;  %7279 = vmatprep.mubr.msk.f32.mxu0 %vm1470_vm1, %v1098_v45  ;;  %v1299_v53 = vsel %vm1274_vm3, %v1242_v44, %v8593_v41  ;;  %v1300_v0 = vsel %vm1274_vm3, %v1243_v50, %v8594_v48  ;;  %v8800_v41 = vpack.i.bf16 %v206_v31, %v205_v30  ;;  %v8795_v44 = vpack.i.bf16 %v150_v35, %v149_v34  ;;  %v262_v48 = vld [vmem:[%s14142_s0 + $0x1ab] sm:$0xff]  ;;  %v320_v30 = vld [vmem:[%s14142_s0 + $0x1bc] sm:$0xf]  ;;  %v73_v34 = vld [vmem:[%s14142_s0 + $0x100] sm:$0xff] }
  0xf4   :  { %v8599_v51 = vunpack.i.h.bf16 %v8597_v49  ;;  %v8598_v52 = vunpack.i.l.bf16 %v8597_v49  ;;  %8771 = vrot.lane.b32.xlu1 %v8770_v40, %s9244_s24 }
  0xf5   :  { %8766 = vrot.lane.b32.xlu0 %v8765_v43, %s9242_s16  ;;  %v70_v43 = vld [vmem:[%s14142_s0 + $0xe8] sm:$0xff] }
  0xf6   :  { %v8602_v58 = vpop.permute.xlu1 %8601  ;;  %v1356_v59 = vsel %vm1331_vm4, %v1299_v53, %v8598_v52  ;;  %v1357_v4 = vsel %vm1331_vm4, %v1300_v0, %v8599_v51 }
  0xf7   :  { %v8604_v60 = vunpack.i.h.bf16 %v8602_v58  ;;  %v8603_v61 = vunpack.i.l.bf16 %v8602_v58  ;;  %v1100_v62 = vpop.permute.xlu0 %1099  ;;  %v1413_v63 = vsel %vm1388_vm5, %v1356_v59, %v1098_v45  ;;  %v152_v58 = vld [vmem:[%s14142_s0 + $0x1b9] sm:$0xf] }
  0xf8   :  { %1772 = vmatmul.mubr.f32.gmra.mxu0 %v1413_v63  ;;  %1145 = vrot.lane.b32.xlu1 %v313_v55, %s9243_s23  ;;  %v1414_v16 = vsel %vm1388_vm5, %v1357_v4, %v1100_v62  ;;  %v8805_v55 = vpack.i.bf16 %v262_v48, %v261_v47  ;;  %v72_v4 = vld [vmem:[%s14142_s0 + $0xf8] sm:$0xff]  ;;  %v8810_v6 = vpack.i.bf16 %v152_v58, %v151_v57 }
  0xf9   :  { %8776 = vrot.lane.b32.xlu0 %v8775_v54, %s9241_s15  ;;  %7280 = vmatprep.mubr.msk.f32.mxu0 %vm1470_vm1, %v1100_v62  ;;  %v1244_v12 = vsel %vm1217_vm2, %v67_v1, %v8603_v61  ;;  %v1245_v13 = vsel %vm1217_vm2, %v68_v2, %v8604_v60  ;;  %v71_v2 = vld [vmem:[%s14142_s0 + $0xf0] sm:$0xff] }
  0xfa   :  { %v8612_v8 = vpop.permute.xlu1 %8611 }
  0xfb   :  { %v8613_v14 = vunpack.i.l.bf16 %v8612_v8  ;;  %v8607_v15 = vpop.permute.xlu0 %8606  ;;  %v8614_v20 = vunpack.i.h.bf16 %v8612_v8  ;;  %v264_v8 = vld [vmem:[%s14142_s0 + $0x1bb] sm:$0xf] }
  0xfc   :  { %v8609_v17 = vunpack.i.h.bf16 %v8607_v15  ;;  %v8608_v18 = vunpack.i.l.bf16 %v8607_v15  ;;  %1777 = vmatmul.mubr.f32.gmra.mxu0 %v1414_v16  ;;  %8781 = vrot.lane.b32.xlu1 %v8780_v5, %s9242_s16 }
  0xfd   :  { %1147 = vrot.lane.b32.xlu0 %v314_v9, %s9243_s23 }
  0xfe   :  { %v1104_v22 = vpop.permute.xlu1 %1103  ;;  %v1301_v23 = vsel %vm1274_vm3, %v1244_v12, %v8608_v18  ;;  %v1302_v24 = vsel %vm1274_vm3, %v1245_v13, %v8609_v17  ;;  %v208_v12 = vld [vmem:[%s14142_s0 + $0x1ba] sm:$0xf] }
  0xff   :  { %v1102_v25 = vpop.permute.xlu0 %1101  ;;  %v1358_v26 = vsel %vm1331_vm4, %v1301_v23, %v8613_v14  ;;  %v1359_v28 = vsel %vm1331_vm4, %v1302_v24, %v8614_v20  ;;  %v8820_v20 = vpack.i.bf16 %v264_v8, %v263_v7 }
 0x100   :  { %7281 = vmatprep.mubr.msk.f32.mxu0 %vm1470_vm1, %v1102_v25  ;;  %v1415_v27 = vsel %vm1388_vm5, %v1358_v26, %v1102_v25  ;;  %8791 = vrot.lane.b32.xlu1 %v8790_v19, %s9241_s15  ;;  %v1416_v40 = vsel %vm1388_vm5, %v1359_v28, %v1104_v22 }
 0x101   :  { %8786 = vrot.lane.b32.xlu0 %v8785_v21, %s9244_s24  ;;  %1782 = vmatmul.mubr.f32.gmra.mxu0 %v1415_v27 }
 0x102   :  { %7282 = vmatprep.mubr.msk.f32.mxu0 %vm1470_vm1, %v1104_v22  ;;  %v8622_v32 = vpop.permute.xlu1 %8621  ;;  %v8815_v22 = vpack.i.bf16 %v208_v12, %v207_v11  ;;  %v2562_v12 = vld [vmem:[%s14144_s5 + $0x70] sm:$0x7f] }
 0x103   :  { %v8617_v36 = vpop.permute.xlu0 %8616  ;;  %v8623_v42 = vunpack.i.l.bf16 %v8622_v32  ;;  %v8624_v49 = vunpack.i.h.bf16 %v8622_v32  ;;  %v319_v32 = vld [vmem:[%s14142_s0 + $0x1b4] sm:$0xff]  ;;  %7888 = vmatprep.subr.msk.mxu1 %vm2044_vm6, %v2562_v12 }
 0x104   :  { %v8619_v38 = vunpack.i.h.bf16 %v8617_v36  ;;  %v8618_v39 = vunpack.i.l.bf16 %v8617_v36  ;;  %1151 = vrot.lane.b32.xlu1 %v316_v29, %s9243_s23  ;;  %7889 = vmatpush3.msk.msra.mxu1 %vm2044_vm6, %v2562_v12 }
 0x105   :  { %1149 = vrot.lane.b32.xlu0 %v315_v33, %s9243_s23  ;;  %1787 = vmatmul.mubr.f32.gmra.mxu0 %v1416_v40 }
 0x106   :  { %v1246_v45 = vsel %vm1217_vm2, %v69_v37, %v8618_v39  ;;  %v1106_v46 = vpop.permute.xlu1 %1105  ;;  %v1247_v51 = vsel %vm1217_vm2, %v70_v43, %v8619_v38  ;;  %v74_v39 = vld [vmem:[%s14142_s0 + $0x108] sm:$0xff] }
 0x107   :  { %v8627_v50 = vpop.permute.xlu0 %8626  ;;  %7283 = vmatprep.mubr.msk.f32.mxu0 %vm1470_vm1, %v1106_v46  ;;  %v1303_v54 = vsel %vm1274_vm3, %v1246_v45, %v8623_v42  ;;  %v1304_v1 = vsel %vm1274_vm3, %v1247_v51, %v8624_v49 }
 0x108   :  { %v8629_v52 = vunpack.i.h.bf16 %v8627_v50  ;;  %v8628_v53 = vunpack.i.l.bf16 %v8627_v50  ;;  %8801 = vrot.lane.b32.xlu1 %v8800_v41, %s9244_s24 }
 0x109   :  { %8796 = vrot.lane.b32.xlu0 %v8795_v44, %s9242_s16 }
 0x10a   :  { %v8632_v59 = vpop.permute.xlu1 %8631  ;;  %v1360_v60 = vsel %vm1331_vm4, %v1303_v54, %v8628_v53  ;;  %v1361_v5 = vsel %vm1331_vm4, %v1304_v1, %v8629_v52 }
 0x10b   :  { %v8634_v61 = vunpack.i.h.bf16 %v8632_v59  ;;  %v8633_v62 = vunpack.i.l.bf16 %v8632_v59  ;;  %v1108_v63 = vpop.permute.xlu0 %1107  ;;  %v1417_v0 = vsel %vm1388_vm5, %v1360_v60, %v1106_v46 }
 0x10c   :  { %1792 = vmatmul.mubr.f32.gmra.mxu0 %v1417_v0  ;;  %1153 = vrot.lane.b32.xlu1 %v317_v56, %s9243_s23  ;;  %v1418_v17 = vsel %vm1388_vm5, %v1361_v5, %v1108_v63  ;;  %v76_v56 = vld [vmem:[%s14142_s0 + $0x118] sm:$0xff] }
 0x10d   :  { %8806 = vrot.lane.b32.xlu0 %v8805_v55, %s9241_s15  ;;  %7284 = vmatprep.mubr.msk.f32.mxu0 %vm1470_vm1, %v1108_v63  ;;  %v1248_v13 = vsel %vm1217_vm2, %v71_v2, %v8633_v62  ;;  %v1249_v14 = vsel %vm1217_vm2, %v72_v4, %v8634_v61  ;;  %v75_v55 = vld [vmem:[%s14142_s0 + $0x110] sm:$0xff] }
 0x10e   :  { %v8642_v9 = vpop.permute.xlu1 %8641 }
 0x10f   :  { %v8643_v15 = vunpack.i.l.bf16 %v8642_v9  ;;  %v8637_v16 = vpop.permute.xlu0 %8636  ;;  %v8644_v21 = vunpack.i.h.bf16 %v8642_v9 }
 0x110   :  { %v8639_v18 = vunpack.i.h.bf16 %v8637_v16  ;;  %v8638_v19 = vunpack.i.l.bf16 %v8637_v16  ;;  %1797 = vmatmul.mubr.f32.gmra.mxu0 %v1418_v17  ;;  %8811 = vrot.lane.b32.xlu1 %v8810_v6, %s9242_s16 }
 0x111   :  { %1155 = vrot.lane.b32.xlu0 %v318_v10, %s9243_s23 }
 0x112   :  { %v1112_v23 = vpop.permute.xlu1 %1111  ;;  %v1305_v24 = vsel %vm1274_vm3, %v1248_v13, %v8638_v19  ;;  %v1306_v25 = vsel %vm1274_vm3, %v1249_v14, %v8639_v18  ;;  %v77_v14 = vld [vmem:[%s14142_s0 + $0x120] sm:$0xff]  ;;  %v2561_v18 = vld [vmem:[%s14144_s5 + $0x68] sm:$0xff] }
 0x113   :  { %v1110_v26 = vpop.permute.xlu0 %1109  ;;  %v1362_v27 = vsel %vm1331_vm4, %v1305_v24, %v8643_v15  ;;  %v1363_v29 = vsel %vm1331_vm4, %v1306_v25, %v8644_v21  ;;  %v78_v19 = vld [vmem:[%s14142_s0 + $0x128] sm:$0xff]  ;;  %7890 = vmatprep.subr.mxu1 %v2561_v18 }
 0x114   :  { %7285 = vmatprep.mubr.msk.f32.mxu0 %vm1470_vm1, %v1110_v26  ;;  %v1419_v28 = vsel %vm1388_vm5, %v1362_v27, %v1110_v26  ;;  %8821 = vrot.lane.b32.xlu1 %v8820_v20, %s9241_s15  ;;  %v1420_v37 = vsel %vm1388_vm5, %v1363_v29, %v1112_v23  ;;  %v2559_v29 = vld [vmem:[%s14144_s5 + $0x58] sm:$0xff]  ;;  %s9247_s15 = smov 52  }
 0x115   :  { %8816 = vrot.lane.b32.xlu0 %v8815_v22, %s9244_s24  ;;  %1802 = vmatmul.mubr.f32.gmra.mxu0 %v1419_v28  ;;  %s9250_s24 = smov 40  }
 0x116   :  { %7286 = vmatprep.mubr.msk.f32.mxu0 %vm1470_vm1, %v1112_v23  ;;  %v8652_v31 = vpop.permute.xlu1 %8651  ;;  %7891 = vmatpush3.msra.mxu1 %v2561_v18  ;;  %v2560_v23 = vld [vmem:[%s14144_s5 + $0x60] sm:$0xff] }
 0x117   :  { %v8647_v33 = vpop.permute.xlu0 %8646  ;;  %v8653_v38 = vunpack.i.l.bf16 %v8652_v31  ;;  %v8654_v42 = vunpack.i.h.bf16 %v8652_v31  ;;  %7892 = vmatprep.subr.mxu1 %v2560_v23 }
 0x118   :  { %v8649_v35 = vunpack.i.h.bf16 %v8647_v33  ;;  %v8648_v36 = vunpack.i.l.bf16 %v8647_v33  ;;  %1159 = vrot.lane.b32.xlu1 %v320_v30, %s9243_s23  ;;  %7893 = vmatpush3.msra.mxu1 %v2560_v23  ;;  %v2558_v33 = vld [vmem:[%s14144_s5 + $0x50] sm:$0xff] }
 0x119   :  { %1157 = vrot.lane.b32.xlu0 %v319_v32, %s9243_s23  ;;  %1807 = vmatmul.mubr.f32.gmra.mxu0 %v1420_v37 }
 0x11a   :  { %v1250_v40 = vsel %vm1217_vm2, %v73_v34, %v8648_v36  ;;  %v1114_v41 = vpop.permute.xlu1 %1113  ;;  %v1251_v44 = vsel %vm1217_vm2, %v74_v39, %v8649_v35  ;;  %7894 = vmatprep.subr.mxu1 %v2559_v29  ;;  %v79_v39 = vld [vmem:[%s14142_s0 + $0x130] sm:$0xff] }
 0x11b   :  { %v8657_v43 = vpop.permute.xlu0 %8656  ;;  %7287 = vmatprep.mubr.msk.f32.mxu0 %vm1470_vm1, %v1114_v41  ;;  %v1307_v47 = vsel %vm1274_vm3, %v1250_v40, %v8653_v38  ;;  %v1308_v54 = vsel %vm1274_vm3, %v1251_v44, %v8654_v42  ;;  %7895 = vmatpush3.msra.mxu1 %v2559_v29  ;;  %v80_v40 = vld [vmem:[%s14142_s0 + $0x138] sm:$0xff]  ;;  %v2557_v42 = vld [vmem:[%s14144_s5 + $0x48] sm:$0xff]  ;;  %v2556_v44 = vld [vmem:[%s14144_s5 + $0x40] sm:$0xff] }
 0x11c   :  { %v8659_v45 = vunpack.i.h.bf16 %v8657_v43  ;;  %v8658_v46 = vunpack.i.l.bf16 %v8657_v43  ;;  %7896 = vmatprep.subr.mxu1 %v2558_v33  ;;  %v2548_v29 = vld [vmem:[%s14144_s5] sm:$0xff] }
 0x11d   :  { %7897 = vmatpush3.msra.mxu1 %v2558_v33 }
 0x11e   :  { %v8662_v48 = vpop.permute.xlu1 %8661  ;;  %v1364_v49 = vsel %vm1331_vm4, %v1307_v47, %v8658_v46  ;;  %v1365_v57 = vsel %vm1331_vm4, %v1308_v54, %v8659_v45  ;;  %7898 = vmatprep.subr.mxu1 %v2557_v42 }
 0x11f   :  { %v8664_v50 = vunpack.i.h.bf16 %v8662_v48  ;;  %v8663_v51 = vunpack.i.l.bf16 %v8662_v48  ;;  %v1116_v52 = vpop.permute.xlu0 %1115  ;;  %v1421_v53 = vsel %vm1388_vm5, %v1364_v49, %v1114_v41  ;;  %7899 = vmatpush3.msra.mxu1 %v2557_v42 }
 0x120   :  { %1812 = vmatmul.mubr.f32.gmra.mxu0 %v1421_v53  ;;  %v1422_v63 = vsel %vm1388_vm5, %v1365_v57, %v1116_v52  ;;  %7900 = vmatprep.subr.mxu1 %v2556_v44  ;;  %v2554_v57 = vld [vmem:[%s14144_s5 + $0x30] sm:$0xff] }
 0x121   :  { %7288 = vmatprep.mubr.msk.f32.mxu0 %vm1470_vm1, %v1116_v52  ;;  %v1252_v59 = vsel %vm1217_vm2, %v75_v55, %v8663_v51  ;;  %v1253_v60 = vsel %vm1217_vm2, %v76_v56, %v8664_v50  ;;  %7901 = vmatpush3.msra.mxu1 %v2556_v44  ;;  %v2555_v52 = vld [vmem:[%s14144_s5 + $0x38] sm:$0xff] }
 0x122   :  { %v8672_v58 = vpop.permute.xlu1 %8671  ;;  %7902 = vmatprep.subr.mxu1 %v2555_v52 }
 0x123   :  { %v8673_v61 = vunpack.i.l.bf16 %v8672_v58  ;;  %v8667_v62 = vpop.permute.xlu0 %8666  ;;  %v8674_v2 = vunpack.i.h.bf16 %v8672_v58  ;;  %7903 = vmatpush3.msra.mxu1 %v2555_v52 }
 0x124   :  { %v8669_v0 = vunpack.i.h.bf16 %v8667_v62  ;;  %v8668_v1 = vunpack.i.l.bf16 %v8667_v62  ;;  %1817 = vmatmul.mubr.f32.gmra.mxu0 %v1422_v63  ;;  %7904 = vmatprep.subr.mxu1 %v2554_v57 }
 0x125   :  { %7905 = vmatpush3.msra.mxu1 %v2554_v57 }
 0x126   :  { %v1120_v4 = vpop.permute.xlu1 %1119  ;;  %v1309_v5 = vsel %vm1274_vm3, %v1252_v59, %v8668_v1  ;;  %v1310_v6 = vsel %vm1274_vm3, %v1253_v60, %v8669_v0  ;;  %v2552_v0 = vld [vmem:[%s14144_s5 + $0x20] sm:$0xff] }
 0x127   :  { %v1118_v7 = vpop.permute.xlu0 %1117  ;;  %v1366_v8 = vsel %vm1331_vm4, %v1309_v5, %v8673_v61  ;;  %v1367_v10 = vsel %vm1331_vm4, %v1310_v6, %v8674_v2  ;;  %v2553_v61 = vld [vmem:[%s14144_s5 + $0x28] sm:$0xff]  ;;  %v81_v2 = vld [vmem:[%s14142_s0 + $0x140] sm:$0xff] }
 0x128   :  { %7289 = vmatprep.mubr.msk.f32.mxu0 %vm1470_vm1, %v1118_v7  ;;  %v1423_v9 = vsel %vm1388_vm5, %v1366_v8, %v1118_v7  ;;  %v1424_v17 = vsel %vm1388_vm5, %v1367_v10, %v1120_v4  ;;  %7906 = vmatprep.subr.mxu1 %v2553_v61  ;;  %v2551_v8 = vld [vmem:[%s14144_s5 + $0x18] sm:$0xff] }
 0x129   :  { %1822 = vmatmul.mubr.f32.gmra.mxu0 %v1423_v9  ;;  %7907 = vmatpush3.msra.mxu1 %v2553_v61  ;;  %v82_v9 = vld [vmem:[%s14142_s0 + $0x148] sm:$0xff] }
 0x12a   :  { %7290 = vmatprep.mubr.msk.f32.mxu0 %vm1470_vm1, %v1120_v4  ;;  %v8682_v11 = vpop.permute.xlu1 %8681  ;;  %v10563_v4 = vld [vmem:[%s14145_s2] ss:$0 sm:$0xff]  ;;  %7908 = vmatprep.subr.mxu1 %v2552_v0 }
 0x12b   :  { %v8677_v13 = vpop.permute.xlu0 %8676  ;;  %v8683_v20 = vunpack.i.l.bf16 %v8682_v11  ;;  %v8684_v24 = vunpack.i.h.bf16 %v8682_v11  ;;  %7909 = vmatpush3.msra.mxu1 %v2552_v0 }
 0x12c   :  { %v8679_v15 = vunpack.i.h.bf16 %v8677_v13  ;;  %v8678_v16 = vunpack.i.l.bf16 %v8677_v13  ;;  %7910 = vmatprep.subr.mxu1 %v2551_v8 }
 0x12d   :  { %1827 = vmatmul.mubr.f32.gmra.mxu0 %v1424_v17  ;;  %7911 = vmatpush3.msra.mxu1 %v2551_v8 }
 0x12e   :  { %v1254_v21 = vsel %vm1217_vm2, %v77_v14, %v8678_v16  ;;  %v1122_v22 = vpop.permute.xlu1 %1121  ;;  %v1255_v26 = vsel %vm1217_vm2, %v78_v19, %v8679_v15  ;;  %v2550_v15 = vld [vmem:[%s14144_s5 + $0x10] sm:$0xff] }
 0x12f   :  { %v8687_v25 = vpop.permute.xlu0 %8686  ;;  %7291 = vmatprep.mubr.msk.f32.mxu0 %vm1470_vm1, %v1122_v22  ;;  %v1311_v30 = vsel %vm1274_vm3, %v1254_v21, %v8683_v20  ;;  %v1312_v38 = vsel %vm1274_vm3, %v1255_v26, %v8684_v24  ;;  %7912 = vmatprep.subr.mxu1 %v2550_v15 }
 0x130   :  { %v8689_v27 = vunpack.i.h.bf16 %v8687_v25  ;;  %v8688_v28 = vunpack.i.l.bf16 %v8687_v25  ;;  %7913 = vmatpush3.msra.mxu1 %v2550_v15 }
 0x132   :  { %v8692_v31 = vpop.permute.xlu1 %8691  ;;  %v1368_v32 = vsel %vm1331_vm4, %v1311_v30, %v8688_v28  ;;  %v1369_v41 = vsel %vm1331_vm4, %v1312_v38, %v8689_v27  ;;  %v84_v38 = vld [vmem:[%s14142_s0 + $0x158] sm:$0xff] }
 0x133   :  { %v1124_v34 = vpop.permute.xlu0 %1123  ;;  %v8694_v35 = vunpack.i.h.bf16 %v8692_v31  ;;  %v8693_v36 = vunpack.i.l.bf16 %v8692_v31  ;;  %v1425_v37 = vsel %vm1388_vm5, %v1368_v32, %v1122_v22  ;;  %v2549_v22 = vld [vmem:[%s14144_s5 + $0x8] sm:$0xff]  ;;  %s9245_s5 = smov 127  }
 0x134   :  { %1832 = vmatmul.mubr.f32.gmra.mxu0 %v1425_v37  ;;  %v1426_v49 = vsel %vm1388_vm5, %v1369_v41, %v1124_v34  ;;  %7914 = vmatprep.subr.mxu1 %v2549_v22  ;;  %v83_v37 = vld [vmem:[%s14142_s0 + $0x150] sm:$0xff] }
 0x135   :  { %7292 = vmatprep.mubr.msk.f32.mxu0 %vm1470_vm1, %v1124_v34  ;;  %v1256_v45 = vsel %vm1217_vm2, %v79_v39, %v8693_v36  ;;  %v1257_v46 = vsel %vm1217_vm2, %v80_v40, %v8694_v35  ;;  %7915 = vmatpush3.msra.mxu1 %v2549_v22 }
 0x136   :  { %v8702_v43 = vpop.permute.xlu1 %8701  ;;  %7916 = vmatprep.subr.mxu1 %v2548_v29 }
 0x137   :  { %v8697_v47 = vpop.permute.xlu0 %8696  ;;  %v8703_v48 = vunpack.i.l.bf16 %v8702_v43  ;;  %v8704_v53 = vunpack.i.h.bf16 %v8702_v43  ;;  %7917 = vmatpush3.msra.mxu1 %v2548_v29 }
 0x138   :  { %v8699_v50 = vunpack.i.h.bf16 %v8697_v47  ;;  %v8698_v51 = vunpack.i.l.bf16 %v8697_v47  ;;  %1837 = vmatmul.mubr.f32.gmra.mxu0 %v1426_v49  ;;  %4509 = vmatprep.subr.mxu1 %v9240_v3 }
 0x13a   :  { %v1128_v54 = vpop.permute.xlu1 %1127  ;;  %v1313_v55 = vsel %vm1274_vm3, %v1256_v45, %v8698_v51  ;;  %v1314_v56 = vsel %vm1274_vm3, %v1257_v46, %v8699_v50 }
 0x13b   :  { %v1126_v58 = vpop.permute.xlu0 %1125  ;;  %v1370_v59 = vsel %vm1331_vm4, %v1313_v55, %v8703_v48  ;;  %v1371_v62 = vsel %vm1331_vm4, %v1314_v56, %v8704_v53 }
 0x13c   :  { %7293 = vmatprep.mubr.msk.f32.mxu0 %vm1470_vm1, %v1126_v58  ;;  %v1427_v60 = vsel %vm1388_vm5, %v1370_v59, %v1126_v58  ;;  %v1428_v7 = vsel %vm1388_vm5, %v1371_v62, %v1128_v54 }
 0x13d   :  { %1842 = vmatmul.mubr.f32.gmra.mxu0 %v1427_v60 }
 0x13e   :  { %v8712_v63 = vpop.permute.xlu1 %8711  ;;  %7294 = vmatprep.mubr.msk.f32.mxu0 %vm1470_vm1, %v1128_v54 }
 0x13f   :  { %v8707_v1 = vpop.permute.xlu0 %8706  ;;  %v8713_v10 = vunpack.i.l.bf16 %v8712_v63  ;;  %v8714_v16 = vunpack.i.h.bf16 %v8712_v63 }
 0x140   :  { %v8709_v5 = vunpack.i.h.bf16 %v8707_v1  ;;  %v8708_v6 = vunpack.i.l.bf16 %v8707_v1 }
 0x141   :  { %v1653_v11 = vpop.f32.mrf.mxu0  ;;  %1847 = vmatmul.mubr.f32.gmra.mxu0 %v1428_v7 }
 0x142   :  { %v1258_v12 = vsel %vm1217_vm2, %v81_v2, %v8708_v6  ;;  %v1654_v13 = vadd.f32 %v10563_v4, %v1653_v11  ;;  %v1130_v14 = vpop.permute.xlu1 %1129  ;;  %v1259_v19 = vsel %vm1217_vm2, %v82_v9, %v8709_v5 }
 0x143   :  { %v8717_v17 = vpop.permute.xlu0 %8716  ;;  %v1655_v18 = vpop.f32.mrf.mxu0  ;;  %7295 = vmatprep.mubr.msk.f32.mxu0 %vm1470_vm1, %v1130_v14  ;;  %v1315_v24 = vsel %vm1274_vm3, %v1258_v12, %v8713_v10  ;;  %v1316_v35 = vsel %vm1274_vm3, %v1259_v19, %v8714_v16  ;;  %v85_v12 = vld [vmem:[%s14142_s0 + $0x160] sm:$0xff] }
 0x144   :  { %v8719_v20 = vunpack.i.h.bf16 %v8717_v17  ;;  %v8718_v21 = vunpack.i.l.bf16 %v8717_v17  ;;  %v1932_v25 = vmax.f32 %v1654_v13, 0.0  ;;  %v86_v13 = vld [vmem:[%s14142_s0 + $0x168] sm:$0xff] }
 0x145   :  { %v1658_v23 = vpop.f32.mrf.mxu0 }
 0x146   :  { %v1659_v26 = vadd.f32 %v10563_v4, %v1658_v23  ;;  %v8722_v27 = vpop.permute.xlu1 %8721  ;;  %v1372_v28 = vsel %vm1331_vm4, %v1315_v24, %v8718_v21  ;;  %v1373_v39 = vsel %vm1331_vm4, %v1316_v35, %v8719_v20  ;;  %v2045_v41 = vrot.slane %v1932_v25, 1 }
 0x147   :  { %v1132_v30 = vpop.permute.xlu0 %1131  ;;  %v1660_v31 = vpop.f32.mrf.mxu0  ;;  %v8724_v32 = vunpack.i.h.bf16 %v8722_v27  ;;  %v8723_v33 = vunpack.i.l.bf16 %v8722_v27  ;;  %v1429_v34 = vsel %vm1388_vm5, %v1372_v28, %v1130_v14 }
 0x148   :  { %v1933_v36 = vmax.f32 %v1659_v26, 0.0  ;;  %1852 = vmatmul.mubr.f32.gmra.mxu0 %v1429_v34  ;;  %v1430_v50 = vsel %vm1388_vm5, %v1373_v39, %v1132_v30 }
 0x149   :  { %v1663_v40 = vpop.f32.mrf.mxu0  ;;  %7296 = vmatprep.mubr.msk.f32.mxu0 %vm1470_vm1, %v1132_v30  ;;  %v1260_v45 = vsel %vm1217_vm2, %v83_v37, %v8723_v33  ;;  %v1261_v46 = vsel %vm1217_vm2, %v84_v38, %v8724_v32 }
 0x14a   :  { %v2046_v42 = vrot.slane %v1933_v36, 1  ;;  %v1664_v43 = vadd.f32 %v10563_v4, %v1663_v40  ;;  %v8732_v44 = vpop.permute.xlu1 %8731 }
 0x14b   :  { %v8727_v47 = vpop.permute.xlu0 %8726  ;;  %v1665_v48 = vpop.f32.mrf.mxu0  ;;  %v8733_v49 = vunpack.i.l.bf16 %v8732_v44  ;;  %v8734_v55 = vunpack.i.h.bf16 %v8732_v44 }
 0x14c   :  { %v2047_v51 = vsel %vm2044_vm6, %v2045_v41, %v2046_v42  ;;  %v1934_v52 = vmax.f32 %v1664_v43, 0.0  ;;  %v8729_v53 = vunpack.i.h.bf16 %v8727_v47  ;;  %v8728_v54 = vunpack.i.l.bf16 %v8727_v47  ;;  %1857 = vmatmul.mubr.f32.gmra.mxu0 %v1430_v50 }
 0x14d   :  { %v1668_v56 = vpop.f32.mrf.mxu0  ;;  %v10604_v57 = vmax.f32 %v1932_v25, %v2047_v51 }
 0x14e   :  { %v2048_v58 = vrot.slane %v1934_v52, 1  ;;  %v1669_v59 = vadd.f32 %v10563_v4, %v1668_v56  ;;  %v1136_v60 = vpop.permute.xlu1 %1135  ;;  %v1317_v61 = vsel %vm1274_vm3, %v1260_v45, %v8728_v54  ;;  %v1318_v62 = vsel %vm1274_vm3, %v1261_v46, %v8729_v53  ;;  %v87_v45 = vld [vmem:[%s14142_s0 + $0x170] sm:$0xff]  ;;  %v88_v46 = vld [vmem:[%s14142_s0 + $0x178] sm:$0xff] }
 0x14f   :  { %v1134_v63 = vpop.permute.xlu0 %1133  ;;  %v1670_v0 = vpop.f32.mrf.mxu0  ;;  %2324 = vrot.lane.b32.xlu0 %v10604_v57, %s9245_s5  ;;  %v1374_v1 = vsel %vm1331_vm4, %v1317_v61, %v8733_v49  ;;  %v1375_v8 = vsel %vm1331_vm4, %v1318_v62, %v8734_v55 }
 0x150   :  { %v2049_v2 = vsel %vm2044_vm6, %v2046_v42, %v2048_v58  ;;  %v1935_v5 = vmax.f32 %v1669_v59, 0.0  ;;  %7297 = vmatprep.mubr.msk.f32.mxu0 %vm1470_vm1, %v1134_v63  ;;  %v1431_v6 = vsel %vm1388_vm5, %v1374_v1, %v1134_v63  ;;  %v1432_v18 = vsel %vm1388_vm5, %v1375_v8, %v1136_v60 }
 0x151   :  { %1862 = vmatmul.mubr.f32.gmra.mxu0 %v1431_v6  ;;  %v10615_v7 = vmax.f32 %v1933_v36, %v2049_v2 }
 0x152   :  { %v2050_v9 = vrot.slane %v1935_v5, 1  ;;  %v8742_v10 = vpop.permute.xlu1 %8741  ;;  %7298 = vmatprep.mubr.msk.f32.mxu0 %vm1470_vm1, %v1136_v60 }
 0x153   :  { %v8737_v11 = vpop.permute.xlu0 %8736  ;;  %2326 = vrot.lane.b32.xlu1 %v10615_v7, %s9245_s5  ;;  %v8744_v19 = vunpack.i.h.bf16 %v8742_v10  ;;  %v8743_v20 = vunpack.i.l.bf16 %v8742_v10 }
 0x154   :  { %v2051_v14 = vsel %vm2044_vm6, %v2048_v58, %v2050_v9  ;;  %v8739_v15 = vunpack.i.h.bf16 %v8737_v11  ;;  %v8738_v16 = vunpack.i.l.bf16 %v8737_v11  ;;  %v1673_v17 = vpop.f32.mrf.mxu0 }
 0x155   :  { %v1674_v21 = vadd.f32 %v10563_v4, %v1673_v17  ;;  %1867 = vmatmul.mubr.f32.gmra.mxu0 %v1432_v18  ;;  %v10630_v22 = vmax.f32 %v1934_v52, %v2051_v14 }
 0x156   :  { %v1262_v23 = vsel %vm1217_vm2, %v85_v12, %v8738_v16  ;;  %v1263_v24 = vsel %vm1217_vm2, %v86_v13, %v8739_v15  ;;  %v1675_v25 = vpop.f32.mrf.mxu0  ;;  %v1138_v26 = vpop.permute.xlu1 %1137 }
 0x157   :  { %v1936_v27 = vmax.f32 %v1674_v21, 0.0  ;;  %v8747_v28 = vpop.permute.xlu0 %8746  ;;  %2328 = vrot.lane.b32.xlu0 %v10630_v22, %s9245_s5  ;;  %7299 = vmatprep.mubr.msk.f32.mxu0 %vm1470_vm1, %v1138_v26  ;;  %v1319_v34 = vsel %vm1274_vm3, %v1262_v23, %v8743_v20  ;;  %v1320_v35 = vsel %vm1274_vm3, %v1263_v24, %v8744_v19  ;;  %v89_v23 = vld [vmem:[%s14142_s0 + $0x180] sm:$0xff]  ;;  %v90_v24 = vld [vmem:[%s14142_s0 + $0x188] sm:$0xff] }
 0x158   :  { %v8749_v29 = vunpack.i.h.bf16 %v8747_v28  ;;  %v8748_v30 = vunpack.i.l.bf16 %v8747_v28  ;;  %v1678_v31 = vpop.f32.mrf.mxu0 }
 0x159   :  { %v2052_v32 = vrot.slane %v1936_v27, 1  ;;  %v1679_v33 = vadd.f32 %v10563_v4, %v1678_v31 }
 0x15a   :  { %v1680_v36 = vpop.f32.mrf.mxu0  ;;  %v8752_v37 = vpop.permute.xlu1 %8751  ;;  %v1376_v38 = vsel %vm1331_vm4, %v1319_v34, %v8748_v30  ;;  %v1377_v39 = vsel %vm1331_vm4, %v1320_v35, %v8749_v29 }
 0x15b   :  { %v2053_v40 = vsel %vm2044_vm6, %v2050_v9, %v2052_v32  ;;  %v1937_v41 = vmax.f32 %v1679_v33, 0.0  ;;  %v1140_v42 = vpop.permute.xlu0 %1139  ;;  %v8754_v43 = vunpack.i.h.bf16 %v8752_v37  ;;  %v8753_v44 = vunpack.i.l.bf16 %v8752_v37 }
 0x15c   :  { %v1433_v47 = vsel %vm1388_vm5, %v1376_v38, %v1138_v26  ;;  %v10650_v48 = vmax.f32 %v1935_v5, %v2053_v40  ;;  %v1434_v53 = vsel %vm1388_vm5, %v1377_v39, %v1140_v42 }
 0x15d   :  { %v2054_v49 = vrot.slane %v1937_v41, 1  ;;  %1872 = vmatmul.mubr.f32.gmra.mxu0 %v1433_v47  ;;  %v1683_v50 = vpop.f32.mrf.mxu0  ;;  %v1264_v55 = vsel %vm1217_vm2, %v87_v45, %v8753_v44  ;;  %v1265_v56 = vsel %vm1217_vm2, %v88_v46, %v8754_v43 }
 0x15e   :  { %v1684_v51 = vadd.f32 %v10563_v4, %v1683_v50  ;;  %2330 = vrot.lane.b32.xlu1 %v10650_v48, %s9245_s5  ;;  %7300 = vmatprep.mubr.msk.f32.mxu0 %vm1470_vm1, %v1140_v42  ;;  %v8762_v52 = vpop.permute.xlu1 %8761 }
 0x15f   :  { %v2055_v54 = vsel %vm2044_vm6, %v2052_v32, %v2054_v49  ;;  %v8757_v58 = vpop.permute.xlu0 %8756  ;;  %v1685_v59 = vpop.f32.mrf.mxu0  ;;  %v8763_v60 = vunpack.i.l.bf16 %v8762_v52  ;;  %v8764_v1 = vunpack.i.h.bf16 %v8762_v52 }
 0x160   :  { %v1938_v61 = vmax.f32 %v1684_v51, 0.0  ;;  %v8759_v62 = vunpack.i.h.bf16 %v8757_v58  ;;  %v8758_v63 = vunpack.i.l.bf16 %v8757_v58  ;;  %v10660_v0 = vmax.f32 %v1936_v27, %v2055_v54  ;;  %v91_v58 = vld [vmem:[%s14142_s0 + $0x190] sm:$0xff]  ;;  %v92_v59 = vld [vmem:[%s14142_s0 + $0x198] sm:$0xff] }
 0x161   :  { %1877 = vmatmul.mubr.f32.gmra.mxu0 %v1434_v53  ;;  %v1688_v2 = vpop.f32.mrf.mxu0 }
 0x162   :  { %v2056_v5 = vrot.slane %v1938_v61, 1  ;;  %v1689_v6 = vadd.f32 %v10563_v4, %v1688_v2  ;;  %2332 = vrot.lane.b32.xlu0 %v10660_v0, %s9245_s5  ;;  %v1144_v8 = vpop.permute.xlu1 %1143  ;;  %v1321_v9 = vsel %vm1274_vm3, %v1264_v55, %v8758_v63  ;;  %v1322_v10 = vsel %vm1274_vm3, %v1265_v56, %v8759_v62 }
 0x163   :  { %v1142_v11 = vpop.permute.xlu0 %1141  ;;  %v1690_v12 = vpop.f32.mrf.mxu0  ;;  %v1378_v13 = vsel %vm1331_vm4, %v1321_v9, %v8763_v60  ;;  %v1379_v18 = vsel %vm1331_vm4, %v1322_v10, %v8764_v1 }
 0x164   :  { %v2057_v14 = vsel %vm2044_vm6, %v2054_v49, %v2056_v5  ;;  %v1939_v15 = vmax.f32 %v1689_v6, 0.0  ;;  %7301 = vmatprep.mubr.msk.f32.mxu0 %vm1470_vm1, %v1142_v11  ;;  %v1435_v16 = vsel %vm1388_vm5, %v1378_v13, %v1142_v11  ;;  %v1436_v29 = vsel %vm1388_vm5, %v1379_v18, %v1144_v8 }
 0x165   :  { %1882 = vmatmul.mubr.f32.gmra.mxu0 %v1435_v16  ;;  %v10671_v17 = vmax.f32 %v1937_v41, %v2057_v14 }
 0x166   :  { %v2058_v19 = vrot.slane %v1939_v15, 1  ;;  %v8772_v20 = vpop.permute.xlu1 %8771  ;;  %7302 = vmatprep.mubr.msk.f32.mxu0 %vm1470_vm1, %v1144_v8 }
 0x167   :  { %v8767_v21 = vpop.permute.xlu0 %8766  ;;  %2334 = vrot.lane.b32.xlu1 %v10671_v17, %s9245_s5  ;;  %v8774_v30 = vunpack.i.h.bf16 %v8772_v20  ;;  %v8773_v31 = vunpack.i.l.bf16 %v8772_v20 }
 0x168   :  { %v2059_v25 = vsel %vm2044_vm6, %v2056_v5, %v2058_v19  ;;  %v8769_v26 = vunpack.i.h.bf16 %v8767_v21  ;;  %v8768_v27 = vunpack.i.l.bf16 %v8767_v21  ;;  %v1693_v28 = vpop.f32.mrf.mxu0 }
 0x169   :  { %v1694_v32 = vadd.f32 %v10563_v4, %v1693_v28  ;;  %1887 = vmatmul.mubr.f32.gmra.mxu0 %v1436_v29  ;;  %v10686_v33 = vmax.f32 %v1938_v61, %v2059_v25 }
 0x16a   :  { %v1266_v34 = vsel %vm1217_vm2, %v89_v23, %v8768_v27  ;;  %v1267_v35 = vsel %vm1217_vm2, %v90_v24, %v8769_v26  ;;  %v1695_v36 = vpop.f32.mrf.mxu0  ;;  %v1146_v37 = vpop.permute.xlu1 %1145 }
 0x16b   :  { %v1940_v38 = vmax.f32 %v1694_v32, 0.0  ;;  %v8777_v39 = vpop.permute.xlu0 %8776  ;;  %2336 = vrot.lane.b32.xlu0 %v10686_v33, %s9245_s5  ;;  %7303 = vmatprep.mubr.msk.f32.mxu0 %vm1470_vm1, %v1146_v37  ;;  %v1323_v45 = vsel %vm1274_vm3, %v1266_v34, %v8773_v31  ;;  %v1324_v46 = vsel %vm1274_vm3, %v1267_v35, %v8774_v30 }
 0x16c   :  { %v8779_v40 = vunpack.i.h.bf16 %v8777_v39  ;;  %v8778_v41 = vunpack.i.l.bf16 %v8777_v39  ;;  %v1698_v42 = vpop.f32.mrf.mxu0  ;;  %v94_v39 = vld [vmem:[%s14142_s0 + $0x1a8] sm:$0xff] }
 0x16d   :  { %v2060_v43 = vrot.slane %v1940_v38, 1  ;;  %v1699_v44 = vadd.f32 %v10563_v4, %v1698_v42 }
 0x16e   :  { %v1700_v47 = vpop.f32.mrf.mxu0  ;;  %v8782_v49 = vpop.permute.xlu1 %8781  ;;  %v1380_v50 = vsel %vm1331_vm4, %v1323_v45, %v8778_v41  ;;  %v1381_v51 = vsel %vm1331_vm4, %v1324_v46, %v8779_v40 }
 0x16f   :  { %v2061_v52 = vsel %vm2044_vm6, %v2058_v19, %v2060_v43  ;;  %v1941_v53 = vmax.f32 %v1699_v44, 0.0  ;;  %v1148_v54 = vpop.permute.xlu0 %1147  ;;  %v8784_v55 = vunpack.i.h.bf16 %v8782_v49  ;;  %v8783_v56 = vunpack.i.l.bf16 %v8782_v49 }
 0x170   :  { %v1437_v60 = vsel %vm1388_vm5, %v1380_v50, %v1146_v37  ;;  %v10706_v61 = vmax.f32 %v1939_v15, %v2061_v52  ;;  %v1438_v5 = vsel %vm1388_vm5, %v1381_v51, %v1148_v54 }
 0x171   :  { %v2062_v62 = vrot.slane %v1941_v53, 1  ;;  %1892 = vmatmul.mubr.f32.gmra.mxu0 %v1437_v60  ;;  %v1703_v63 = vpop.f32.mrf.mxu0  ;;  %v1268_v8 = vsel %vm1217_vm2, %v91_v58, %v8783_v56  ;;  %v1269_v9 = vsel %vm1217_vm2, %v92_v59, %v8784_v55 }
 0x172   :  { %v1704_v1 = vadd.f32 %v10563_v4, %v1703_v63  ;;  %2338 = vrot.lane.b32.xlu1 %v10706_v61, %s9245_s5  ;;  %7304 = vmatprep.mubr.msk.f32.mxu0 %vm1470_vm1, %v1148_v54  ;;  %v8792_v2 = vpop.permute.xlu1 %8791 }
 0x173   :  { %v2063_v6 = vsel %vm2044_vm6, %v2060_v43, %v2062_v62  ;;  %v8787_v10 = vpop.permute.xlu0 %8786  ;;  %v1705_v11 = vpop.f32.mrf.mxu0  ;;  %v8793_v12 = vunpack.i.l.bf16 %v8792_v2  ;;  %v8794_v18 = vunpack.i.h.bf16 %v8792_v2 }
 0x174   :  { %v1942_v13 = vmax.f32 %v1704_v1, 0.0  ;;  %v8789_v14 = vunpack.i.h.bf16 %v8787_v10  ;;  %v8788_v15 = vunpack.i.l.bf16 %v8787_v10  ;;  %v10716_v16 = vmax.f32 %v1940_v38, %v2063_v6  ;;  %v93_v38 = vld [vmem:[%s14142_s0 + $0x1a0] sm:$0xff] }
 0x175   :  { %1897 = vmatmul.mubr.f32.gmra.mxu0 %v1438_v5  ;;  %v1708_v19 = vpop.f32.mrf.mxu0 }
 0x176   :  { %v2064_v20 = vrot.slane %v1942_v13, 1  ;;  %v1709_v21 = vadd.f32 %v10563_v4, %v1708_v19  ;;  %2340 = vrot.lane.b32.xlu0 %v10716_v16, %s9245_s5  ;;  %v1152_v23 = vpop.permute.xlu1 %1151  ;;  %v1325_v24 = vsel %vm1274_vm3, %v1268_v8, %v8788_v15  ;;  %v1326_v25 = vsel %vm1274_vm3, %v1269_v9, %v8789_v14  ;;  %v95_v14 = vld [vmem:[%s14142_s0 + $0x1b0] sm:$0xff]  ;;  %v96_v15 = vld [vmem:[%s14142_s0 + $0x1b8] sm:$0xf]  ;;  %s9249_s0 = smov 60  }
 0x177   :  { %v1150_v26 = vpop.permute.xlu0 %1149  ;;  %v1710_v27 = vpop.f32.mrf.mxu0  ;;  %v1382_v28 = vsel %vm1331_vm4, %v1325_v24, %v8793_v12  ;;  %v1383_v34 = vsel %vm1331_vm4, %v1326_v25, %v8794_v18 }
 0x178   :  { %v2065_v29 = vsel %vm2044_vm6, %v2062_v62, %v2064_v20  ;;  %v1943_v30 = vmax.f32 %v1709_v21, 0.0  ;;  %7305 = vmatprep.mubr.msk.f32.mxu0 %vm1470_vm1, %v1150_v26  ;;  %v1439_v31 = vsel %vm1388_vm5, %v1382_v28, %v1150_v26  ;;  %v1440_v44 = vsel %vm1388_vm5, %v1383_v34, %v1152_v23 }
 0x179   :  { %1902 = vmatmul.mubr.f32.gmra.mxu0 %v1439_v31  ;;  %v10727_v32 = vmax.f32 %v1941_v53, %v2065_v29 }
 0x17a   :  { %v2066_v35 = vrot.slane %v1943_v30, 1  ;;  %v8802_v36 = vpop.permute.xlu1 %8801  ;;  %7306 = vmatprep.mubr.msk.f32.mxu0 %vm1470_vm1, %v1152_v23 }
 0x17b   :  { %v8797_v37 = vpop.permute.xlu0 %8796  ;;  %2342 = vrot.lane.b32.xlu1 %v10727_v32, %s9245_s5  ;;  %v8804_v45 = vunpack.i.h.bf16 %v8802_v36  ;;  %v8803_v46 = vunpack.i.l.bf16 %v8802_v36 }
 0x17c   :  { %v2067_v40 = vsel %vm2044_vm6, %v2064_v20, %v2066_v35  ;;  %v8799_v41 = vunpack.i.h.bf16 %v8797_v37  ;;  %v8798_v42 = vunpack.i.l.bf16 %v8797_v37  ;;  %v1713_v43 = vpop.f32.mrf.mxu0 }
 0x17d   :  { %v1714_v47 = vadd.f32 %v10563_v4, %v1713_v43  ;;  %1907 = vmatmul.mubr.f32.gmra.mxu0 %v1440_v44  ;;  %v10742_v49 = vmax.f32 %v1942_v13, %v2067_v40 }
 0x17e   :  { %v1270_v50 = vsel %vm1217_vm2, %v93_v38, %v8798_v42  ;;  %v1271_v51 = vsel %vm1217_vm2, %v94_v39, %v8799_v41  ;;  %v1715_v52 = vpop.f32.mrf.mxu0  ;;  %v1154_v53 = vpop.permute.xlu1 %1153 }
 0x17f   :  { %v1944_v54 = vmax.f32 %v1714_v47, 0.0  ;;  %v8807_v55 = vpop.permute.xlu0 %8806  ;;  %2344 = vrot.lane.b32.xlu0 %v10742_v49, %s9245_s5  ;;  %7307 = vmatprep.mubr.msk.f32.mxu0 %vm1470_vm1, %v1154_v53  ;;  %v1327_v63 = vsel %vm1274_vm3, %v1270_v50, %v8803_v46  ;;  %v1328_v1 = vsel %vm1274_vm3, %v1271_v51, %v8804_v45 }
 0x180   :  { %v8809_v56 = vunpack.i.h.bf16 %v8807_v55  ;;  %v8808_v58 = vunpack.i.l.bf16 %v8807_v55  ;;  %v1718_v59 = vpop.f32.mrf.mxu0 }
 0x181   :  { %v2068_v60 = vrot.slane %v1944_v54, 1  ;;  %v1719_v62 = vadd.f32 %v10563_v4, %v1718_v59 }
 0x182   :  { %v1720_v2 = vpop.f32.mrf.mxu0  ;;  %v8812_v5 = vpop.permute.xlu1 %8811  ;;  %v1384_v6 = vsel %vm1331_vm4, %v1327_v63, %v8808_v58  ;;  %v1385_v8 = vsel %vm1331_vm4, %v1328_v1, %v8809_v56 }
 0x183   :  { %v2069_v9 = vsel %vm2044_vm6, %v2066_v35, %v2068_v60  ;;  %v1945_v10 = vmax.f32 %v1719_v62, 0.0  ;;  %v1156_v11 = vpop.permute.xlu0 %1155  ;;  %v8814_v12 = vunpack.i.h.bf16 %v8812_v5  ;;  %v8813_v13 = vunpack.i.l.bf16 %v8812_v5 }
 0x184   :  { %v1441_v18 = vsel %vm1388_vm5, %v1384_v6, %v1154_v53  ;;  %v10762_v19 = vmax.f32 %v1943_v30, %v2069_v9  ;;  %v1442_v26 = vsel %vm1388_vm5, %v1385_v8, %v1156_v11 }
 0x185   :  { %v2070_v20 = vrot.slane %v1945_v10, 1  ;;  %1912 = vmatmul.mubr.f32.gmra.mxu0 %v1441_v18  ;;  %v1723_v21 = vpop.f32.mrf.mxu0  ;;  %v1272_v23 = vsel %vm1217_vm2, %v95_v14, %v8813_v13  ;;  %v1273_v28 = vsel %vm1217_vm2, %v96_v15, %v8814_v12  ;;  %vm6327_vm2 = vcmask 1040384  }
 0x186   :  { %v1724_v24 = vadd.f32 %v10563_v4, %v1723_v21  ;;  %2346 = vrot.lane.b32.xlu1 %v10762_v19, %s9245_s5  ;;  %7308 = vmatprep.mubr.msk.f32.mxu0 %vm1470_vm1, %v1156_v11  ;;  %v8822_v25 = vpop.permute.xlu1 %8821 }
 0x187   :  { %v2071_v27 = vsel %vm2044_vm6, %v2068_v60, %v2070_v20  ;;  %v8817_v29 = vpop.permute.xlu0 %8816  ;;  %v1725_v30 = vpop.f32.mrf.mxu0  ;;  %v8824_v31 = vunpack.i.h.bf16 %v8822_v25  ;;  %v8823_v34 = vunpack.i.l.bf16 %v8822_v25 }
 0x188   :  { %v1946_v35 = vmax.f32 %v1724_v24, 0.0  ;;  %v8819_v36 = vunpack.i.h.bf16 %v8817_v29  ;;  %v8818_v37 = vunpack.i.l.bf16 %v8817_v29  ;;  %v10772_v38 = vmax.f32 %v1944_v54, %v2071_v27 }
 0x189   :  { %1917 = vmatmul.mubr.f32.gmra.mxu0 %v1442_v26  ;;  %v1728_v39 = vpop.f32.mrf.mxu0 }
 0x18a   :  { %v2072_v40 = vrot.slane %v1946_v35, 1  ;;  %v1729_v41 = vadd.f32 %v10563_v4, %v1728_v39  ;;  %2348 = vrot.lane.b32.xlu0 %v10772_v38, %s9245_s5  ;;  %v1329_v42 = vsel %vm1274_vm3, %v1272_v23, %v8818_v37  ;;  %v1160_v43 = vpop.permute.xlu1 %1159  ;;  %v1330_v44 = vsel %vm1274_vm3, %v1273_v28, %v8819_v36 }
 0x18b   :  { %v1158_v45 = vpop.permute.xlu0 %1157  ;;  %v1730_v46 = vpop.f32.mrf.mxu0  ;;  %v1386_v47 = vsel %vm1331_vm4, %v1329_v42, %v8823_v34  ;;  %v1387_v50 = vsel %vm1331_vm4, %v1330_v44, %v8824_v31  ;;  %vm7003_vm3 = vcmask 654336   ;;  %vm7035_vm4 = vcmask 261120  }
 0x18c   :  { %v2073_v51 = vsel %vm2044_vm6, %v2070_v20, %v2072_v40  ;;  %v1947_v52 = vmax.f32 %v1729_v41, 0.0  ;;  %7309 = vmatprep.mubr.msk.f32.mxu0 %vm1470_vm1, %v1158_v45  ;;  %v1443_v53 = vsel %vm1388_vm5, %v1386_v47, %v1158_v45  ;;  %v1444_v56 = vsel %vm1388_vm5, %v1387_v50, %v1160_v43 }
 0x18d   :  { %1922 = vmatmul.mubr.f32.gmra.mxu0 %v1443_v53  ;;  %v10784_v54 = vmax.f32 %v1945_v10, %v2073_v51 }
 0x18e   :  { %v2074_v55 = vrot.slane %v1947_v52, 1  ;;  %7310 = vmatprep.mubr.msk.f32.mxu0 %vm1470_vm1, %v1160_v43  ;;  %vm6320_vm1 = vcmask 400384  }
 0x18f   :  { %2350 = vrot.lane.b32.xlu1 %v10784_v54, %s9245_s5 }
 0x190   :  { %v2075_v58 = vsel %vm2044_vm6, %v2072_v40, %v2074_v55  ;;  %v1733_v59 = vpop.f32.mrf.mxu0 }
 0x191   :  { %v1734_v60 = vadd.f32 %v10563_v4, %v1733_v59  ;;  %1927 = vmatmul.mubr.f32.gmra.mxu0 %v1444_v56  ;;  %v10792_v62 = vmax.f32 %v1946_v35, %v2075_v58 }
 0x192   :  { %v1735_v63 = vpop.f32.mrf.mxu0  ;;  %8014 = vmatprep.mubr.msk.f32.mxu0 %vm9246_vm8, %v9240_v3 }
 0x193   :  { %v1948_v1 = vmax.f32 %v1734_v60, 0.0  ;;  %2352 = vrot.lane.b32.xlu0 %v10792_v62, %s9245_s5 }
 0x194   :  { %v1738_v2 = vpop.f32.mrf.mxu0 }
 0x195   :  { %v2076_v5 = vrot.slane %v1948_v1, 1  ;;  %v1739_v6 = vadd.f32 %v10563_v4, %v1738_v2 }
 0x196   :  { %v1740_v8 = vpop.f32.mrf.mxu0 }
 0x197   :  { %v2077_v9 = vsel %vm2044_vm6, %v2074_v55, %v2076_v5  ;;  %v1949_v10 = vmax.f32 %v1739_v6, 0.0 }
 0x198   :  { %v10798_v11 = vmax.f32 %v1947_v52, %v2077_v9 }
 0x199   :  { %v2078_v12 = vrot.slane %v1949_v10, 1  ;;  %v1743_v13 = vpop.f32.mrf.mxu0 }
 0x19a   :  { %v1744_v14 = vadd.f32 %v10563_v4, %v1743_v13  ;;  %2354 = vrot.lane.b32.xlu1 %v10798_v11, %s9245_s5 }
 0x19b   :  { %v2079_v15 = vsel %vm2044_vm6, %v2076_v5, %v2078_v12  ;;  %v1745_v18 = vpop.f32.mrf.mxu0 }
 0x19c   :  { %v1950_v20 = vmax.f32 %v1744_v14, 0.0  ;;  %v10804_v21 = vmax.f32 %v1948_v1, %v2079_v15 }
 0x19d   :  { %v1748_v23 = vpop.f32.mrf.mxu0 }
 0x19e   :  { %v2080_v24 = vrot.slane %v1950_v20, 1  ;;  %v1749_v25 = vadd.f32 %v10563_v4, %v1748_v23  ;;  %2356 = vrot.lane.b32.xlu0 %v10804_v21, %s9245_s5 }
 0x19f   :  { %v1750_v26 = vpop.f32.mrf.mxu0 }
 0x1a0   :  { %v2081_v27 = vsel %vm2044_vm6, %v2078_v12, %v2080_v24  ;;  %v1951_v28 = vmax.f32 %v1749_v25, 0.0 }
 0x1a1   :  { %v10810_v29 = vmax.f32 %v1949_v10, %v2081_v27 }
 0x1a2   :  { %v2082_v30 = vrot.slane %v1951_v28, 1 }
 0x1a3   :  { %2358 = vrot.lane.b32.xlu1 %v10810_v29, %s9245_s5 }
 0x1a4   :  { %v2083_v31 = vsel %vm2044_vm6, %v2080_v24, %v2082_v30  ;;  %v1753_v34 = vpop.f32.mrf.mxu0 }
 0x1a5   :  { %v1754_v35 = vadd.f32 %v10563_v4, %v1753_v34  ;;  %v10816_v36 = vmax.f32 %v1950_v20, %v2083_v31 }
 0x1a6   :  { %v1755_v37 = vpop.f32.mrf.mxu0 }
 0x1a7   :  { %v1952_v39 = vmax.f32 %v1754_v35, 0.0  ;;  %2360 = vrot.lane.b32.xlu0 %v10816_v36, %s9245_s5 }
 0x1a8   :  { %v1758_v40 = vpop.f32.mrf.mxu0 }
 0x1a9   :  { %v2084_v41 = vrot.slane %v1952_v39, 1  ;;  %v1759_v42 = vadd.f32 %v10563_v4, %v1758_v40 }
 0x1aa   :  { %v1760_v43 = vpop.f32.mrf.mxu0 }
 0x1ab   :  { %v2085_v44 = vsel %vm2044_vm6, %v2082_v30, %v2084_v41  ;;  %v1953_v45 = vmax.f32 %v1759_v42, 0.0 }
 0x1ac   :  { %v10822_v46 = vmax.f32 %v1951_v28, %v2085_v44 }
 0x1ad   :  { %v2086_v47 = vrot.slane %v1953_v45, 1  ;;  %v1763_v50 = vpop.f32.mrf.mxu0 }
 0x1ae   :  { %v1764_v51 = vadd.f32 %v10563_v4, %v1763_v50  ;;  %2362 = vrot.lane.b32.xlu1 %v10822_v46, %s9245_s5 }
 0x1af   :  { %v2087_v52 = vsel %vm2044_vm6, %v2084_v41, %v2086_v47  ;;  %v1765_v53 = vpop.f32.mrf.mxu0 }
 0x1b0   :  { %v1954_v55 = vmax.f32 %v1764_v51, 0.0  ;;  %v10828_v56 = vmax.f32 %v1952_v39, %v2087_v52 }
 0x1b1   :  { %v1768_v58 = vpop.f32.mrf.mxu0 }
 0x1b2   :  { %v2088_v59 = vrot.slane %v1954_v55, 1  ;;  %v1769_v60 = vadd.f32 %v10563_v4, %v1768_v58  ;;  %2364 = vrot.lane.b32.xlu0 %v10828_v56, %s9245_s5 }
 0x1b3   :  { %v1770_v63 = vpop.f32.mrf.mxu0 }
 0x1b4   :  { %v2089_v1 = vsel %vm2044_vm6, %v2086_v47, %v2088_v59  ;;  %v1955_v2 = vmax.f32 %v1769_v60, 0.0 }
 0x1b5   :  { %v10834_v5 = vmax.f32 %v1953_v45, %v2089_v1 }
 0x1b6   :  { %v2090_v6 = vrot.slane %v1955_v2, 1 }
 0x1b7   :  { %2366 = vrot.lane.b32.xlu1 %v10834_v5, %s9245_s5 }
 0x1b8   :  { %v2091_v8 = vsel %vm2044_vm6, %v2088_v59, %v2090_v6  ;;  %v1773_v9 = vpop.f32.mrf.mxu0 }
 0x1b9   :  { %v1774_v10 = vadd.f32 %v10563_v4, %v1773_v9  ;;  %v10840_v12 = vmax.f32 %v1954_v55, %v2091_v8 }
 0x1ba   :  { %v1775_v13 = vpop.f32.mrf.mxu0 }
 0x1bb   :  { %v1956_v14 = vmax.f32 %v1774_v10, 0.0  ;;  %2368 = vrot.lane.b32.xlu0 %v10840_v12, %s9245_s5 }
 0x1bc   :  { %v1778_v15 = vpop.f32.mrf.mxu0 }
 0x1bd   :  { %v2092_v18 = vrot.slane %v1956_v14, 1  ;;  %v1779_v20 = vadd.f32 %v10563_v4, %v1778_v15 }
 0x1be   :  { %v1780_v23 = vpop.f32.mrf.mxu0 }
 0x1bf   :  { %v2093_v24 = vsel %vm2044_vm6, %v2090_v6, %v2092_v18  ;;  %v1957_v25 = vmax.f32 %v1779_v20, 0.0 }
 0x1c0   :  { %v10846_v26 = vmax.f32 %v1955_v2, %v2093_v24 }
 0x1c1   :  { %v2094_v27 = vrot.slane %v1957_v25, 1  ;;  %v1783_v28 = vpop.f32.mrf.mxu0  ;;  %v2325_v30 = vpop.permute.xlu0 %2324 }
 0x1c2   :  { %v1784_v31 = vadd.f32 %v10563_v4, %v1783_v28  ;;  %2370 = vrot.lane.b32.xlu1 %v10846_v26, %s9245_s5  ;;  %v2492_v34 = vmax.f32 %v10604_v57, %v2325_v30 }
 0x1c3   :  { %v2095_v35 = vsel %vm2044_vm6, %v2092_v18, %v2094_v27  ;;  %v1785_v37 = vpop.f32.mrf.mxu0 }
 0x1c4   :  { %v1958_v39 = vmax.f32 %v1784_v31, 0.0  ;;  %7918 = vmatprep.mubr.msk.f32.mxu1 %vm2563_vm7, %v2492_v34  ;;  %v10854_v40 = vmax.f32 %v1956_v14, %v2095_v35 }
 0x1c5   :  { %v1788_v41 = vpop.f32.mrf.mxu0  ;;  %v2327_v42 = vpop.permute.xlu1 %2326 }
 0x1c6   :  { %v2096_v43 = vrot.slane %v1958_v39, 1  ;;  %v1789_v44 = vadd.f32 %v10563_v4, %v1788_v41  ;;  %v2493_v45 = vmax.f32 %v10615_v7, %v2327_v42  ;;  %2372 = vrot.lane.b32.xlu0 %v10854_v40, %s9245_s5 }
 0x1c7   :  { %v1790_v47 = vpop.f32.mrf.mxu0 }
 0x1c8   :  { %v2097_v57 = vsel %vm2044_vm6, %v2094_v27, %v2096_v43  ;;  %v1959_v50 = vmax.f32 %v1789_v44, 0.0  ;;  %7919 = vmatmul.mubr.msk.f32.vlgmr.msra.gmra.mxu1 %vm2563_vm7, %v2493_v45 }
 0x1c9   :  { %v2329_v51 = vpop.permute.xlu0 %2328  ;;  %v10862_v52 = vmax.f32 %v1957_v25, %v2097_v57 }
 0x1ca   :  { %v2098_v53 = vrot.slane %v1959_v50, 1  ;;  %v2494_v55 = vmax.f32 %v10630_v22, %v2329_v51 }
 0x1cb   :  { %2374 = vrot.lane.b32.xlu1 %v10862_v52, %s9245_s5 }
 0x1cc   :  { %v2099_v7 = vsel %vm2044_vm6, %v2096_v43, %v2098_v53  ;;  %v1793_v58 = vpop.f32.mrf.mxu0  ;;  %7921 = vmatprep.mubr.msk.f32.mxu1 %vm2563_vm7, %v2494_v55 }
 0x1cd   :  { %v1794_v59 = vadd.f32 %v10563_v4, %v1793_v58  ;;  %v10870_v60 = vmax.f32 %v1958_v39, %v2099_v7 }
 0x1ce   :  { %v1795_v63 = vpop.f32.mrf.mxu0 }
 0x1cf   :  { %v1960_v1 = vmax.f32 %v1794_v59, 0.0  ;;  %2376 = vrot.lane.b32.xlu0 %v10870_v60, %s9245_s5 }
 0x1d0   :  { %v1798_v2 = vpop.f32.mrf.mxu0  ;;  %v2331_v6 = vpop.permute.xlu1 %2330 }
 0x1d1   :  { %v2100_v22 = vrot.slane %v1960_v1, 1  ;;  %v1799_v8 = vadd.f32 %v10563_v4, %v1798_v2  ;;  %v2495_v9 = vmax.f32 %v10650_v48, %v2331_v6 }
 0x1d2   :  { %v1800_v10 = vpop.f32.mrf.mxu0 }
 0x1d3   :  { %v2101_v13 = vsel %vm2044_vm6, %v2098_v53, %v2100_v22  ;;  %v1961_v14 = vmax.f32 %v1799_v8, 0.0  ;;  %7922 = vmatmul.mubr.msk.f32.gmra.mxu1 %vm2563_vm7, %v2495_v9 }
 0x1d4   :  { %v2333_v15 = vpop.permute.xlu0 %2332  ;;  %v10878_v18 = vmax.f32 %v1959_v50, %v2101_v13 }
 0x1d5   :  { %v2102_v20 = vrot.slane %v1961_v14, 1  ;;  %v2496_v23 = vmax.f32 %v10660_v0, %v2333_v15  ;;  %v1803_v24 = vpop.f32.mrf.mxu0 }
 0x1d6   :  { %v1804_v25 = vadd.f32 %v10563_v4, %v1803_v24  ;;  %2378 = vrot.lane.b32.xlu1 %v10878_v18, %s9245_s5 }
 0x1d7   :  { %v2103_v48 = vsel %vm2044_vm6, %v2100_v22, %v2102_v20  ;;  %v1805_v27 = vpop.f32.mrf.mxu0  ;;  %7924 = vmatprep.mubr.msk.f32.mxu1 %vm2563_vm7, %v2496_v23 }
 0x1d8   :  { %v1962_v28 = vmax.f32 %v1804_v25, 0.0  ;;  %v10886_v30 = vmax.f32 %v1960_v1, %v2103_v48 }
 0x1d9   :  { %v1808_v31 = vpop.f32.mrf.mxu0  ;;  %v2335_v34 = vpop.permute.xlu1 %2334 }
 0x1da   :  { %v2104_v35 = vrot.slane %v1962_v28, 1  ;;  %v1809_v37 = vadd.f32 %v10563_v4, %v1808_v31  ;;  %v2497_v0 = vmax.f32 %v10671_v17, %v2335_v34  ;;  %2380 = vrot.lane.b32.xlu0 %v10886_v30, %s9245_s5 }
 0x1db   :  { %v1810_v39 = vpop.f32.mrf.mxu0 }
 0x1dc   :  { %v2105_v41 = vsel %vm2044_vm6, %v2102_v20, %v2104_v35  ;;  %v1963_v42 = vmax.f32 %v1809_v37, 0.0  ;;  %7925 = vmatmul.mubr.msk.f32.gmra.mxu1 %vm2563_vm7, %v2497_v0 }
 0x1dd   :  { %v2337_v43 = vpop.permute.xlu0 %2336  ;;  %v10894_v44 = vmax.f32 %v1961_v14, %v2105_v41 }
 0x1de   :  { %v2106_v45 = vrot.slane %v1963_v42, 1  ;;  %v2498_v47 = vmax.f32 %v10686_v33, %v2337_v43 }
 0x1df   :  { %2382 = vrot.lane.b32.xlu1 %v10894_v44, %s9245_s5 }
 0x1e0   :  { %v2107_v17 = vsel %vm2044_vm6, %v2104_v35, %v2106_v45  ;;  %v1813_v57 = vpop.f32.mrf.mxu0  ;;  %7927 = vmatprep.mubr.msk.f32.mxu1 %vm2563_vm7, %v2498_v47 }
 0x1e1   :  { %v1814_v50 = vadd.f32 %v10563_v4, %v1813_v57  ;;  %v10902_v51 = vmax.f32 %v1962_v28, %v2107_v17 }
 0x1e2   :  { %v1815_v53 = vpop.f32.mrf.mxu0 }
 0x1e3   :  { %v1964_v55 = vmax.f32 %v1814_v50, 0.0  ;;  %2384 = vrot.lane.b32.xlu0 %v10902_v51, %s9245_s5 }
 0x1e4   :  { %v1818_v7 = vpop.f32.mrf.mxu0  ;;  %v2339_v58 = vpop.permute.xlu1 %2338 }
 0x1e5   :  { %v2108_v33 = vrot.slane %v1964_v55, 1  ;;  %v1819_v59 = vadd.f32 %v10563_v4, %v1818_v7  ;;  %v2499_v63 = vmax.f32 %v10706_v61, %v2339_v58 }
 0x1e6   :  { %v1820_v1 = vpop.f32.mrf.mxu0 }
 0x1e7   :  { %v2109_v2 = vsel %vm2044_vm6, %v2106_v45, %v2108_v33  ;;  %v1965_v6 = vmax.f32 %v1819_v59, 0.0  ;;  %7928 = vmatmul.mubr.msk.f32.gmra.mxu1 %vm2563_vm7, %v2499_v63 }
 0x1e8   :  { %v2341_v22 = vpop.permute.xlu0 %2340  ;;  %v10910_v8 = vmax.f32 %v1963_v42, %v2109_v2 }
 0x1e9   :  { %v2110_v9 = vrot.slane %v1965_v6, 1  ;;  %v2500_v10 = vmax.f32 %v10716_v16, %v2341_v22  ;;  %v1823_v13 = vpop.f32.mrf.mxu0  ;;  %v10923_v16 = vld [vmem:[%s14145_s2] ss:$0 sm:$0xff] }
 0x1ea   :  { %v1824_v14 = vadd.f32 %v10563_v4, %v1823_v13  ;;  %2386 = vrot.lane.b32.xlu1 %v10910_v8, %s9245_s5 }
 0x1eb   :  { %v2111_v61 = vsel %vm2044_vm6, %v2108_v33, %v2110_v9  ;;  %v1825_v15 = vpop.f32.mrf.mxu0  ;;  %7930 = vmatprep.mubr.msk.f32.mxu1 %vm2563_vm7, %v2500_v10 }
 0x1ec   :  { %v1966_v20 = vmax.f32 %v1824_v14, 0.0  ;;  %v10918_v23 = vmax.f32 %v1964_v55, %v2111_v61 }
 0x1ed   :  { %v1828_v24 = vpop.f32.mrf.mxu0  ;;  %v2343_v25 = vpop.permute.xlu1 %2342 }
 0x1ee   :  { %v2112_v48 = vrot.slane %v1966_v20, 1  ;;  %v1829_v4 = vadd.f32 %v10923_v16, %v1828_v24  ;;  %v2501_v27 = vmax.f32 %v10727_v32, %v2343_v25  ;;  %2388 = vrot.lane.b32.xlu0 %v10918_v23, %s9245_s5 }
 0x1ef   :  { %v1830_v28 = vpop.f32.mrf.mxu0 }
 0x1f0   :  { %v2113_v31 = vsel %vm2044_vm6, %v2110_v9, %v2112_v48  ;;  %v1967_v34 = vmax.f32 %v1829_v4, 0.0  ;;  %7931 = vmatmul.mubr.msk.f32.gmra.mxu1 %vm2563_vm7, %v2501_v27 }
 0x1f1   :  { %v2345_v35 = vpop.permute.xlu0 %2344  ;;  %v10931_v37 = vmax.f32 %v1965_v6, %v2113_v31 }
 0x1f2   :  { %v2114_v0 = vrot.slane %v1967_v34, 1  ;;  %v2502_v39 = vmax.f32 %v10742_v49, %v2345_v35 }
 0x1f3   :  { %2390 = vrot.lane.b32.xlu1 %v10931_v37, %s9245_s5 }
 0x1f4   :  { %v2115_v32 = vsel %vm2044_vm6, %v2112_v48, %v2114_v0  ;;  %v1833_v41 = vpop.f32.mrf.mxu0  ;;  %7933 = vmatprep.mubr.msk.f32.mxu1 %vm2563_vm7, %v2502_v39 }
 0x1f5   :  { %v1834_v42 = vadd.f32 %v10923_v16, %v1833_v41  ;;  %v10939_v43 = vmax.f32 %v1966_v20, %v2115_v32 }
 0x1f6   :  { %v1835_v45 = vpop.f32.mrf.mxu0 }
 0x1f7   :  { %v1968_v47 = vmax.f32 %v1834_v42, 0.0  ;;  %2392 = vrot.lane.b32.xlu0 %v10939_v43, %s9245_s5 }
 0x1f8   :  { %v1838_v17 = vpop.f32.mrf.mxu0  ;;  %v2347_v57 = vpop.permute.xlu1 %2346 }
 0x1f9   :  { %v2116_v49 = vrot.slane %v1968_v47, 1  ;;  %v1839_v50 = vadd.f32 %v10923_v16, %v1838_v17  ;;  %v2503_v53 = vmax.f32 %v10762_v19, %v2347_v57 }
 0x1fa   :  { %v1840_v55 = vpop.f32.mrf.mxu0 }
 0x1fb   :  { %v2117_v7 = vsel %vm2044_vm6, %v2114_v0, %v2116_v49  ;;  %v1969_v58 = vmax.f32 %v1839_v50, 0.0  ;;  %7934 = vmatmul.mubr.msk.f32.gmra.mxu1 %vm2563_vm7, %v2503_v53 }
 0x1fc   :  { %v2349_v33 = vpop.permute.xlu0 %2348  ;;  %v10947_v59 = vmax.f32 %v1967_v34, %v2117_v7 }
 0x1fd   :  { %v2118_v63 = vrot.slane %v1969_v58, 1  ;;  %v2504_v1 = vmax.f32 %v10772_v38, %v2349_v33  ;;  %v1843_v2 = vpop.f32.mrf.mxu0 }
 0x1fe   :  { %v1844_v6 = vadd.f32 %v10923_v16, %v1843_v2  ;;  %2394 = vrot.lane.b32.xlu1 %v10947_v59, %s9245_s5 }
 0x1ff   :  { %v2119_v19 = vsel %vm2044_vm6, %v2116_v49, %v2118_v63  ;;  %v1845_v22 = vpop.f32.mrf.mxu0  ;;  %7936 = vmatprep.mubr.msk.f32.mxu1 %vm2563_vm7, %v2504_v1 }
 0x200   :  { %v1970_v9 = vmax.f32 %v1844_v6, 0.0  ;;  %v10955_v10 = vmax.f32 %v1968_v47, %v2119_v19 }
 0x201   :  { %v1848_v13 = vpop.f32.mrf.mxu0  ;;  %v2351_v14 = vpop.permute.xlu1 %2350 }
 0x202   :  { %v2120_v61 = vrot.slane %v1970_v9, 1  ;;  %v1849_v15 = vadd.f32 %v10923_v16, %v1848_v13  ;;  %v2505_v38 = vmax.f32 %v10784_v54, %v2351_v14  ;;  %2396 = vrot.lane.b32.xlu0 %v10955_v10, %s9245_s5 }
 0x203   :  { %v1850_v20 = vpop.f32.mrf.mxu0 }
 0x204   :  { %v2121_v24 = vsel %vm2044_vm6, %v2118_v63, %v2120_v61  ;;  %v1971_v25 = vmax.f32 %v1849_v15, 0.0  ;;  %7937 = vmatmul.mubr.msk.f32.gmra.mxu1 %vm2563_vm7, %v2505_v38 }
 0x205   :  { %v2353_v48 = vpop.permute.xlu0 %2352  ;;  %v10963_v4 = vmax.f32 %v1969_v58, %v2121_v24 }
 0x206   :  { %v2122_v27 = vrot.slane %v1971_v25, 1  ;;  %v2506_v28 = vmax.f32 %v10792_v62, %v2353_v48 }
 0x207   :  { %2398 = vrot.lane.b32.xlu1 %v10963_v4, %s9245_s5 }
 0x208   :  { %v2123_v54 = vsel %vm2044_vm6, %v2120_v61, %v2122_v27  ;;  %v1853_v31 = vpop.f32.mrf.mxu0  ;;  %7939 = vmatprep.mubr.msk.f32.mxu1 %vm2563_vm7, %v2506_v28 }
 0x209   :  { %v1854_v34 = vadd.f32 %v10923_v16, %v1853_v31  ;;  %v10971_v35 = vmax.f32 %v1970_v9, %v2123_v54 }
 0x20a   :  { %v1855_v0 = vpop.f32.mrf.mxu0 }
 0x20b   :  { %v1972_v39 = vmax.f32 %v1854_v34, 0.0  ;;  %2400 = vrot.lane.b32.xlu0 %v10971_v35, %s9245_s5 }
 0x20c   :  { %v1858_v32 = vpop.f32.mrf.mxu0  ;;  %v2355_v41 = vpop.permute.xlu1 %2354 }
 0x20d   :  { %v2124_v62 = vrot.slane %v1972_v39, 1  ;;  %v1859_v42 = vadd.f32 %v10923_v16, %v1858_v32  ;;  %v2507_v45 = vmax.f32 %v10798_v11, %v2355_v41 }
 0x20e   :  { %v1860_v47 = vpop.f32.mrf.mxu0 }
 0x20f   :  { %v2125_v17 = vsel %vm2044_vm6, %v2122_v27, %v2124_v62  ;;  %v1973_v57 = vmax.f32 %v1859_v42, 0.0  ;;  %7940 = vmatmul.mubr.msk.f32.gmra.mxu1 %vm2563_vm7, %v2507_v45 }
 0x210   :  { %v2357_v49 = vpop.permute.xlu0 %2356  ;;  %v10979_v50 = vmax.f32 %v1971_v25, %v2125_v17 }
 0x211   :  { %v2126_v53 = vrot.slane %v1973_v57, 1  ;;  %v2508_v55 = vmax.f32 %v10804_v21, %v2357_v49  ;;  %v1863_v7 = vpop.f32.mrf.mxu0 }
 0x212   :  { %v1864_v58 = vadd.f32 %v10923_v16, %v1863_v7  ;;  %2402 = vrot.lane.b32.xlu1 %v10979_v50, %s9245_s5 }
 0x213   :  { %v2127_v11 = vsel %vm2044_vm6, %v2124_v62, %v2126_v53  ;;  %v1865_v33 = vpop.f32.mrf.mxu0  ;;  %7942 = vmatprep.mubr.msk.f32.mxu1 %vm2563_vm7, %v2508_v55 }
 0x214   :  { %v1974_v63 = vmax.f32 %v1864_v58, 0.0  ;;  %v10987_v1 = vmax.f32 %v1972_v39, %v2127_v11 }
 0x215   :  { %v1868_v2 = vpop.f32.mrf.mxu0  ;;  %v2359_v6 = vpop.permute.xlu1 %2358 }
 0x216   :  { %v2128_v19 = vrot.slane %v1974_v63, 1  ;;  %v1869_v22 = vadd.f32 %v10923_v16, %v1868_v2  ;;  %v2509_v21 = vmax.f32 %v10810_v29, %v2359_v6  ;;  %2404 = vrot.lane.b32.xlu0 %v10987_v1, %s9245_s5 }
 0x217   :  { %v1870_v9 = vpop.f32.mrf.mxu0 }
 0x218   :  { %v2129_v13 = vsel %vm2044_vm6, %v2126_v53, %v2128_v19  ;;  %v1975_v14 = vmax.f32 %v1869_v22, 0.0  ;;  %7943 = vmatmul.mubr.msk.f32.gmra.mxu1 %vm2563_vm7, %v2509_v21 }
 0x219   :  { %v2361_v61 = vpop.permute.xlu0 %2360  ;;  %v10995_v15 = vmax.f32 %v1973_v57, %v2129_v13 }
 0x21a   :  { %v2130_v38 = vrot.slane %v1975_v14, 1  ;;  %v2510_v20 = vmax.f32 %v10816_v36, %v2361_v61 }
 0x21b   :  { %2406 = vrot.lane.b32.xlu1 %v10995_v15, %s9245_s5 }
 0x21c   :  { %v2131_v29 = vsel %vm2044_vm6, %v2128_v19, %v2130_v38  ;;  %7945 = vmatprep.mubr.msk.f32.mxu1 %vm2563_vm7, %v2510_v20 }
 0x21d   :  { %v1873_v24 = vpop.f32.mrf.mxu0  ;;  %v11002_v25 = vmax.f32 %v1974_v63, %v2131_v29 }
 0x21e   :  { %v1874_v48 = vadd.f32 %v10923_v16, %v1873_v24 }
 0x21f   :  { %v1875_v27 = vpop.f32.mrf.mxu0  ;;  %2408 = vrot.lane.b32.xlu0 %v11002_v25, %s9245_s5 }
 0x220   :  { %v1976_v28 = vmax.f32 %v1874_v48, 0.0  ;;  %v2363_v54 = vpop.permute.xlu1 %2362 }
 0x221   :  { %v1878_v31 = vpop.f32.mrf.mxu0  ;;  %v2511_v36 = vmax.f32 %v10822_v46, %v2363_v54 }
 0x222   :  { %v2132_v34 = vrot.slane %v1976_v28, 1  ;;  %v1879_v0 = vadd.f32 %v10923_v16, %v1878_v31 }
 0x223   :  { %v1880_v39 = vpop.f32.mrf.mxu0  ;;  %7946 = vmatmul.mubr.msk.f32.gmra.mxu1 %vm2563_vm7, %v2511_v36 }
 0x224   :  { %v2133_v32 = vsel %vm2044_vm6, %v2130_v38, %v2132_v34  ;;  %v1977_v41 = vmax.f32 %v1879_v0, 0.0  ;;  %v2365_v62 = vpop.permute.xlu0 %2364 }
 0x225   :  { %v2512_v42 = vmax.f32 %v10828_v56, %v2365_v62  ;;  %v1883_v45 = vpop.f32.mrf.mxu0  ;;  %v11012_v47 = vmax.f32 %v1975_v14, %v2133_v32 }
 0x226   :  { %v2134_v17 = vrot.slane %v1977_v41, 1  ;;  %v1884_v57 = vadd.f32 %v10923_v16, %v1883_v45 }
 0x227   :  { %2410 = vrot.lane.b32.xlu1 %v11012_v47, %s9245_s5  ;;  %v1885_v46 = vpop.f32.mrf.mxu0  ;;  %7948 = vmatprep.mubr.msk.f32.mxu1 %vm2563_vm7, %v2512_v42 }
 0x228   :  { %v2135_v49 = vsel %vm2044_vm6, %v2132_v34, %v2134_v17  ;;  %v1978_v53 = vmax.f32 %v1884_v57, 0.0 }
 0x229   :  { %v1888_v55 = vpop.f32.mrf.mxu0  ;;  %v2367_v7 = vpop.permute.xlu1 %2366  ;;  %v11019_v58 = vmax.f32 %v1976_v28, %v2135_v49 }
 0x22a   :  { %v2136_v56 = vrot.slane %v1978_v53, 1  ;;  %v1889_v11 = vadd.f32 %v10923_v16, %v1888_v55  ;;  %v2513_v33 = vmax.f32 %v10834_v5, %v2367_v7 }
 0x22b   :  { %2412 = vrot.lane.b32.xlu0 %v11019_v58, %s9245_s5  ;;  %v1890_v63 = vpop.f32.mrf.mxu0 }
 0x22c   :  { %v2137_v2 = vsel %vm2044_vm6, %v2134_v17, %v2136_v56  ;;  %v1979_v6 = vmax.f32 %v1889_v11, 0.0  ;;  %7949 = vmatmul.mubr.msk.f32.gmra.mxu1 %vm2563_vm7, %v2513_v33 }
 0x22d   :  { %v2369_v19 = vpop.permute.xlu0 %2368  ;;  %v11027_v22 = vmax.f32 %v1977_v41, %v2137_v2 }
 0x22e   :  { %v2138_v21 = vrot.slane %v1979_v6, 1  ;;  %v2514_v9 = vmax.f32 %v10840_v12, %v2369_v19 }
 0x22f   :  { %2414 = vrot.lane.b32.xlu1 %v11027_v22, %s9245_s5 }
 0x230   :  { %v2139_v5 = vsel %vm2044_vm6, %v2136_v56, %v2138_v21  ;;  %7951 = vmatprep.mubr.msk.f32.mxu1 %vm2563_vm7, %v2514_v9 }
 0x231   :  { %v1893_v13 = vpop.f32.mrf.mxu0  ;;  %v11034_v14 = vmax.f32 %v1978_v53, %v2139_v5 }
 0x232   :  { %v1894_v61 = vadd.f32 %v10923_v16, %v1893_v13 }
 0x233   :  { %v1895_v38 = vpop.f32.mrf.mxu0  ;;  %2416 = vrot.lane.b32.xlu0 %v11034_v14, %s9245_s5 }
 0x234   :  { %v1980_v20 = vmax.f32 %v1894_v61, 0.0  ;;  %v2371_v29 = vpop.permute.xlu1 %2370 }
 0x235   :  { %v1898_v24 = vpop.f32.mrf.mxu0  ;;  %v2515_v12 = vmax.f32 %v10846_v26, %v2371_v29 }
 0x236   :  { %v2140_v48 = vrot.slane %v1980_v20, 1  ;;  %v1899_v27 = vadd.f32 %v10923_v16, %v1898_v24 }
 0x237   :  { %v1900_v28 = vpop.f32.mrf.mxu0  ;;  %7952 = vmatmul.mubr.msk.f32.gmra.mxu1 %vm2563_vm7, %v2515_v12 }
 0x238   :  { %v2141_v54 = vsel %vm2044_vm6, %v2138_v21, %v2140_v48  ;;  %v1981_v31 = vmax.f32 %v1899_v27, 0.0  ;;  %v2373_v36 = vpop.permute.xlu0 %2372 }
 0x239   :  { %v2516_v34 = vmax.f32 %v10854_v40, %v2373_v36  ;;  %v1903_v0 = vpop.f32.mrf.mxu0  ;;  %v11044_v39 = vmax.f32 %v1979_v6, %v2141_v54 }
 0x23a   :  { %v2142_v32 = vrot.slane %v1981_v31, 1  ;;  %v1904_v41 = vadd.f32 %v10923_v16, %v1903_v0 }
 0x23b   :  { %2418 = vrot.lane.b32.xlu1 %v11044_v39, %s9245_s5  ;;  %v1905_v26 = vpop.f32.mrf.mxu0  ;;  %7954 = vmatprep.mubr.msk.f32.mxu1 %vm2563_vm7, %v2516_v34 }
 0x23c   :  { %v2143_v62 = vsel %vm2044_vm6, %v2140_v48, %v2142_v32  ;;  %v1982_v42 = vmax.f32 %v1904_v41, 0.0 }
 0x23d   :  { %v1908_v45 = vpop.f32.mrf.mxu0  ;;  %v2375_v17 = vpop.permute.xlu1 %2374  ;;  %v11051_v57 = vmax.f32 %v1980_v20, %v2143_v62 }
 0x23e   :  { %v2144_v40 = vrot.slane %v1982_v42, 1  ;;  %v1909_v46 = vadd.f32 %v10923_v16, %v1908_v45  ;;  %v2517_v49 = vmax.f32 %v10862_v52, %v2375_v17 }
 0x23f   :  { %2420 = vrot.lane.b32.xlu0 %v11051_v57, %s9245_s5  ;;  %v1910_v53 = vpop.f32.mrf.mxu0 }
 0x240   :  { %v2145_v55 = vsel %vm2044_vm6, %v2142_v32, %v2144_v40  ;;  %v1983_v7 = vmax.f32 %v1909_v46, 0.0  ;;  %7955 = vmatmul.mubr.msk.f32.gmra.mxu1 %vm2563_vm7, %v2517_v49 }
 0x241   :  { %v2377_v56 = vpop.permute.xlu0 %2376  ;;  %v11059_v11 = vmax.f32 %v1981_v31, %v2145_v55  ;;  %v4365_v55 = vld [vmem:[%s14146_s3 + $0x78] sm:$0xff] }
 0x242   :  { %v2146_v33 = vrot.slane %v1983_v7, 1  ;;  %v2518_v63 = vmax.f32 %v10870_v60, %v2377_v56  ;;  %4510 = vmatpush1.msra.mxu1 %v4365_v55  ;;  %v4363_v56 = vld [vmem:[%s14146_s3 + $0x68] sm:$0xff] }
 0x243   :  { %2422 = vrot.lane.b32.xlu1 %v11059_v11, %s9245_s5  ;;  %4511 = vmatprep.subr.mxu1 %v9240_v3  ;;  %v4375_v55 = vld [vmem:[%s14146_s3 + $0xc8] sm:$0xff] }
 0x244   :  { %v2147_v52 = vsel %vm2044_vm6, %v2144_v40, %v2146_v33  ;;  %7957 = vmatprep.mubr.msk.f32.mxu1 %vm2563_vm7, %v2518_v63 }
 0x245   :  { %v1913_v2 = vpop.f32.mrf.mxu0  ;;  %v11066_v6 = vmax.f32 %v1982_v42, %v2147_v52  ;;  %v4362_v52 = vld [vmem:[%s14146_s3 + $0x60] sm:$0xff] }
 0x246   :  { %v1914_v19 = vadd.f32 %v10923_v16, %v1913_v2  ;;  %v4361_v2 = vld [vmem:[%s14146_s3 + $0x58] sm:$0xff] }
 0x247   :  { %v1915_v21 = vpop.f32.mrf.mxu0  ;;  %2424 = vrot.lane.b32.xlu0 %v11066_v6, %s9245_s5 }
 0x248   :  { %v1984_v9 = vmax.f32 %v1914_v19, 0.0  ;;  %v2379_v5 = vpop.permute.xlu1 %2378 }
 0x249   :  { %v1918_v13 = vpop.f32.mrf.mxu0  ;;  %v2519_v60 = vmax.f32 %v10878_v18, %v2379_v5 }
 0x24a   :  { %v2148_v61 = vrot.slane %v1984_v9, 1  ;;  %v1919_v38 = vadd.f32 %v10923_v16, %v1918_v13  ;;  %v4358_v13 = vld [vmem:[%s14146_s3 + $0x40] sm:$0xff] }
 0x24b   :  { %v1920_v20 = vpop.f32.mrf.mxu0  ;;  %7958 = vmatmul.mubr.msk.f32.gmra.mxu1 %vm2563_vm7, %v2519_v60  ;;  %v4357_v60 = vld [vmem:[%s14146_s3 + $0x38] sm:$0xff] }
 0x24c   :  { %v2149_v29 = vsel %vm2044_vm6, %v2146_v33, %v2148_v61  ;;  %v1985_v24 = vmax.f32 %v1919_v38, 0.0  ;;  %v2381_v12 = vpop.permute.xlu0 %2380  ;;  %v4355_v20 = vld [vmem:[%s14146_s3 + $0x28] sm:$0xff] }
 0x24d   :  { %v2520_v48 = vmax.f32 %v10886_v30, %v2381_v12  ;;  %v1923_v27 = vpop.f32.mrf.mxu0  ;;  %v11076_v28 = vmax.f32 %v1983_v7, %v2149_v29  ;;  %v4386_v12 = vld [vmem:[%s14146_s3 + $0x120] sm:$0xff] }
 0x24e   :  { %v2150_v54 = vrot.slane %v1985_v24, 1  ;;  %v1924_v31 = vadd.f32 %v10923_v16, %v1923_v27  ;;  %v4353_v27 = vld [vmem:[%s14146_s3 + $0x18] sm:$0xff] }
 0x24f   :  { %2426 = vrot.lane.b32.xlu1 %v11076_v28, %s9245_s5  ;;  %v1925_v18 = vpop.f32.mrf.mxu0  ;;  %7960 = vmatprep.mubr.msk.f32.mxu1 %vm2563_vm7, %v2520_v48 }
 0x250   :  { %v2151_v36 = vsel %vm2044_vm6, %v2148_v61, %v2150_v54  ;;  %v1986_v34 = vmax.f32 %v1924_v31, 0.0 }
 0x251   :  { %v1928_v0 = vpop.f32.mrf.mxu0  ;;  %v2383_v32 = vpop.permute.xlu1 %2382  ;;  %v11083_v41 = vmax.f32 %v1984_v9, %v2151_v36  ;;  %v4359_v9 = vld [vmem:[%s14146_s3 + $0x48] sm:$0xff] }
 0x252   :  { %v2152_v30 = vrot.slane %v1986_v34, 1  ;;  %v1929_v26 = vadd.f32 %v10923_v16, %v1928_v0  ;;  %v2521_v62 = vmax.f32 %v10894_v44, %v2383_v32  ;;  %v4351_v36 = vld [vmem:[%s14146_s3 + $0x8] sm:$0xff] }
 0x253   :  { %2428 = vrot.lane.b32.xlu0 %v11083_v41, %s9245_s5  ;;  %v1930_v42 = vpop.f32.mrf.mxu0 }
 0x254   :  { %v2153_v45 = vsel %vm2044_vm6, %v2150_v54, %v2152_v30  ;;  %v1987_v17 = vmax.f32 %v1929_v26, 0.0  ;;  %7961 = vmatmul.mubr.msk.f32.gmra.mxu1 %vm2563_vm7, %v2521_v62  ;;  %v4352_v54 = vld [vmem:[%s14146_s3 + $0x10] sm:$0xff]  ;;  %v4383_v26 = vld [vmem:[%s14146_s3 + $0x108] sm:$0xff]  ;;  %v4382_v62 = vld [vmem:[%s14146_s3 + $0x100] sm:$0xff] }
 0x255   :  { %v2385_v40 = vpop.permute.xlu0 %2384  ;;  %v11091_v46 = vmax.f32 %v1985_v24, %v2153_v45  ;;  %v4387_v24 = vld [vmem:[%s14146_s3 + $0x128] sm:$0xf] }
 0x256   :  { %v2154_v49 = vrot.slane %v1987_v17, 1  ;;  %v2522_v53 = vmax.f32 %v10902_v51, %v2385_v40  ;;  %v4364_v51 = vld [vmem:[%s14146_s3 + $0x70] sm:$0xff]  ;;  %8003 = vmatpush3.msk.msra.mxu0 %vm1583_vm0, %v4387_v24  ;;  %v4378_v40 = vld [vmem:[%s14146_s3 + $0xe0] sm:$0xff] }
 0x257   :  { %2430 = vrot.lane.b32.xlu1 %v11091_v46, %s9245_s5  ;;  %4512 = vmatpush1.msra.mxu1 %v4364_v51 }
 0x258   :  { %v2155_v44 = vsel %vm2044_vm6, %v2152_v30, %v2154_v49  ;;  %v11097_v16 = vmax.f32 %v1987_v17, %v2154_v49  ;;  %7963 = vmatprep.mubr.msk.f32.mxu1 %vm2563_vm7, %v2522_v53  ;;  %4513 = vmatprep.subr.mxu1 %v9240_v3  ;;  %v4381_v30 = vld [vmem:[%s14146_s3 + $0xf8] sm:$0xff]  ;;  %v4379_v17 = vld [vmem:[%s14146_s3 + $0xe8] sm:$0xff] }
 0x259   :  { %v11103_v7 = vmax.f32 %v1986_v34, %v2155_v44  ;;  %4514 = vmatpush1.msra.mxu1 %v4363_v56  ;;  %8004 = vmatprep.subr.mxu0 %v9240_v3  ;;  %v4384_v34 = vld [vmem:[%s14146_s3 + $0x110] sm:$0xff] }
 0x25a   :  { %4515 = vmatprep.subr.mxu1 %v9240_v3  ;;  %8005 = vmatpush3.msra.mxu0 %v4386_v12  ;;  %v4376_v44 = vld [vmem:[%s14146_s3 + $0xd0] sm:$0xff] }
 0x25b   :  { %2434 = vrot.lane.b32.xlu1 %v11097_v16, %s9245_s5  ;;  %2432 = vrot.lane.b32.xlu0 %v11103_v7, %s9245_s5 }
 0x25c   :  { %v2387_v33 = vpop.permute.xlu1 %2386  ;;  %4516 = vmatpush1.msra.mxu1 %v4362_v52  ;;  %8006 = vmatprep.subr.mxu0 %v9240_v3 }
 0x25d   :  { %v2523_v63 = vmax.f32 %v10910_v8, %v2387_v33  ;;  %4517 = vmatprep.subr.mxu1 %v9240_v3  ;;  %v4360_v8 = vld [vmem:[%s14146_s3 + $0x50] sm:$0xff] }
 0x25e   :  { %4518 = vmatpush1.msra.mxu1 %v4361_v2  ;;  %v4372_v2 = vld [vmem:[%s14146_s3 + $0xb0] sm:$0xff] }
 0x25f   :  { %7964 = vmatmul.mubr.msk.f32.gmra.mxu1 %vm2563_vm7, %v2523_v63  ;;  %4519 = vmatprep.subr.mxu1 %v9240_v3  ;;  %v4373_v63 = vld [vmem:[%s14146_s3 + $0xb8] sm:$0xff] }
 0x260   :  { %v2389_v19 = vpop.permute.xlu0 %2388  ;;  %4520 = vmatpush1.msra.mxu1 %v4360_v8 }
 0x261   :  { %v2524_v21 = vmax.f32 %v10918_v23, %v2389_v19  ;;  %4521 = vmatprep.subr.mxu1 %v9240_v3  ;;  %v4371_v19 = vld [vmem:[%s14146_s3 + $0xa8] sm:$0xff] }
 0x262   :  { %4522 = vmatpush1.msra.mxu1 %v4359_v9 }
 0x263   :  { %7966 = vmatprep.mubr.msk.f32.mxu1 %vm2563_vm7, %v2524_v21  ;;  %4523 = vmatprep.subr.mxu1 %v9240_v3 }
 0x264   :  { %4524 = vmatpush1.msra.mxu1 %v4358_v13 }
 0x265   :  { %v2391_v5 = vpop.permute.xlu1 %2390  ;;  %4525 = vmatprep.subr.mxu1 %v9240_v3 }
 0x266   :  { %v2525_v23 = vmax.f32 %v10931_v37, %v2391_v5  ;;  %v4356_v37 = vld [vmem:[%s14146_s3 + $0x30] sm:$0xff]  ;;  %4526 = vmatpush1.msra.mxu1 %v4357_v60  ;;  %v4370_v5 = vld [vmem:[%s14146_s3 + $0xa0] sm:$0xff] }
 0x267   :  { %4527 = vmatprep.subr.mxu1 %v9240_v3 }
 0x268   :  { %7967 = vmatmul.mubr.msk.f32.gmra.mxu1 %vm2563_vm7, %v2525_v23 }
 0x269   :  { %v2393_v61 = vpop.permute.xlu0 %2392  ;;  %4528 = vmatpush1.msra.mxu1 %v4356_v37 }
 0x26a   :  { %v2526_v38 = vmax.f32 %v10939_v43, %v2393_v61  ;;  %4529 = vmatprep.subr.mxu1 %v9240_v3  ;;  %v4354_v43 = vld [vmem:[%s14146_s3 + $0x20] sm:$0xff] }
 0x26b   :  { %4530 = vmatpush1.msra.mxu1 %v4355_v20  ;;  %v4369_v20 = vld [vmem:[%s14146_s3 + $0x98] sm:$0xff] }
 0x26c   :  { %7969 = vmatprep.mubr.msk.f32.mxu1 %vm2563_vm7, %v2526_v38  ;;  %4531 = vmatprep.subr.mxu1 %v9240_v3 }
 0x26d   :  { %4532 = vmatpush1.msra.mxu1 %v4354_v43 }
 0x26e   :  { %4533 = vmatprep.subr.mxu1 %v9240_v3 }
 0x26f   :  { %4534 = vmatpush1.msra.mxu1 %v4353_v27  ;;  %v4368_v27 = vld [vmem:[%s14146_s3 + $0x90] sm:$0xff] }
 0x270   :  { %v2395_v29 = vpop.permute.xlu1 %2394  ;;  %4535 = vmatprep.subr.mxu1 %v9240_v3 }
 0x271   :  { %v2527_v48 = vmax.f32 %v10947_v59, %v2395_v29  ;;  %v4385_v59 = vld [vmem:[%s14146_s3 + $0x118] sm:$0xff]  ;;  %4536 = vmatpush1.msra.mxu1 %v4352_v54 }
 0x272   :  { %8007 = vmatpush3.msra.mxu0 %v4385_v59  ;;  %4537 = vmatprep.subr.mxu1 %v9240_v3 }
 0x273   :  { %7970 = vmatmul.mubr.msk.f32.gmra.mxu1 %vm2563_vm7, %v2527_v48  ;;  %8008 = vmatprep.subr.mxu0 %v9240_v3 }
 0x274   :  { %v2397_v31 = vpop.permute.xlu0 %2396  ;;  %4538 = vmatpush1.msra.mxu1 %v4351_v36  ;;  %8009 = vmatpush3.msra.mxu0 %v4384_v34 }
 0x275   :  { %v2528_v18 = vmax.f32 %v10955_v10, %v2397_v31  ;;  %v4350_v10 = vld [vmem:[%s14146_s3] sm:$0xff]  ;;  %4539 = vmatprep.subr.mxu1 %v9240_v3  ;;  %8010 = vmatprep.subr.mxu0 %v9240_v3 }
 0x276   :  { %4540 = vmatpush1.msra.mxu1 %v4350_v10  ;;  %8011 = vmatpush3.msra.mxu0 %v4383_v26 }
 0x277   :  { %7972 = vmatprep.mubr.msk.f32.mxu1 %vm2563_vm7, %v2528_v18  ;;  %4541 = vmatprep.subr.mxu1 %v9240_v3 }
 0x278   :  { %8012 = vmatprep.subr.mxu0 %v9240_v3  ;;  %4542 = vmatpush2.msra.mxu1 %v4381_v30 }
 0x279   :  { %v2399_v0 = vpop.permute.xlu1 %2398  ;;  %8013 = vmatpush3.msra.mxu0 %v4382_v62  ;;  %4543 = vmatprep.subr.mxu1 %v9240_v3 }
 0x27a   :  { %v2529_v32 = vmax.f32 %v10963_v4, %v2399_v0  ;;  %v4380_v4 = vld [vmem:[%s14146_s3 + $0xf0] sm:$0xff]  ;;  %v4367_v0 = vld [vmem:[%s14146_s3 + $0x88] sm:$0xff] }
 0x27b   :  { %4544 = vmatpush2.msra.mxu1 %v4380_v4 }
 0x27c   :  { %7973 = vmatmul.mubr.msk.f32.gmra.mxu1 %vm2563_vm7, %v2529_v32  ;;  %4545 = vmatprep.subr.mxu1 %v9240_v3 }
 0x27d   :  { %v2401_v42 = vpop.permute.xlu0 %2400  ;;  %4546 = vmatpush2.msra.mxu1 %v4379_v17 }
 0x27e   :  { %v2530_v45 = vmax.f32 %v10971_v35, %v2401_v42  ;;  %4547 = vmatprep.subr.mxu1 %v9240_v3  ;;  %v4377_v35 = vld [vmem:[%s14146_s3 + $0xd8] sm:$0xff]  ;;  %v4366_v42 = vld [vmem:[%s14146_s3 + $0x80] sm:$0xff] }
 0x27f   :  { %4548 = vmatpush2.msra.mxu1 %v4378_v40 }
 0x280   :  { %7975 = vmatprep.mubr.msk.f32.mxu1 %vm2563_vm7, %v2530_v45  ;;  %4549 = vmatprep.subr.mxu1 %v9240_v3 }
 0x281   :  { %4550 = vmatpush2.msra.mxu1 %v4377_v35 }
 0x282   :  { %4551 = vmatprep.subr.mxu1 %v9240_v3 }
 0x283   :  { %4552 = vmatpush2.msra.mxu1 %v4376_v44 }
 0x284   :  { %v2403_v49 = vpop.permute.xlu1 %2402  ;;  %4553 = vmatprep.subr.mxu1 %v9240_v3 }
 0x285   :  { %v2531_v53 = vmax.f32 %v10979_v50, %v2403_v49  ;;  %v4374_v50 = vld [vmem:[%s14146_s3 + $0xc0] sm:$0xff]  ;;  %4554 = vmatpush2.msra.mxu1 %v4375_v55 }
 0x286   :  { %4555 = vmatprep.subr.mxu1 %v9240_v3 }
 0x287   :  { %7976 = vmatmul.mubr.msk.f32.gmra.mxu1 %vm2563_vm7, %v2531_v53 }
 0x288   :  { %v11240_v51 = vpop.f32.mrf.mxu1  ;;  %v2405_v56 = vpop.permute.xlu0 %2404  ;;  %4556 = vmatpush2.msra.mxu1 %v4374_v50 }
 0x289   :  { %v2532_v33 = vmax.f32 %v10987_v1, %v2405_v56  ;;  %3962 = vrot.lane.b32.xlu1 %v11240_v51, %s9243_s23  ;;  %4557 = vmatprep.subr.mxu1 %v9240_v3  ;;  %v3687_v61 = vrot.slane %v11240_v51, 6  ;;  %v3137_v54 = vrot.slane %v11240_v51, 2 }
 0x28a   :  { %4558 = vmatpush2.msra.mxu1 %v4373_v63  ;;  %v11264_v21 = vpop.f32.mrf.mxu1 }
 0x28b   :  { %7978 = vmatprep.mubr.msk.f32.mxu1 %vm2563_vm7, %v2532_v33  ;;  %4559 = vmatprep.subr.mxu1 %v9240_v3  ;;  %v3410_v23 = vrot.slane %v11264_v21, 4  ;;  %v3686_v13 = vrot.slane %v11264_v21, 6  ;;  %v3136_v31 = vrot.slane %v11264_v21, 2 }
 0x28c   :  { %4560 = vmatpush2.msra.mxu1 %v4372_v2 }
 0x28d   :  { %v2407_v1 = vpop.permute.xlu1 %2406  ;;  %4561 = vmatprep.subr.mxu1 %v9240_v3  ;;  %v3688_v29 = vsel %vm3685_vm9, %v3686_v13, %v3687_v61  ;;  %v3138_v30 = vsel %vm3135_vm10, %v3136_v31, %v3137_v54 }
 0x28e   :  { %v2533_v52 = vmax.f32 %v10995_v15, %v2407_v1  ;;  %4562 = vmatpush2.msra.mxu1 %v4371_v19 }
 0x28f   :  { %4563 = vmatprep.subr.mxu1 %v9240_v3 }
 0x290   :  { %7979 = vmatmul.mubr.msk.f32.gmra.mxu1 %vm2563_vm7, %v2533_v52 }
 0x291   :  { %v2409_v8 = vpop.permute.xlu0 %2408  ;;  %4564 = vmatpush2.msra.mxu1 %v4370_v5 }
 0x292   :  { %v2534_v9 = vmax.f32 %v11002_v25, %v2409_v8  ;;  %v3411_v25 = vrot.slane %v11240_v51, 4  ;;  %4565 = vmatprep.subr.mxu1 %v9240_v3 }
 0x293   :  { %v11268_v15 = vpop.f32.mrf.mxu1  ;;  %4566 = vmatpush2.msra.mxu1 %v4369_v20 }
 0x294   :  { %3966 = vrot.lane.b32.xlu0 %v11268_v15, %s9243_s23  ;;  %7981 = vmatprep.mubr.msk.f32.mxu1 %vm2563_vm7, %v2534_v9  ;;  %v3412_v12 = vsel %vm1583_vm0, %v3410_v23, %v3411_v25  ;;  %v3691_v45 = vrot.slane %v11268_v15, 6  ;;  %v3141_v50 = vrot.slane %v11268_v15, 2 }
 0x295   :  { %v11278_v60 = vpop.f32.mrf.mxu1  ;;  %4567 = vmatprep.subr.mxu1 %v9240_v3 }
 0x296   :  { %v3413_v38 = vrot.slane %v11278_v60, 4  ;;  %v3689_v37 = vrot.slane %v11278_v60, 6  ;;  %v3139_v43 = vrot.slane %v11278_v60, 2  ;;  %4568 = vmatpush2.msra.mxu1 %v4368_v27 }
 0x297   :  { %4569 = vmatprep.subr.mxu1 %v9240_v3 }
 0x298   :  { %3964 = vrot.lane.b32.xlu0 %v11278_v60, %s9243_s23  ;;  %v3690_v24 = vsel %vm3685_vm9, %v3687_v61, %v3689_v37  ;;  %v3414_v48 = vsel %vm1583_vm0, %v3411_v25, %v3413_v38  ;;  %v3140_v10 = vsel %vm3135_vm10, %v3137_v54, %v3139_v43  ;;  %4570 = vmatpush2.msra.mxu1 %v4367_v0 }
 0x299   :  { %v2411_v59 = vpop.permute.xlu1 %2410  ;;  %v8830_v18 = vpack.i.bf16 %v3690_v24, %v3688_v29  ;;  %v8825_v36 = vpack.i.bf16 %v3414_v48, %v3412_v12  ;;  %v8835_v4 = vpack.i.bf16 %v3140_v10, %v3138_v30  ;;  %4571 = vmatprep.subr.mxu1 %v9240_v3  ;;  %v3692_v49 = vsel %vm3685_vm9, %v3689_v37, %v3691_v45 }
 0x29a   :  { %v2535_v34 = vmax.f32 %v11012_v47, %v2411_v59  ;;  %4572 = vmatpush2.msra.mxu1 %v4366_v42  ;;  %v3142_v8 = vsel %vm3135_vm10, %v3139_v43, %v3141_v50 }
 0x29b   :  { %8831 = vrot.lane.b32.xlu1 %v8830_v18, %s9247_s15  ;;  %8179 = vmatprep.subr.mxu1 %v9240_v3 }
 0x29c   :  { %7982 = vmatmul.mubr.msk.f32.gmra.mxu1 %vm2563_vm7, %v2535_v34  ;;  %8826 = vrot.lane.b32.xlu0 %v8825_v36, %s9248_s25  ;;  %v11312_v47 = vpop.f32.mrf.mxu1 }
 0x29d   :  { %v2413_v32 = vpop.permute.xlu0 %2412  ;;  %v3695_v23 = vrot.slane %v11312_v47, 6  ;;  %v3145_v29 = vrot.slane %v11312_v47, 2 }
 0x29e   :  { %v2536_v26 = vmax.f32 %v11019_v58, %v2413_v32  ;;  %v11317_v62 = vpop.f32.mrf.mxu1  ;;  %v3415_v58 = vrot.slane %v11268_v15, 4 }
 0x29f   :  { %v3417_v17 = vrot.slane %v11317_v62, 4  ;;  %v3693_v40 = vrot.slane %v11317_v62, 6  ;;  %3970 = vrot.lane.b32.xlu1 %v11312_v47, %s9243_s23  ;;  %v3143_v44 = vrot.slane %v11317_v62, 2 }
 0x2a0   :  { %7984 = vmatprep.mubr.msk.f32.mxu1 %vm2563_vm7, %v2536_v26  ;;  %8836 = vrot.lane.b32.xlu0 %v8835_v4, %s9249_s0  ;;  %v3416_v63 = vsel %vm1583_vm0, %v3413_v38, %v3415_v58 }
 0x2a1   :  { %v2415_v35 = vpop.permute.xlu1 %2414  ;;  %v3694_v53 = vsel %vm3685_vm9, %v3691_v45, %v3693_v40  ;;  %v3418_v33 = vsel %vm1583_vm0, %v3415_v58, %v3417_v17  ;;  %v3144_v2 = vsel %vm3135_vm10, %v3141_v50, %v3143_v44  ;;  %v3696_v38 = vsel %vm3685_vm9, %v3693_v40, %v3695_v23 }
 0x2a2   :  { %v2537_v55 = vmax.f32 %v11027_v22, %v2415_v35  ;;  %v8845_v56 = vpack.i.bf16 %v3694_v53, %v3692_v49  ;;  %v8840_v52 = vpack.i.bf16 %v3418_v33, %v3416_v63  ;;  %v8850_v5 = vpack.i.bf16 %v3144_v2, %v3142_v8 }
 0x2a3   :  { %3968 = vrot.lane.b32.xlu1 %v11317_v62, %s9243_s23  ;;  %v3146_v18 = vsel %vm3135_vm10, %v3143_v44, %v3145_v29 }
 0x2a4   :  { %8846 = vrot.lane.b32.xlu0 %v8845_v56, %s9247_s15  ;;  %7985 = vmatmul.mubr.msk.f32.gmra.mxu1 %vm2563_vm7, %v2537_v55 }
 0x2a5   :  { %v2417_v1 = vpop.permute.xlu0 %2416 }
 0x2a6   :  { %v2538_v22 = vmax.f32 %v11034_v14, %v2417_v1  ;;  %v3419_v14 = vrot.slane %v11312_v47, 4 }
 0x2a7   :  { %8841 = vrot.lane.b32.xlu1 %v8840_v52, %s9248_s25  ;;  %v11346_v19 = vpop.f32.mrf.mxu1 }
 0x2a8   :  { %3974 = vrot.lane.b32.xlu0 %v11346_v19, %s9243_s23  ;;  %7987 = vmatprep.mubr.msk.f32.mxu1 %vm2563_vm7, %v2538_v22  ;;  %v3420_v20 = vsel %vm1583_vm0, %v3417_v17, %v3419_v14  ;;  %v3423_v30 = vrot.slane %v11346_v19, 4  ;;  %v3149_v58 = vrot.slane %v11346_v19, 2 }
 0x2a9   :  { %v11354_v9 = vpop.f32.mrf.mxu1 }
 0x2aa   :  { %v3421_v13 = vrot.slane %v11354_v9, 4  ;;  %v3697_v25 = vrot.slane %v11354_v9, 6  ;;  %v3147_v61 = vrot.slane %v11354_v9, 2 }
 0x2ab   :  { %8851 = vrot.lane.b32.xlu1 %v8850_v5, %s9249_s0 }
 0x2ac   :  { %3972 = vrot.lane.b32.xlu0 %v11354_v9, %s9243_s23  ;;  %v3698_v37 = vsel %vm3685_vm9, %v3695_v23, %v3697_v25  ;;  %v3422_v43 = vsel %vm1583_vm0, %v3419_v14, %v3421_v13  ;;  %v3148_v54 = vsel %vm3135_vm10, %v3145_v29, %v3147_v61  ;;  %v3424_v35 = vsel %vm1583_vm0, %v3421_v13, %v3423_v30 }
 0x2ad   :  { %v2419_v24 = vpop.permute.xlu1 %2418  ;;  %v8860_v12 = vpack.i.bf16 %v3698_v37, %v3696_v38  ;;  %v8855_v48 = vpack.i.bf16 %v3422_v43, %v3420_v20  ;;  %v8865_v10 = vpack.i.bf16 %v3148_v54, %v3146_v18  ;;  %v3150_v56 = vsel %vm3135_vm10, %v3147_v61, %v3149_v58 }
 0x2ae   :  { %v2539_v27 = vmax.f32 %v11044_v39, %v2419_v24  ;;  %v3699_v39 = vrot.slane %v11346_v19, 6 }
 0x2af   :  { %8861 = vrot.lane.b32.xlu1 %v8860_v12, %s9247_s15 }
 0x2b0   :  { %7988 = vmatmul.mubr.msk.f32.gmra.mxu1 %vm2563_vm7, %v2539_v27  ;;  %8856 = vrot.lane.b32.xlu0 %v8855_v48, %s9248_s25  ;;  %v11374_v31 = vpop.f32.mrf.mxu1 }
 0x2b1   :  { %v2421_v59 = vpop.permute.xlu0 %2420  ;;  %v3427_v63 = vrot.slane %v11374_v31, 4  ;;  %v3153_v23 = vrot.slane %v11374_v31, 2 }
 0x2b2   :  { %v2540_v36 = vmax.f32 %v11051_v57, %v2421_v59  ;;  %v11378_v34 = vpop.f32.mrf.mxu1  ;;  %v3700_v57 = vsel %vm3685_vm9, %v3697_v25, %v3699_v39 }
 0x2b3   :  { %v3425_v0 = vrot.slane %v11378_v34, 4  ;;  %v3701_v32 = vrot.slane %v11378_v34, 6  ;;  %3978 = vrot.lane.b32.xlu1 %v11374_v31, %s9243_s23  ;;  %v3151_v42 = vrot.slane %v11378_v34, 2 }
 0x2b4   :  { %7990 = vmatprep.mubr.msk.f32.mxu1 %vm2563_vm7, %v2540_v36  ;;  %8866 = vrot.lane.b32.xlu0 %v8865_v10, %s9249_s0 }
 0x2b5   :  { %v2423_v26 = vpop.permute.xlu1 %2422  ;;  %v3702_v4 = vsel %vm3685_vm9, %v3699_v39, %v3701_v32  ;;  %v3426_v40 = vsel %vm1583_vm0, %v3423_v30, %v3425_v0  ;;  %v3428_v5 = vsel %vm1583_vm0, %v3425_v0, %v3427_v63  ;;  %v3154_v29 = vsel %vm3135_vm10, %v3151_v42, %v3153_v23 }
 0x2b6   :  { %v2541_v45 = vmax.f32 %v11059_v11, %v2423_v26  ;;  %v8875_v17 = vpack.i.bf16 %v3702_v4, %v3700_v57  ;;  %v8870_v53 = vpack.i.bf16 %v3426_v40, %v3424_v35  ;;  %v3152_v11 = vsel %vm3135_vm10, %v3149_v58, %v3151_v42 }
 0x2b7   :  { %3976 = vrot.lane.b32.xlu1 %v11378_v34, %s9243_s23  ;;  %v8880_v50 = vpack.i.bf16 %v3152_v11, %v3150_v56 }
 0x2b8   :  { %8876 = vrot.lane.b32.xlu0 %v8875_v17, %s9247_s15  ;;  %7991 = vmatmul.mubr.msk.f32.gmra.mxu1 %vm2563_vm7, %v2541_v45 }
 0x2b9   :  { %v2425_v49 = vpop.permute.xlu0 %2424 }
 0x2ba   :  { %v2542_v44 = vmax.f32 %v11066_v6, %v2425_v49  ;;  %v3703_v6 = vrot.slane %v11374_v31, 6 }
 0x2bb   :  { %8871 = vrot.lane.b32.xlu1 %v8870_v53, %s9248_s25  ;;  %v11402_v55 = vpop.f32.mrf.mxu1 }
 0x2bc   :  { %3982 = vrot.lane.b32.xlu0 %v11402_v55, %s9243_s23  ;;  %7993 = vmatprep.mubr.msk.f32.mxu1 %vm2563_vm7, %v2542_v44  ;;  %v3704_v2 = vsel %vm3685_vm9, %v3701_v32, %v3703_v6  ;;  %v3431_v59 = vrot.slane %v11402_v55, 4  ;;  %v3157_v30 = vrot.slane %v11402_v55, 2 }
 0x2bd   :  { %v11408_v33 = vpop.f32.mrf.mxu1 }
 0x2be   :  { %v3429_v1 = vrot.slane %v11408_v33, 4  ;;  %v3705_v52 = vrot.slane %v11408_v33, 6  ;;  %v3155_v22 = vrot.slane %v11408_v33, 2 }
 0x2bf   :  { %8881 = vrot.lane.b32.xlu1 %v8880_v50, %s9249_s0 }
 0x2c0   :  { %3980 = vrot.lane.b32.xlu0 %v11408_v33, %s9243_s23  ;;  %v3706_v8 = vsel %vm3685_vm9, %v3703_v6, %v3705_v52  ;;  %v3430_v14 = vsel %vm1583_vm0, %v3427_v63, %v3429_v1  ;;  %v3156_v37 = vsel %vm3135_vm10, %v3153_v23, %v3155_v22  ;;  %v3432_v26 = vsel %vm1583_vm0, %v3429_v1, %v3431_v59 }
 0x2c1   :  { %v2427_v13 = vpop.permute.xlu1 %2426  ;;  %v8890_v25 = vpack.i.bf16 %v3706_v8, %v3704_v2  ;;  %v8885_v61 = vpack.i.bf16 %v3430_v14, %v3428_v5  ;;  %v8895_v48 = vpack.i.bf16 %v3156_v37, %v3154_v29  ;;  %v3158_v58 = vsel %vm3135_vm10, %v3155_v22, %v3157_v30 }
 0x2c2   :  { %v2543_v38 = vmax.f32 %v11076_v28, %v2427_v13  ;;  %v3707_v28 = vrot.slane %v11402_v55, 6 }
 0x2c3   :  { %8891 = vrot.lane.b32.xlu1 %v8890_v25, %s9247_s15 }
 0x2c4   :  { %7994 = vmatmul.mubr.msk.f32.gmra.mxu1 %vm2563_vm7, %v2543_v38  ;;  %8886 = vrot.lane.b32.xlu0 %v8885_v61, %s9248_s25  ;;  %v11428_v20 = vpop.f32.mrf.mxu1 }
 0x2c5   :  { %v2429_v43 = vpop.permute.xlu0 %2428  ;;  %v3711_v49 = vrot.slane %v11428_v20, 6  ;;  %v3161_v1 = vrot.slane %v11428_v20, 2 }
 0x2c6   :  { %v2544_v24 = vmax.f32 %v11083_v41, %v2429_v43  ;;  %v11432_v12 = vpop.f32.mrf.mxu1  ;;  %v3708_v41 = vsel %vm3685_vm9, %v3705_v52, %v3707_v28 }
 0x2c7   :  { %v3433_v27 = vrot.slane %v11432_v12, 4  ;;  %v3709_v54 = vrot.slane %v11432_v12, 6  ;;  %3986 = vrot.lane.b32.xlu1 %v11428_v20, %s9243_s23  ;;  %v3159_v10 = vrot.slane %v11432_v12, 2 }
 0x2c8   :  { %7996 = vmatprep.mubr.msk.f32.mxu1 %vm2563_vm7, %v2544_v24  ;;  %8896 = vrot.lane.b32.xlu0 %v8895_v48, %s9249_s0 }
 0x2c9   :  { %v2431_v18 = vpop.permute.xlu1 %2430  ;;  %v3710_v36 = vsel %vm3685_vm9, %v3707_v28, %v3709_v54  ;;  %v3434_v32 = vsel %vm1583_vm0, %v3431_v59, %v3433_v27  ;;  %v3160_v17 = vsel %vm3135_vm10, %v3157_v30, %v3159_v10  ;;  %v3712_v56 = vsel %vm3685_vm9, %v3709_v54, %v3711_v49 }
 0x2ca   :  { %v2545_v39 = vmax.f32 %v11091_v46, %v2431_v18  ;;  %v8905_v0 = vpack.i.bf16 %v3710_v36, %v3708_v41  ;;  %v8900_v42 = vpack.i.bf16 %v3434_v32, %v3432_v26  ;;  %v3162_v5 = vsel %vm3135_vm10, %v3159_v10, %v3161_v1 }
 0x2cb   :  { %3984 = vrot.lane.b32.xlu1 %v11432_v12, %s9243_s23 }
 0x2cc   :  { %8906 = vrot.lane.b32.xlu0 %v8905_v0, %s9247_s15  ;;  %7997 = vmatmul.mubr.msk.f32.gmra.mxu1 %vm2563_vm7, %v2545_v39 }
 0x2cd   :  { %v2435_v57 = vpop.permute.xlu1 %2434  ;;  %v2433_v4 = vpop.permute.xlu0 %2432 }
 0x2ce   :  { %v2547_v45 = vmax.f32 %v11097_v16, %v2435_v57  ;;  %v2546_v46 = vmax.f32 %v11103_v7, %v2433_v4  ;;  %v8910_v16 = vpack.i.bf16 %v3160_v17, %v3158_v58  ;;  %v3435_v7 = vrot.slane %v11428_v20, 4 }
 0x2cf   :  { %8901 = vrot.lane.b32.xlu1 %v8900_v42, %s9248_s25  ;;  %v11457_v40 = vpop.f32.mrf.mxu1 }
 0x2d0   :  { %3990 = vrot.lane.b32.xlu0 %v11457_v40, %s9243_s23  ;;  %7999 = vmatprep.mubr.msk.f32.mxu1 %vm2563_vm7, %v2546_v46  ;;  %v3436_v63 = vsel %vm1583_vm0, %v3433_v27, %v3435_v7  ;;  %v3715_v13 = vrot.slane %v11457_v40, 6  ;;  %v3439_v38 = vrot.slane %v11457_v40, 4  ;;  %v3165_v28 = vrot.slane %v11457_v40, 2 }
 0x2d1   :  { %v11463_v35 = vpop.f32.mrf.mxu1  ;;  %8000 = vmatmul.mubr.msk.f32.gmra.mxu1 %vm2563_vm7, %v2547_v45 }
 0x2d2   :  { %v3437_v53 = vrot.slane %v11463_v35, 4  ;;  %v3713_v44 = vrot.slane %v11463_v35, 6  ;;  %v3163_v11 = vrot.slane %v11463_v35, 2 }
 0x2d3   :  { %8911 = vrot.lane.b32.xlu1 %v8910_v16, %s9249_s0 }
 0x2d4   :  { %3988 = vrot.lane.b32.xlu0 %v11463_v35, %s9243_s23  ;;  %v3714_v50 = vsel %vm3685_vm9, %v3711_v49, %v3713_v44  ;;  %v3438_v6 = vsel %vm1583_vm0, %v3435_v7, %v3437_v53  ;;  %v3164_v2 = vsel %vm3135_vm10, %v3161_v1, %v3163_v11  ;;  %v3716_v37 = vsel %vm3685_vm9, %v3713_v44, %v3715_v13 }
 0x2d5   :  { %v8920_v52 = vpack.i.bf16 %v3714_v50, %v3712_v56  ;;  %v8915_v22 = vpack.i.bf16 %v3438_v6, %v3436_v63  ;;  %v8925_v23 = vpack.i.bf16 %v3164_v2, %v3162_v5  ;;  %v3440_v27 = vsel %vm1583_vm0, %v3437_v53, %v3439_v38 }
 0x2d6   :  { %v3166_v41 = vsel %vm3135_vm10, %v3163_v11, %v3165_v28 }
 0x2d7   :  { %8921 = vrot.lane.b32.xlu1 %v8920_v52, %s9247_s15 }
 0x2d8   :  { %8916 = vrot.lane.b32.xlu0 %v8915_v22, %s9248_s25  ;;  %v11482_v8 = vpop.f32.mrf.mxu1 }
 0x2d9   :  { %v3443_v39 = vrot.slane %v11482_v8, 4  ;;  %v3719_v0 = vrot.slane %v11482_v8, 6  ;;  %v3169_v46 = vrot.slane %v11482_v8, 2 }
 0x2da   :  { %v11485_v14 = vpop.f32.mrf.mxu1 }
 0x2db   :  { %v3441_v25 = vrot.slane %v11485_v14, 4  ;;  %v3717_v61 = vrot.slane %v11485_v14, 6  ;;  %3994 = vrot.lane.b32.xlu1 %v11482_v8, %s9243_s23  ;;  %v3167_v29 = vrot.slane %v11485_v14, 2 }
 0x2dc   :  { %8926 = vrot.lane.b32.xlu0 %v8925_v23, %s9249_s0 }
 0x2dd   :  { %v3718_v43 = vsel %vm3685_vm9, %v3715_v13, %v3717_v61  ;;  %v3442_v48 = vsel %vm1583_vm0, %v3439_v38, %v3441_v25  ;;  %v3168_v59 = vsel %vm3135_vm10, %v3165_v28, %v3167_v29  ;;  %v3720_v57 = vsel %vm3685_vm9, %v3717_v61, %v3719_v0 }
 0x2de   :  { %v8935_v24 = vpack.i.bf16 %v3718_v43, %v3716_v37  ;;  %v8930_v54 = vpack.i.bf16 %v3442_v48, %v3440_v27  ;;  %v8940_v10 = vpack.i.bf16 %v3168_v59, %v3166_v41  ;;  %v3444_v42 = vsel %vm1583_vm0, %v3441_v25, %v3443_v39 }
 0x2df   :  { %3992 = vrot.lane.b32.xlu1 %v11485_v14, %s9243_s23  ;;  %v3170_v49 = vsel %vm3135_vm10, %v3167_v29, %v3169_v46 }
 0x2e0   :  { %8936 = vrot.lane.b32.xlu0 %v8935_v24, %s9247_s15 }
 0x2e3   :  { %8931 = vrot.lane.b32.xlu1 %v8930_v54, %s9248_s25  ;;  %v11505_v18 = vpop.f32.mrf.mxu1 }
 0x2e4   :  { %3998 = vrot.lane.b32.xlu0 %v11505_v18, %s9243_s23  ;;  %v3723_v11 = vrot.slane %v11505_v18, 6  ;;  %v3447_v63 = vrot.slane %v11505_v18, 4  ;;  %v3173_v5 = vrot.slane %v11505_v18, 2 }
 0x2e5   :  { %v11510_v36 = vpop.f32.mrf.mxu1 }
 0x2e6   :  { %v3445_v32 = vrot.slane %v11510_v36, 4  ;;  %v3721_v30 = vrot.slane %v11510_v36, 6  ;;  %v3171_v26 = vrot.slane %v11510_v36, 2 }
 0x2e7   :  { %8941 = vrot.lane.b32.xlu1 %v8940_v10, %s9249_s0 }
 0x2e8   :  { %3996 = vrot.lane.b32.xlu0 %v11510_v36, %s9243_s23  ;;  %v3722_v4 = vsel %vm3685_vm9, %v3719_v0, %v3721_v30  ;;  %v3446_v45 = vsel %vm1583_vm0, %v3443_v39, %v3445_v32  ;;  %v3172_v16 = vsel %vm3135_vm10, %v3169_v46, %v3171_v26  ;;  %v3724_v6 = vsel %vm3685_vm9, %v3721_v30, %v3723_v11 }
 0x2e9   :  { %v8950_v17 = vpack.i.bf16 %v3722_v4, %v3720_v57  ;;  %v8945_v58 = vpack.i.bf16 %v3446_v45, %v3444_v42  ;;  %v8955_v44 = vpack.i.bf16 %v3172_v16, %v3170_v49  ;;  %v3448_v23 = vsel %vm1583_vm0, %v3445_v32, %v3447_v63 }
 0x2ea   :  { %v3174_v38 = vsel %vm3135_vm10, %v3171_v26, %v3173_v5 }
 0x2eb   :  { %8951 = vrot.lane.b32.xlu1 %v8950_v17, %s9247_s15 }
 0x2ec   :  { %8946 = vrot.lane.b32.xlu0 %v8945_v58, %s9248_s25  ;;  %v11528_v7 = vpop.f32.mrf.mxu1 }
 0x2ed   :  { %v3727_v37 = vrot.slane %v11528_v7, 6  ;;  %v3451_v24 = vrot.slane %v11528_v7, 4  ;;  %v3177_v0 = vrot.slane %v11528_v7, 2 }
 0x2ee   :  { %v11531_v53 = vpop.f32.mrf.mxu1 }
 0x2ef   :  { %v3449_v56 = vrot.slane %v11531_v53, 4  ;;  %v3725_v50 = vrot.slane %v11531_v53, 6  ;;  %4002 = vrot.lane.b32.xlu1 %v11528_v7, %s9243_s23  ;;  %v3175_v52 = vrot.slane %v11531_v53, 2 }
 0x2f0   :  { %8956 = vrot.lane.b32.xlu0 %v8955_v44, %s9249_s0 }
 0x2f1   :  { %v3726_v1 = vsel %vm3685_vm9, %v3723_v11, %v3725_v50  ;;  %v3450_v2 = vsel %vm1583_vm0, %v3447_v63, %v3449_v56  ;;  %v3176_v25 = vsel %vm3135_vm10, %v3173_v5, %v3175_v52  ;;  %v3728_v59 = vsel %vm3685_vm9, %v3725_v50, %v3727_v37 }
 0x2f2   :  { %v8965_v22 = vpack.i.bf16 %v3726_v1, %v3724_v6  ;;  %v8960_v13 = vpack.i.bf16 %v3450_v2, %v3448_v23  ;;  %v8970_v29 = vpack.i.bf16 %v3176_v25, %v3174_v38  ;;  %v3452_v10 = vsel %vm1583_vm0, %v3449_v56, %v3451_v24 }
 0x2f3   :  { %4000 = vrot.lane.b32.xlu1 %v11531_v53, %s9243_s23  ;;  %v3178_v4 = vsel %vm3135_vm10, %v3175_v52, %v3177_v0 }
 0x2f4   :  { %8966 = vrot.lane.b32.xlu0 %v8965_v22, %s9247_s15 }
 0x2f7   :  { %8961 = vrot.lane.b32.xlu1 %v8960_v13, %s9248_s25  ;;  %v11551_v61 = vpop.f32.mrf.mxu1 }
 0x2f8   :  { %4006 = vrot.lane.b32.xlu0 %v11551_v61, %s9243_s23  ;;  %v3731_v46 = vrot.slane %v11551_v61, 6  ;;  %v3455_v16 = vrot.slane %v11551_v61, 4  ;;  %v3181_v6 = vrot.slane %v11551_v61, 2 }
 0x2f9   :  { %v11557_v43 = vpop.f32.mrf.mxu1 }
 0x2fa   :  { %v3453_v48 = vrot.slane %v11557_v43, 4  ;;  %v3729_v28 = vrot.slane %v11557_v43, 6  ;;  %v3179_v27 = vrot.slane %v11557_v43, 2 }
 0x2fb   :  { %v11563_v54 = vpop.permute.xlu1 %3962  ;;  %8971 = vrot.lane.b32.xlu1 %v8970_v29, %s9249_s0 }
 0x2fc   :  { %8015 = vmatmul.mubr.msk.f32.vlgmr.msra.gmra.mxu0 %vm4395_vm11, %v11563_v54  ;;  %4004 = vrot.lane.b32.xlu0 %v11557_v43, %s9243_s23  ;;  %v3730_v41 = vsel %vm3685_vm9, %v3727_v37, %v3729_v28  ;;  %v3454_v39 = vsel %vm1583_vm0, %v3451_v24, %v3453_v48  ;;  %v3180_v26 = vsel %vm3135_vm10, %v3177_v0, %v3179_v27 }
 0x2fd   :  { %v8980_v32 = vpack.i.bf16 %v3730_v41, %v3728_v59  ;;  %v8975_v30 = vpack.i.bf16 %v3454_v39, %v3452_v10  ;;  %8017 = vmatprep.mubr.msk.f32.mxu0 %vm9246_vm8, %v9240_v3  ;;  %v8985_v45 = vpack.i.bf16 %v3180_v26, %v3178_v4  ;;  %v3732_v49 = vsel %vm3685_vm9, %v3729_v28, %v3731_v46 }
 0x2fe   :  { %v3456_v1 = vsel %vm1583_vm0, %v3453_v48, %v3455_v16  ;;  %v3182_v23 = vsel %vm3135_vm10, %v3179_v27, %v3181_v6 }
 0x2ff   :  { %8981 = vrot.lane.b32.xlu1 %v8980_v32, %s9247_s15 }
 0x300   :  { %8976 = vrot.lane.b32.xlu0 %v8975_v30, %s9248_s25  ;;  %v11580_v57 = vpop.f32.mrf.mxu1 }
 0x301   :  { %v3459_v37 = vrot.slane %v11580_v57, 4  ;;  %v3735_v29 = vrot.slane %v11580_v57, 6  ;;  %v3185_v59 = vrot.slane %v11580_v57, 2 }
 0x302   :  { %v11583_v42 = vpop.f32.mrf.mxu1 }
 0x303   :  { %v3457_v17 = vrot.slane %v11583_v42, 4  ;;  %v3733_v58 = vrot.slane %v11583_v42, 6  ;;  %4010 = vrot.lane.b32.xlu1 %v11580_v57, %s9243_s23  ;;  %v3183_v11 = vrot.slane %v11583_v42, 2 }
 0x304   :  { %8986 = vrot.lane.b32.xlu0 %v8985_v45, %s9249_s0 }
 0x305   :  { %v3734_v44 = vsel %vm3685_vm9, %v3731_v46, %v3733_v58  ;;  %v3458_v63 = vsel %vm1583_vm0, %v3455_v16, %v3457_v17  ;;  %v3184_v2 = vsel %vm3135_vm10, %v3181_v6, %v3183_v11  ;;  %v3736_v0 = vsel %vm3685_vm9, %v3733_v58, %v3735_v29 }
 0x306   :  { %v11595_v56 = vpop.permute.xlu0 %3966  ;;  %v8995_v50 = vpack.i.bf16 %v3734_v44, %v3732_v49  ;;  %v8990_v52 = vpack.i.bf16 %v3458_v63, %v3456_v1  ;;  %v9000_v38 = vpack.i.bf16 %v3184_v2, %v3182_v23  ;;  %v3460_v32 = vsel %vm1583_vm0, %v3457_v17, %v3459_v37 }
 0x307   :  { %4008 = vrot.lane.b32.xlu1 %v11583_v42, %s9243_s23 }
 0x308   :  { %8996 = vrot.lane.b32.xlu0 %v8995_v50, %s9247_s15 }
 0x30a   :  { %v11603_v22 = vpop.permute.xlu0 %3964 }
 0x30b   :  { %8991 = vrot.lane.b32.xlu1 %v8990_v52, %s9248_s25  ;;  %v11607_v5 = vpop.f32.mrf.mxu1  ;;  %8018 = vmatmul.mubr.msk.f32.gmra.mxu0 %vm4395_vm11, %v11603_v22  ;;  %v3186_v52 = vsel %vm3135_vm10, %v3183_v11, %v3185_v59 }
 0x30c   :  { %4014 = vrot.lane.b32.xlu0 %v11607_v5, %s9243_s23  ;;  %8020 = vmatprep.mubr.msk.f32.mxu0 %vm9246_vm8, %v9240_v3 }
 0x30d   :  { %v8832_v13 = vpop.permute.xlu1 %8831  ;;  %v11616_v25 = vpop.f32.mrf.mxu1 }
 0x30e   :  { %v8833_v24 = vunpack.i.l.bf16 %v8832_v13  ;;  %v3461_v48 = vrot.slane %v11616_v25, 4  ;;  %v8827_v28 = vpop.permute.xlu0 %8826  ;;  %v3187_v41 = vrot.slane %v11616_v25, 2  ;;  %v3737_v10 = vrot.slane %v11616_v25, 6 }
 0x30f   :  { %v8828_v27 = vunpack.i.l.bf16 %v8827_v28  ;;  %9001 = vrot.lane.b32.xlu1 %v9000_v38, %s9249_s0  ;;  %8021 = vmatmul.mubr.msk.f32.gmra.mxu0 %vm4395_vm11, %v11595_v56  ;;  %v8834_v39 = vunpack.i.h.bf16 %v8832_v13  ;;  %v8829_v26 = vunpack.i.h.bf16 %v8827_v28 }
 0x310   :  { %4012 = vrot.lane.b32.xlu0 %v11616_v25, %s9243_s23  ;;  %v3462_v30 = vsel %vm1583_vm0, %v3459_v37, %v3461_v48  ;;  %8023 = vmatprep.mubr.msk.f32.mxu0 %vm9246_vm8, %v9240_v3  ;;  %v3738_v45 = vsel %vm3685_vm9, %v3735_v29, %v3737_v10  ;;  %v3188_v63 = vsel %vm3135_vm10, %v3185_v59, %v3187_v41  ;;  %v3739_v29 = vrot.slane %v11607_v5, 6 }
 0x311   :  { %v11636_v4 = vpop.permute.xlu1 %3970  ;;  %v4240_v46 = vsel %vm4239_vm12, %v8828_v27, %v8833_v24  ;;  %v9005_v16 = vpack.i.bf16 %v3462_v30, %v3460_v32  ;;  %v9010_v44 = vpack.i.bf16 %v3738_v45, %v3736_v0  ;;  %v4241_v2 = vsel %vm4239_vm12, %v8829_v26, %v8834_v39 }
 0x312   :  { %v8837_v49 = vpop.permute.xlu0 %8836  ;;  %v4295_v17 = vsel %vm1388_vm5, %v4240_v46, %v11563_v54  ;;  %v9015_v37 = vpack.i.bf16 %v3188_v63, %v3186_v52  ;;  %v4296_v11 = vsel %vm1388_vm5, %v4241_v2, %v11603_v22  ;;  %v3463_v59 = vrot.slane %v11607_v5, 4 }
 0x313   :  { %v8839_v58 = vunpack.i.h.bf16 %v8837_v49  ;;  %v8838_v50 = vunpack.i.l.bf16 %v8837_v49  ;;  %4573 = vmatprep.mubr.f32.mxu1 %v4295_v17  ;;  %9011 = vrot.lane.b32.xlu1 %v9010_v44, %s9247_s15  ;;  %v3740_v0 = vsel %vm3685_vm9, %v3737_v10, %v3739_v29  ;;  %v3189_v49 = vrot.slane %v11607_v5, 2 }
 0x314   :  { %9006 = vrot.lane.b32.xlu0 %v9005_v16, %s9248_s25  ;;  %v11647_v6 = vpop.f32.mrf.mxu1 }
 0x315   :  { %v11649_v1 = vpop.permute.xlu1 %3968  ;;  %v4128_v54 = vsel %vm4127_vm13, %v11264_v21, %v8838_v50  ;;  %v4129_v21 = vsel %vm4127_vm13, %v11240_v51, %v8839_v58  ;;  %v3464_v50 = vsel %vm1583_vm0, %v3461_v48, %v3463_v59 }
 0x316   :  { %v11655_v23 = vpop.f32.mrf.mxu1  ;;  %8024 = vmatmul.mubr.msk.f32.gmra.mxu0 %vm4395_vm11, %v11649_v1  ;;  %v8847_v13 = vpop.permute.xlu0 %8846  ;;  %v4184_v38 = vsel %vm4183_vm14, %v4128_v54, %v8828_v27  ;;  %v4185_v45 = vsel %vm4183_vm14, %v4129_v21, %v8829_v26  ;;  %v3467_v21 = vrot.slane %v11647_v6, 4 }
 0x317   :  { %v3465_v24 = vrot.slane %v11655_v23, 4  ;;  %v3741_v28 = vrot.slane %v11655_v23, 6  ;;  %4574 = vmatmul.mubr.f32.vlgmr.msra.gmra.mxu1 %v4184_v38  ;;  %8026 = vmatprep.mubr.msk.f32.mxu0 %vm9246_vm8, %v9240_v3  ;;  %v3191_v27 = vrot.slane %v11655_v23, 2  ;;  %v8848_v32 = vunpack.i.l.bf16 %v8847_v13 }
 0x318   :  { %4018 = vrot.lane.b32.xlu1 %v11647_v6, %s9243_s23  ;;  %9016 = vrot.lane.b32.xlu0 %v9015_v37, %s9249_s0  ;;  %v8849_v44 = vunpack.i.h.bf16 %v8847_v13  ;;  %v3193_v13 = vrot.slane %v11647_v6, 2 }
 0x319   :  { %4578 = vmatprep.mubr.f32.mxu1 %v4296_v11  ;;  %v11674_v39 = vpop.permute.xlu1 %8841  ;;  %v3742_v51 = vsel %vm3685_vm9, %v3739_v29, %v3741_v28  ;;  %v3466_v10 = vsel %vm1583_vm0, %v3463_v59, %v3465_v24  ;;  %v3192_v38 = vsel %vm3135_vm10, %v3189_v49, %v3191_v27  ;;  %v3190_v29 = vsel %vm3135_vm10, %v3187_v41, %v3189_v49 }
 0x31a   :  { %v8843_v30 = vunpack.i.l.bf16 %v11674_v39  ;;  %8027 = vmatmul.mubr.msk.f32.gmra.mxu0 %vm4395_vm11, %v11636_v4  ;;  %v11683_v22 = vpop.permute.xlu0 %3974  ;;  %v9025_v46 = vpack.i.bf16 %v3742_v51, %v3740_v0  ;;  %v8844_v16 = vunpack.i.h.bf16 %v11674_v39  ;;  %v9020_v2 = vpack.i.bf16 %v3466_v10, %v3464_v50 }
 0x31b   :  { %4579 = vmatmul.mubr.f32.gmra.mxu1 %v4185_v45  ;;  %8029 = vmatprep.mubr.msk.f32.mxu0 %vm9246_vm8, %v9240_v3  ;;  %v3743_v11 = vrot.slane %v11647_v6, 6  ;;  %v9030_v51 = vpack.i.bf16 %v3192_v38, %v3190_v29 }
 0x31c   :  { %4016 = vrot.lane.b32.xlu1 %v11655_v23, %s9243_s23  ;;  %9026 = vrot.lane.b32.xlu0 %v9025_v46, %s9247_s15  ;;  %v4242_v26 = vsel %vm4239_vm12, %v8843_v30, %v8848_v32 }
 0x31d   :  { %v8852_v17 = vpop.permute.xlu1 %8851  ;;  %v4297_v58 = vsel %vm1388_vm5, %v4242_v26, %v11595_v56  ;;  %v4243_v56 = vsel %vm4239_vm12, %v8844_v16, %v8849_v44 }
 0x31e   :  { %v8854_v63 = vunpack.i.h.bf16 %v8852_v17  ;;  %v8853_v54 = vunpack.i.l.bf16 %v8852_v17  ;;  %v11702_v52 = vpop.permute.xlu0 %3972  ;;  %4583 = vmatprep.mubr.f32.mxu1 %v4297_v58  ;;  %v4298_v41 = vsel %vm1388_vm5, %v4243_v56, %v11649_v1 }
 0x31f   :  { %v11707_v37 = vpop.f32.mrf.mxu1  ;;  %8030 = vmatmul.mubr.msk.f32.gmra.mxu0 %vm4395_vm11, %v11702_v52 }
 0x320   :  { %9021 = vrot.lane.b32.xlu1 %v9020_v2, %s9248_s25  ;;  %4022 = vrot.lane.b32.xlu0 %v11707_v37, %s9243_s23  ;;  %v4130_v48 = vsel %vm4127_vm13, %v11278_v60, %v8853_v54  ;;  %v4131_v46 = vsel %vm4127_vm13, %v11268_v15, %v8854_v63  ;;  %v3468_v15 = vsel %vm1583_vm0, %v3465_v24, %v3467_v21 }
 0x321   :  { %v8862_v59 = vpop.permute.xlu1 %8861  ;;  %v11723_v39 = vpop.f32.mrf.mxu1  ;;  %8032 = vmatprep.mubr.msk.f32.mxu0 %vm9246_vm8, %v9240_v3  ;;  %v4186_v0 = vsel %vm4183_vm14, %v4130_v48, %v8843_v30  ;;  %v3744_v30 = vsel %vm3685_vm9, %v3741_v28, %v3743_v11  ;;  %v4187_v28 = vsel %vm4183_vm14, %v4131_v46, %v8844_v16 }
 0x322   :  { %v8863_v32 = vunpack.i.l.bf16 %v8862_v59  ;;  %v3469_v60 = vrot.slane %v11723_v39, 4  ;;  %v11729_v45 = vpop.permute.xlu0 %8856  ;;  %4584 = vmatmul.mubr.f32.gmra.mxu1 %v4186_v0  ;;  %v3195_v10 = vrot.slane %v11723_v39, 2  ;;  %v3745_v49 = vrot.slane %v11723_v39, 6 }
 0x323   :  { %v8858_v26 = vunpack.i.l.bf16 %v11729_v45  ;;  %4588 = vmatprep.mubr.f32.mxu1 %v4298_v41  ;;  %8033 = vmatmul.mubr.msk.f32.gmra.mxu0 %vm4395_vm11, %v11683_v22  ;;  %v8864_v44 = vunpack.i.h.bf16 %v8862_v59  ;;  %v8859_v1 = vunpack.i.h.bf16 %v11729_v45  ;;  %v3747_v41 = vrot.slane %v11707_v37, 6 }
 0x324   :  { %9031 = vrot.lane.b32.xlu1 %v9030_v51, %s9249_s0  ;;  %4020 = vrot.lane.b32.xlu0 %v11723_v39, %s9243_s23  ;;  %v3470_v17 = vsel %vm1583_vm0, %v3467_v21, %v3469_v60  ;;  %v3746_v50 = vsel %vm3685_vm9, %v3743_v11, %v3745_v49  ;;  %v3196_v16 = vsel %vm3135_vm10, %v3193_v13, %v3195_v10 }
 0x325   :  { %v11753_v58 = vpop.permute.xlu1 %3978  ;;  %v4244_v63 = vsel %vm4239_vm12, %v8858_v26, %v8863_v32  ;;  %v9035_v54 = vpack.i.bf16 %v3470_v17, %v3468_v15  ;;  %8035 = vmatprep.mubr.msk.f32.mxu0 %vm9246_vm8, %v9240_v3  ;;  %v9040_v38 = vpack.i.bf16 %v3746_v50, %v3744_v30  ;;  %v4245_v59 = vsel %vm4239_vm12, %v8859_v1, %v8864_v44 }
 0x326   :  { %v8867_v2 = vpop.permute.xlu0 %8866  ;;  %4589 = vmatmul.mubr.f32.gmra.mxu1 %v4187_v28  ;;  %v4299_v24 = vsel %vm1388_vm5, %v4244_v63, %v11636_v4  ;;  %v3194_v4 = vsel %vm3135_vm10, %v3191_v27, %v3193_v13  ;;  %v4300_v13 = vsel %vm1388_vm5, %v4245_v59, %v11702_v52  ;;  %v3748_v15 = vsel %vm3685_vm9, %v3745_v49, %v3747_v41 }
 0x327   :  { %v8869_v56 = vunpack.i.h.bf16 %v8867_v2  ;;  %v8868_v48 = vunpack.i.l.bf16 %v8867_v2  ;;  %4593 = vmatprep.mubr.f32.mxu1 %v4299_v24  ;;  %v9045_v45 = vpack.i.bf16 %v3196_v16, %v3194_v4  ;;  %v3197_v2 = vrot.slane %v11707_v37, 2 }
 0x328   :  { %9041 = vrot.lane.b32.xlu1 %v9040_v38, %s9247_s15  ;;  %v11766_v29 = vpop.f32.mrf.mxu1  ;;  %9036 = vrot.lane.b32.xlu0 %v9035_v54, %s9248_s25 }
 0x329   :  { %v11769_v21 = vpop.permute.xlu1 %3976  ;;  %v4132_v11 = vsel %vm4127_vm13, %v11317_v62, %v8868_v48  ;;  %v4133_v27 = vsel %vm4127_vm13, %v11312_v47, %v8869_v56 }
 0x32a   :  { %v11777_v0 = vpop.f32.mrf.mxu1  ;;  %8036 = vmatmul.mubr.msk.f32.gmra.mxu0 %vm4395_vm11, %v11769_v21  ;;  %v8877_v51 = vpop.permute.xlu0 %8876  ;;  %v4188_v32 = vsel %vm4183_vm14, %v4132_v11, %v8858_v26  ;;  %v3471_v26 = vrot.slane %v11707_v37, 4  ;;  %v4189_v50 = vsel %vm4183_vm14, %v4133_v27, %v8859_v1  ;;  %v3475_v27 = vrot.slane %v11766_v29, 4 }
 0x32b   :  { %v3473_v46 = vrot.slane %v11777_v0, 4  ;;  %v3749_v62 = vrot.slane %v11777_v0, 6  ;;  %4594 = vmatmul.mubr.f32.gmra.mxu1 %v4188_v32  ;;  %8038 = vmatprep.mubr.msk.f32.mxu0 %vm9246_vm8, %v9240_v3  ;;  %v3199_v30 = vrot.slane %v11777_v0, 2  ;;  %v8878_v17 = vunpack.i.l.bf16 %v8877_v51 }
 0x32c   :  { %4026 = vrot.lane.b32.xlu1 %v11766_v29, %s9243_s23  ;;  %9046 = vrot.lane.b32.xlu0 %v9045_v45, %s9249_s0  ;;  %v8879_v38 = vunpack.i.h.bf16 %v8877_v51  ;;  %v3472_v48 = vsel %vm1583_vm0, %v3469_v60, %v3471_v26  ;;  %v3201_v51 = vrot.slane %v11766_v29, 2 }
 0x32d   :  { %4598 = vmatprep.mubr.f32.mxu1 %v4300_v13  ;;  %v11796_v44 = vpop.permute.xlu1 %8871  ;;  %v3750_v47 = vsel %vm3685_vm9, %v3747_v41, %v3749_v62  ;;  %v3474_v49 = vsel %vm1583_vm0, %v3471_v26, %v3473_v46  ;;  %v3200_v32 = vsel %vm3135_vm10, %v3197_v2, %v3199_v30  ;;  %v3198_v41 = vsel %vm3135_vm10, %v3195_v10, %v3197_v2 }
 0x32e   :  { %v8873_v28 = vunpack.i.l.bf16 %v11796_v44  ;;  %8039 = vmatmul.mubr.msk.f32.gmra.mxu0 %vm4395_vm11, %v11753_v58  ;;  %v11805_v52 = vpop.permute.xlu0 %3982  ;;  %v9055_v63 = vpack.i.bf16 %v3750_v47, %v3748_v15  ;;  %v8874_v54 = vunpack.i.h.bf16 %v11796_v44  ;;  %v9050_v59 = vpack.i.bf16 %v3474_v49, %v3472_v48 }
 0x32f   :  { %4599 = vmatmul.mubr.f32.gmra.mxu1 %v4189_v50  ;;  %8041 = vmatprep.mubr.msk.f32.mxu0 %vm9246_vm8, %v9240_v3  ;;  %v3751_v13 = vrot.slane %v11766_v29, 6  ;;  %v9060_v47 = vpack.i.bf16 %v3200_v32, %v3198_v41 }
 0x330   :  { %4024 = vrot.lane.b32.xlu1 %v11777_v0, %s9243_s23  ;;  %9056 = vrot.lane.b32.xlu0 %v9055_v63, %s9247_s15  ;;  %v4246_v1 = vsel %vm4239_vm12, %v8873_v28, %v8878_v17 }
 0x331   :  { %v8882_v24 = vpop.permute.xlu1 %8881  ;;  %v4301_v56 = vsel %vm1388_vm5, %v4246_v1, %v11683_v22  ;;  %v4247_v22 = vsel %vm4239_vm12, %v8874_v54, %v8879_v38 }
 0x332   :  { %v8884_v16 = vunpack.i.h.bf16 %v8882_v24  ;;  %v8883_v11 = vunpack.i.l.bf16 %v8882_v24  ;;  %v11824_v4 = vpop.permute.xlu0 %3980  ;;  %4603 = vmatprep.mubr.f32.mxu1 %v4301_v56  ;;  %v4302_v10 = vsel %vm1388_vm5, %v4247_v22, %v11769_v21 }
 0x333   :  { %v11829_v45 = vpop.f32.mrf.mxu1  ;;  %8042 = vmatmul.mubr.msk.f32.gmra.mxu0 %vm4395_vm11, %v11824_v4 }
 0x334   :  { %9051 = vrot.lane.b32.xlu1 %v9050_v59, %s9248_s25  ;;  %4030 = vrot.lane.b32.xlu0 %v11829_v45, %s9243_s23  ;;  %v4134_v60 = vsel %vm4127_vm13, %v11354_v9, %v8883_v11  ;;  %v4135_v63 = vsel %vm4127_vm13, %v11346_v19, %v8884_v16  ;;  %v3476_v19 = vsel %vm1583_vm0, %v3473_v46, %v3475_v27 }
 0x335   :  { %v8892_v26 = vpop.permute.xlu1 %8891  ;;  %v11845_v44 = vpop.f32.mrf.mxu1  ;;  %8044 = vmatprep.mubr.msk.f32.mxu0 %vm9246_vm8, %v9240_v3  ;;  %v4190_v15 = vsel %vm4183_vm14, %v4134_v60, %v8873_v28  ;;  %v3752_v28 = vsel %vm3685_vm9, %v3749_v62, %v3751_v13  ;;  %v4191_v62 = vsel %vm4183_vm14, %v4135_v63, %v8874_v54 }
 0x336   :  { %v8893_v17 = vunpack.i.l.bf16 %v8892_v26  ;;  %v3477_v9 = vrot.slane %v11845_v44, 4  ;;  %v11851_v50 = vpop.permute.xlu0 %8886  ;;  %4604 = vmatmul.mubr.f32.gmra.mxu1 %v4190_v15  ;;  %v3203_v49 = vrot.slane %v11845_v44, 2  ;;  %v3753_v2 = vrot.slane %v11845_v44, 6 }
 0x337   :  { %v8888_v1 = vunpack.i.l.bf16 %v11851_v50  ;;  %4608 = vmatprep.mubr.f32.mxu1 %v4302_v10  ;;  %8045 = vmatmul.mubr.msk.f32.gmra.mxu0 %vm4395_vm11, %v11805_v52  ;;  %v8894_v38 = vunpack.i.h.bf16 %v8892_v26  ;;  %v8889_v21 = vunpack.i.h.bf16 %v11851_v50  ;;  %v3755_v10 = vrot.slane %v11829_v45, 6 }
 0x338   :  { %9061 = vrot.lane.b32.xlu1 %v9060_v47, %s9249_s0  ;;  %4028 = vrot.lane.b32.xlu0 %v11845_v44, %s9243_s23  ;;  %v3478_v24 = vsel %vm1583_vm0, %v3475_v27, %v3477_v9  ;;  %v3754_v48 = vsel %vm3685_vm9, %v3751_v13, %v3753_v2  ;;  %v3204_v54 = vsel %vm3135_vm10, %v3201_v51, %v3203_v49 }
 0x339   :  { %v11875_v56 = vpop.permute.xlu1 %3986  ;;  %v4248_v16 = vsel %vm4239_vm12, %v8888_v1, %v8893_v17  ;;  %v9065_v11 = vpack.i.bf16 %v3478_v24, %v3476_v19  ;;  %8047 = vmatprep.mubr.msk.f32.mxu0 %vm9246_vm8, %v9240_v3  ;;  %v9070_v32 = vpack.i.bf16 %v3754_v48, %v3752_v28  ;;  %v4249_v26 = vsel %vm4239_vm12, %v8889_v21, %v8894_v38 }
 0x33a   :  { %v8897_v59 = vpop.permute.xlu0 %8896  ;;  %4609 = vmatmul.mubr.f32.gmra.mxu1 %v4191_v62  ;;  %v4303_v46 = vsel %vm1388_vm5, %v4248_v16, %v11753_v58  ;;  %v3202_v58 = vsel %vm3135_vm10, %v3199_v30, %v3201_v51  ;;  %v4304_v51 = vsel %vm1388_vm5, %v4249_v26, %v11824_v4  ;;  %v3756_v19 = vsel %vm3685_vm9, %v3753_v2, %v3755_v10 }
 0x33b   :  { %v8899_v22 = vunpack.i.h.bf16 %v8897_v59  ;;  %v8898_v60 = vunpack.i.l.bf16 %v8897_v59  ;;  %4613 = vmatprep.mubr.f32.mxu1 %v4303_v46  ;;  %v9075_v50 = vpack.i.bf16 %v3204_v54, %v3202_v58  ;;  %v3205_v59 = vrot.slane %v11829_v45, 2 }
 0x33c   :  { %9071 = vrot.lane.b32.xlu1 %v9070_v32, %s9247_s15  ;;  %v11888_v41 = vpop.f32.mrf.mxu1  ;;  %9066 = vrot.lane.b32.xlu0 %v9065_v11, %s9248_s25 }
 0x33d   :  { %v11891_v27 = vpop.permute.xlu1 %3984  ;;  %v4136_v13 = vsel %vm4127_vm13, %v11378_v34, %v8898_v60  ;;  %v4137_v30 = vsel %vm4127_vm13, %v11374_v31, %v8899_v22 }
 0x33e   :  { %v11899_v15 = vpop.f32.mrf.mxu1  ;;  %8048 = vmatmul.mubr.msk.f32.gmra.mxu0 %vm4395_vm11, %v11891_v27  ;;  %v8907_v47 = vpop.permute.xlu0 %8906  ;;  %v4192_v17 = vsel %vm4183_vm14, %v4136_v13, %v8888_v1  ;;  %v3479_v1 = vrot.slane %v11829_v45, 4  ;;  %v4193_v48 = vsel %vm4183_vm14, %v4137_v30, %v8889_v21  ;;  %v3483_v30 = vrot.slane %v11888_v41, 4 }
 0x33f   :  { %v3481_v63 = vrot.slane %v11899_v15, 4  ;;  %v3757_v34 = vrot.slane %v11899_v15, 6  ;;  %4614 = vmatmul.mubr.f32.gmra.mxu1 %v4192_v17  ;;  %8050 = vmatprep.mubr.msk.f32.mxu0 %vm9246_vm8, %v9240_v3  ;;  %v3207_v28 = vrot.slane %v11899_v15, 2  ;;  %v8908_v24 = vunpack.i.l.bf16 %v8907_v47 }
 0x340   :  { %4034 = vrot.lane.b32.xlu1 %v11888_v41, %s9243_s23  ;;  %9076 = vrot.lane.b32.xlu0 %v9075_v50, %s9249_s0  ;;  %v8909_v32 = vunpack.i.h.bf16 %v8907_v47  ;;  %v3480_v60 = vsel %vm1583_vm0, %v3477_v9, %v3479_v1  ;;  %v3209_v47 = vrot.slane %v11888_v41, 2 }
 0x341   :  { %4618 = vmatprep.mubr.f32.mxu1 %v4304_v51  ;;  %v11918_v38 = vpop.permute.xlu1 %8901  ;;  %v3758_v31 = vsel %vm3685_vm9, %v3755_v10, %v3757_v34  ;;  %v3482_v2 = vsel %vm1583_vm0, %v3479_v1, %v3481_v63  ;;  %v3208_v17 = vsel %vm3135_vm10, %v3205_v59, %v3207_v28  ;;  %v3206_v10 = vsel %vm3135_vm10, %v3203_v49, %v3205_v59 }
 0x342   :  { %v8903_v62 = vunpack.i.l.bf16 %v11918_v38  ;;  %8051 = vmatmul.mubr.msk.f32.gmra.mxu0 %vm4395_vm11, %v11875_v56  ;;  %v11927_v4 = vpop.permute.xlu0 %3990  ;;  %v9085_v16 = vpack.i.bf16 %v3758_v31, %v3756_v19  ;;  %v8904_v11 = vunpack.i.h.bf16 %v11918_v38  ;;  %v9080_v26 = vpack.i.bf16 %v3482_v2, %v3480_v60 }
 0x343   :  { %4619 = vmatmul.mubr.f32.gmra.mxu1 %v4193_v48  ;;  %8053 = vmatprep.mubr.msk.f32.mxu0 %vm9246_vm8, %v9240_v3  ;;  %v3759_v51 = vrot.slane %v11888_v41, 6  ;;  %v9090_v31 = vpack.i.bf16 %v3208_v17, %v3206_v10 }
 0x344   :  { %4032 = vrot.lane.b32.xlu1 %v11899_v15, %s9243_s23  ;;  %9086 = vrot.lane.b32.xlu0 %v9085_v16, %s9247_s15  ;;  %v4250_v21 = vsel %vm4239_vm12, %v8903_v62, %v8908_v24 }
 0x345   :  { %v8912_v46 = vpop.permute.xlu1 %8911  ;;  %v4305_v22 = vsel %vm1388_vm5, %v4250_v21, %v11805_v52  ;;  %v4251_v52 = vsel %vm4239_vm12, %v8904_v11, %v8909_v32 }
 0x346   :  { %v8914_v54 = vunpack.i.h.bf16 %v8912_v46  ;;  %v8913_v13 = vunpack.i.l.bf16 %v8912_v46  ;;  %v11946_v58 = vpop.permute.xlu0 %3988  ;;  %4623 = vmatprep.mubr.f32.mxu1 %v4305_v22  ;;  %v4306_v49 = vsel %vm1388_vm5, %v4251_v52, %v11891_v27 }
 0x347   :  { %v11951_v50 = vpop.f32.mrf.mxu1  ;;  %8054 = vmatmul.mubr.msk.f32.gmra.mxu0 %vm4395_vm11, %v11946_v58 }
 0x348   :  { %9081 = vrot.lane.b32.xlu1 %v9080_v26, %s9248_s25  ;;  %4038 = vrot.lane.b32.xlu0 %v11951_v50, %s9243_s23  ;;  %v4138_v9 = vsel %vm4127_vm13, %v11408_v33, %v8913_v13  ;;  %v4139_v16 = vsel %vm4127_vm13, %v11402_v55, %v8914_v54  ;;  %v3484_v55 = vsel %vm1583_vm0, %v3481_v63, %v3483_v30 }
 0x349   :  { %v8922_v1 = vpop.permute.xlu1 %8921  ;;  %v11967_v38 = vpop.f32.mrf.mxu1  ;;  %8056 = vmatprep.mubr.msk.f32.mxu0 %vm9246_vm8, %v9240_v3  ;;  %v4194_v19 = vsel %vm4183_vm14, %v4138_v9, %v8903_v62  ;;  %v3760_v62 = vsel %vm3685_vm9, %v3757_v34, %v3759_v51  ;;  %v4195_v60 = vsel %vm4183_vm14, %v4139_v16, %v8904_v11 }
 0x34a   :  { %v8923_v24 = vunpack.i.l.bf16 %v8922_v1  ;;  %v3485_v33 = vrot.slane %v11967_v38, 4  ;;  %v8917_v48 = vpop.permute.xlu0 %8916  ;;  %4624 = vmatmul.mubr.f32.gmra.mxu1 %v4194_v19  ;;  %v3211_v2 = vrot.slane %v11967_v38, 2  ;;  %v3761_v59 = vrot.slane %v11967_v38, 6 }
 0x34b   :  { %v8918_v21 = vunpack.i.l.bf16 %v8917_v48  ;;  %4628 = vmatprep.mubr.f32.mxu1 %v4306_v49  ;;  %8057 = vmatmul.mubr.msk.f32.gmra.mxu0 %vm4395_vm11, %v11927_v4  ;;  %v8924_v32 = vunpack.i.h.bf16 %v8922_v1  ;;  %v8919_v46 = vunpack.i.h.bf16 %v8917_v48  ;;  %v3763_v49 = vrot.slane %v11951_v50, 6 }
 0x34c   :  { %9091 = vrot.lane.b32.xlu1 %v9090_v31, %s9249_s0  ;;  %4036 = vrot.lane.b32.xlu0 %v11967_v38, %s9243_s23  ;;  %v3486_v27 = vsel %vm1583_vm0, %v3483_v30, %v3485_v33  ;;  %v3762_v34 = vsel %vm3685_vm9, %v3759_v51, %v3761_v59  ;;  %v3212_v11 = vsel %vm3135_vm10, %v3209_v47, %v3211_v2 }
 0x34d   :  { %v11993_v22 = vpop.permute.xlu1 %3994  ;;  %v4252_v54 = vsel %vm4239_vm12, %v8918_v21, %v8923_v24  ;;  %v9095_v13 = vpack.i.bf16 %v3486_v27, %v3484_v55  ;;  %8059 = vmatprep.mubr.msk.f32.mxu0 %vm9246_vm8, %v9240_v3  ;;  %v9100_v17 = vpack.i.bf16 %v3762_v34, %v3760_v62  ;;  %v4253_v1 = vsel %vm4239_vm12, %v8919_v46, %v8924_v32 }
 0x34e   :  { %v8927_v26 = vpop.permute.xlu0 %8926  ;;  %4629 = vmatmul.mubr.f32.gmra.mxu1 %v4195_v60  ;;  %v4307_v63 = vsel %vm1388_vm5, %v4252_v54, %v11875_v56  ;;  %v3210_v56 = vsel %vm3135_vm10, %v3207_v28, %v3209_v47  ;;  %v4308_v47 = vsel %vm1388_vm5, %v4253_v1, %v11946_v58  ;;  %v3764_v32 = vsel %vm3685_vm9, %v3761_v59, %v3763_v49 }
 0x34f   :  { %v8929_v52 = vunpack.i.h.bf16 %v8927_v26  ;;  %v8928_v9 = vunpack.i.l.bf16 %v8927_v26  ;;  %4633 = vmatprep.mubr.f32.mxu1 %v4307_v63  ;;  %v9105_v48 = vpack.i.bf16 %v3212_v11, %v3210_v56  ;;  %v3213_v26 = vrot.slane %v11951_v50, 2 }
 0x350   :  { %9101 = vrot.lane.b32.xlu1 %v9100_v17, %s9247_s15  ;;  %v12006_v10 = vpop.f32.mrf.mxu1  ;;  %9096 = vrot.lane.b32.xlu0 %v9095_v13, %s9248_s25 }
 0x351   :  { %v12009_v30 = vpop.permute.xlu1 %3992  ;;  %v4140_v51 = vsel %vm4127_vm13, %v11432_v12, %v8928_v9  ;;  %v4141_v28 = vsel %vm4127_vm13, %v11428_v20, %v8929_v52 }
 0x352   :  { %v12017_v19 = vpop.f32.mrf.mxu1  ;;  %8060 = vmatmul.mubr.msk.f32.gmra.mxu0 %vm4395_vm11, %v12009_v30  ;;  %v8937_v31 = vpop.permute.xlu0 %8936  ;;  %v4196_v24 = vsel %vm4183_vm14, %v4140_v51, %v8918_v21  ;;  %v3487_v21 = vrot.slane %v11951_v50, 4  ;;  %v4197_v58 = vsel %vm4183_vm14, %v4141_v28, %v8919_v46 }
 0x353   :  { %v3489_v16 = vrot.slane %v12017_v19, 4  ;;  %v3765_v12 = vrot.slane %v12017_v19, 6  ;;  %4634 = vmatmul.mubr.f32.gmra.mxu1 %v4196_v24  ;;  %8062 = vmatprep.mubr.msk.f32.mxu0 %vm9246_vm8, %v9240_v3  ;;  %v8938_v20 = vunpack.i.l.bf16 %v8937_v31  ;;  %v3215_v54 = vrot.slane %v12017_v19, 2 }
 0x354   :  { %4042 = vrot.lane.b32.xlu1 %v12006_v10, %s9243_s23  ;;  %9106 = vrot.lane.b32.xlu0 %v9105_v48, %s9249_s0  ;;  %v8939_v17 = vunpack.i.h.bf16 %v8937_v31  ;;  %v3488_v9 = vsel %vm1583_vm0, %v3485_v33, %v3487_v21  ;;  %v3217_v48 = vrot.slane %v12006_v10, 2 }
 0x355   :  { %4638 = vmatprep.mubr.f32.mxu1 %v4308_v47  ;;  %v12035_v62 = vpop.permute.xlu1 %8931  ;;  %v3766_v55 = vsel %vm3685_vm9, %v3763_v49, %v3765_v12  ;;  %v3490_v59 = vsel %vm1583_vm0, %v3487_v21, %v3489_v16  ;;  %v3216_v31 = vsel %vm3135_vm10, %v3213_v26, %v3215_v54  ;;  %v3767_v49 = vrot.slane %v12006_v10, 6 }
 0x356   :  { %v8933_v27 = vunpack.i.l.bf16 %v12035_v62  ;;  %8063 = vmatmul.mubr.msk.f32.gmra.mxu0 %vm4395_vm11, %v11993_v22  ;;  %v12044_v60 = vpop.permute.xlu0 %3998  ;;  %v9115_v34 = vpack.i.bf16 %v3766_v55, %v3764_v32  ;;  %v8934_v13 = vunpack.i.h.bf16 %v12035_v62  ;;  %v9110_v1 = vpack.i.bf16 %v3490_v59, %v3488_v9 }
 0x357   :  { %4639 = vmatmul.mubr.f32.gmra.mxu1 %v4197_v58  ;;  %8065 = vmatprep.mubr.msk.f32.mxu0 %vm9246_vm8, %v9240_v3  ;;  %v3214_v21 = vsel %vm3135_vm10, %v3211_v2, %v3213_v26 }
 0x358   :  { %4040 = vrot.lane.b32.xlu1 %v12017_v19, %s9243_s23  ;;  %9116 = vrot.lane.b32.xlu0 %v9115_v34, %s9247_s15  ;;  %v4254_v46 = vsel %vm4239_vm12, %v8933_v27, %v8938_v20  ;;  %v4255_v24 = vsel %vm4239_vm12, %v8934_v13, %v8939_v17  ;;  %v3491_v34 = vrot.slane %v12006_v10, 4 }
 0x359   :  { %v8942_v63 = vpop.permute.xlu1 %8941  ;;  %v4309_v52 = vsel %vm1388_vm5, %v4254_v46, %v11927_v4  ;;  %v4310_v20 = vsel %vm1388_vm5, %v4255_v24, %v12009_v30 }
 0x35a   :  { %v8944_v11 = vunpack.i.h.bf16 %v8942_v63  ;;  %v8943_v51 = vunpack.i.l.bf16 %v8942_v63  ;;  %v12064_v56 = vpop.permute.xlu0 %3996  ;;  %4643 = vmatprep.mubr.f32.mxu1 %v4309_v52  ;;  %v3492_v9 = vsel %vm1583_vm0, %v3489_v16, %v3491_v34 }
 0x35b   :  { %8066 = vmatmul.mubr.msk.f32.gmra.mxu0 %vm4395_vm11, %v12064_v56 }
 0x35c   :  { %9111 = vrot.lane.b32.xlu1 %v9110_v1, %s9248_s25  ;;  %v12073_v4 = vpop.f32.mrf.mxu1  ;;  %8068 = vmatprep.mubr.msk.f32.mxu0 %vm9246_vm8, %v9240_v3  ;;  %v4142_v33 = vsel %vm4127_vm13, %v11463_v35, %v8943_v51  ;;  %v9120_v35 = vpack.i.bf16 %v3216_v31, %v3214_v21  ;;  %v4143_v58 = vsel %vm4127_vm13, %v11457_v40, %v8944_v11 }
 0x35d   :  { %4046 = vrot.lane.b32.xlu0 %v12073_v4, %s9243_s23  ;;  %v8952_v28 = vpop.permute.xlu1 %8951  ;;  %v4198_v47 = vsel %vm4183_vm14, %v4142_v33, %v8933_v27  ;;  %v3768_v40 = vsel %vm3685_vm9, %v3765_v12, %v3767_v49  ;;  %v4199_v63 = vsel %vm4183_vm14, %v4143_v58, %v8934_v13 }
 0x35e   :  { %v8953_v62 = vunpack.i.l.bf16 %v8952_v28  ;;  %v12087_v32 = vpop.f32.mrf.mxu1  ;;  %v12089_v55 = vpop.permute.xlu0 %8946  ;;  %4644 = vmatmul.mubr.f32.gmra.mxu1 %v4198_v47  ;;  %v8954_v46 = vunpack.i.h.bf16 %v8952_v28 }
 0x35f   :  { %v3219_v27 = vrot.slane %v12087_v32, 2  ;;  %v3493_v59 = vrot.slane %v12087_v32, 4  ;;  %v3769_v2 = vrot.slane %v12087_v32, 6  ;;  %4648 = vmatprep.mubr.f32.mxu1 %v4310_v20  ;;  %8069 = vmatmul.mubr.msk.f32.gmra.mxu0 %vm4395_vm11, %v12044_v60  ;;  %v8949_v26 = vunpack.i.h.bf16 %v12089_v55 }
 0x360   :  { %v8948_v30 = vunpack.i.l.bf16 %v12089_v55  ;;  %9121 = vrot.lane.b32.xlu1 %v9120_v35, %s9249_s0  ;;  %8071 = vmatprep.mubr.msk.f32.mxu0 %vm9246_vm8, %v9240_v3 }
 0x361   :  { %4044 = vrot.lane.b32.xlu0 %v12087_v32, %s9243_s23  ;;  %v12111_v17 = vpop.permute.xlu1 %4002  ;;  %v3770_v52 = vsel %vm3685_vm9, %v3767_v49, %v3769_v2  ;;  %v3494_v12 = vsel %vm1583_vm0, %v3491_v34, %v3493_v59  ;;  %v3220_v49 = vsel %vm3135_vm10, %v3217_v48, %v3219_v27  ;;  %v4257_v28 = vsel %vm4239_vm12, %v8949_v26, %v8954_v46 }
 0x362   :  { %v8957_v11 = vpop.permute.xlu0 %8956  ;;  %4649 = vmatmul.mubr.f32.gmra.mxu1 %v4199_v63  ;;  %v9130_v51 = vpack.i.bf16 %v3770_v52, %v3768_v40  ;;  %v4256_v1 = vsel %vm4239_vm12, %v8948_v30, %v8953_v62  ;;  %v9125_v31 = vpack.i.bf16 %v3494_v12, %v3492_v9  ;;  %v3771_v62 = vrot.slane %v12073_v4, 6 }
 0x363   :  { %v8959_v24 = vunpack.i.h.bf16 %v8957_v11  ;;  %v8958_v33 = vunpack.i.l.bf16 %v8957_v11  ;;  %v4311_v13 = vsel %vm1388_vm5, %v4256_v1, %v11993_v22  ;;  %v3218_v22 = vsel %vm3135_vm10, %v3215_v54, %v3217_v48 }
 0x364   :  { %9131 = vrot.lane.b32.xlu1 %v9130_v51, %s9247_s15  ;;  %4653 = vmatprep.mubr.f32.mxu1 %v4311_v13  ;;  %v12128_v16 = vpop.f32.mrf.mxu1  ;;  %v9135_v58 = vpack.i.bf16 %v3220_v49, %v3218_v22  ;;  %v3495_v48 = vrot.slane %v12073_v4, 4  ;;  %v3772_v63 = vsel %vm3685_vm9, %v3769_v2, %v3771_v62  ;;  %v3221_v1 = vrot.slane %v12073_v4, 2 }
 0x365   :  { %9126 = vrot.lane.b32.xlu0 %v9125_v31, %s9248_s25  ;;  %v12132_v47 = vpop.permute.xlu1 %4000  ;;  %v4144_v21 = vsel %vm4127_vm13, %v11485_v14, %v8958_v33  ;;  %v4312_v14 = vsel %vm1388_vm5, %v4257_v28, %v12064_v56  ;;  %v4145_v54 = vsel %vm4127_vm13, %v11482_v8, %v8959_v24 }
 0x366   :  { %v12140_v55 = vpop.f32.mrf.mxu1  ;;  %8072 = vmatmul.mubr.msk.f32.gmra.mxu0 %vm4395_vm11, %v12132_v47  ;;  %v8967_v35 = vpop.permute.xlu0 %8966  ;;  %v4200_v20 = vsel %vm4183_vm14, %v4144_v21, %v8948_v30  ;;  %v4201_v12 = vsel %vm4183_vm14, %v4145_v54, %v8949_v26  ;;  %v3496_v13 = vsel %vm1583_vm0, %v3493_v59, %v3495_v48 }
 0x367   :  { %v3497_v34 = vrot.slane %v12140_v55, 4  ;;  %v3773_v46 = vrot.slane %v12140_v55, 6  ;;  %4654 = vmatmul.mubr.f32.gmra.mxu1 %v4200_v20  ;;  %8074 = vmatprep.mubr.msk.f32.mxu0 %vm9246_vm8, %v9240_v3  ;;  %v3223_v30 = vrot.slane %v12140_v55, 2  ;;  %v8968_v52 = vunpack.i.l.bf16 %v8967_v35 }
 0x368   :  { %4050 = vrot.lane.b32.xlu1 %v12128_v16, %s9243_s23  ;;  %4658 = vmatprep.mubr.f32.mxu1 %v4312_v14  ;;  %v8969_v24 = vunpack.i.h.bf16 %v8967_v35  ;;  %v3222_v20 = vsel %vm3135_vm10, %v3219_v27, %v3221_v1  ;;  %v3775_v14 = vrot.slane %v12128_v16, 6 }
 0x369   :  { %9136 = vrot.lane.b32.xlu0 %v9135_v58, %s9249_s0  ;;  %v8962_v40 = vpop.permute.xlu1 %8961  ;;  %v3774_v56 = vsel %vm3685_vm9, %v3771_v62, %v3773_v46  ;;  %v3498_v2 = vsel %vm1583_vm0, %v3495_v48, %v3497_v34  ;;  %v3224_v62 = vsel %vm3135_vm10, %v3221_v1, %v3223_v30  ;;  %v3499_v58 = vrot.slane %v12128_v16, 4 }
 0x36a   :  { %v8963_v9 = vunpack.i.l.bf16 %v8962_v40  ;;  %8075 = vmatmul.mubr.msk.f32.gmra.mxu0 %vm4395_vm11, %v12111_v17  ;;  %v12164_v8 = vpop.permute.xlu0 %4006  ;;  %v9145_v11 = vpack.i.bf16 %v3774_v56, %v3772_v63  ;;  %v8964_v51 = vunpack.i.h.bf16 %v8962_v40  ;;  %v9140_v22 = vpack.i.bf16 %v3498_v2, %v3496_v13 }
 0x36b   :  { %4659 = vmatmul.mubr.f32.gmra.mxu1 %v4201_v12  ;;  %8077 = vmatprep.mubr.msk.f32.mxu0 %vm9246_vm8, %v9240_v3  ;;  %v9150_v40 = vpack.i.bf16 %v3224_v62, %v3222_v20  ;;  %v3500_v13 = vsel %vm1583_vm0, %v3497_v34, %v3499_v58 }
 0x36c   :  { %4048 = vrot.lane.b32.xlu1 %v12140_v55, %s9243_s23  ;;  %v4258_v31 = vsel %vm4239_vm12, %v8963_v9, %v8968_v52  ;;  %v4259_v35 = vsel %vm4239_vm12, %v8964_v51, %v8969_v24 }
 0x36d   :  { %9146 = vrot.lane.b32.xlu0 %v9145_v11, %s9247_s15  ;;  %v8972_v26 = vpop.permute.xlu1 %8971  ;;  %v4313_v33 = vsel %vm1388_vm5, %v4258_v31, %v12044_v60  ;;  %v4314_v27 = vsel %vm1388_vm5, %v4259_v35, %v12132_v47  ;;  %v3225_v31 = vrot.slane %v12128_v16, 2 }
 0x36e   :  { %v8974_v49 = vunpack.i.h.bf16 %v8972_v26  ;;  %v8973_v28 = vunpack.i.l.bf16 %v8972_v26  ;;  %v12182_v21 = vpop.permute.xlu0 %4004  ;;  %4663 = vmatprep.mubr.f32.mxu1 %v4313_v33 }
 0x36f   :  { %8078 = vmatmul.mubr.msk.f32.gmra.mxu0 %vm4395_vm11, %v12182_v21 }
 0x370   :  { %9141 = vrot.lane.b32.xlu1 %v9140_v22, %s9248_s25  ;;  %v12191_v60 = vpop.f32.mrf.mxu1  ;;  %8080 = vmatprep.mubr.msk.f32.mxu0 %vm9246_vm8, %v9240_v3  ;;  %v4146_v59 = vsel %vm4127_vm13, %v11510_v36, %v8973_v28  ;;  %v4147_v12 = vsel %vm4127_vm13, %v11505_v18, %v8974_v49  ;;  %v3776_v18 = vsel %vm3685_vm9, %v3773_v46, %v3775_v14 }
 0x371   :  { %4054 = vrot.lane.b32.xlu0 %v12191_v60, %s9243_s23  ;;  %v8982_v54 = vpop.permute.xlu1 %8981  ;;  %v4202_v48 = vsel %vm4183_vm14, %v4146_v59, %v8963_v9  ;;  %v4203_v26 = vsel %vm4183_vm14, %v4147_v12, %v8964_v51 }
 0x372   :  { %v8984_v63 = vunpack.i.h.bf16 %v8982_v54  ;;  %v8983_v56 = vunpack.i.l.bf16 %v8982_v54  ;;  %v12205_v52 = vpop.f32.mrf.mxu1  ;;  %v12207_v36 = vpop.permute.xlu0 %8976  ;;  %4664 = vmatmul.mubr.f32.gmra.mxu1 %v4202_v48 }
 0x373   :  { %v3227_v11 = vrot.slane %v12205_v52, 2  ;;  %v3501_v2 = vrot.slane %v12205_v52, 4  ;;  %v3777_v9 = vrot.slane %v12205_v52, 6  ;;  %v8979_v1 = vunpack.i.h.bf16 %v12207_v36  ;;  %4668 = vmatprep.mubr.f32.mxu1 %v4314_v27  ;;  %8081 = vmatmul.mubr.msk.f32.gmra.mxu0 %vm4395_vm11, %v12164_v8 }
 0x374   :  { %v8978_v24 = vunpack.i.l.bf16 %v12207_v36  ;;  %9151 = vrot.lane.b32.xlu1 %v9150_v40, %s9249_s0  ;;  %8083 = vmatprep.mubr.msk.f32.mxu0 %vm9246_vm8, %v9240_v3  ;;  %v3226_v40 = vsel %vm3135_vm10, %v3223_v30, %v3225_v31 }
 0x375   :  { %4052 = vrot.lane.b32.xlu0 %v12205_v52, %s9243_s23  ;;  %v12229_v47 = vpop.permute.xlu1 %4010  ;;  %v3778_v33 = vsel %vm3685_vm9, %v3775_v14, %v3777_v9  ;;  %v3502_v49 = vsel %vm1583_vm0, %v3499_v58, %v3501_v2  ;;  %v3228_v35 = vsel %vm3135_vm10, %v3225_v31, %v3227_v11  ;;  %v4261_v14 = vsel %vm4239_vm12, %v8979_v1, %v8984_v63 }
 0x376   :  { %v8987_v28 = vpop.permute.xlu0 %8986  ;;  %4669 = vmatmul.mubr.f32.gmra.mxu1 %v4203_v26  ;;  %v9160_v46 = vpack.i.bf16 %v3778_v33, %v3776_v18  ;;  %v4260_v22 = vsel %vm4239_vm12, %v8978_v24, %v8983_v56  ;;  %v9155_v62 = vpack.i.bf16 %v3502_v49, %v3500_v13  ;;  %v3503_v58 = vrot.slane %v12191_v60, 4 }
 0x377   :  { %v8989_v59 = vunpack.i.h.bf16 %v8987_v28  ;;  %v8988_v51 = vunpack.i.l.bf16 %v8987_v28  ;;  %v4315_v20 = vsel %vm1388_vm5, %v4260_v22, %v12111_v17  ;;  %v3779_v17 = vrot.slane %v12191_v60, 6 }
 0x378   :  { %9161 = vrot.lane.b32.xlu1 %v9160_v46, %s9247_s15  ;;  %4673 = vmatprep.mubr.f32.mxu1 %v4315_v20  ;;  %v12245_v34 = vpop.f32.mrf.mxu1  ;;  %v9165_v27 = vpack.i.bf16 %v3228_v35, %v3226_v40  ;;  %v4316_v12 = vsel %vm1388_vm5, %v4261_v14, %v12182_v21  ;;  %v3229_v31 = vrot.slane %v12191_v60, 2  ;;  %v3504_v21 = vsel %vm1583_vm0, %v3501_v2, %v3503_v58 }
 0x379   :  { %9156 = vrot.lane.b32.xlu0 %v9155_v62, %s9248_s25  ;;  %v4009_v54 = vpop.permute.xlu1 %4008  ;;  %v4148_v48 = vsel %vm4127_vm13, %v11531_v53, %v8988_v51  ;;  %v4149_v30 = vsel %vm4127_vm13, %v11528_v7, %v8989_v59  ;;  %v3780_v49 = vsel %vm3685_vm9, %v3777_v9, %v3779_v17 }
 0x37a   :  { %v12255_v63 = vpop.f32.mrf.mxu1  ;;  %8084 = vmatmul.mubr.msk.f32.gmra.mxu0 %vm4395_vm11, %v4009_v54  ;;  %v8997_v56 = vpop.permute.xlu0 %8996  ;;  %v4204_v36 = vsel %vm4183_vm14, %v4148_v48, %v8978_v24  ;;  %v4205_v2 = vsel %vm4183_vm14, %v4149_v30, %v8979_v1  ;;  %v3230_v14 = vsel %vm3135_vm10, %v3227_v11, %v3229_v31 }
 0x37b   :  { %v3231_v18 = vrot.slane %v12255_v63, 2  ;;  %v3505_v53 = vrot.slane %v12255_v63, 4  ;;  %v3781_v26 = vrot.slane %v12255_v63, 6  ;;  %4674 = vmatmul.mubr.f32.gmra.mxu1 %v4204_v36  ;;  %8086 = vmatprep.mubr.msk.f32.mxu0 %vm9246_vm8, %v9240_v3  ;;  %v8998_v24 = vunpack.i.l.bf16 %v8997_v56 }
 0x37c   :  { %4056 = vrot.lane.b32.xlu1 %v12255_v63, %s9243_s23  ;;  %4678 = vmatprep.mubr.f32.mxu1 %v4316_v12  ;;  %v8999_v51 = vunpack.i.h.bf16 %v8997_v56 }
 0x37d   :  { %9166 = vrot.lane.b32.xlu0 %v9165_v27, %s9249_s0  ;;  %v8992_v33 = vpop.permute.xlu1 %8991  ;;  %v3506_v13 = vsel %vm1583_vm0, %v3503_v58, %v3505_v53  ;;  %v3782_v7 = vsel %vm3685_vm9, %v3779_v17, %v3781_v26  ;;  %v3232_v9 = vsel %vm3135_vm10, %v3229_v31, %v3231_v18  ;;  %v3507_v27 = vrot.slane %v12245_v34, 4 }
 0x37e   :  { %v8993_v28 = vunpack.i.l.bf16 %v8992_v33  ;;  %8087 = vmatmul.mubr.msk.f32.gmra.mxu0 %vm4395_vm11, %v12229_v47  ;;  %v12280_v46 = vpop.permute.xlu0 %4014  ;;  %v9170_v22 = vpack.i.bf16 %v3506_v13, %v3504_v21  ;;  %v9175_v62 = vpack.i.bf16 %v3782_v7, %v3780_v49  ;;  %v8994_v35 = vunpack.i.h.bf16 %v8992_v33 }
 0x37f   :  { %4679 = vmatmul.mubr.f32.gmra.mxu1 %v4205_v2  ;;  %8089 = vmatprep.mubr.msk.f32.mxu0 %vm9246_vm8, %v9240_v3  ;;  %v9180_v17 = vpack.i.bf16 %v3232_v9, %v3230_v14 }
 0x380   :  { %9171 = vrot.lane.b32.xlu1 %v9170_v22, %s9248_s25  ;;  %v4262_v59 = vsel %vm4239_vm12, %v8993_v28, %v8998_v24  ;;  %v4263_v36 = vsel %vm4239_vm12, %v8994_v35, %v8999_v51 }
 0x381   :  { %9176 = vrot.lane.b32.xlu0 %v9175_v62, %s9247_s15  ;;  %v9002_v20 = vpop.permute.xlu1 %9001  ;;  %v4317_v1 = vsel %vm1388_vm5, %v4262_v59, %v12164_v8  ;;  %v4318_v31 = vsel %vm1388_vm5, %v4263_v36, %v4009_v54 }
 0x382   :  { %v9004_v58 = vunpack.i.h.bf16 %v9002_v20  ;;  %v9003_v48 = vunpack.i.l.bf16 %v9002_v20  ;;  %v4013_v40 = vpop.permute.xlu0 %4012  ;;  %4683 = vmatprep.mubr.f32.mxu1 %v4317_v1 }
 0x383   :  { %8090 = vmatmul.mubr.msk.f32.gmra.mxu0 %vm4395_vm11, %v4013_v40 }
 0x384   :  { %v12298_v56 = vpop.f32.mrf.mxu1  ;;  %9181 = vrot.lane.b32.xlu1 %v9180_v17, %s9249_s0  ;;  %8092 = vmatprep.mubr.msk.f32.mxu0 %vm9246_vm8, %v9240_v3  ;;  %v4150_v8 = vsel %vm4127_vm13, %v11557_v43, %v9003_v48  ;;  %v4151_v21 = vsel %vm4127_vm13, %v11551_v61, %v9004_v58  ;;  %v3783_v43 = vrot.slane %v12245_v34, 6  ;;  %v3233_v17 = vrot.slane %v12245_v34, 2 }
 0x385   :  { %v4206_v11 = vsel %vm4183_vm14, %v4150_v8, %v8993_v28  ;;  %v9012_v12 = vpop.permute.xlu1 %9011  ;;  %v3508_v28 = vsel %vm1583_vm0, %v3505_v53, %v3507_v27  ;;  %v4207_v2 = vsel %vm4183_vm14, %v4151_v21, %v8994_v35 }
 0x386   :  { %v12307_v30 = vpop.f32.mrf.mxu1  ;;  %4684 = vmatmul.mubr.f32.gmra.mxu1 %v4206_v11  ;;  %v9013_v24 = vunpack.i.l.bf16 %v9012_v12  ;;  %v9007_v13 = vpop.permute.xlu0 %9006  ;;  %v9014_v54 = vunpack.i.h.bf16 %v9012_v12  ;;  %v3784_v9 = vsel %vm3685_vm9, %v3781_v26, %v3783_v43 }
 0x387   :  { %v3509_v33 = vrot.slane %v12307_v30, 4  ;;  %4688 = vmatprep.mubr.f32.mxu1 %v4318_v31  ;;  %8093 = vmatmul.mubr.msk.f32.gmra.mxu0 %vm4395_vm11, %v12280_v46  ;;  %v3785_v49 = vrot.slane %v12307_v30, 6  ;;  %v9008_v7 = vunpack.i.l.bf16 %v9007_v13  ;;  %v9009_v61 = vunpack.i.h.bf16 %v9007_v13 }
 0x388   :  { %8095 = vmatprep.mubr.msk.f32.mxu0 %vm9246_vm8, %v9240_v3  ;;  %v3235_v35 = vrot.slane %v12307_v30, 2 }
 0x389   :  { %v3510_v22 = vsel %vm1583_vm0, %v3507_v27, %v3509_v33  ;;  %v3786_v53 = vsel %vm3685_vm9, %v3783_v43, %v3785_v49  ;;  %v4264_v51 = vsel %vm4239_vm12, %v9008_v7, %v9013_v24  ;;  %v4265_v36 = vsel %vm4239_vm12, %v9009_v61, %v9014_v54 }
 0x38a   :  { %v12324_v62 = vpop.permute.xlu1 %4018  ;;  %4689 = vmatmul.mubr.f32.gmra.mxu1 %v4207_v2  ;;  %v9185_v59 = vpack.i.bf16 %v3510_v22, %v3508_v28  ;;  %v9017_v20 = vpop.permute.xlu0 %9016  ;;  %v9190_v1 = vpack.i.bf16 %v3786_v53, %v3784_v9  ;;  %v4319_v14 = vsel %vm1388_vm5, %v4264_v51, %v12229_v47  ;;  %v3236_v31 = vsel %vm3135_vm10, %v3233_v17, %v3235_v35 }
 0x38b   :  { %v9019_v58 = vunpack.i.h.bf16 %v9017_v20  ;;  %v9018_v48 = vunpack.i.l.bf16 %v9017_v20  ;;  %4693 = vmatprep.mubr.f32.mxu1 %v4319_v14  ;;  %v4320_v24 = vsel %vm1388_vm5, %v4265_v36, %v4013_v40  ;;  %v3234_v43 = vsel %vm3135_vm10, %v3231_v18, %v3233_v17 }
 0x38c   :  { %9186 = vrot.lane.b32.xlu0 %v9185_v59, %s9248_s25  ;;  %v12337_v26 = vpop.f32.mrf.mxu1  ;;  %9191 = vrot.lane.b32.xlu1 %v9190_v1, %s9247_s15  ;;  %v3237_v53 = vrot.slane %v12298_v56, 2  ;;  %v3787_v59 = vrot.slane %v12298_v56, 6 }
 0x38d   :  { %v4152_v47 = vsel %vm4127_vm13, %v11583_v42, %v9018_v48  ;;  %v4153_v42 = vsel %vm4127_vm13, %v11580_v57, %v9019_v58  ;;  %v9195_v57 = vpack.i.bf16 %v3236_v31, %v3234_v43  ;;  %v3515_v43 = vrot.slane %v12337_v26, 4 }
 0x38e   :  { %v12342_v8 = vpop.permute.xlu1 %4016  ;;  %v12344_v11 = vpop.f32.mrf.mxu1  ;;  %v4208_v12 = vsel %vm4183_vm14, %v4152_v47, %v9008_v7  ;;  %v3511_v7 = vrot.slane %v12298_v56, 4  ;;  %v4209_v18 = vsel %vm4183_vm14, %v4153_v42, %v9009_v61 }
 0x38f   :  { %8096 = vmatmul.mubr.msk.f32.gmra.mxu0 %vm4395_vm11, %v12342_v8  ;;  %v9027_v27 = vpop.permute.xlu0 %9026  ;;  %v3513_v21 = vrot.slane %v12344_v11, 4  ;;  %4694 = vmatmul.mubr.f32.gmra.mxu1 %v4208_v12  ;;  %v3239_v28 = vrot.slane %v12344_v11, 2  ;;  %v3789_v54 = vrot.slane %v12344_v11, 6 }
 0x390   :  { %4060 = vrot.lane.b32.xlu0 %v12307_v30, %s9243_s23  ;;  %4058 = vrot.lane.b32.xlu1 %v12245_v34, %s9243_s23  ;;  %v9028_v2 = vunpack.i.l.bf16 %v9027_v27  ;;  %v3512_v14 = vsel %vm1583_vm0, %v3509_v33, %v3511_v7  ;;  %v9029_v58 = vunpack.i.h.bf16 %v9027_v27 }
 0x391   :  { %4698 = vmatprep.mubr.f32.mxu1 %v4320_v24  ;;  %v12362_v13 = vpop.f32.mrf.mxu1  ;;  %8098 = vmatprep.mubr.msk.f32.mxu0 %vm9246_vm8, %v9240_v3  ;;  %v3514_v1 = vsel %vm1583_vm0, %v3511_v7, %v3513_v21  ;;  %v3240_v36 = vsel %vm3135_vm10, %v3237_v53, %v3239_v28  ;;  %v3790_v47 = vsel %vm3685_vm9, %v3787_v59, %v3789_v54 }
 0x392   :  { %v12370_v40 = vpop.permute.xlu1 %9021  ;;  %v9200_v33 = vpack.i.bf16 %v3514_v1, %v3512_v14 }
 0x393   :  { %v9023_v22 = vunpack.i.l.bf16 %v12370_v40  ;;  %8099 = vmatmul.mubr.msk.f32.gmra.mxu0 %vm4395_vm11, %v12324_v62  ;;  %v12377_v9 = vpop.permute.xlu0 %4022  ;;  %v9024_v51 = vunpack.i.h.bf16 %v12370_v40  ;;  %v12383_v20 = vpop.f32.mrf.mxu1  ;;  %4699 = vmatmul.mubr.f32.gmra.mxu1 %v4209_v18  ;;  %v3238_v40 = vsel %vm3135_vm10, %v3235_v35, %v3237_v53 }
 0x394   :  { %9196 = vrot.lane.b32.xlu0 %v9195_v57, %s9249_s0  ;;  %4064 = vrot.lane.b32.xlu1 %v12344_v11, %s9243_s23  ;;  %v3517_v12 = vrot.slane %v12383_v20, 4  ;;  %v3793_v27 = vrot.slane %v12383_v20, 6  ;;  %v3788_v57 = vsel %vm3685_vm9, %v3785_v49, %v3787_v59 }
 0x395   :  { %8101 = vmatprep.mubr.msk.f32.mxu0 %vm9246_vm8, %v9240_v3  ;;  %v4266_v61 = vsel %vm4239_vm12, %v9023_v22, %v9028_v2  ;;  %v3791_v2 = vrot.slane %v12337_v26, 6  ;;  %v9205_v14 = vpack.i.bf16 %v3790_v47, %v3788_v57 }
 0x396   :  { %v9032_v48 = vpop.permute.xlu1 %9031  ;;  %v4321_v17 = vsel %vm1388_vm5, %v4266_v61, %v12280_v46  ;;  %v4267_v46 = vsel %vm4239_vm12, %v9024_v51, %v9029_v58  ;;  %v9210_v61 = vpack.i.bf16 %v3240_v36, %v3238_v40  ;;  %v3518_v49 = vsel %vm1583_vm0, %v3515_v43, %v3517_v12 }
 0x397   :  { %v9034_v31 = vunpack.i.h.bf16 %v9032_v48  ;;  %v9033_v24 = vunpack.i.l.bf16 %v9032_v48  ;;  %v4021_v42 = vpop.permute.xlu0 %4020  ;;  %4703 = vmatprep.mubr.f32.mxu1 %v4321_v17  ;;  %v3792_v47 = vsel %vm3685_vm9, %v3789_v54, %v3791_v2  ;;  %v3241_v54 = vrot.slane %v12337_v26, 2 }
 0x398   :  { %4062 = vrot.lane.b32.xlu0 %v12298_v56, %s9243_s23  ;;  %8102 = vmatmul.mubr.msk.f32.gmra.mxu0 %vm4395_vm11, %v4021_v42 }
 0x399   :  { %9201 = vrot.lane.b32.xlu1 %v9200_v33, %s9248_s25  ;;  %8104 = vmatprep.mubr.msk.f32.mxu0 %vm9246_vm8, %v9240_v3  ;;  %v4154_v7 = vsel %vm4127_vm13, %v11616_v25, %v9033_v24  ;;  %v4322_v25 = vsel %vm1388_vm5, %v4267_v46, %v12342_v8  ;;  %v4155_v35 = vsel %vm4127_vm13, %v11607_v5, %v9034_v31  ;;  %v3243_v33 = vrot.slane %v12383_v20, 2 }
 0x39a   :  { %v9042_v18 = vpop.permute.xlu1 %9041  ;;  %v4210_v1 = vsel %vm4183_vm14, %v4154_v7, %v9023_v22  ;;  %v3794_v22 = vsel %vm3685_vm9, %v3791_v2, %v3793_v27  ;;  %v3516_v5 = vsel %vm1583_vm0, %v3513_v21, %v3515_v43  ;;  %v4211_v36 = vsel %vm4183_vm14, %v4155_v35, %v9024_v51 }
 0x39b   :  { %v9043_v58 = vunpack.i.l.bf16 %v9042_v18  ;;  %v9037_v48 = vpop.permute.xlu0 %9036  ;;  %4704 = vmatmul.mubr.f32.gmra.mxu1 %v4210_v1  ;;  %v9044_v59 = vunpack.i.h.bf16 %v9042_v18  ;;  %v9215_v31 = vpack.i.bf16 %v3518_v49, %v3516_v5  ;;  %v9220_v7 = vpack.i.bf16 %v3794_v22, %v3792_v47 }
 0x39c   :  { %v9038_v53 = vunpack.i.l.bf16 %v9037_v48  ;;  %9206 = vrot.lane.b32.xlu0 %v9205_v14, %s9247_s15  ;;  %4708 = vmatprep.mubr.f32.mxu1 %v4322_v25  ;;  %v9039_v17 = vunpack.i.h.bf16 %v9037_v48  ;;  %v3244_v1 = vsel %vm3135_vm10, %v3241_v54, %v3243_v33 }
 0x39d   :  { %9211 = vrot.lane.b32.xlu1 %v9210_v61, %s9249_s0  ;;  %8105 = vmatmul.mubr.msk.f32.gmra.mxu0 %vm4395_vm11, %v12377_v9 }
 0x39e   :  { %v12442_v8 = vpop.permute.xlu1 %4026  ;;  %v4268_v24 = vsel %vm4239_vm12, %v9038_v53, %v9043_v58  ;;  %8107 = vmatprep.mubr.msk.f32.mxu0 %vm9246_vm8, %v9240_v3  ;;  %v4269_v40 = vsel %vm4239_vm12, %v9039_v17, %v9044_v59 }
 0x39f   :  { %v9047_v46 = vpop.permute.xlu0 %9046  ;;  %4709 = vmatmul.mubr.f32.gmra.mxu1 %v4211_v36  ;;  %v4323_v21 = vsel %vm1388_vm5, %v4268_v24, %v12324_v62  ;;  %v4324_v61 = vsel %vm1388_vm5, %v4269_v40, %v4021_v42 }
 0x3a0   :  { %v9049_v43 = vunpack.i.h.bf16 %v9047_v46  ;;  %v9048_v51 = vunpack.i.l.bf16 %v9047_v46  ;;  %9216 = vrot.lane.b32.xlu0 %v9215_v31, %s9248_s25  ;;  %4713 = vmatprep.mubr.f32.mxu1 %v4323_v21 }
 0x3a1   :  { %9221 = vrot.lane.b32.xlu1 %v9220_v7, %s9247_s15 }
 0x3a2   :  { %v4025_v57 = vpop.permute.xlu1 %4024  ;;  %v4156_v2 = vsel %vm4127_vm13, %v11655_v23, %v9048_v51  ;;  %v4157_v14 = vsel %vm4127_vm13, %v11647_v6, %v9049_v43  ;;  %v3242_v23 = vsel %vm3135_vm10, %v3239_v28, %v3241_v54  ;;  %v3795_v28 = vrot.slane %v12362_v13, 6 }
 0x3a3   :  { %8108 = vmatmul.mubr.msk.f32.gmra.mxu0 %vm4395_vm11, %v4025_v57  ;;  %v9057_v18 = vpop.permute.xlu0 %9056  ;;  %v4212_v62 = vsel %vm4183_vm14, %v4156_v2, %v9038_v53  ;;  %v9225_v48 = vpack.i.bf16 %v3244_v1, %v3242_v23  ;;  %v4213_v6 = vsel %vm4183_vm14, %v4157_v14, %v9039_v17 }
 0x3a4   :  { %4068 = vrot.lane.b32.xlu0 %v12383_v20, %s9243_s23  ;;  %4714 = vmatmul.mubr.f32.gmra.mxu1 %v4212_v62  ;;  %v9058_v25 = vunpack.i.l.bf16 %v9057_v18  ;;  %v9059_v22 = vunpack.i.h.bf16 %v9057_v18  ;;  %v3796_v31 = vsel %vm3685_vm9, %v3793_v27, %v3795_v28 }
 0x3a5   :  { %4066 = vrot.lane.b32.xlu1 %v12337_v26, %s9243_s23  ;;  %4718 = vmatprep.mubr.f32.mxu1 %v4324_v61 }
 0x3a6   :  { %v9052_v58 = vpop.permute.xlu1 %9051  ;;  %8110 = vmatprep.mubr.msk.f32.mxu0 %vm9246_vm8, %v9240_v3 }
 0x3a7   :  { %v9053_v35 = vunpack.i.l.bf16 %v9052_v58  ;;  %8111 = vmatmul.mubr.msk.f32.gmra.mxu0 %vm4395_vm11, %v12442_v8  ;;  %v12477_v42 = vpop.permute.xlu0 %4030  ;;  %v9054_v49 = vunpack.i.h.bf16 %v9052_v58 }
 0x3a8   :  { %9226 = vrot.lane.b32.xlu0 %v9225_v48, %s9249_s0  ;;  %4719 = vmatmul.mubr.f32.gmra.mxu1 %v4213_v6 }
 0x3a9   :  { %3627 = vrot.lane.b32.xlu1 %v3517_v12, %s9248_s25  ;;  %8113 = vmatprep.mubr.msk.f32.mxu0 %vm9246_vm8, %v9240_v3  ;;  %v4270_v53 = vsel %vm4239_vm12, %v9053_v35, %v9058_v25  ;;  %v4271_v12 = vsel %vm4239_vm12, %v9054_v49, %v9059_v22 }
 0x3aa   :  { %v9062_v59 = vpop.permute.xlu1 %9061  ;;  %v4325_v17 = vsel %vm1388_vm5, %v4270_v53, %v12377_v9  ;;  %v4326_v27 = vsel %vm1388_vm5, %v4271_v12, %v4025_v57 }
 0x3ab   :  { %v9064_v5 = vunpack.i.h.bf16 %v9062_v59  ;;  %v9063_v36 = vunpack.i.l.bf16 %v9062_v59  ;;  %v4029_v47 = vpop.permute.xlu0 %4028  ;;  %4723 = vmatprep.mubr.f32.mxu1 %v4325_v17 }
 0x3ac   :  { %3905 = vrot.lane.b32.xlu0 %v3796_v31, %s9247_s15  ;;  %8114 = vmatmul.mubr.msk.f32.gmra.mxu0 %vm4395_vm11, %v4029_v47 }
 0x3ad   :  { %3353 = vrot.lane.b32.xlu1 %v3243_v33, %s9249_s0  ;;  %8116 = vmatprep.mubr.msk.f32.mxu0 %vm9246_vm8, %v9240_v3  ;;  %v4158_v9 = vsel %vm4127_vm13, %v11723_v39, %v9063_v36  ;;  %v4159_v43 = vsel %vm4127_vm13, %v11707_v37, %v9064_v5 }
 0x3ae   :  { %v9072_v24 = vpop.permute.xlu1 %9071  ;;  %v4214_v46 = vsel %vm4183_vm14, %v4158_v9, %v9053_v35  ;;  %v4215_v40 = vsel %vm4183_vm14, %v4159_v43, %v9054_v49 }
 0x3af   :  { %v9073_v7 = vunpack.i.l.bf16 %v9072_v24  ;;  %v9067_v21 = vpop.permute.xlu0 %9066  ;;  %4724 = vmatmul.mubr.f32.gmra.mxu1 %v4214_v46  ;;  %v9074_v33 = vunpack.i.h.bf16 %v9072_v24 }
 0x3b0   :  { %v9068_v51 = vunpack.i.l.bf16 %v9067_v21  ;;  %4070 = vrot.lane.b32.xlu0 %v12362_v13, %s9243_s23  ;;  %4728 = vmatprep.mubr.f32.mxu1 %v4326_v27  ;;  %v9069_v54 = vunpack.i.h.bf16 %v9067_v21  ;;  %v5802_v27 = vld [vmem:[%s14147_s6 + $0x48] sm:$0x7f] }
 0x3b1   :  { %8117 = vmatmul.mubr.msk.f32.gmra.mxu0 %vm4395_vm11, %v12477_v42  ;;  %8180 = vmatpush3.msk.msra.mxu1 %vm2044_vm6, %v5802_v27  ;;  %v5797_v27 = vld [vmem:[%s14147_s6 + $0x20] sm:$0xff]  ;;  %vm7222_vm6 = vcmask 80896  }
 0x3b2   :  { %v12509_v39 = vpop.permute.xlu1 %4034  ;;  %v4272_v2 = vsel %vm4239_vm12, %v9068_v51, %v9073_v7  ;;  %8119 = vmatprep.mubr.msk.f32.mxu0 %vm9246_vm8, %v9240_v3  ;;  %v4273_v62 = vsel %vm4239_vm12, %v9069_v54, %v9074_v33  ;;  %8181 = vmatprep.subr.mxu1 %v9240_v3 }
 0x3b3   :  { %v9077_v37 = vpop.permute.xlu0 %9076  ;;  %4729 = vmatmul.mubr.f32.gmra.mxu1 %v4215_v40  ;;  %v4327_v13 = vsel %vm1388_vm5, %v4272_v2, %v12442_v8  ;;  %v4328_v58 = vsel %vm1388_vm5, %v4273_v62, %v4029_v47 }
 0x3b4   :  { %v9079_v57 = vunpack.i.h.bf16 %v9077_v37  ;;  %v9078_v18 = vunpack.i.l.bf16 %v9077_v37  ;;  %4733 = vmatprep.mubr.f32.mxu1 %v4327_v13 }
 0x3b6   :  { %v4033_v1 = vpop.permute.xlu1 %4032  ;;  %v4160_v61 = vsel %vm4127_vm13, %v11777_v0, %v9078_v18  ;;  %v4161_v8 = vsel %vm4127_vm13, %v11766_v29, %v9079_v57 }
 0x3b7   :  { %8120 = vmatmul.mubr.msk.f32.gmra.mxu0 %vm4395_vm11, %v4033_v1  ;;  %v9087_v14 = vpop.permute.xlu0 %9086  ;;  %v4216_v23 = vsel %vm4183_vm14, %v4160_v61, %v9068_v51  ;;  %v4217_v6 = vsel %vm4183_vm14, %v4161_v8, %v9069_v54 }
 0x3b8   :  { %4734 = vmatmul.mubr.f32.gmra.mxu1 %v4216_v23  ;;  %8122 = vmatprep.mubr.msk.f32.mxu0 %vm9246_vm8, %v9240_v3  ;;  %v9088_v25 = vunpack.i.l.bf16 %v9087_v14  ;;  %v9089_v53 = vunpack.i.h.bf16 %v9087_v14 }
 0x3b9   :  { %4738 = vmatprep.mubr.f32.mxu1 %v4328_v58 }
 0x3ba   :  { %v9082_v48 = vpop.permute.xlu1 %9081 }
 0x3bb   :  { %v9083_v35 = vunpack.i.l.bf16 %v9082_v48  ;;  %8123 = vmatmul.mubr.msk.f32.gmra.mxu0 %vm4395_vm11, %v12509_v39  ;;  %v12529_v0 = vpop.permute.xlu0 %4038  ;;  %v9084_v49 = vunpack.i.h.bf16 %v9082_v48 }
 0x3bc   :  { %4739 = vmatmul.mubr.f32.gmra.mxu1 %v4217_v6  ;;  %v12532_v28 = vpop.f32.mrf.mxu0  ;;  %8125 = vmatprep.mubr.msk.f32.mxu0 %vm9246_vm8, %v9240_v3 }
 0x3bd   :  { %v4274_v29 = vsel %vm4239_vm12, %v9083_v35, %v9088_v25  ;;  %v4275_v31 = vsel %vm4239_vm12, %v9084_v49, %v9089_v53 }
 0x3be   :  { %v9092_v22 = vpop.permute.xlu1 %9091  ;;  %v8016_v59 = vpop.f32.mrf.mxu0  ;;  %v4329_v17 = vsel %vm1388_vm5, %v4274_v29, %v12477_v42  ;;  %v4330_v42 = vsel %vm1388_vm5, %v4275_v31, %v4033_v1  ;;  %v5800_v29 = vld [vmem:[%s14147_s6 + $0x38] sm:$0xff] }
 0x3bf   :  { %v9094_v5 = vunpack.i.h.bf16 %v9092_v22  ;;  %v9093_v36 = vunpack.i.l.bf16 %v9092_v22  ;;  %v4037_v47 = vpop.permute.xlu0 %4036  ;;  %4743 = vmatprep.mubr.f32.mxu1 %v4329_v17 }
 0x3c0   :  { %8126 = vmatmul.mubr.msk.f32.gmra.mxu0 %vm4395_vm11, %v4037_v47 }
 0x3c1   :  { %8128 = vmatprep.mubr.msk.f32.mxu0 %vm9246_vm8, %v9240_v3  ;;  %v4162_v12 = vsel %vm4127_vm13, %v11845_v44, %v9093_v36  ;;  %v4163_v21 = vsel %vm4127_vm13, %v11829_v45, %v9094_v5  ;;  %v5799_v36 = vld [vmem:[%s14147_s6 + $0x30] sm:$0xff] }
 0x3c2   :  { %v9102_v9 = vpop.permute.xlu1 %9101  ;;  %v4218_v24 = vsel %vm4183_vm14, %v4162_v12, %v9083_v35  ;;  %v4219_v45 = vsel %vm4183_vm14, %v4163_v21, %v9084_v49 }
 0x3c3   :  { %v9103_v46 = vunpack.i.l.bf16 %v9102_v9  ;;  %v9097_v7 = vpop.permute.xlu0 %9096  ;;  %4744 = vmatmul.mubr.f32.gmra.mxu1 %v4218_v24  ;;  %v9104_v44 = vunpack.i.h.bf16 %v9102_v9 }
 0x3c4   :  { %v9098_v43 = vunpack.i.l.bf16 %v9097_v7  ;;  %4748 = vmatprep.mubr.f32.mxu1 %v4330_v42  ;;  %8129 = vmatmul.mubr.msk.f32.gmra.mxu0 %vm4395_vm11, %v12529_v0  ;;  %v9099_v51 = vunpack.i.h.bf16 %v9097_v7 }
 0x3c5   :  { %8131 = vmatprep.mubr.msk.f32.mxu0 %vm9246_vm8, %v9240_v3 }
 0x3c6   :  { %v12557_v33 = vpop.permute.xlu1 %4042  ;;  %v4276_v54 = vsel %vm4239_vm12, %v9098_v43, %v9103_v46  ;;  %v4277_v57 = vsel %vm4239_vm12, %v9099_v51, %v9104_v44  ;;  %v12618_v46 = vld [vmem:[%s14148_s4] ss:$0 sm:$0xff] }
 0x3c7   :  { %v9107_v40 = vpop.permute.xlu0 %9106  ;;  %4749 = vmatmul.mubr.f32.gmra.mxu1 %v4219_v45  ;;  %v4331_v2 = vsel %vm1388_vm5, %v4276_v54, %v12509_v39  ;;  %v4332_v23 = vsel %vm1388_vm5, %v4277_v57, %v4037_v47 }
 0x3c8   :  { %v9109_v37 = vunpack.i.h.bf16 %v9107_v40  ;;  %v9108_v13 = vunpack.i.l.bf16 %v9107_v40  ;;  %4753 = vmatprep.mubr.f32.mxu1 %v4331_v2 }
 0x3ca   :  { %v4041_v18 = vpop.permute.xlu1 %4040  ;;  %v4164_v62 = vsel %vm4127_vm13, %v11899_v15, %v9108_v13  ;;  %v4165_v39 = vsel %vm4127_vm13, %v11888_v41, %v9109_v37  ;;  %v5801_v15 = vld [vmem:[%s14147_s6 + $0x40] sm:$0xff] }
 0x3cb   :  { %8132 = vmatmul.mubr.msk.f32.gmra.mxu0 %vm4395_vm11, %v4041_v18  ;;  %v9117_v1 = vpop.permute.xlu0 %9116  ;;  %v4220_v61 = vsel %vm4183_vm14, %v4164_v62, %v9098_v43  ;;  %v12569_v14 = vpop.f32.mrf.mxu0  ;;  %v4221_v6 = vsel %vm4183_vm14, %v4165_v39, %v9099_v51  ;;  %8182 = vmatpush3.msra.mxu1 %v5801_v15 }
 0x3cc   :  { %4754 = vmatmul.mubr.f32.gmra.mxu1 %v4220_v61  ;;  %8134 = vmatprep.mubr.msk.f32.mxu0 %vm9246_vm8, %v9240_v3  ;;  %v9118_v48 = vunpack.i.l.bf16 %v9117_v1  ;;  %v9119_v59 = vunpack.i.h.bf16 %v9117_v1 }
 0x3cd   :  { %4758 = vmatprep.mubr.f32.mxu1 %v4332_v23  ;;  %v8019_v58 = vpop.f32.mrf.mxu0  ;;  %8183 = vmatprep.subr.mxu1 %v9240_v3 }
 0x3ce   :  { %v12576_v8 = vpop.permute.xlu1 %9111  ;;  %8184 = vmatpush3.msra.mxu1 %v5800_v29 }
 0x3cf   :  { %v9113_v25 = vunpack.i.l.bf16 %v12576_v8  ;;  %8135 = vmatmul.mubr.msk.f32.gmra.mxu0 %vm4395_vm11, %v12557_v33  ;;  %v12584_v35 = vpop.permute.xlu0 %4046  ;;  %v12587_v49 = vpop.f32.mrf.mxu0  ;;  %v9114_v41 = vunpack.i.h.bf16 %v12576_v8  ;;  %8185 = vmatprep.subr.mxu1 %v9240_v3 }
 0x3d0   :  { %4759 = vmatmul.mubr.f32.gmra.mxu1 %v4221_v6  ;;  %8137 = vmatprep.mubr.msk.f32.mxu0 %vm9246_vm8, %v9240_v3 }
 0x3d1   :  { %v8022_v53 = vpop.f32.mrf.mxu0  ;;  %v4278_v22 = vsel %vm4239_vm12, %v9113_v25, %v9118_v48  ;;  %v4279_v9 = vsel %vm4239_vm12, %v9114_v41, %v9119_v59  ;;  %8186 = vmatpush3.msra.mxu1 %v5799_v36 }
 0x3d2   :  { %v9122_v17 = vpop.permute.xlu1 %9121  ;;  %v4333_v5 = vsel %vm1388_vm5, %v4278_v22, %v12529_v0  ;;  %v5798_v0 = vld [vmem:[%s14147_s6 + $0x28] sm:$0xff]  ;;  %8187 = vmatprep.subr.mxu1 %v9240_v3  ;;  %v4334_v51 = vsel %vm1388_vm5, %v4279_v9, %v4041_v18  ;;  %v5793_v9 = vld [vmem:[%s14147_s6] sm:$0xff] }
 0x3d3   :  { %v9124_v47 = vunpack.i.h.bf16 %v9122_v17  ;;  %v9123_v31 = vunpack.i.l.bf16 %v9122_v17  ;;  %v12602_v12 = vpop.permute.xlu0 %4044  ;;  %4763 = vmatprep.mubr.f32.mxu1 %v4333_v5  ;;  %8188 = vmatpush3.msra.mxu1 %v5798_v0  ;;  %v5794_v17 = vld [vmem:[%s14147_s6 + $0x8] sm:$0xff] }
 0x3d4   :  { %8138 = vmatmul.mubr.msk.f32.gmra.mxu0 %vm4395_vm11, %v12602_v12  ;;  %8189 = vmatprep.subr.mxu1 %v9240_v3 }
 0x3d5   :  { %8140 = vmatprep.mubr.msk.f32.mxu0 %vm9246_vm8, %v9240_v3  ;;  %v4166_v24 = vsel %vm4127_vm13, %v11967_v38, %v9123_v31  ;;  %v4167_v45 = vsel %vm4127_vm13, %v11951_v50, %v9124_v47  ;;  %8190 = vmatpush3.msra.mxu1 %v5797_v27  ;;  %v5796_v50 = vld [vmem:[%s14147_s6 + $0x18] sm:$0xff] }
 0x3d6   :  { %v9132_v7 = vpop.permute.xlu1 %9131  ;;  %v12621_v42 = vpop.f32.mrf.mxu0  ;;  %v4222_v21 = vsel %vm4183_vm14, %v4166_v24, %v9113_v25  ;;  %v4223_v61 = vsel %vm4183_vm14, %v4167_v45, %v9114_v41  ;;  %8191 = vmatprep.subr.mxu1 %v9240_v3 }
 0x3d7   :  { %v9133_v43 = vunpack.i.l.bf16 %v9132_v7  ;;  %v12627_v44 = vpop.permute.xlu0 %9126  ;;  %4764 = vmatmul.mubr.f32.gmra.mxu1 %v4222_v21  ;;  %v4575_v38 = vpop.f32.mrf.mxu1  ;;  %v9134_v37 = vunpack.i.h.bf16 %v9132_v7 }
 0x3d8   :  { %v9128_v54 = vunpack.i.l.bf16 %v12627_v44  ;;  %v4576_v40 = vadd.f32 %v12618_v46, %v4575_v38  ;;  %4768 = vmatprep.mubr.f32.mxu1 %v4334_v51  ;;  %8141 = vmatmul.mubr.msk.f32.gmra.mxu0 %vm4395_vm11, %v12584_v35  ;;  %v8025_v2 = vpop.f32.mrf.mxu0  ;;  %v9129_v13 = vunpack.i.h.bf16 %v12627_v44 }
 0x3d9   :  { %v4577_v57 = vpop.f32.mrf.mxu1  ;;  %8143 = vmatprep.mubr.msk.f32.mxu0 %vm9246_vm8, %v9240_v3  ;;  %8192 = vmatpush3.msra.mxu1 %v5796_v50 }
 0x3da   :  { %v12644_v18 = vadd.f32 %v12532_v28, %v4576_v40  ;;  %v12646_v62 = vpop.permute.xlu1 %4050  ;;  %v12648_v1 = vpop.f32.mrf.mxu0  ;;  %v4280_v23 = vsel %vm4239_vm12, %v9128_v54, %v9133_v43  ;;  %v5795_v28 = vld [vmem:[%s14147_s6 + $0x10] sm:$0xff]  ;;  %v4281_v29 = vsel %vm4239_vm12, %v9129_v13, %v9134_v37  ;;  %8193 = vmatprep.subr.mxu1 %v9240_v3 }
 0x3db   :  { %v9137_v39 = vpop.permute.xlu0 %9136  ;;  %4769 = vmatmul.mubr.f32.gmra.mxu1 %v4223_v61  ;;  %v4580_v58 = vpop.f32.mrf.mxu1  ;;  %v4335_v8 = vsel %vm1388_vm5, %v4280_v23, %v12557_v33  ;;  %v4336_v31 = vsel %vm1388_vm5, %v4281_v29, %v12602_v12 }
 0x3dc   :  { %v9139_v15 = vunpack.i.h.bf16 %v9137_v39  ;;  %v9138_v48 = vunpack.i.l.bf16 %v9137_v39  ;;  %v4581_v25 = vadd.f32 %v12618_v46, %v4580_v58  ;;  %4773 = vmatprep.mubr.f32.mxu1 %v4335_v8  ;;  %v8028_v6 = vpop.f32.mrf.mxu0  ;;  %v5189_v53 = vmax.f32 %v12644_v18, 0.0  ;;  %8194 = vmatpush3.msra.mxu1 %v5795_v28 }
 0x3dd   :  { %v4582_v41 = vpop.f32.mrf.mxu1  ;;  %8195 = vmatprep.subr.mxu1 %v9240_v3 }
 0x3de   :  { %v12663_v33 = vadd.f32 %v12569_v14, %v4581_v25  ;;  %v12665_v22 = vpop.permute.xlu1 %4048  ;;  %v4168_v59 = vsel %vm4127_vm13, %v12017_v19, %v9138_v48  ;;  %v4169_v14 = vsel %vm4127_vm13, %v12006_v10, %v9139_v15  ;;  %8196 = vmatpush3.msra.mxu1 %v5794_v17  ;;  %v5299_v24 = vrot.slane %v5189_v53, 2 }
 0x3df   :  { %8144 = vmatmul.mubr.msk.f32.gmra.mxu0 %vm4395_vm11, %v12665_v22  ;;  %v9147_v5 = vpop.permute.xlu0 %9146  ;;  %v4224_v36 = vsel %vm4183_vm14, %v4168_v59, %v9128_v54  ;;  %v12675_v47 = vpop.f32.mrf.mxu0  ;;  %v4225_v27 = vsel %vm4183_vm14, %v4169_v14, %v9129_v13  ;;  %8197 = vmatprep.subr.mxu1 %v9240_v3 }
 0x3e0   :  { %v5190_v19 = vmax.f32 %v12663_v33, 0.0  ;;  %4774 = vmatmul.mubr.f32.gmra.mxu1 %v4224_v36  ;;  %8146 = vmatprep.mubr.msk.f32.mxu0 %vm9246_vm8, %v9240_v3  ;;  %v9148_v12 = vunpack.i.l.bf16 %v9147_v5  ;;  %v9149_v54 = vunpack.i.h.bf16 %v9147_v5 }
 0x3e1   :  { %4778 = vmatprep.mubr.f32.mxu1 %v4336_v31  ;;  %v8031_v0 = vpop.f32.mrf.mxu0  ;;  %8198 = vmatpush3.msra.mxu1 %v5793_v9 }
 0x3e2   :  { %v5300_v10 = vrot.slane %v5190_v19, 2  ;;  %v12690_v7 = vpop.permute.xlu1 %9141  ;;  %v4585_v21 = vpop.f32.mrf.mxu1  ;;  %6571 = vmatprep.subr.mxu1 %v9240_v3 }
 0x3e3   :  { %v9144_v43 = vunpack.i.h.bf16 %v12690_v7  ;;  %v9143_v44 = vunpack.i.l.bf16 %v12690_v7  ;;  %8147 = vmatmul.mubr.msk.f32.gmra.mxu0 %vm4395_vm11, %v12646_v62  ;;  %v12698_v38 = vpop.permute.xlu0 %4054  ;;  %v4586_v51 = vadd.f32 %v12618_v46, %v4585_v21  ;;  %v12701_v45 = vpop.f32.mrf.mxu0 }
 0x3e4   :  { %4779 = vmatmul.mubr.f32.gmra.mxu1 %v4225_v27  ;;  %v4587_v40 = vpop.f32.mrf.mxu1  ;;  %8149 = vmatprep.mubr.msk.f32.mxu0 %vm9246_vm8, %v9240_v3  ;;  %v5301_v2 = vsel %vm3135_vm10, %v5299_v24, %v5300_v10 }
 0x3e5   :  { %v12707_v37 = vadd.f32 %v12587_v49, %v4586_v51  ;;  %v8034_v13 = vpop.f32.mrf.mxu0  ;;  %v4282_v57 = vsel %vm4239_vm12, %v9143_v44, %v9148_v12  ;;  %v12710_v50 = vmax.f32 %v5189_v53, %v5301_v2  ;;  %v4283_v39 = vsel %vm4239_vm12, %v9144_v43, %v9149_v54 }
 0x3e6   :  { %v9152_v18 = vpop.permute.xlu1 %9151  ;;  %v4590_v61 = vpop.f32.mrf.mxu1  ;;  %v4337_v23 = vsel %vm1388_vm5, %v4282_v57, %v12584_v35  ;;  %v4338_v59 = vsel %vm1388_vm5, %v4283_v39, %v12665_v22 }
 0x3e7   :  { %v5191_v58 = vmax.f32 %v12707_v37, 0.0  ;;  %v9154_v8 = vunpack.i.h.bf16 %v9152_v18  ;;  %v9153_v28 = vunpack.i.l.bf16 %v9152_v18  ;;  %v12717_v49 = vpop.permute.xlu0 %4052  ;;  %v4591_v15 = vadd.f32 %v12618_v46, %v4590_v61  ;;  %4783 = vmatprep.mubr.f32.mxu1 %v4337_v23  ;;  %5573 = vrot.lane.b32.xlu1 %v12710_v50, %s9245_s5 }
 0x3e8   :  { %8150 = vmatmul.mubr.msk.f32.gmra.mxu0 %vm4395_vm11, %v12717_v49  ;;  %v4592_v48 = vpop.f32.mrf.mxu1 }
 0x3e9   :  { %v5302_v25 = vrot.slane %v5191_v58, 2  ;;  %v12725_v35 = vadd.f32 %v12621_v42, %v4591_v15  ;;  %8152 = vmatprep.mubr.msk.f32.mxu0 %vm9246_vm8, %v9240_v3  ;;  %v4170_v6 = vsel %vm4127_vm13, %v12087_v32, %v9153_v28  ;;  %v4171_v17 = vsel %vm4127_vm13, %v12073_v4, %v9154_v8 }
 0x3ea   :  { %v9162_v41 = vpop.permute.xlu1 %9161  ;;  %v12731_v29 = vpop.f32.mrf.mxu0  ;;  %v4226_v53 = vsel %vm4183_vm14, %v4170_v6, %v9143_v44  ;;  %v4227_v44 = vsel %vm4183_vm14, %v4171_v17, %v9144_v43 }
 0x3eb   :  { %v5192_v42 = vmax.f32 %v12725_v35, 0.0  ;;  %v9164_v5 = vunpack.i.h.bf16 %v9162_v41  ;;  %v9163_v36 = vunpack.i.l.bf16 %v9162_v41  ;;  %v12739_v14 = vpop.permute.xlu0 %9156  ;;  %4784 = vmatmul.mubr.f32.gmra.mxu1 %v4226_v53  ;;  %v4595_v31 = vpop.f32.mrf.mxu1  ;;  %v5303_v32 = vsel %vm3135_vm10, %v5300_v10, %v5302_v25 }
 0x3ec   :  { %v9159_v9 = vunpack.i.h.bf16 %v12739_v14  ;;  %v9158_v0 = vunpack.i.l.bf16 %v12739_v14  ;;  %v4596_v24 = vadd.f32 %v12618_v46, %v4595_v31  ;;  %4788 = vmatprep.mubr.f32.mxu1 %v4338_v59  ;;  %8153 = vmatmul.mubr.msk.f32.gmra.mxu0 %vm4395_vm11, %v12698_v38  ;;  %v8037_v4 = vpop.f32.mrf.mxu0  ;;  %v12749_v22 = vmax.f32 %v5190_v19, %v5303_v32 }
 0x3ed   :  { %v5304_v7 = vrot.slane %v5192_v42, 2  ;;  %v4597_v21 = vpop.f32.mrf.mxu1  ;;  %8155 = vmatprep.mubr.msk.f32.mxu0 %vm9246_vm8, %v9240_v3 }
 0x3ee   :  { %v4936_v10 = vadd.f32 %v12648_v1, %v4596_v24  ;;  %v12754_v27 = vpop.permute.xlu1 %4056  ;;  %v12756_v12 = vpop.f32.mrf.mxu0  ;;  %5575 = vrot.lane.b32.xlu0 %v12749_v22, %s9245_s5  ;;  %v4284_v33 = vsel %vm4239_vm12, %v9158_v0, %v9163_v36  ;;  %v4285_v1 = vsel %vm4239_vm12, %v9159_v9, %v9164_v5 }
 0x3ef   :  { %v9167_v19 = vpop.permute.xlu0 %9166  ;;  %4789 = vmatmul.mubr.f32.gmra.mxu1 %v4227_v44  ;;  %v4600_v51 = vpop.f32.mrf.mxu1  ;;  %v4339_v54 = vsel %vm1388_vm5, %v4284_v33, %v12646_v62  ;;  %v5305_v40 = vsel %vm3135_vm10, %v5302_v25, %v5304_v7  ;;  %v4340_v25 = vsel %vm1388_vm5, %v4285_v1, %v12717_v49 }
 0x3f0   :  { %v5193_v2 = vmax.f32 %v4936_v10, 0.0  ;;  %v9169_v37 = vunpack.i.h.bf16 %v9167_v19  ;;  %v9168_v13 = vunpack.i.l.bf16 %v9167_v19  ;;  %v4601_v43 = vadd.f32 %v12618_v46, %v4600_v51  ;;  %4793 = vmatprep.mubr.f32.mxu1 %v4339_v54  ;;  %8156 = vmatmul.mubr.msk.f32.gmra.mxu0 %vm4395_vm11, %v12754_v27  ;;  %v8040_v57 = vpop.f32.mrf.mxu0 }
 0x3f1   :  { %v4602_v18 = vpop.f32.mrf.mxu1  ;;  %v12769_v61 = vmax.f32 %v5191_v58, %v5305_v40  ;;  %8158 = vmatprep.mubr.msk.f32.mxu0 %vm9246_vm8, %v9240_v3 }
 0x3f2   :  { %v5306_v62 = vrot.slane %v5193_v2, 2  ;;  %v12774_v23 = vadd.f32 %v12675_v47, %v4601_v43  ;;  %v9172_v39 = vpop.permute.xlu1 %9171  ;;  %v4172_v8 = vsel %vm4127_vm13, %v12140_v55, %v9168_v13  ;;  %v4173_v6 = vsel %vm4127_vm13, %v12128_v16, %v9169_v37 }
 0x3f3   :  { %v9173_v28 = vunpack.i.l.bf16 %v9172_v39  ;;  %v9177_v15 = vpop.permute.xlu0 %9176  ;;  %5577 = vrot.lane.b32.xlu1 %v12769_v61, %s9245_s5  ;;  %v4228_v48 = vsel %vm4183_vm14, %v4172_v8, %v9158_v0  ;;  %v12781_v58 = vpop.f32.mrf.mxu0  ;;  %v9174_v41 = vunpack.i.h.bf16 %v9172_v39  ;;  %v4229_v0 = vsel %vm4183_vm14, %v4173_v6, %v9159_v9 }
 0x3f4   :  { %v5194_v35 = vmax.f32 %v12774_v23, 0.0  ;;  %v9178_v47 = vunpack.i.l.bf16 %v9177_v15  ;;  %4794 = vmatmul.mubr.f32.gmra.mxu1 %v4228_v48  ;;  %v5307_v55 = vsel %vm3135_vm10, %v5304_v7, %v5306_v62  ;;  %v9179_v53 = vunpack.i.h.bf16 %v9177_v15 }
 0x3f5   :  { %4798 = vmatprep.mubr.f32.mxu1 %v4340_v25  ;;  %v8043_v59 = vpop.f32.mrf.mxu0  ;;  %v12789_v17 = vmax.f32 %v5192_v42, %v5307_v55 }
 0x3f6   :  { %v5308_v5 = vrot.slane %v5194_v35, 2  ;;  %v9182_v36 = vpop.permute.xlu1 %9181  ;;  %v4605_v14 = vpop.f32.mrf.mxu1  ;;  %v4286_v49 = vsel %vm4239_vm12, %v9173_v28, %v9178_v47  ;;  %v4287_v33 = vsel %vm4239_vm12, %v9174_v41, %v9179_v53 }
 0x3f7   :  { %v9183_v31 = vunpack.i.l.bf16 %v9182_v36  ;;  %v4606_v32 = vadd.f32 %v12618_v46, %v4605_v14  ;;  %v12794_v24 = vpop.f32.mrf.mxu0  ;;  %5579 = vrot.lane.b32.xlu0 %v12789_v17, %s9245_s5  ;;  %v4341_v16 = vsel %vm1388_vm5, %v4286_v49, %v12698_v38  ;;  %v9184_v42 = vunpack.i.h.bf16 %v9182_v36 }
 0x3f8   :  { %4799 = vmatmul.mubr.f32.gmra.mxu1 %v4229_v0  ;;  %v4607_v4 = vpop.f32.mrf.mxu1  ;;  %v5309_v7 = vsel %vm3135_vm10, %v5306_v62, %v5308_v5  ;;  %v4342_v40 = vsel %vm1388_vm5, %v4287_v33, %v12754_v27 }
 0x3f9   :  { %v4946_v21 = vadd.f32 %v12701_v45, %v4606_v32  ;;  %4803 = vmatprep.mubr.f32.mxu1 %v4341_v16  ;;  %v8046_v10 = vpop.f32.mrf.mxu0  ;;  %v4174_v9 = vsel %vm4127_vm13, %v12205_v52, %v9183_v31  ;;  %v12804_v44 = vmax.f32 %v5193_v2, %v5309_v7  ;;  %v4175_v52 = vsel %vm4127_vm13, %v12191_v60, %v9184_v42 }
 0x3fa   :  { %v4610_v19 = vpop.f32.mrf.mxu1  ;;  %v4230_v51 = vsel %vm4183_vm14, %v4174_v9, %v9173_v28  ;;  %v4231_v23 = vsel %vm4183_vm14, %v4175_v52, %v9174_v41 }
 0x3fb   :  { %v5195_v38 = vmax.f32 %v4946_v21, 0.0  ;;  %v4611_v54 = vadd.f32 %v12618_v46, %v4610_v19  ;;  %5581 = vrot.lane.b32.xlu1 %v12804_v44, %s9245_s5 }
 0x3fc   :  { %4804 = vmatmul.mubr.f32.gmra.mxu1 %v4230_v51  ;;  %v4612_v45 = vpop.f32.mrf.mxu1 }
 0x3fd   :  { %v5310_v1 = vrot.slane %v5195_v38, 2  ;;  %v4951_v2 = vadd.f32 %v12731_v29, %v4611_v54  ;;  %4808 = vmatprep.mubr.f32.mxu1 %v4342_v40 }
 0x3fe   :  { %v12816_v37 = vpop.permute.xlu0 %9186  ;;  %v12818_v13 = vpop.f32.mrf.mxu0 }
 0x3ff   :  { %v5196_v43 = vmax.f32 %v4951_v2, 0.0  ;;  %v9192_v57 = vpop.permute.xlu1 %9191  ;;  %v9188_v18 = vunpack.i.l.bf16 %v12816_v37  ;;  %v4615_v62 = vpop.f32.mrf.mxu1  ;;  %v5311_v27 = vsel %vm3135_vm10, %v5308_v5, %v5310_v1  ;;  %v9189_v41 = vunpack.i.h.bf16 %v12816_v37 }
 0x400   :  { %v9193_v39 = vunpack.i.l.bf16 %v9192_v57  ;;  %v4616_v60 = vadd.f32 %v12618_v46, %v4615_v62  ;;  %4809 = vmatmul.mubr.f32.gmra.mxu1 %v4231_v23  ;;  %v8049_v8 = vpop.f32.mrf.mxu0  ;;  %v12824_v29 = vmax.f32 %v5194_v35, %v5311_v27  ;;  %v9194_v55 = vunpack.i.h.bf16 %v9192_v57 }
 0x401   :  { %v5312_v28 = vrot.slane %v5196_v43, 2  ;;  %v4617_v15 = vpop.f32.mrf.mxu1 }
 0x402   :  { %v4956_v48 = vadd.f32 %v12756_v12, %v4616_v60  ;;  %v4061_v25 = vpop.permute.xlu0 %4060  ;;  %v12827_v47 = vpop.f32.mrf.mxu0  ;;  %5583 = vrot.lane.b32.xlu0 %v12824_v29, %s9245_s5  ;;  %v4288_v6 = vsel %vm4239_vm12, %v9188_v18, %v9193_v39  ;;  %v4289_v9 = vsel %vm4239_vm12, %v9189_v41, %v9194_v55 }
 0x403   :  { %v4059_v53 = vpop.permute.xlu1 %4058  ;;  %v4620_v59 = vpop.f32.mrf.mxu1  ;;  %v5313_v35 = vsel %vm3135_vm10, %v5310_v1, %v5312_v28  ;;  %v4344_v2 = vsel %vm1388_vm5, %v4289_v9, %v4061_v25 }
 0x404   :  { %v5197_v5 = vmax.f32 %v4956_v48, 0.0  ;;  %8159 = vmatmul.mubr.msk.f32.gmra.mxu0 %vm4395_vm11, %v4059_v53  ;;  %v4621_v12 = vadd.f32 %v12618_v46, %v4620_v59  ;;  %v4343_v36 = vsel %vm1388_vm5, %v4288_v6, %v4059_v53  ;;  %v8052_v14 = vpop.f32.mrf.mxu0  ;;  %v12837_v49 = vmax.f32 %v5195_v38, %v5313_v35 }
 0x405   :  { %4813 = vmatprep.mubr.f32.mxu1 %v4343_v36  ;;  %8161 = vmatprep.mubr.msk.f32.mxu0 %vm9246_vm8, %v9240_v3  ;;  %v4622_v31 = vpop.f32.mrf.mxu1 }
 0x406   :  { %v5314_v32 = vrot.slane %v5197_v5, 2  ;;  %v12842_v0 = vadd.f32 %v12781_v58, %v4621_v12  ;;  %v9197_v16 = vpop.permute.xlu0 %9196  ;;  %5585 = vrot.lane.b32.xlu1 %v12837_v49, %s9245_s5 }
 0x407   :  { %v12846_v42 = vpop.permute.xlu1 %4064  ;;  %v9199_v4 = vunpack.i.h.bf16 %v9197_v16  ;;  %v9198_v7 = vunpack.i.l.bf16 %v9197_v16  ;;  %v12848_v21 = vpop.f32.mrf.mxu0 }
 0x408   :  { %v5198_v10 = vmax.f32 %v12842_v0, 0.0  ;;  %8162 = vmatmul.mubr.msk.f32.gmra.mxu0 %vm4395_vm11, %v4061_v25  ;;  %v5315_v33 = vsel %vm3135_vm10, %v5312_v28, %v5314_v32 }
 0x409   :  { %v8055_v58 = vpop.f32.mrf.mxu0  ;;  %8164 = vmatprep.mubr.msk.f32.mxu0 %vm9246_vm8, %v9240_v3  ;;  %v4176_v19 = vsel %vm4127_vm13, %v12255_v63, %v9198_v7  ;;  %v12858_v51 = vmax.f32 %v5196_v43, %v5315_v33  ;;  %v4177_v63 = vsel %vm4127_vm13, %v12245_v34, %v9199_v4 }
 0x40a   :  { %v5316_v38 = vrot.slane %v5198_v10, 2  ;;  %v4063_v54 = vpop.permute.xlu0 %4062  ;;  %v4625_v45 = vpop.f32.mrf.mxu1  ;;  %v4232_v40 = vsel %vm4183_vm14, %v4176_v19, %v9188_v18  ;;  %v4233_v8 = vsel %vm4183_vm14, %v4177_v63, %v9189_v41 }
 0x40b   :  { %v12863_v52 = vpop.permute.xlu1 %9201  ;;  %v4626_v1 = vadd.f32 %v12618_v46, %v4625_v45  ;;  %4814 = vmatmul.mubr.f32.gmra.mxu1 %v4232_v40  ;;  %v12867_v37 = vpop.f32.mrf.mxu0  ;;  %5587 = vrot.lane.b32.xlu0 %v12858_v51, %s9245_s5 }
 0x40c   :  { %8165 = vmatmul.mubr.msk.f32.gmra.mxu0 %vm4395_vm11, %v4063_v54  ;;  %4818 = vmatprep.mubr.f32.mxu1 %v4344_v2  ;;  %v4627_v43 = vpop.f32.mrf.mxu1  ;;  %v5317_v57 = vsel %vm3135_vm10, %v5314_v32, %v5316_v38  ;;  %v9204_v27 = vunpack.i.h.bf16 %v12863_v52  ;;  %v9203_v39 = vunpack.i.l.bf16 %v12863_v52 }
 0x40d   :  { %v12876_v18 = vadd.f32 %v12794_v24, %v4626_v1  ;;  %v8058_v62 = vpop.f32.mrf.mxu0  ;;  %8167 = vmatprep.mubr.msk.f32.mxu0 %vm9246_vm8, %v9240_v3  ;;  %v12880_v23 = vmax.f32 %v5197_v5, %v5317_v57 }
 0x40e   :  { %v9207_v34 = vpop.permute.xlu0 %9206  ;;  %v4630_v60 = vpop.f32.mrf.mxu1 }
 0x40f   :  { %v5199_v28 = vmax.f32 %v12876_v18, 0.0  ;;  %v9212_v15 = vpop.permute.xlu1 %9211  ;;  %v9209_v48 = vunpack.i.h.bf16 %v9207_v34  ;;  %v9208_v24 = vunpack.i.l.bf16 %v9207_v34  ;;  %v4631_v25 = vadd.f32 %v12618_v46, %v4630_v60  ;;  %4819 = vmatmul.mubr.f32.gmra.mxu1 %v4233_v8  ;;  %5589 = vrot.lane.b32.xlu1 %v12880_v23, %s9245_s5 }
 0x410   :  { %v9214_v6 = vunpack.i.h.bf16 %v9212_v15  ;;  %v9213_v55 = vunpack.i.l.bf16 %v9212_v15  ;;  %8168 = vmatmul.mubr.msk.f32.gmra.mxu0 %vm4395_vm11, %v12846_v42  ;;  %v4632_v53 = vpop.f32.mrf.mxu1 }
 0x411   :  { %v5318_v59 = vrot.slane %v5199_v28, 2  ;;  %v4971_v41 = vadd.f32 %v12818_v13, %v4631_v25  ;;  %v4290_v35 = vsel %vm4239_vm12, %v9203_v39, %v9208_v24  ;;  %v4291_v5 = vsel %vm4239_vm12, %v9204_v27, %v9209_v48  ;;  %8170 = vmatprep.mubr.msk.f32.mxu0 %vm9246_vm8, %v9240_v3 }
 0x412   :  { %v12896_v12 = vpop.permute.xlu0 %9216  ;;  %v4345_v36 = vsel %vm1388_vm5, %v4290_v35, %v4063_v54  ;;  %v12899_v14 = vpop.f32.mrf.mxu0  ;;  %v4178_v31 = vsel %vm4127_vm13, %v12307_v30, %v9213_v55  ;;  %v4346_v9 = vsel %vm1388_vm5, %v4291_v5, %v12846_v42  ;;  %v4179_v30 = vsel %vm4127_vm13, %v12298_v56, %v9214_v6 }
 0x413   :  { %v5200_v32 = vmax.f32 %v4971_v41, 0.0  ;;  %v9222_v16 = vpop.permute.xlu1 %9221  ;;  %v9218_v13 = vunpack.i.l.bf16 %v12896_v12  ;;  %4823 = vmatprep.mubr.f32.mxu1 %v4345_v36  ;;  %v4635_v4 = vpop.f32.mrf.mxu1  ;;  %v4234_v7 = vsel %vm4183_vm14, %v4178_v31, %v9203_v39  ;;  %v5319_v54 = vsel %vm3135_vm10, %v5316_v38, %v5318_v59 }
 0x414   :  { %v9223_v33 = vunpack.i.l.bf16 %v9222_v16  ;;  %v4636_v58 = vadd.f32 %v12618_v46, %v4635_v4  ;;  %4824 = vmatmul.mubr.f32.gmra.mxu1 %v4234_v7  ;;  %v8061_v19 = vpop.f32.mrf.mxu0  ;;  %v12913_v52 = vmax.f32 %v5198_v10, %v5319_v54  ;;  %v9224_v43 = vunpack.i.h.bf16 %v9222_v16 }
 0x415   :  { %v5320_v45 = vrot.slane %v5200_v32, 2  ;;  %4828 = vmatprep.mubr.f32.mxu1 %v4346_v9  ;;  %v4637_v40 = vpop.f32.mrf.mxu1  ;;  %v9219_v38 = vunpack.i.h.bf16 %v12896_v12  ;;  %v4235_v18 = vsel %vm4183_vm14, %v4179_v30, %v9204_v27 }
 0x416   :  { %v4976_v1 = vadd.f32 %v12827_v47, %v4636_v58  ;;  %v4069_v42 = vpop.permute.xlu0 %4068  ;;  %v12916_v2 = vpop.f32.mrf.mxu0  ;;  %v4292_v63 = vsel %vm4239_vm12, %v9218_v13, %v9223_v33  ;;  %5591 = vrot.lane.b32.xlu0 %v12913_v52, %s9245_s5 }
 0x417   :  { %v4067_v57 = vpop.permute.xlu1 %4066  ;;  %v4640_v56 = vpop.f32.mrf.mxu1  ;;  %v5321_v0 = vsel %vm3135_vm10, %v5318_v59, %v5320_v45 }
 0x418   :  { %v5201_v10 = vmax.f32 %v4976_v1, 0.0  ;;  %8171 = vmatmul.mubr.msk.f32.gmra.mxu0 %vm4395_vm11, %v4067_v57  ;;  %v4641_v47 = vadd.f32 %v12618_v46, %v4640_v56  ;;  %4829 = vmatmul.mubr.f32.gmra.mxu1 %v4235_v18  ;;  %v4347_v62 = vsel %vm1388_vm5, %v4292_v63, %v4067_v57  ;;  %v8064_v39 = vpop.f32.mrf.mxu0  ;;  %v12927_v34 = vmax.f32 %v5199_v28, %v5321_v0 }
 0x419   :  { %4833 = vmatprep.mubr.f32.mxu1 %v4347_v62  ;;  %8173 = vmatprep.mubr.msk.f32.mxu0 %vm9246_vm8, %v9240_v3  ;;  %v4642_v60 = vpop.f32.mrf.mxu1  ;;  %v4293_v28 = vsel %vm4239_vm12, %v9219_v38, %v9224_v43 }
 0x41a   :  { %v5322_v8 = vrot.slane %v5201_v10, 2  ;;  %v4981_v27 = vadd.f32 %v12848_v21, %v4641_v47  ;;  %v9227_v15 = vpop.permute.xlu0 %9226  ;;  %5593 = vrot.lane.b32.xlu1 %v12927_v34, %s9245_s5  ;;  %v4348_v16 = vsel %vm1388_vm5, %v4293_v28, %v4069_v42 }
 0x41b   :  { %v3628_v48 = vpop.permute.xlu1 %3627  ;;  %v9229_v24 = vunpack.i.h.bf16 %v9227_v15  ;;  %v9228_v25 = vunpack.i.l.bf16 %v9227_v15  ;;  %v12934_v6 = vpop.f32.mrf.mxu0 }
 0x41c   :  { %v5202_v55 = vmax.f32 %v4981_v27, 0.0  ;;  %8174 = vmatmul.mubr.msk.f32.gmra.mxu0 %vm4395_vm11, %v4069_v42  ;;  %v5323_v53 = vsel %vm3135_vm10, %v5320_v45, %v5322_v8 }
 0x41d   :  { %v8067_v59 = vpop.f32.mrf.mxu0  ;;  %v4180_v21 = vsel %vm4127_vm13, %v12344_v11, %v9228_v25  ;;  %v12941_v41 = vmax.f32 %v5200_v32, %v5323_v53  ;;  %8176 = vmatprep.mubr.msk.f32.mxu0 %vm9246_vm8, %v9240_v3  ;;  %v4181_v11 = vsel %vm4127_vm13, %v12337_v26, %v9229_v24 }
 0x41e   :  { %v5324_v35 = vrot.slane %v5202_v55, 2  ;;  %v3906_v5 = vpop.permute.xlu0 %3905  ;;  %v4645_v12 = vpop.f32.mrf.mxu1  ;;  %v4236_v36 = vsel %vm4183_vm14, %v4180_v21, %v9218_v13  ;;  %v4237_v45 = vsel %vm4183_vm14, %v4181_v11, %v9219_v38 }
 0x41f   :  { %v4646_v31 = vadd.f32 %v12618_v46, %v4645_v12  ;;  %4834 = vmatmul.mubr.f32.gmra.mxu1 %v4236_v36  ;;  %v12948_v4 = vpop.f32.mrf.mxu0  ;;  %5595 = vrot.lane.b32.xlu0 %v12941_v41, %s9245_s5  ;;  %v3354_v32 = vpop.permute.xlu1 %3353  ;;  %v4294_v19 = vsel %vm4239_vm12, %v3628_v48, %v3906_v5 }
 0x420   :  { %4838 = vmatprep.mubr.f32.mxu1 %v4348_v16  ;;  %v4647_v7 = vpop.f32.mrf.mxu1  ;;  %v5325_v9 = vsel %vm3135_vm10, %v5322_v8, %v5324_v35  ;;  %v4182_v40 = vsel %vm4127_vm13, %v12383_v20, %v3354_v32 }
 0x421   :  { %v4986_v13 = vadd.f32 %v12867_v37, %v4646_v31  ;;  %v8070_v33 = vpop.f32.mrf.mxu0  ;;  %v12956_v58 = vmax.f32 %v5201_v10, %v5325_v9  ;;  %v4238_v38 = vsel %vm4183_vm14, %v4182_v40, %v3628_v48 }
 0x422   :  { %v4071_v54 = vpop.permute.xlu0 %4070  ;;  %v4650_v30 = vpop.f32.mrf.mxu1 }
 0x423   :  { %v5203_v26 = vmax.f32 %v4986_v13, 0.0  ;;  %v4651_v1 = vadd.f32 %v12618_v46, %v4650_v30  ;;  %4839 = vmatmul.mubr.f32.gmra.mxu1 %v4237_v45  ;;  %8177 = vmatmul.mubr.msk.f32.gmra.mxu0 %vm4395_vm11, %v4071_v54  ;;  %v4349_v37 = vsel %vm1388_vm5, %v4294_v19, %v4071_v54  ;;  %vm7137_vm5 = vcmask 818176  }
 0x424   :  { %4843 = vmatprep.mubr.f32.mxu1 %v4349_v37  ;;  %5597 = vrot.lane.b32.xlu1 %v12956_v58, %s9245_s5  ;;  %v4652_v42 = vpop.f32.mrf.mxu1 }
 0x425   :  { %v5326_v63 = vrot.slane %v5203_v26, 2  ;;  %v4991_v43 = vadd.f32 %v12899_v14, %v4651_v1 }
 0x426   :  { %v5010_v57 = vpop.f32.mrf.mxu0 }
 0x427   :  { %v5204_v20 = vmax.f32 %v4991_v43, 0.0  ;;  %4844 = vmatmul.mubr.f32.gmra.mxu1 %v4238_v38  ;;  %v4655_v56 = vpop.f32.mrf.mxu1  ;;  %v5327_v18 = vsel %vm3135_vm10, %v5324_v35, %v5326_v63 }
 0x428   :  { %v4656_v0 = vadd.f32 %v12618_v46, %v4655_v56  ;;  %v8073_v10 = vpop.f32.mrf.mxu0  ;;  %v12971_v47 = vmax.f32 %v5202_v55, %v5327_v18  ;;  %8199 = vmatprep.mubr.msk.f32.mxu1 %vm9246_vm8, %v9240_v3 }
 0x429   :  { %v5328_v62 = vrot.slane %v5204_v20, 2  ;;  %v4657_v39 = vpop.f32.mrf.mxu1 }
 0x42a   :  { %v4996_v14 = vadd.f32 %v12916_v2, %v4656_v0  ;;  %v5015_v60 = vpop.f32.mrf.mxu0  ;;  %5599 = vrot.lane.b32.xlu0 %v12971_v47, %s9245_s5 }
 0x42b   :  { %v4660_v8 = vpop.f32.mrf.mxu1  ;;  %v5329_v27 = vsel %vm3135_vm10, %v5326_v63, %v5328_v62 }
 0x42c   :  { %v5205_v15 = vmax.f32 %v4996_v14, 0.0  ;;  %v4661_v48 = vadd.f32 %v12618_v46, %v4660_v8  ;;  %v8076_v24 = vpop.f32.mrf.mxu0  ;;  %v12980_v25 = vmax.f32 %v5203_v26, %v5329_v27 }
 0x42d   :  { %v4662_v55 = vpop.f32.mrf.mxu1 }
 0x42e   :  { %v5330_v28 = vrot.slane %v5205_v15, 2  ;;  %v5001_v53 = vadd.f32 %v12934_v6, %v4661_v48  ;;  %5601 = vrot.lane.b32.xlu1 %v12980_v25, %s9245_s5 }
 0x42f   :  { %v5020_v2 = vpop.f32.mrf.mxu0 }
 0x430   :  { %v5206_v59 = vmax.f32 %v5001_v53, 0.0  ;;  %v5331_v21 = vsel %vm3135_vm10, %v5328_v62, %v5330_v28 }
 0x431   :  { %v8079_v35 = vpop.f32.mrf.mxu0  ;;  %v12986_v5 = vmax.f32 %v5204_v20, %v5331_v21 }
 0x432   :  { %v5332_v12 = vrot.slane %v5206_v59, 2  ;;  %v4665_v36 = vpop.f32.mrf.mxu1 }
 0x433   :  { %v4666_v31 = vadd.f32 %v12618_v46, %v4665_v36  ;;  %v5025_v16 = vpop.f32.mrf.mxu0  ;;  %5603 = vrot.lane.b32.xlu0 %v12986_v5, %s9245_s5 }
 0x434   :  { %v4667_v11 = vpop.f32.mrf.mxu1  ;;  %v5333_v6 = vsel %vm3135_vm10, %v5330_v28, %v5332_v12 }
 0x435   :  { %v5006_v32 = vadd.f32 %v12948_v4, %v4666_v31  ;;  %v8082_v7 = vpop.f32.mrf.mxu0  ;;  %v12993_v9 = vmax.f32 %v5205_v15, %v5333_v6 }
 0x436   :  { %v4670_v13 = vpop.f32.mrf.mxu1 }
 0x437   :  { %v5207_v33 = vmax.f32 %v5006_v32, 0.0  ;;  %v4671_v19 = vadd.f32 %v12618_v46, %v4670_v13  ;;  %5605 = vrot.lane.b32.xlu1 %v12993_v9, %s9245_s5 }
 0x438   :  { %v4672_v54 = vpop.f32.mrf.mxu1 }
 0x439   :  { %v5334_v30 = vrot.slane %v5207_v33, 2  ;;  %v5011_v45 = vadd.f32 %v5010_v57, %v4671_v19 }
 0x43a   :  { %v5030_v40 = vpop.f32.mrf.mxu0 }
 0x43b   :  { %v5208_v26 = vmax.f32 %v5011_v45, 0.0  ;;  %v4675_v1 = vpop.f32.mrf.mxu1  ;;  %v5335_v37 = vsel %vm3135_vm10, %v5332_v12, %v5334_v30 }
 0x43c   :  { %v4676_v4 = vadd.f32 %v12618_v46, %v4675_v1  ;;  %v8085_v42 = vpop.f32.mrf.mxu0  ;;  %v13000_v63 = vmax.f32 %v5206_v59, %v5335_v37 }
 0x43d   :  { %v5336_v43 = vrot.slane %v5208_v26, 2  ;;  %v4677_v38 = vpop.f32.mrf.mxu1 }
 0x43e   :  { %v5016_v20 = vadd.f32 %v5015_v60, %v4676_v4  ;;  %v5035_v56 = vpop.f32.mrf.mxu0  ;;  %5607 = vrot.lane.b32.xlu0 %v13000_v63, %s9245_s5 }
 0x43f   :  { %v4680_v18 = vpop.f32.mrf.mxu1  ;;  %v5337_v57 = vsel %vm3135_vm10, %v5334_v30, %v5336_v43 }
 0x440   :  { %v5209_v0 = vmax.f32 %v5016_v20, 0.0  ;;  %v4681_v10 = vadd.f32 %v12618_v46, %v4680_v18  ;;  %v8088_v62 = vpop.f32.mrf.mxu0  ;;  %v13006_v39 = vmax.f32 %v5207_v33, %v5337_v57 }
 0x441   :  { %v4682_v14 = vpop.f32.mrf.mxu1 }
 0x442   :  { %v5338_v8 = vrot.slane %v5209_v0, 2  ;;  %v5021_v27 = vadd.f32 %v5020_v2, %v4681_v10  ;;  %5609 = vrot.lane.b32.xlu1 %v13006_v39, %s9245_s5 }
 0x443   :  { %v5040_v60 = vpop.f32.mrf.mxu0 }
 0x444   :  { %v5210_v15 = vmax.f32 %v5021_v27, 0.0  ;;  %v5339_v48 = vsel %vm3135_vm10, %v5336_v43, %v5338_v8 }
 0x445   :  { %v8091_v24 = vpop.f32.mrf.mxu0  ;;  %v13011_v55 = vmax.f32 %v5208_v26, %v5339_v48 }
 0x446   :  { %v5340_v28 = vrot.slane %v5210_v15, 2  ;;  %v4685_v53 = vpop.f32.mrf.mxu1 }
 0x447   :  { %v4686_v59 = vadd.f32 %v12618_v46, %v4685_v53  ;;  %v5045_v21 = vpop.f32.mrf.mxu0  ;;  %5611 = vrot.lane.b32.xlu0 %v13011_v55, %s9245_s5 }
 0x448   :  { %v4687_v35 = vpop.f32.mrf.mxu1  ;;  %v5341_v2 = vsel %vm3135_vm10, %v5338_v8, %v5340_v28 }
 0x449   :  { %v5026_v12 = vadd.f32 %v5025_v16, %v4686_v59  ;;  %v8094_v36 = vpop.f32.mrf.mxu0  ;;  %v13017_v31 = vmax.f32 %v5209_v0, %v5341_v2 }
 0x44a   :  { %v4690_v11 = vpop.f32.mrf.mxu1 }
 0x44b   :  { %v5211_v6 = vmax.f32 %v5026_v12, 0.0  ;;  %v4691_v32 = vadd.f32 %v12618_v46, %v4690_v11  ;;  %5613 = vrot.lane.b32.xlu1 %v13017_v31, %s9245_s5 }
 0x44c   :  { %v4692_v7 = vpop.f32.mrf.mxu1 }
 0x44d   :  { %v5342_v13 = vrot.slane %v5211_v6, 2  ;;  %v5031_v33 = vadd.f32 %v5030_v40, %v4691_v32 }
 0x44f   :  { %v5212_v19 = vmax.f32 %v5031_v33, 0.0  ;;  %v5050_v54 = vpop.f32.mrf.mxu0  ;;  %v5343_v30 = vsel %vm3135_vm10, %v5340_v28, %v5342_v13  ;;  %v4695_v45 = vpop.f32.mrf.mxu1 }
 0x450   :  { %v13023_v26 = vmax.f32 %v5210_v15, %v5343_v30  ;;  %v4696_v1 = vadd.f32 %v12618_v46, %v4695_v45 }
 0x451   :  { %v5344_v16 = vrot.slane %v5212_v19, 2  ;;  %v8097_v37 = vpop.f32.mrf.mxu0  ;;  %v4697_v4 = vpop.f32.mrf.mxu1 }
 0x452   :  { %5615 = vrot.lane.b32.xlu0 %v13023_v26, %s9245_s5  ;;  %v5036_v42 = vadd.f32 %v5035_v56, %v4696_v1 }
 0x453   :  { %v5055_v43 = vpop.f32.mrf.mxu0  ;;  %v5345_v38 = vsel %vm3135_vm10, %v5342_v13, %v5344_v16  ;;  %v4700_v40 = vpop.f32.mrf.mxu1 }
 0x454   :  { %v13029_v20 = vmax.f32 %v5211_v6, %v5345_v38  ;;  %v5213_v18 = vmax.f32 %v5036_v42, 0.0  ;;  %v4701_v57 = vadd.f32 %v12618_v46, %v4700_v40 }
 0x455   :  { %v8100_v0 = vpop.f32.mrf.mxu0  ;;  %v4702_v10 = vpop.f32.mrf.mxu1 }
 0x456   :  { %5617 = vrot.lane.b32.xlu1 %v13029_v20, %s9245_s5  ;;  %v5346_v62 = vrot.slane %v5213_v18, 2  ;;  %v5041_v14 = vadd.f32 %v5040_v60, %v4701_v57 }
 0x458   :  { %v5060_v8 = vpop.f32.mrf.mxu0  ;;  %v5214_v27 = vmax.f32 %v5041_v14, 0.0  ;;  %v5347_v56 = vsel %vm3135_vm10, %v5344_v16, %v5346_v62 }
 0x459   :  { %v5574_v15 = vpop.permute.xlu1 %5573  ;;  %v13036_v28 = vmax.f32 %v5212_v19, %v5347_v56 }
 0x45a   :  { %v8103_v48 = vpop.f32.mrf.mxu0  ;;  %v5738_v24 = vmax.f32 %v12710_v50, %v5574_v15  ;;  %v5348_v53 = vrot.slane %v5214_v27, 2 }
 0x45b   :  { %v4705_v59 = vpop.f32.mrf.mxu1  ;;  %5619 = vrot.lane.b32.xlu0 %v13036_v28, %s9245_s5 }
 0x45c   :  { %v4706_v35 = vadd.f32 %v12618_v46, %v4705_v59  ;;  %8200 = vmatmul.mubr.msk.f32.vlgmr.msra.gmra.mxu1 %vm5803_vm15, %v5738_v24  ;;  %v5349_v12 = vsel %vm3135_vm10, %v5346_v62, %v5348_v53  ;;  %v13052_v46 = vld [vmem:[%s14148_s4] ss:$0 sm:$0xff] }
 0x45d   :  { %v13042_v60 = vpop.f32.mrf.mxu0  ;;  %v4707_v2 = vpop.f32.mrf.mxu1  ;;  %8202 = vmatprep.mubr.msk.f32.mxu1 %vm9246_vm8, %v9240_v3  ;;  %v13047_v36 = vmax.f32 %v5213_v18, %v5349_v12 }
 0x45e   :  { %v5046_v50 = vadd.f32 %v5045_v21, %v4706_v35 }
 0x45f   :  { %v8106_v11 = vpop.f32.mrf.mxu0  ;;  %v4710_v6 = vpop.f32.mrf.mxu1  ;;  %5621 = vrot.lane.b32.xlu1 %v13047_v36, %s9245_s5 }
 0x460   :  { %v5215_v32 = vmax.f32 %v5046_v50, 0.0  ;;  %v4711_v7 = vadd.f32 %v13052_v46, %v4710_v6  ;;  %v5576_v13 = vpop.permute.xlu0 %5575 }
 0x461   :  { %v4712_v33 = vpop.f32.mrf.mxu1  ;;  %v5739_v19 = vmax.f32 %v12749_v22, %v5576_v13 }
 0x462   :  { %v5350_v21 = vrot.slane %v5215_v32, 2  ;;  %v5051_v30 = vadd.f32 %v5050_v54, %v4711_v7 }
 0x463   :  { %v5070_v45 = vpop.f32.mrf.mxu0  ;;  %8203 = vmatmul.mubr.msk.f32.gmra.mxu1 %vm5803_vm15, %v5739_v19 }
 0x464   :  { %v5216_v16 = vmax.f32 %v5051_v30, 0.0  ;;  %v4715_v1 = vpop.f32.mrf.mxu1  ;;  %v5351_v37 = vsel %vm3135_vm10, %v5348_v53, %v5350_v21  ;;  %8205 = vmatprep.mubr.msk.f32.mxu1 %vm9246_vm8, %v9240_v3 }
 0x465   :  { %v4716_v4 = vadd.f32 %v13052_v46, %v4715_v1  ;;  %v8109_v42 = vpop.f32.mrf.mxu0  ;;  %v5578_v38 = vpop.permute.xlu1 %5577  ;;  %v13063_v40 = vmax.f32 %v5214_v27, %v5351_v37 }
 0x466   :  { %v5352_v18 = vrot.slane %v5216_v16, 2  ;;  %v5740_v22 = vmax.f32 %v12769_v61, %v5578_v38  ;;  %v4717_v54 = vpop.f32.mrf.mxu1 }
 0x467   :  { %v5056_v57 = vadd.f32 %v5055_v43, %v4716_v4  ;;  %v5075_v0 = vpop.f32.mrf.mxu0  ;;  %5623 = vrot.lane.b32.xlu0 %v13063_v40, %s9245_s5 }
 0x468   :  { %v4720_v10 = vpop.f32.mrf.mxu1  ;;  %8206 = vmatmul.mubr.msk.f32.gmra.mxu1 %vm5803_vm15, %v5740_v22  ;;  %v5353_v62 = vsel %vm3135_vm10, %v5350_v21, %v5352_v18 }
 0x469   :  { %v5217_v14 = vmax.f32 %v5056_v57, 0.0  ;;  %v4721_v15 = vadd.f32 %v13052_v46, %v4720_v10  ;;  %v8112_v56 = vpop.f32.mrf.mxu0  ;;  %v5580_v27 = vpop.permute.xlu0 %5579  ;;  %v13071_v48 = vmax.f32 %v5215_v32, %v5353_v62  ;;  %8208 = vmatprep.mubr.msk.f32.mxu1 %vm9246_vm8, %v9240_v3 }
 0x46a   :  { %v4722_v61 = vpop.f32.mrf.mxu1  ;;  %v5741_v43 = vmax.f32 %v12789_v17, %v5580_v27 }
 0x46b   :  { %v5354_v24 = vrot.slane %v5217_v14, 2  ;;  %v5061_v53 = vadd.f32 %v5060_v8, %v4721_v15  ;;  %5625 = vrot.lane.b32.xlu1 %v13071_v48, %s9245_s5 }
 0x46c   :  { %v5080_v59 = vpop.f32.mrf.mxu0  ;;  %8209 = vmatmul.mubr.msk.f32.gmra.mxu1 %vm5803_vm15, %v5741_v43 }
 0x46d   :  { %v5218_v35 = vmax.f32 %v5061_v53, 0.0  ;;  %v5582_v2 = vpop.permute.xlu1 %5581  ;;  %v5355_v12 = vsel %vm3135_vm10, %v5352_v18, %v5354_v24  ;;  %8211 = vmatprep.mubr.msk.f32.mxu1 %vm9246_vm8, %v9240_v3 }
 0x46e   :  { %v8115_v50 = vpop.f32.mrf.mxu0  ;;  %v5742_v11 = vmax.f32 %v12804_v44, %v5582_v2  ;;  %v13083_v6 = vmax.f32 %v5216_v16, %v5355_v12 }
 0x46f   :  { %v5356_v17 = vrot.slane %v5218_v35, 2  ;;  %v4725_v8 = vpop.f32.mrf.mxu1 }
 0x470   :  { %v4726_v32 = vadd.f32 %v13052_v46, %v4725_v8  ;;  %5627 = vrot.lane.b32.xlu0 %v13083_v6, %s9245_s5  ;;  %8212 = vmatmul.mubr.msk.f32.gmra.mxu1 %vm5803_vm15, %v5742_v11 }
 0x471   :  { %v13089_v7 = vpop.f32.mrf.mxu0  ;;  %v4727_v13 = vpop.f32.mrf.mxu1  ;;  %v5357_v33 = vsel %vm3135_vm10, %v5354_v24, %v5356_v17  ;;  %8214 = vmatprep.mubr.msk.f32.mxu1 %vm9246_vm8, %v9240_v3 }
 0x472   :  { %v5066_v44 = vadd.f32 %v13042_v60, %v4726_v32  ;;  %v13095_v19 = vmax.f32 %v5217_v14, %v5357_v33 }
 0x473   :  { %v8118_v21 = vpop.f32.mrf.mxu0  ;;  %v4730_v30 = vpop.f32.mrf.mxu1 }
 0x474   :  { %v5219_v16 = vmax.f32 %v5066_v44, 0.0  ;;  %v4731_v1 = vadd.f32 %v13052_v46, %v4730_v30  ;;  %5629 = vrot.lane.b32.xlu1 %v13095_v19, %s9245_s5  ;;  %v5584_v37 = vpop.permute.xlu0 %5583 }
 0x475   :  { %v4732_v4 = vpop.f32.mrf.mxu1  ;;  %v5743_v42 = vmax.f32 %v12824_v29, %v5584_v37 }
 0x476   :  { %v5358_v38 = vrot.slane %v5219_v16, 2  ;;  %v5071_v18 = vadd.f32 %v5070_v45, %v4731_v1 }
 0x477   :  { %v5090_v22 = vpop.f32.mrf.mxu0  ;;  %8215 = vmatmul.mubr.msk.f32.gmra.mxu1 %vm5803_vm15, %v5743_v42 }
 0x478   :  { %v5220_v60 = vmax.f32 %v5071_v18, 0.0  ;;  %v4735_v54 = vpop.f32.mrf.mxu1  ;;  %v5586_v57 = vpop.permute.xlu1 %5585  ;;  %v5359_v10 = vsel %vm3135_vm10, %v5356_v17, %v5358_v38  ;;  %8217 = vmatprep.mubr.msk.f32.mxu1 %vm9246_vm8, %v9240_v3 }
 0x479   :  { %v4736_v62 = vadd.f32 %v13052_v46, %v4735_v54  ;;  %v8121_v14 = vpop.f32.mrf.mxu0  ;;  %v5744_v15 = vmax.f32 %v12837_v49, %v5586_v57  ;;  %v13107_v56 = vmax.f32 %v5218_v35, %v5359_v10 }
 0x47a   :  { %v5360_v29 = vrot.slane %v5220_v60, 2  ;;  %v4737_v45 = vpop.f32.mrf.mxu1 }
 0x47b   :  { %v5076_v27 = vadd.f32 %v5075_v0, %v4736_v62  ;;  %v5095_v61 = vpop.f32.mrf.mxu0  ;;  %5631 = vrot.lane.b32.xlu0 %v13107_v56, %s9245_s5  ;;  %8218 = vmatmul.mubr.msk.f32.gmra.mxu1 %vm5803_vm15, %v5744_v15 }
 0x47c   :  { %v4740_v43 = vpop.f32.mrf.mxu1  ;;  %v5361_v24 = vsel %vm3135_vm10, %v5358_v38, %v5360_v29  ;;  %8220 = vmatprep.mubr.msk.f32.mxu1 %vm9246_vm8, %v9240_v3 }
 0x47d   :  { %v5221_v53 = vmax.f32 %v5076_v27, 0.0  ;;  %v4741_v49 = vadd.f32 %v13052_v46, %v4740_v43  ;;  %v8124_v35 = vpop.f32.mrf.mxu0  ;;  %v5588_v2 = vpop.permute.xlu0 %5587  ;;  %v13116_v12 = vmax.f32 %v5219_v16, %v5361_v24 }
 0x47e   :  { %v4742_v0 = vpop.f32.mrf.mxu1  ;;  %v5745_v50 = vmax.f32 %v12858_v51, %v5588_v2 }
 0x47f   :  { %v5362_v11 = vrot.slane %v5221_v53, 2  ;;  %v5081_v17 = vadd.f32 %v5080_v59, %v4741_v49  ;;  %5633 = vrot.lane.b32.xlu1 %v13116_v12, %s9245_s5 }
 0x480   :  { %v5100_v8 = vpop.f32.mrf.mxu0  ;;  %8221 = vmatmul.mubr.msk.f32.gmra.mxu1 %vm5803_vm15, %v5745_v50 }
 0x481   :  { %v5222_v32 = vmax.f32 %v5081_v17, 0.0  ;;  %v5590_v13 = vpop.permute.xlu1 %5589  ;;  %v5363_v33 = vsel %vm3135_vm10, %v5360_v29, %v5362_v11  ;;  %8223 = vmatprep.mubr.msk.f32.mxu1 %vm9246_vm8, %v9240_v3 }
 0x482   :  { %v8127_v44 = vpop.f32.mrf.mxu0  ;;  %v5746_v21 = vmax.f32 %v12880_v23, %v5590_v13  ;;  %v13126_v30 = vmax.f32 %v5220_v60, %v5363_v33 }
 0x483   :  { %v5364_v51 = vrot.slane %v5222_v32, 2  ;;  %v4745_v59 = vpop.f32.mrf.mxu1 }
 0x484   :  { %v4746_v16 = vadd.f32 %v13052_v46, %v4745_v59  ;;  %v13129_v1 = vpop.f32.mrf.mxu0  ;;  %5635 = vrot.lane.b32.xlu0 %v13126_v30, %s9245_s5  ;;  %8224 = vmatmul.mubr.msk.f32.gmra.mxu1 %vm5803_vm15, %v5746_v21 }
 0x485   :  { %v4747_v37 = vpop.f32.mrf.mxu1  ;;  %v5365_v4 = vsel %vm3135_vm10, %v5362_v11, %v5364_v51  ;;  %8226 = vmatprep.mubr.msk.f32.mxu1 %vm9246_vm8, %v9240_v3 }
 0x486   :  { %v5086_v23 = vadd.f32 %v13089_v7, %v4746_v16  ;;  %v8130_v42 = vpop.f32.mrf.mxu0  ;;  %v13138_v38 = vmax.f32 %v5221_v53, %v5365_v4 }
 0x487   :  { %v4750_v18 = vpop.f32.mrf.mxu1 }
 0x488   :  { %v5223_v60 = vmax.f32 %v5086_v23, 0.0  ;;  %v4751_v54 = vadd.f32 %v13052_v46, %v4750_v18  ;;  %5637 = vrot.lane.b32.xlu1 %v13138_v38, %s9245_s5  ;;  %v5592_v10 = vpop.permute.xlu0 %5591 }
 0x489   :  { %v4752_v57 = vpop.f32.mrf.mxu1  ;;  %v5747_v15 = vmax.f32 %v12913_v52, %v5592_v10 }
 0x48a   :  { %v5366_v62 = vrot.slane %v5223_v60, 2  ;;  %v5091_v14 = vadd.f32 %v5090_v22, %v4751_v54 }
 0x48b   :  { %v5110_v29 = vpop.f32.mrf.mxu0  ;;  %8227 = vmatmul.mubr.msk.f32.gmra.mxu1 %vm5803_vm15, %v5747_v15 }
 0x48c   :  { %v5224_v45 = vmax.f32 %v5091_v14, 0.0  ;;  %v4755_v27 = vpop.f32.mrf.mxu1  ;;  %v5594_v7 = vpop.permute.xlu1 %5593  ;;  %v5367_v43 = vsel %vm3135_vm10, %v5364_v51, %v5366_v62  ;;  %8229 = vmatprep.mubr.msk.f32.mxu1 %vm9246_vm8, %v9240_v3 }
 0x48d   :  { %v4756_v24 = vadd.f32 %v13052_v46, %v4755_v27  ;;  %v8133_v53 = vpop.f32.mrf.mxu0  ;;  %v5748_v49 = vmax.f32 %v12927_v34, %v5594_v7  ;;  %v13148_v35 = vmax.f32 %v5222_v32, %v5367_v43 }
 0x48e   :  { %v5368_v22 = vrot.slane %v5224_v45, 2  ;;  %v4757_v52 = vpop.f32.mrf.mxu1 }
 0x48f   :  { %v5096_v2 = vadd.f32 %v5095_v61, %v4756_v24  ;;  %v5115_v0 = vpop.f32.mrf.mxu0  ;;  %5639 = vrot.lane.b32.xlu0 %v13148_v35, %s9245_s5  ;;  %8230 = vmatmul.mubr.msk.f32.gmra.mxu1 %vm5803_vm15, %v5748_v49 }
 0x490   :  { %v4760_v50 = vpop.f32.mrf.mxu1  ;;  %v5369_v11 = vsel %vm3135_vm10, %v5366_v62, %v5368_v22  ;;  %8232 = vmatprep.mubr.msk.f32.mxu1 %vm9246_vm8, %v9240_v3 }
 0x491   :  { %v5225_v17 = vmax.f32 %v5096_v2, 0.0  ;;  %v4761_v34 = vadd.f32 %v13052_v46, %v4760_v50  ;;  %v8136_v32 = vpop.f32.mrf.mxu0  ;;  %v5596_v13 = vpop.permute.xlu0 %5595  ;;  %v13157_v33 = vmax.f32 %v5223_v60, %v5369_v11 }
 0x492   :  { %v4762_v61 = vpop.f32.mrf.mxu1  ;;  %v5749_v44 = vmax.f32 %v12941_v41, %v5596_v13 }
 0x493   :  { %v5370_v21 = vrot.slane %v5225_v17, 2  ;;  %v5101_v51 = vadd.f32 %v5100_v8, %v4761_v34  ;;  %5641 = vrot.lane.b32.xlu1 %v13157_v33, %s9245_s5 }
 0x494   :  { %v5120_v59 = vpop.f32.mrf.mxu0  ;;  %8233 = vmatmul.mubr.msk.f32.gmra.mxu1 %vm5803_vm15, %v5749_v44 }
 0x495   :  { %v5226_v16 = vmax.f32 %v5101_v51, 0.0  ;;  %v5371_v37 = vsel %vm3135_vm10, %v5368_v22, %v5370_v21  ;;  %8235 = vmatprep.mubr.msk.f32.mxu1 %vm9246_vm8, %v9240_v3 }
 0x496   :  { %v8139_v4 = vpop.f32.mrf.mxu0  ;;  %v5598_v23 = vpop.permute.xlu1 %5597  ;;  %v13168_v42 = vmax.f32 %v5224_v45, %v5371_v37 }
 0x497   :  { %v5372_v18 = vrot.slane %v5226_v16, 2  ;;  %v5750_v41 = vmax.f32 %v12956_v58, %v5598_v23  ;;  %v4765_v8 = vpop.f32.mrf.mxu1 }
 0x498   :  { %v4766_v60 = vadd.f32 %v13052_v46, %v4765_v8  ;;  %v13172_v54 = vpop.f32.mrf.mxu0  ;;  %5643 = vrot.lane.b32.xlu0 %v13168_v42, %s9245_s5 }
 0x499   :  { %v4767_v57 = vpop.f32.mrf.mxu1  ;;  %8236 = vmatmul.mubr.msk.f32.gmra.mxu1 %vm5803_vm15, %v5750_v41  ;;  %v5373_v10 = vsel %vm3135_vm10, %v5370_v21, %v5372_v18 }
 0x49a   :  { %v5106_v62 = vadd.f32 %v13129_v1, %v4766_v60  ;;  %v8142_v14 = vpop.f32.mrf.mxu0  ;;  %v13179_v15 = vmax.f32 %v5225_v17, %v5373_v10  ;;  %8238 = vmatprep.mubr.msk.f32.mxu1 %vm9246_vm8, %v9240_v3 }
 0x49b   :  { %v4770_v58 = vpop.f32.mrf.mxu1 }
 0x49c   :  { %v5227_v45 = vmax.f32 %v5106_v62, 0.0  ;;  %v4771_v27 = vadd.f32 %v13052_v46, %v4770_v58  ;;  %5645 = vrot.lane.b32.xlu1 %v13179_v15, %s9245_s5  ;;  %v5600_v7 = vpop.permute.xlu0 %5599 }
 0x49d   :  { %v4772_v43 = vpop.f32.mrf.mxu1  ;;  %v5751_v24 = vmax.f32 %v12971_v47, %v5600_v7 }
 0x49e   :  { %v5374_v53 = vrot.slane %v5227_v45, 2  ;;  %v5111_v49 = vadd.f32 %v5110_v29, %v4771_v27 }
 0x49f   :  { %v5130_v1 = vpop.f32.mrf.mxu0  ;;  %8239 = vmatmul.mubr.msk.f32.gmra.mxu1 %vm5803_vm15, %v5751_v24 }
 0x4a0   :  { %v5228_v22 = vmax.f32 %v5111_v49, 0.0  ;;  %v4775_v52 = vpop.f32.mrf.mxu1  ;;  %v5602_v2 = vpop.permute.xlu1 %5601  ;;  %v5375_v50 = vsel %vm3135_vm10, %v5372_v18, %v5374_v53  ;;  %8241 = vmatprep.mubr.msk.f32.mxu1 %vm9246_vm8, %v9240_v3 }
 0x4a1   :  { %v4776_v11 = vadd.f32 %v13052_v46, %v4775_v52  ;;  %v8145_v17 = vpop.f32.mrf.mxu0  ;;  %v5752_v34 = vmax.f32 %v12980_v25, %v5602_v2  ;;  %v13193_v32 = vmax.f32 %v5226_v16, %v5375_v50 }
 0x4a2   :  { %v5376_v47 = vrot.slane %v5228_v22, 2  ;;  %v4777_v29 = vpop.f32.mrf.mxu1 }
 0x4a3   :  { %v5116_v13 = vadd.f32 %v5115_v0, %v4776_v11  ;;  %v5135_v61 = vpop.f32.mrf.mxu0  ;;  %5647 = vrot.lane.b32.xlu0 %v13193_v32, %s9245_s5  ;;  %8242 = vmatmul.mubr.msk.f32.gmra.mxu1 %vm5803_vm15, %v5752_v34 }
 0x4a4   :  { %v4780_v44 = vpop.f32.mrf.mxu1  ;;  %v5377_v21 = vsel %vm3135_vm10, %v5374_v53, %v5376_v47  ;;  %8244 = vmatprep.mubr.msk.f32.mxu1 %vm9246_vm8, %v9240_v3 }
 0x4a5   :  { %v5229_v51 = vmax.f32 %v5116_v13, 0.0  ;;  %v4781_v25 = vadd.f32 %v13052_v46, %v4780_v44  ;;  %v8148_v16 = vpop.f32.mrf.mxu0  ;;  %v5604_v37 = vpop.permute.xlu0 %5603  ;;  %v13202_v4 = vmax.f32 %v5227_v45, %v5377_v21 }
 0x4a6   :  { %v4782_v0 = vpop.f32.mrf.mxu1  ;;  %v5753_v23 = vmax.f32 %v12986_v5, %v5604_v37 }
 0x4a7   :  { %v5378_v18 = vrot.slane %v5229_v51, 2  ;;  %v5121_v41 = vadd.f32 %v5120_v59, %v4781_v25  ;;  %5649 = vrot.lane.b32.xlu1 %v13202_v4, %s9245_s5 }
 0x4a8   :  { %v5140_v8 = vpop.f32.mrf.mxu0  ;;  %8245 = vmatmul.mubr.msk.f32.gmra.mxu1 %vm5803_vm15, %v5753_v23 }
 0x4a9   :  { %v5230_v60 = vmax.f32 %v5121_v41, 0.0  ;;  %v5606_v57 = vpop.permute.xlu1 %5605  ;;  %v5379_v10 = vsel %vm3135_vm10, %v5376_v47, %v5378_v18  ;;  %8247 = vmatprep.mubr.msk.f32.mxu1 %vm9246_vm8, %v9240_v3 }
 0x4aa   :  { %v8151_v62 = vpop.f32.mrf.mxu0  ;;  %v5754_v14 = vmax.f32 %v12993_v9, %v5606_v57  ;;  %v13212_v58 = vmax.f32 %v5228_v22, %v5379_v10 }
 0x4ab   :  { %v5380_v5 = vrot.slane %v5230_v60, 2  ;;  %v4785_v59 = vpop.f32.mrf.mxu1 }
 0x4ac   :  { %v4786_v45 = vadd.f32 %v13052_v46, %v4785_v59  ;;  %v5145_v27 = vpop.f32.mrf.mxu0  ;;  %5651 = vrot.lane.b32.xlu0 %v13212_v58, %s9245_s5  ;;  %8248 = vmatmul.mubr.msk.f32.gmra.mxu1 %vm5803_vm15, %v5754_v14 }
 0x4ad   :  { %v4787_v7 = vpop.f32.mrf.mxu1  ;;  %v5381_v43 = vsel %vm3135_vm10, %v5378_v18, %v5380_v5  ;;  %8250 = vmatprep.mubr.msk.f32.mxu1 %vm9246_vm8, %v9240_v3 }
 0x4ae   :  { %v5126_v9 = vadd.f32 %v13172_v54, %v4786_v45  ;;  %v8154_v24 = vpop.f32.mrf.mxu0  ;;  %v13222_v53 = vmax.f32 %v5229_v51, %v5381_v43 }
 0x4af   :  { %v4790_v49 = vpop.f32.mrf.mxu1 }
 0x4b0   :  { %v5231_v22 = vmax.f32 %v5126_v9, 0.0  ;;  %v4791_v52 = vadd.f32 %v13052_v46, %v4790_v49  ;;  %v5150_v2 = vpop.f32.mrf.mxu0  ;;  %5653 = vrot.lane.b32.xlu1 %v13222_v53, %s9245_s5  ;;  %v5608_v50 = vpop.permute.xlu0 %5607 }
 0x4b1   :  { %v4792_v11 = vpop.f32.mrf.mxu1  ;;  %v5755_v17 = vmax.f32 %v13000_v63, %v5608_v50 }
 0x4b2   :  { %v5382_v34 = vrot.slane %v5231_v22, 2  ;;  %v5131_v47 = vadd.f32 %v5130_v1, %v4791_v52  ;;  %v8157_v29 = vpop.f32.mrf.mxu0 }
 0x4b3   :  { %8251 = vmatmul.mubr.msk.f32.gmra.mxu1 %vm5803_vm15, %v5755_v17 }
 0x4b4   :  { %v5232_v54 = vmax.f32 %v5131_v47, 0.0  ;;  %v4795_v13 = vpop.f32.mrf.mxu1  ;;  %v5610_v44 = vpop.permute.xlu1 %5609  ;;  %v5383_v21 = vsel %vm3135_vm10, %v5380_v5, %v5382_v34  ;;  %8253 = vmatprep.mubr.msk.f32.mxu1 %vm9246_vm8, %v9240_v3 }
 0x4b5   :  { %v4796_v51 = vadd.f32 %v13052_v46, %v4795_v13  ;;  %v5756_v25 = vmax.f32 %v13006_v39, %v5610_v44  ;;  %v13234_v16 = vmax.f32 %v5230_v60, %v5383_v21 }
 0x4b6   :  { %v5384_v63 = vrot.slane %v5232_v54, 2  ;;  %v4797_v37 = vpop.f32.mrf.mxu1 }
 0x4b7   :  { %v5136_v1 = vadd.f32 %v5135_v61, %v4796_v51  ;;  %5655 = vrot.lane.b32.xlu0 %v13234_v16, %s9245_s5  ;;  %8254 = vmatmul.mubr.msk.f32.gmra.mxu1 %vm5803_vm15, %v5756_v25 }
 0x4b8   :  { %v4800_v0 = vpop.f32.mrf.mxu1  ;;  %v5385_v23 = vsel %vm3135_vm10, %v5382_v34, %v5384_v63  ;;  %8256 = vmatprep.mubr.msk.f32.mxu1 %vm9246_vm8, %v9240_v3 }
 0x4b9   :  { %v5233_v18 = vmax.f32 %v5136_v1, 0.0  ;;  %v4801_v41 = vadd.f32 %v13052_v46, %v4800_v0  ;;  %v5612_v39 = vpop.permute.xlu0 %5611  ;;  %v13243_v60 = vmax.f32 %v5231_v22, %v5385_v23 }
 0x4ba   :  { %v4802_v57 = vpop.f32.mrf.mxu1  ;;  %v5757_v61 = vmax.f32 %v13011_v55, %v5612_v39 }
 0x4bb   :  { %v5386_v10 = vrot.slane %v5233_v18, 2  ;;  %v5141_v62 = vadd.f32 %v5140_v8, %v4801_v41  ;;  %5657 = vrot.lane.b32.xlu1 %v13243_v60, %s9245_s5 }
 0x4bc   :  { %v4805_v14 = vpop.f32.mrf.mxu1  ;;  %8257 = vmatmul.mubr.msk.f32.gmra.mxu1 %vm5803_vm15, %v5757_v61 }
 0x4bd   :  { %v5234_v5 = vmax.f32 %v5141_v62, 0.0  ;;  %v4806_v59 = vadd.f32 %v13052_v46, %v4805_v14  ;;  %v5614_v45 = vpop.permute.xlu1 %5613  ;;  %v5387_v7 = vsel %vm3135_vm10, %v5384_v63, %v5386_v10  ;;  %8259 = vmatprep.mubr.msk.f32.mxu1 %vm9246_vm8, %v9240_v3 }
 0x4be   :  { %v4807_v43 = vpop.f32.mrf.mxu1  ;;  %v5758_v55 = vmax.f32 %v13017_v31, %v5614_v45  ;;  %v13254_v9 = vmax.f32 %v5232_v54, %v5387_v7 }
 0x4bf   :  { %v5388_v8 = vrot.slane %v5234_v5, 2  ;;  %v5146_v24 = vadd.f32 %v5145_v27, %v4806_v59 }
 0x4c0   :  { %v4810_v49 = vpop.f32.mrf.mxu1  ;;  %5659 = vrot.lane.b32.xlu0 %v13254_v9, %s9245_s5  ;;  %8260 = vmatmul.mubr.msk.f32.gmra.mxu1 %vm5803_vm15, %v5758_v55 }
 0x4c1   :  { %v5235_v22 = vmax.f32 %v5146_v24, 0.0  ;;  %v4811_v52 = vadd.f32 %v13052_v46, %v4810_v49  ;;  %v5389_v50 = vsel %vm3135_vm10, %v5386_v10, %v5388_v8  ;;  %8262 = vmatprep.mubr.msk.f32.mxu1 %vm9246_vm8, %v9240_v3 }
 0x4c2   :  { %v4812_v11 = vpop.f32.mrf.mxu1  ;;  %v13263_v31 = vmax.f32 %v5233_v18, %v5389_v50 }
 0x4c3   :  { %v5390_v17 = vrot.slane %v5235_v22, 2  ;;  %v5151_v34 = vadd.f32 %v5150_v2, %v4811_v52 }
 0x4c4   :  { %v5155_v27 = vpop.f32.mrf.mxu0  ;;  %5661 = vrot.lane.b32.xlu1 %v13263_v31, %s9245_s5  ;;  %v5616_v47 = vpop.permute.xlu0 %5615 }
 0x4c5   :  { %v5236_v29 = vmax.f32 %v5151_v34, 0.0  ;;  %v5759_v54 = vmax.f32 %v13023_v26, %v5616_v47  ;;  %v5391_v13 = vsel %vm3135_vm10, %v5388_v8, %v5390_v17 }
 0x4c6   :  { %v8160_v44 = vpop.f32.mrf.mxu0  ;;  %v13269_v21 = vmax.f32 %v5234_v5, %v5391_v13 }
 0x4c7   :  { %v5392_v51 = vrot.slane %v5236_v29, 2  ;;  %8263 = vmatmul.mubr.msk.f32.gmra.mxu1 %vm5803_vm15, %v5759_v54 }
 0x4c8   :  { %v5160_v25 = vpop.f32.mrf.mxu0  ;;  %5663 = vrot.lane.b32.xlu0 %v13269_v21, %s9245_s5  ;;  %v5618_v2 = vpop.permute.xlu1 %5617  ;;  %8265 = vmatprep.mubr.msk.f32.mxu1 %vm9246_vm8, %v9240_v3 }
 0x4c9   :  { %v5760_v63 = vmax.f32 %v13029_v20, %v5618_v2  ;;  %v5393_v26 = vsel %vm3135_vm10, %v5390_v17, %v5392_v51 }
 0x4ca   :  { %v8163_v37 = vpop.f32.mrf.mxu0  ;;  %v13278_v1 = vmax.f32 %v5235_v22, %v5393_v26 }
 0x4cb   :  { %v4815_v0 = vpop.f32.mrf.mxu1  ;;  %8266 = vmatmul.mubr.msk.f32.gmra.mxu1 %vm5803_vm15, %v5760_v63 }
 0x4cc   :  { %v4816_v23 = vadd.f32 %v13052_v46, %v4815_v0  ;;  %v5165_v18 = vpop.f32.mrf.mxu0  ;;  %5665 = vrot.lane.b32.xlu1 %v13278_v1, %s9245_s5  ;;  %8268 = vmatprep.mubr.msk.f32.mxu1 %vm9246_vm8, %v9240_v3 }
 0x4cd   :  { %v4817_v41 = vpop.f32.mrf.mxu1  ;;  %v5620_v57 = vpop.permute.xlu0 %5619 }
 0x4ce   :  { %v5156_v39 = vadd.f32 %v5155_v27, %v4816_v23  ;;  %v8166_v20 = vpop.f32.mrf.mxu0  ;;  %v5761_v61 = vmax.f32 %v13036_v28, %v5620_v57 }
 0x4cf   :  { %v4820_v10 = vpop.f32.mrf.mxu1 }
 0x4d0   :  { %v5237_v62 = vmax.f32 %v5156_v39, 0.0  ;;  %v4821_v14 = vadd.f32 %v13052_v46, %v4820_v10  ;;  %v5170_v5 = vpop.f32.mrf.mxu0  ;;  %8269 = vmatmul.mubr.msk.f32.gmra.mxu1 %vm5803_vm15, %v5761_v61 }
 0x4d1   :  { %v4822_v59 = vpop.f32.mrf.mxu1  ;;  %v5622_v55 = vpop.permute.xlu1 %5621  ;;  %8271 = vmatprep.mubr.msk.f32.mxu1 %vm9246_vm8, %v9240_v3 }
 0x4d2   :  { %v5394_v45 = vrot.slane %v5237_v62, 2  ;;  %v5161_v7 = vadd.f32 %v5160_v25, %v4821_v14  ;;  %v8169_v43 = vpop.f32.mrf.mxu0  ;;  %v5762_v8 = vmax.f32 %v13047_v36, %v5622_v55 }
 0x4d4   :  { %v5238_v24 = vmax.f32 %v5161_v7, 0.0  ;;  %v4825_v49 = vpop.f32.mrf.mxu1  ;;  %v5395_v28 = vsel %vm3135_vm10, %v5392_v51, %v5394_v45  ;;  %8272 = vmatmul.mubr.msk.f32.gmra.mxu1 %vm5803_vm15, %v5762_v8 }
 0x4d5   :  { %v4826_v22 = vadd.f32 %v13052_v46, %v4825_v49  ;;  %v13295_v52 = vmax.f32 %v5236_v29, %v5395_v28  ;;  %8274 = vmatprep.mubr.msk.f32.mxu1 %vm9246_vm8, %v9240_v3 }
 0x4d6   :  { %v5396_v50 = vrot.slane %v5238_v24, 2  ;;  %v4827_v11 = vpop.f32.mrf.mxu1 }
 0x4d7   :  { %v5166_v17 = vadd.f32 %v5165_v18, %v4826_v22  ;;  %5667 = vrot.lane.b32.xlu0 %v13295_v52, %s9245_s5 }
 0x4d8   :  { %v5175_v36 = vpop.f32.mrf.mxu0  ;;  %v4830_v34 = vpop.f32.mrf.mxu1  ;;  %v5397_v27 = vsel %vm3135_vm10, %v5394_v45, %v5396_v50 }
 0x4d9   :  { %v5239_v47 = vmax.f32 %v5166_v17, 0.0  ;;  %v4831_v54 = vadd.f32 %v13052_v46, %v4830_v34  ;;  %v5624_v13 = vpop.permute.xlu0 %5623  ;;  %v13303_v44 = vmax.f32 %v5237_v62, %v5397_v27 }
 0x4da   :  { %v8172_v29 = vpop.f32.mrf.mxu0  ;;  %v5763_v51 = vmax.f32 %v13063_v40, %v5624_v13  ;;  %v4832_v25 = vpop.f32.mrf.mxu1 }
 0x4db   :  { %v5398_v2 = vrot.slane %v5239_v47, 2  ;;  %v5171_v63 = vadd.f32 %v5170_v5, %v4831_v54  ;;  %5669 = vrot.lane.b32.xlu1 %v13303_v44, %s9245_s5 }
 0x4dc   :  { %v5180_v26 = vpop.f32.mrf.mxu0  ;;  %8275 = vmatmul.mubr.msk.f32.gmra.mxu1 %vm5803_vm15, %v5763_v51 }
 0x4dd   :  { %v5240_v37 = vmax.f32 %v5171_v63, 0.0  ;;  %v5626_v0 = vpop.permute.xlu1 %5625  ;;  %8277 = vmatprep.mubr.msk.f32.mxu1 %vm9246_vm8, %v9240_v3  ;;  %v5399_v23 = vsel %vm3135_vm10, %v5396_v50, %v5398_v2 }
 0x4de   :  { %v8175_v18 = vpop.f32.mrf.mxu0  ;;  %v5764_v41 = vmax.f32 %v13071_v48, %v5626_v0  ;;  %v13313_v40 = vmax.f32 %v5238_v24, %v5399_v23 }
 0x4df   :  { %v5400_v39 = vrot.slane %v5240_v37, 2  ;;  %v4835_v20 = vpop.f32.mrf.mxu1 }
 0x4e0   :  { %v4836_v57 = vadd.f32 %v13052_v46, %v4835_v20  ;;  %5671 = vrot.lane.b32.xlu0 %v13313_v40, %s9245_s5  ;;  %8278 = vmatmul.mubr.msk.f32.gmra.mxu1 %vm5803_vm15, %v5764_v41 }
 0x4e1   :  { %v4837_v61 = vpop.f32.mrf.mxu1  ;;  %v5401_v10 = vsel %vm3135_vm10, %v5398_v2, %v5400_v39  ;;  %8280 = vmatprep.mubr.msk.f32.mxu1 %vm9246_vm8, %v9240_v3 }
 0x4e2   :  { %v5176_v62 = vadd.f32 %v5175_v36, %v4836_v57  ;;  %v5628_v14 = vpop.permute.xlu0 %5627  ;;  %v13322_v48 = vmax.f32 %v5239_v47, %v5401_v10 }
 0x4e3   :  { %v5765_v5 = vmax.f32 %v13083_v6, %v5628_v14  ;;  %v4840_v59 = vpop.f32.mrf.mxu1  ;;  %v5185_v45 = vpop.f32.mrf.mxu0 }
 0x4e4   :  { %v5241_v7 = vmax.f32 %v5176_v62, 0.0  ;;  %v4841_v43 = vadd.f32 %v13052_v46, %v4840_v59  ;;  %5673 = vrot.lane.b32.xlu1 %v13322_v48, %s9245_s5 }
 0x4e5   :  { %v4842_v55 = vpop.f32.mrf.mxu1  ;;  %v8178_v8 = vpop.f32.mrf.mxu0  ;;  %8281 = vmatmul.mubr.msk.f32.gmra.mxu1 %vm5803_vm15, %v5765_v5 }
 0x4e6   :  { %v5402_v24 = vrot.slane %v5241_v7, 2  ;;  %v5181_v49 = vadd.f32 %v5180_v26, %v4841_v43  ;;  %v5630_v28 = vpop.permute.xlu1 %5629  ;;  %8283 = vmatprep.mubr.msk.f32.mxu1 %vm9246_vm8, %v9240_v3 }
 0x4e7   :  { %v5766_v6 = vmax.f32 %v13095_v19, %v5630_v28  ;;  %v4845_v22 = vpop.f32.mrf.mxu1 }
 0x4e8   :  { %v5242_v50 = vmax.f32 %v5181_v49, 0.0  ;;  %v4846_v11 = vadd.f32 %v13052_v46, %v4845_v22  ;;  %v5403_v17 = vsel %vm3135_vm10, %v5400_v39, %v5402_v24 }
 0x4e9   :  { %v4847_v36 = vpop.f32.mrf.mxu1  ;;  %8284 = vmatmul.mubr.msk.f32.gmra.mxu1 %vm5803_vm15, %v5766_v6  ;;  %v13335_v34 = vmax.f32 %v5240_v37, %v5403_v17 }
 0x4ea   :  { %v5404_v27 = vrot.slane %v5242_v50, 2  ;;  %v5186_v47 = vadd.f32 %v5185_v45, %v4846_v11  ;;  %8286 = vmatprep.mubr.msk.f32.mxu1 %vm9246_vm8, %v9240_v3 }
 0x4eb   :  { %5675 = vrot.lane.b32.xlu0 %v13335_v34, %s9245_s5 }
 0x4ec   :  { %v5243_v19 = vmax.f32 %v5186_v47, 0.0  ;;  %v5405_v54 = vsel %vm3135_vm10, %v5402_v24, %v5404_v27 }
 0x4ed   :  { %v5632_v13 = vpop.permute.xlu0 %5631  ;;  %v13342_v46 = vmax.f32 %v5241_v7, %v5405_v54 }
 0x4ee   :  { %v5406_v29 = vrot.slane %v5243_v19, 2  ;;  %v5767_v51 = vmax.f32 %v13107_v56, %v5632_v13 }
 0x4ef   :  { %5677 = vrot.lane.b32.xlu1 %v13342_v46, %s9245_s5 }
 0x4f0   :  { %v13347_v25 = vmax.f32 %v5243_v19, %v5406_v29  ;;  %8287 = vmatmul.mubr.msk.f32.gmra.mxu1 %vm5803_vm15, %v5767_v51  ;;  %v5407_v2 = vsel %vm3135_vm10, %v5404_v27, %v5406_v29 }
 0x4f1   :  { %v5634_v63 = vpop.permute.xlu1 %5633  ;;  %v13351_v26 = vmax.f32 %v5242_v50, %v5407_v2  ;;  %8289 = vmatprep.mubr.msk.f32.mxu1 %vm9246_vm8, %v9240_v3 }
 0x4f2   :  { %v5768_v37 = vmax.f32 %v13116_v12, %v5634_v63 }
 0x4f3   :  { %5679 = vrot.lane.b32.xlu0 %v13351_v26, %s9245_s5  ;;  %5681 = vrot.lane.b32.xlu1 %v13347_v25, %s9245_s5 }
 0x4f4   :  { %8290 = vmatmul.mubr.msk.f32.gmra.mxu1 %vm5803_vm15, %v5768_v37 }
 0x4f5   :  { %8292 = vmatprep.mubr.msk.f32.mxu1 %vm9246_vm8, %v9240_v3 }
 0x4f6   :  { %v5636_v56 = vpop.permute.xlu0 %5635 }
 0x4f7   :  { %v5769_v0 = vmax.f32 %v13126_v30, %v5636_v56 }
 0x4f9   :  { %8293 = vmatmul.mubr.msk.f32.gmra.mxu1 %vm5803_vm15, %v5769_v0 }
 0x4fa   :  { %v5638_v23 = vpop.permute.xlu1 %5637  ;;  %8295 = vmatprep.mubr.msk.f32.mxu1 %vm9246_vm8, %v9240_v3 }
 0x4fb   :  { %v5770_v12 = vmax.f32 %v13138_v38, %v5638_v23 }
 0x4fd   :  { %8296 = vmatmul.mubr.msk.f32.gmra.mxu1 %vm5803_vm15, %v5770_v12 }
 0x4fe   :  { %8298 = vmatprep.mubr.msk.f32.mxu1 %vm9246_vm8, %v9240_v3 }
 0x501   :  { %v5640_v18 = vpop.permute.xlu0 %5639 }
 0x502   :  { %v5771_v41 = vmax.f32 %v13148_v35, %v5640_v18 }
 0x504   :  { %8299 = vmatmul.mubr.msk.f32.gmra.mxu1 %vm5803_vm15, %v5771_v41 }
 0x505   :  { %v5642_v39 = vpop.permute.xlu1 %5641  ;;  %8301 = vmatprep.mubr.msk.f32.mxu1 %vm9246_vm8, %v9240_v3 }
 0x506   :  { %v5772_v30 = vmax.f32 %v13157_v33, %v5642_v39 }
 0x508   :  { %8302 = vmatmul.mubr.msk.f32.gmra.mxu1 %vm5803_vm15, %v5772_v30 }
 0x509   :  { %8304 = vmatprep.mubr.msk.f32.mxu1 %vm9246_vm8, %v9240_v3 }
 0x50a   :  { %v5644_v38 = vpop.permute.xlu0 %5643 }
 0x50b   :  { %v5773_v20 = vmax.f32 %v13168_v42, %v5644_v38 }
 0x50d   :  { %8305 = vmatmul.mubr.msk.f32.gmra.mxu1 %vm5803_vm15, %v5773_v20 }
 0x50e   :  { %v5646_v57 = vpop.permute.xlu1 %5645  ;;  %8307 = vmatprep.mubr.msk.f32.mxu1 %vm9246_vm8, %v9240_v3 }
 0x50f   :  { %v5774_v35 = vmax.f32 %v13179_v15, %v5646_v57 }
 0x511   :  { %8308 = vmatmul.mubr.msk.f32.gmra.mxu1 %vm5803_vm15, %v5774_v35 }
 0x512   :  { %8310 = vmatprep.mubr.msk.f32.mxu1 %vm9246_vm8, %v9240_v3 }
 0x515   :  { %v5648_v33 = vpop.permute.xlu0 %5647 }
 0x516   :  { %v5775_v61 = vmax.f32 %v13193_v32, %v5648_v33 }
 0x518   :  { %8311 = vmatmul.mubr.msk.f32.gmra.mxu1 %vm5803_vm15, %v5775_v61 }
 0x519   :  { %v5650_v10 = vpop.permute.xlu1 %5649  ;;  %8313 = vmatprep.mubr.msk.f32.mxu1 %vm9246_vm8, %v9240_v3 }
 0x51a   :  { %v5776_v42 = vmax.f32 %v13202_v4, %v5650_v10 }
 0x51c   :  { %8314 = vmatmul.mubr.msk.f32.gmra.mxu1 %vm5803_vm15, %v5776_v42  ;;  %v13393_v62 = vpop.f32.mrf.mxu1 }
 0x51d   :  { %8316 = vmatprep.mubr.msk.f32.mxu1 %vm9246_vm8, %v9240_v3 }
 0x51e   :  { %v5652_v15 = vpop.permute.xlu0 %5651  ;;  %v8201_v14 = vpop.f32.mrf.mxu1 }
 0x51f   :  { %v5777_v5 = vmax.f32 %v13212_v58, %v5652_v15 }
 0x521   :  { %8317 = vmatmul.mubr.msk.f32.gmra.mxu1 %vm5803_vm15, %v5777_v5 }
 0x522   :  { %v5654_v32 = vpop.permute.xlu1 %5653  ;;  %8319 = vmatprep.mubr.msk.f32.mxu1 %vm9246_vm8, %v9240_v3 }
 0x523   :  { %v5778_v59 = vmax.f32 %v13222_v53, %v5654_v32  ;;  %v13402_v4 = vpop.f32.mrf.mxu1 }
 0x525   :  { %8320 = vmatmul.mubr.msk.f32.gmra.mxu1 %vm5803_vm15, %v5778_v59  ;;  %v8204_v45 = vpop.f32.mrf.mxu1 }
 0x526   :  { %8322 = vmatprep.mubr.msk.f32.mxu1 %vm9246_vm8, %v9240_v3 }
 0x528   :  { %v13407_v7 = vpop.f32.mrf.mxu1 }
 0x529   :  { %v5656_v43 = vpop.permute.xlu0 %5655 }
 0x52a   :  { %v5779_v58 = vmax.f32 %v13234_v16, %v5656_v43  ;;  %v8207_v55 = vpop.f32.mrf.mxu1 }
 0x52c   :  { %8323 = vmatmul.mubr.msk.f32.gmra.mxu1 %vm5803_vm15, %v5779_v58  ;;  %v13411_v8 = vpop.f32.mrf.mxu1 }
 0x52d   :  { %v5658_v24 = vpop.permute.xlu1 %5657  ;;  %8325 = vmatprep.mubr.msk.f32.mxu1 %vm9246_vm8, %v9240_v3 }
 0x52e   :  { %v5780_v53 = vmax.f32 %v13243_v60, %v5658_v24  ;;  %v8210_v49 = vpop.f32.mrf.mxu1 }
 0x530   :  { %8326 = vmatmul.mubr.msk.f32.gmra.mxu1 %vm5803_vm15, %v5780_v53  ;;  %v13417_v28 = vpop.f32.mrf.mxu1 }
 0x531   :  { %8328 = vmatprep.mubr.msk.f32.mxu1 %vm9246_vm8, %v9240_v3 }
 0x532   :  { %v5660_v16 = vpop.permute.xlu0 %5659  ;;  %v8213_v6 = vpop.f32.mrf.mxu1 }
 0x533   :  { %v5781_v22 = vmax.f32 %v13254_v9, %v5660_v16 }
 0x535   :  { %8329 = vmatmul.mubr.msk.f32.gmra.mxu1 %vm5803_vm15, %v5781_v22  ;;  %v6313_v22 = vld [vmem:[%s14149_s7 + $0x8] sm:$0xff] }
 0x536   :  { %v5662_v50 = vpop.permute.xlu1 %5661  ;;  %8331 = vmatprep.mubr.msk.f32.mxu1 %vm9246_vm8, %v9240_v3  ;;  %6395 = vmatprep.mubr.f32.mxu0 %v6313_v22 }
 0x537   :  { %v5782_v60 = vmax.f32 %v13263_v31, %v5662_v50  ;;  %v13426_v11 = vpop.f32.mrf.mxu1 }
 0x539   :  { %8332 = vmatmul.mubr.msk.f32.gmra.mxu1 %vm5803_vm15, %v5782_v60  ;;  %v8216_v17 = vpop.f32.mrf.mxu1 }
 0x53a   :  { %v5664_v36 = vpop.permute.xlu0 %5663  ;;  %8334 = vmatprep.mubr.msk.f32.mxu1 %vm9246_vm8, %v9240_v3 }
 0x53b   :  { %v5783_v27 = vmax.f32 %v13269_v21, %v5664_v36  ;;  %v13432_v9 = vpop.f32.mrf.mxu1 }
 0x53d   :  { %8335 = vmatmul.mubr.msk.f32.gmra.mxu1 %vm5803_vm15, %v5783_v27  ;;  %v8219_v47 = vpop.f32.mrf.mxu1 }
 0x53e   :  { %v5666_v19 = vpop.permute.xlu1 %5665  ;;  %8337 = vmatprep.mubr.msk.f32.mxu1 %vm9246_vm8, %v9240_v3 }
 0x53f   :  { %v5784_v31 = vmax.f32 %v13278_v1, %v5666_v19 }
 0x540   :  { %v13438_v54 = vpop.f32.mrf.mxu1 }
 0x541   :  { %8338 = vmatmul.mubr.msk.f32.gmra.mxu1 %vm5803_vm15, %v5784_v31 }
 0x542   :  { %v8222_v13 = vpop.f32.mrf.mxu1  ;;  %8340 = vmatprep.mubr.msk.f32.mxu1 %vm9246_vm8, %v9240_v3 }
 0x544   :  { %v13443_v21 = vpop.f32.mrf.mxu1 }
 0x546   :  { %v8225_v29 = vpop.f32.mrf.mxu1 }
 0x549   :  { %v5668_v51 = vpop.permute.xlu0 %5667 }
 0x54a   :  { %v5785_v2 = vmax.f32 %v13295_v52, %v5668_v51 }
 0x54b   :  { %v13446_v63 = vpop.f32.mrf.mxu1 }
 0x54c   :  { %8341 = vmatmul.mubr.msk.f32.gmra.mxu1 %vm5803_vm15, %v5785_v2 }
 0x54d   :  { %v5670_v37 = vpop.permute.xlu1 %5669  ;;  %8343 = vmatprep.mubr.msk.f32.mxu1 %vm9246_vm8, %v9240_v3  ;;  %v8228_v56 = vpop.f32.mrf.mxu1 }
 0x54e   :  { %v5786_v1 = vmax.f32 %v13303_v44, %v5670_v37 }
 0x54f   :  { %v13452_v0 = vpop.f32.mrf.mxu1 }
 0x550   :  { %8344 = vmatmul.mubr.msk.f32.gmra.mxu1 %vm5803_vm15, %v5786_v1 }
 0x551   :  { %8346 = vmatprep.mubr.msk.f32.mxu1 %vm9246_vm8, %v9240_v3  ;;  %v8231_v52 = vpop.f32.mrf.mxu1 }
 0x552   :  { %v5672_v23 = vpop.permute.xlu0 %5671 }
 0x553   :  { %v5787_v12 = vmax.f32 %v13313_v40, %v5672_v23 }
 0x554   :  { %v13458_v18 = vpop.f32.mrf.mxu1 }
 0x555   :  { %8347 = vmatmul.mubr.msk.f32.gmra.mxu1 %vm5803_vm15, %v5787_v12 }
 0x556   :  { %v5674_v41 = vpop.permute.xlu1 %5673  ;;  %v8234_v39 = vpop.f32.mrf.mxu1  ;;  %8349 = vmatprep.mubr.msk.f32.mxu1 %vm9246_vm8, %v9240_v3 }
 0x557   :  { %v5788_v44 = vmax.f32 %v13322_v48, %v5674_v41  ;;  %v7487_v41 = vld [vmem:[%s14149_s7 + $0x58] sm:$0xff] }
 0x559   :  { %v13464_v30 = vpop.f32.mrf.mxu1  ;;  %8350 = vmatmul.mubr.msk.f32.gmra.mxu1 %vm5803_vm15, %v5788_v44 }
 0x55a   :  { %8352 = vmatprep.mubr.msk.f32.mxu1 %vm9246_vm8, %v9240_v3 }
 0x55b   :  { %v8237_v38 = vpop.f32.mrf.mxu1 }
 0x55d   :  { %v5676_v40 = vpop.permute.xlu0 %5675 }
 0x55e   :  { %v5789_v20 = vmax.f32 %v13335_v34, %v5676_v40 }
 0x55f   :  { %v13470_v57 = vpop.f32.mrf.mxu1 }
 0x560   :  { %8353 = vmatmul.mubr.msk.f32.gmra.mxu1 %vm5803_vm15, %v5789_v20 }
 0x561   :  { %v5678_v35 = vpop.permute.xlu1 %5677  ;;  %v8240_v33 = vpop.f32.mrf.mxu1  ;;  %8355 = vmatprep.mubr.msk.f32.mxu1 %vm9246_vm8, %v9240_v3 }
 0x562   :  { %v5790_v48 = vmax.f32 %v13342_v46, %v5678_v35 }
 0x563   :  { %v13476_v61 = vpop.f32.mrf.mxu1 }
 0x564   :  { %8356 = vmatmul.mubr.msk.f32.gmra.mxu1 %vm5803_vm15, %v5790_v48 }
 0x565   :  { %v5680_v10 = vpop.permute.xlu0 %5679  ;;  %8358 = vmatprep.mubr.msk.f32.mxu1 %vm9246_vm8, %v9240_v3  ;;  %v8243_v42 = vpop.f32.mrf.mxu1 }
 0x566   :  { %v5791_v34 = vmax.f32 %v13351_v26, %v5680_v10  ;;  %v5682_v15 = vpop.permute.xlu1 %5681 }
 0x567   :  { %v5792_v46 = vmax.f32 %v13347_v25, %v5682_v15  ;;  %v6312_v15 = vld [vmem:[%s14149_s7] sm:$0xff] }
 0x568   :  { %8359 = vmatmul.mubr.msk.f32.gmra.mxu1 %vm5803_vm15, %v5791_v34  ;;  %v13483_v14 = vpop.f32.mrf.mxu1 }
 0x569   :  { %8361 = vmatprep.mubr.msk.f32.mxu1 %vm9246_vm8, %v9240_v3 }
 0x56a   :  { %v8246_v5 = vpop.f32.mrf.mxu1 }
 0x56b   :  { %v6317_v5 = vld [vmem:[%s14149_s7 + $0x28] sm:$0xff] }
 0x56c   :  { %8362 = vmatmul.mubr.msk.f32.gmra.mxu1 %vm5803_vm15, %v5792_v46  ;;  %v13489_v32 = vpop.f32.mrf.mxu1 }
 0x56d   :  { %7493 = vmatprep.mubr.msk.f32.mxu1 %vm6320_vm1, %v7487_v41 }
 0x56e   :  { %v8249_v59 = vpop.f32.mrf.mxu1 }
 0x573   :  { %v13491_v45 = vpop.f32.mrf.mxu1 }
 0x575   :  { %v8252_v26 = vpop.f32.mrf.mxu1 }
 0x576   :  { %v6316_v26 = vld [vmem:[%s14149_s7 + $0x20] sm:$0xff] }
 0x577   :  { %v13493_v43 = vpop.f32.mrf.mxu1 }
 0x579   :  { %v8255_v58 = vpop.f32.mrf.mxu1 }
 0x57c   :  { %v13495_v55 = vpop.f32.mrf.mxu1 }
 0x57e   :  { %v8258_v24 = vpop.f32.mrf.mxu1 }
 0x57f   :  { %v6315_v24 = vld [vmem:[%s14149_s7 + $0x18] sm:$0xff] }
 0x580   :  { %v13497_v53 = vpop.f32.mrf.mxu1 }
 0x582   :  { %v8261_v49 = vpop.f32.mrf.mxu1 }
 0x587   :  { %v13499_v16 = vpop.f32.mrf.mxu1 }
 0x589   :  { %v8264_v25 = vpop.f32.mrf.mxu1 }
 0x58b   :  { %v13501_v6 = vpop.f32.mrf.mxu1 }
 0x58d   :  { %v8267_v50 = vpop.f32.mrf.mxu1 }
 0x590   :  { %v13506_v60 = vpop.f32.mrf.mxu1 }
 0x592   :  { %v8270_v17 = vpop.f32.mrf.mxu1 }
 0x594   :  { %v13508_v36 = vpop.f32.mrf.mxu1 }
 0x596   :  { %v8273_v27 = vpop.f32.mrf.mxu1 }
 0x59c   :  { %v13510_v47 = vpop.f32.mrf.mxu1 }
 0x59e   :  { %v8276_v19 = vpop.f32.mrf.mxu1 }
 0x5a0   :  { %v13512_v31 = vpop.f32.mrf.mxu1 }
 0x5a2   :  { %v8279_v13 = vpop.f32.mrf.mxu1 }
 0x5a5   :  { %v13514_v29 = vpop.f32.mrf.mxu1 }
 0x5a7   :  { %v8282_v51 = vpop.f32.mrf.mxu1 }
 0x5a9   :  { %v13516_v2 = vpop.f32.mrf.mxu1 }
 0x5ab   :  { %v8285_v37 = vpop.f32.mrf.mxu1 }
 0x5b0   :  { %v13518_v1 = vpop.f32.mrf.mxu1 }
 0x5b2   :  { %v8288_v56 = vpop.f32.mrf.mxu1 }
 0x5b4   :  { %v13520_v23 = vpop.f32.mrf.mxu1 }
 0x5b6   :  { %v8291_v52 = vpop.f32.mrf.mxu1 }
 0x5b9   :  { %v13522_v12 = vpop.f32.mrf.mxu1 }
 0x5ba   :  { %7721 = vmatprep.subr.mxu0 %v13522_v12 }
 0x5bb   :  { %v8294_v39 = vpop.f32.mrf.mxu1  ;;  %7722 = vmatpush3.msra.mxu0 %v13483_v14 }
 0x5bc   :  { %7723 = vmatprep.subr.mxu0 %v13520_v23 }
 0x5bd   :  { %v13531_v44 = vpop.f32.mrf.mxu1  ;;  %7724 = vmatpush3.msra.mxu0 %v13476_v61 }
 0x5be   :  { %7725 = vmatprep.subr.mxu0 %v13518_v1 }
 0x5bf   :  { %v8297_v38 = vpop.f32.mrf.mxu1  ;;  %7726 = vmatpush3.msra.mxu0 %v13470_v57 }
 0x5c0   :  { %7727 = vmatprep.subr.mxu0 %v13516_v2 }
 0x5c1   :  { %7728 = vmatpush3.msra.mxu0 %v13464_v30 }
 0x5c2   :  { %7729 = vmatprep.subr.mxu0 %v13514_v29 }
 0x5c3   :  { %7730 = vmatpush3.msra.mxu0 %v13458_v18 }
 0x5c4   :  { %v13540_v40 = vpop.f32.mrf.mxu1  ;;  %7731 = vmatprep.subr.mxu0 %v13512_v31 }
 0x5c5   :  { %7732 = vmatpush3.msra.mxu0 %v13452_v0 }
 0x5c6   :  { %v8300_v20 = vpop.f32.mrf.mxu1  ;;  %7733 = vmatprep.subr.mxu0 %v13510_v47 }
 0x5c7   :  { %7734 = vmatpush3.msra.mxu0 %v13446_v63 }
 0x5c8   :  { %v13546_v35 = vpop.f32.mrf.mxu1  ;;  %7735 = vmatprep.subr.mxu0 %v13508_v36 }
 0x5c9   :  { %7736 = vmatpush3.msra.mxu0 %v13443_v21 }
 0x5ca   :  { %v8303_v33 = vpop.f32.mrf.mxu1  ;;  %7737 = vmatprep.subr.mxu0 %v13506_v60 }
 0x5cb   :  { %7738 = vmatpush3.msra.mxu0 %v13438_v54 }
 0x5cc   :  { %7739 = vmatprep.subr.mxu0 %v13501_v6 }
 0x5cd   :  { %v13553_v48 = vpop.f32.mrf.mxu1  ;;  %7740 = vmatpush3.msra.mxu0 %v13432_v9 }
 0x5ce   :  { %7741 = vmatprep.subr.mxu0 %v13499_v16 }
 0x5cf   :  { %v8306_v10 = vpop.f32.mrf.mxu1  ;;  %7742 = vmatpush3.msra.mxu0 %v13426_v11 }
 0x5d0   :  { %7743 = vmatprep.subr.mxu0 %v13497_v53 }
 0x5d1   :  { %v13559_v34 = vpop.f32.mrf.mxu1  ;;  %7744 = vmatpush3.msra.mxu0 %v13417_v28 }
 0x5d2   :  { %7745 = vmatprep.subr.mxu0 %v13495_v55 }
 0x5d3   :  { %v8309_v42 = vpop.f32.mrf.mxu1  ;;  %7746 = vmatpush3.msra.mxu0 %v13411_v8 }
 0x5d4   :  { %7747 = vmatprep.subr.mxu0 %v13493_v43 }
 0x5d5   :  { %7748 = vmatpush3.msra.mxu0 %v13407_v7 }
 0x5d6   :  { %7749 = vmatprep.subr.mxu0 %v13491_v45 }
 0x5d7   :  { %7750 = vmatpush3.msra.mxu0 %v13402_v4 }
 0x5d8   :  { %v13571_v46 = vpop.f32.mrf.mxu1  ;;  %7751 = vmatprep.subr.mxu0 %v13489_v32 }
 0x5d9   :  { %7752 = vmatpush3.msra.mxu0 %v13393_v62 }
 0x5da   :  { %v8312_v59 = vpop.f32.mrf.mxu1  ;;  %6406 = vmatprep.subr.mxu0 %v9240_v3  ;;  %6396 = vmatmul.mubr.f32.vlgmr.msra.gmra.mxu0 %v6312_v15 }
 0x5db   :  { %6400 = vmatprep.mubr.f32.mxu0 %v6317_v5 }
 0x5dc   :  { %v13582_v58 = vpop.f32.mrf.mxu1 }
 0x5de   :  { %v8315_v49 = vpop.f32.mrf.mxu1  ;;  %6401 = vmatmul.mubr.f32.gmra.mxu0 %v6316_v26 }
 0x5df   :  { %7482 = vmatprep.mubr.msk.f32.mxu0 %vm6320_vm1, %v6315_v24 }
 0x5e1   :  { %v13588_v25 = vpop.f32.mrf.mxu1 }
 0x5e3   :  { %v8318_v22 = vpop.f32.mrf.mxu1 }
 0x5e5   :  { %v13590_v50 = vpop.f32.mrf.mxu1 }
 0x5e7   :  { %v8321_v17 = vpop.f32.mrf.mxu1 }
 0x5ec   :  { %v13592_v27 = vpop.f32.mrf.mxu1 }
 0x5ee   :  { %v8324_v19 = vpop.f32.mrf.mxu1 }
 0x5f0   :  { %v13594_v13 = vpop.f32.mrf.mxu1 }
 0x5f2   :  { %v8327_v51 = vpop.f32.mrf.mxu1 }
 0x5f5   :  { %v13596_v37 = vpop.f32.mrf.mxu1 }
 0x5f7   :  { %v8330_v56 = vpop.f32.mrf.mxu1 }
 0x5f9   :  { %v13598_v52 = vpop.f32.mrf.mxu1 }
 0x5fb   :  { %v8333_v41 = vpop.f32.mrf.mxu1 }
 0x5fd   :  { %v13600_v39 = vpop.f32.mrf.mxu1 }
 0x5ff   :  { %v8336_v38 = vpop.f32.mrf.mxu1 }
 0x601   :  { %v13602_v20 = vpop.f32.mrf.mxu1 }
 0x603   :  { %v8339_v33 = vpop.f32.mrf.mxu1 }
 0x60c   :  { %v13604_v10 = vpop.f32.mrf.mxu1 }
 0x60d   :  { %6407 = vmatpush1.msra.mxu0 %v13604_v10  ;;  %6572 = vmatpush1.msra.mxu1 %v13604_v10 }
 0x60e   :  { %v8342_v42 = vpop.f32.mrf.mxu1  ;;  %6408 = vmatprep.subr.mxu0 %v9240_v3  ;;  %6573 = vmatprep.subr.mxu1 %v9240_v3 }
 0x60f   :  { %6409 = vmatpush1.msra.mxu0 %v13602_v20  ;;  %6574 = vmatpush1.msra.mxu1 %v13602_v20  ;;  %v6314_v42 = vld [vmem:[%s14149_s7 + $0x10] sm:$0xff] }
 0x610   :  { %v13612_v15 = vpop.f32.mrf.mxu1  ;;  %6410 = vmatprep.subr.mxu0 %v9240_v3  ;;  %6575 = vmatprep.subr.mxu1 %v9240_v3 }
 0x611   :  { %6411 = vmatpush1.msra.mxu0 %v13600_v39  ;;  %6576 = vmatpush1.msra.mxu1 %v13600_v39 }
 0x612   :  { %v8345_v5 = vpop.f32.mrf.mxu1  ;;  %6412 = vmatprep.subr.mxu0 %v9240_v3  ;;  %6577 = vmatprep.subr.mxu1 %v9240_v3 }
 0x613   :  { %6413 = vmatpush1.msra.mxu0 %v13598_v52  ;;  %6578 = vmatpush1.msra.mxu1 %v13598_v52  ;;  %v7486_v5 = vld [vmem:[%s14149_s7 + $0x50] sm:$0xff] }
 0x614   :  { %6414 = vmatprep.subr.mxu0 %v9240_v3  ;;  %6579 = vmatprep.subr.mxu1 %v9240_v3 }
 0x615   :  { %v13624_v59 = vpop.f32.mrf.mxu1  ;;  %6415 = vmatpush1.msra.mxu0 %v13596_v37  ;;  %6580 = vmatpush1.msra.mxu1 %v13596_v37 }
 0x616   :  { %6416 = vmatprep.subr.mxu0 %v9240_v3  ;;  %6581 = vmatprep.subr.mxu1 %v9240_v3 }
 0x617   :  { %v8348_v26 = vpop.f32.mrf.mxu1  ;;  %6417 = vmatpush1.msra.mxu0 %v13594_v13  ;;  %6582 = vmatpush1.msra.mxu1 %v13594_v13 }
 0x618   :  { %6418 = vmatprep.subr.mxu0 %v9240_v3  ;;  %6583 = vmatprep.subr.mxu1 %v9240_v3  ;;  %v6319_v26 = vld [vmem:[%s14149_s7 + $0x38] sm:$0xff] }
 0x619   :  { %v13634_v24 = vpop.f32.mrf.mxu1  ;;  %6419 = vmatpush1.msra.mxu0 %v13592_v27  ;;  %6584 = vmatpush1.msra.mxu1 %v13592_v27 }
 0x61a   :  { %6420 = vmatprep.subr.mxu0 %v9240_v3  ;;  %6585 = vmatprep.subr.mxu1 %v9240_v3 }
 0x61b   :  { %v8351_v49 = vpop.f32.mrf.mxu1  ;;  %6421 = vmatpush1.msra.mxu0 %v13590_v50  ;;  %6586 = vmatpush1.msra.mxu1 %v13590_v50 }
 0x61c   :  { %6422 = vmatprep.subr.mxu0 %v9240_v3  ;;  %6587 = vmatprep.subr.mxu1 %v9240_v3  ;;  %v6318_v49 = vld [vmem:[%s14149_s7 + $0x30] sm:$0xff] }
 0x61d   :  { %6423 = vmatpush1.msra.mxu0 %v13588_v25  ;;  %6588 = vmatpush1.msra.mxu1 %v13588_v25 }
 0x61e   :  { %6424 = vmatprep.subr.mxu0 %v9240_v3  ;;  %6589 = vmatprep.subr.mxu1 %v9240_v3 }
 0x61f   :  { %6425 = vmatpush1.msra.mxu0 %v13582_v58  ;;  %6590 = vmatpush1.msra.mxu1 %v13582_v58 }
 0x620   :  { %v13650_v22 = vpop.f32.mrf.mxu1  ;;  %6426 = vmatprep.subr.mxu0 %v9240_v3  ;;  %6591 = vmatprep.subr.mxu1 %v9240_v3 }
 0x621   :  { %6427 = vmatpush1.msra.mxu0 %v13571_v46  ;;  %6592 = vmatpush1.msra.mxu1 %v13571_v46 }
 0x622   :  { %v8354_v17 = vpop.f32.mrf.mxu1  ;;  %6428 = vmatprep.subr.mxu0 %v9240_v3  ;;  %6593 = vmatprep.subr.mxu1 %v9240_v3 }
 0x623   :  { %6429 = vmatpush1.msra.mxu0 %v13559_v34  ;;  %6594 = vmatpush1.msra.mxu1 %v13559_v34  ;;  %v7485_v17 = vld [vmem:[%s14149_s7 + $0x48] sm:$0xff] }
 0x624   :  { %v13660_v19 = vpop.f32.mrf.mxu1  ;;  %6430 = vmatprep.subr.mxu0 %v9240_v3  ;;  %6595 = vmatprep.subr.mxu1 %v9240_v3 }
 0x625   :  { %6431 = vmatpush1.msra.mxu0 %v13553_v48  ;;  %6596 = vmatpush1.msra.mxu1 %v13553_v48 }
 0x626   :  { %v8357_v51 = vpop.f32.mrf.mxu1  ;;  %6432 = vmatprep.subr.mxu0 %v9240_v3  ;;  %6597 = vmatprep.subr.mxu1 %v9240_v3 }
 0x627   :  { %6433 = vmatpush1.msra.mxu0 %v13546_v35  ;;  %6598 = vmatpush1.msra.mxu1 %v13546_v35  ;;  %v7484_v51 = vld [vmem:[%s14149_s7 + $0x40] sm:$0xff] }
 0x628   :  { %v13670_v56 = vpop.f32.mrf.mxu1  ;;  %6434 = vmatprep.subr.mxu0 %v9240_v3  ;;  %6599 = vmatprep.subr.mxu1 %v9240_v3 }
 0x629   :  { %6435 = vmatpush1.msra.mxu0 %v13540_v40  ;;  %6600 = vmatpush1.msra.mxu1 %v13540_v40 }
 0x62a   :  { %v8360_v41 = vpop.f32.mrf.mxu1  ;;  %6436 = vmatprep.subr.mxu0 %v9240_v3  ;;  %6601 = vmatprep.subr.mxu1 %v9240_v3 }
 0x62b   :  { %6437 = vmatpush1.msra.mxu0 %v13531_v44  ;;  %6602 = vmatpush1.msra.mxu1 %v13531_v44  ;;  %v7489_v41 = vld [vmem:[%s14149_s7 + $0x68] sm:$0xff] }
 0x62c   :  { %v13680_v38 = vpop.f32.mrf.mxu1  ;;  %6456 = vmatprep.subr.mxu0 %v9240_v3  ;;  %6621 = vmatprep.subr.mxu1 %v9240_v3 }
 0x62d   :  { %7481 = vmatpush2.msk.msra.mxu0 %vm6327_vm2, %v13680_v38  ;;  %7492 = vmatpush2.msk.msra.mxu1 %vm6327_vm2, %v13680_v38 }
 0x62e   :  { %v8363_v33 = vpop.f32.mrf.mxu1  ;;  %6458 = vmatprep.subr.mxu0 %v9240_v3  ;;  %6623 = vmatprep.subr.mxu1 %v9240_v3 }
 0x62f   :  { %6459 = vmatpush2.msra.mxu0 %v13670_v56  ;;  %6624 = vmatpush2.msra.mxu1 %v13670_v56  ;;  %v7491_v33 = vld [vmem:[%s14149_s7 + $0x78] sm:$0xff] }
 0x630   :  { %6460 = vmatprep.subr.mxu0 %v9240_v3  ;;  %6625 = vmatprep.subr.mxu1 %v9240_v3 }
 0x631   :  { %6461 = vmatpush2.msra.mxu0 %v13660_v19  ;;  %6626 = vmatpush2.msra.mxu1 %v13660_v19 }
 0x632   :  { %6462 = vmatprep.subr.mxu0 %v9240_v3  ;;  %6627 = vmatprep.subr.mxu1 %v9240_v3 }
 0x633   :  { %6463 = vmatpush2.msra.mxu0 %v13650_v22  ;;  %6628 = vmatpush2.msra.mxu1 %v13650_v22 }
 0x634   :  { %6464 = vmatprep.subr.mxu0 %v9240_v3  ;;  %6629 = vmatprep.subr.mxu1 %v9240_v3 }
 0x635   :  { %6465 = vmatpush2.msra.mxu0 %v13634_v24  ;;  %6630 = vmatpush2.msra.mxu1 %v13634_v24 }
 0x636   :  { %6466 = vmatprep.subr.mxu0 %v9240_v3  ;;  %6631 = vmatprep.subr.mxu1 %v9240_v3 }
 0x637   :  { %6467 = vmatpush2.msra.mxu0 %v13624_v59  ;;  %6632 = vmatpush2.msra.mxu1 %v13624_v59 }
 0x638   :  { %6468 = vmatprep.subr.mxu0 %v9240_v3  ;;  %6633 = vmatprep.subr.mxu1 %v9240_v3 }
 0x639   :  { %6469 = vmatpush2.msra.mxu0 %v13612_v15  ;;  %6634 = vmatpush2.msra.mxu1 %v13612_v15 }
 0x63a   :  { %7759 = vmatprep.subr.mxu0 %v13522_v12  ;;  %6736 = vmatprep.subr.mxu1 %v9240_v3 }
 0x63b   :  { %6471 = vmatmul.mubr.f32.vlgmr.msra.gmra.mxu0 %v6314_v42  ;;  %6636 = vmatmul.mubr.f32.vlgmr.msra.gmra.mxu1 %v7486_v5  ;;  %v7488_v42 = vld [vmem:[%s14149_s7 + $0x60] sm:$0xff]  ;;  %v7496_v5 = vld [vmem:[%s14149_s7 + $0x88] sm:$0xff] }
 0x63c   :  { %7760 = vmatpush3.msra.mxu0 %v13483_v14  ;;  %6737 = vmatpush1.msra.mxu1 %v13604_v10 }
 0x63d   :  { %7761 = vmatprep.subr.mxu0 %v13520_v23  ;;  %6738 = vmatprep.subr.mxu1 %v9240_v3 }
 0x63e   :  { %7762 = vmatpush3.msra.mxu0 %v13476_v61  ;;  %6739 = vmatpush1.msra.mxu1 %v13602_v20 }
 0x63f   :  { %7763 = vmatprep.subr.mxu0 %v13518_v1  ;;  %6740 = vmatprep.subr.mxu1 %v9240_v3 }
 0x640   :  { %7764 = vmatpush3.msra.mxu0 %v13470_v57  ;;  %6741 = vmatpush1.msra.mxu1 %v13600_v39 }
 0x641   :  { %7765 = vmatprep.subr.mxu0 %v13516_v2  ;;  %6742 = vmatprep.subr.mxu1 %v9240_v3 }
 0x642   :  { %7766 = vmatpush3.msra.mxu0 %v13464_v30  ;;  %6743 = vmatpush1.msra.mxu1 %v13598_v52 }
 0x643   :  { %7767 = vmatprep.subr.mxu0 %v13514_v29  ;;  %6744 = vmatprep.subr.mxu1 %v9240_v3 }
 0x644   :  { %7768 = vmatpush3.msra.mxu0 %v13458_v18  ;;  %6745 = vmatpush1.msra.mxu1 %v13596_v37 }
 0x645   :  { %7769 = vmatprep.subr.mxu0 %v13512_v31  ;;  %6746 = vmatprep.subr.mxu1 %v9240_v3 }
 0x646   :  { %7770 = vmatpush3.msra.mxu0 %v13452_v0  ;;  %6747 = vmatpush1.msra.mxu1 %v13594_v13 }
 0x647   :  { %7771 = vmatprep.subr.mxu0 %v13510_v47  ;;  %6748 = vmatprep.subr.mxu1 %v9240_v3 }
 0x648   :  { %7772 = vmatpush3.msra.mxu0 %v13446_v63  ;;  %6749 = vmatpush1.msra.mxu1 %v13592_v27 }
 0x649   :  { %7773 = vmatprep.subr.mxu0 %v13508_v36  ;;  %6750 = vmatprep.subr.mxu1 %v9240_v3 }
 0x64a   :  { %7774 = vmatpush3.msra.mxu0 %v13443_v21  ;;  %6751 = vmatpush1.msra.mxu1 %v13590_v50 }
 0x64b   :  { %7775 = vmatprep.subr.mxu0 %v13506_v60  ;;  %6752 = vmatprep.subr.mxu1 %v9240_v3 }
 0x64c   :  { %7776 = vmatpush3.msra.mxu0 %v13438_v54  ;;  %6753 = vmatpush1.msra.mxu1 %v13588_v25 }
 0x64d   :  { %7777 = vmatprep.subr.mxu0 %v13501_v6  ;;  %6754 = vmatprep.subr.mxu1 %v9240_v3 }
 0x64e   :  { %7778 = vmatpush3.msra.mxu0 %v13432_v9  ;;  %6755 = vmatpush1.msra.mxu1 %v13582_v58 }
 0x64f   :  { %7779 = vmatprep.subr.mxu0 %v13499_v16  ;;  %6756 = vmatprep.subr.mxu1 %v9240_v3 }
 0x650   :  { %7780 = vmatpush3.msra.mxu0 %v13426_v11  ;;  %6757 = vmatpush1.msra.mxu1 %v13571_v46 }
 0x651   :  { %7781 = vmatprep.subr.mxu0 %v13497_v53  ;;  %6758 = vmatprep.subr.mxu1 %v9240_v3 }
 0x652   :  { %7782 = vmatpush3.msra.mxu0 %v13417_v28  ;;  %6759 = vmatpush1.msra.mxu1 %v13559_v34 }
 0x653   :  { %7783 = vmatprep.subr.mxu0 %v13495_v55  ;;  %6760 = vmatprep.subr.mxu1 %v9240_v3 }
 0x654   :  { %7784 = vmatpush3.msra.mxu0 %v13411_v8  ;;  %6761 = vmatpush1.msra.mxu1 %v13553_v48 }
 0x655   :  { %7785 = vmatprep.subr.mxu0 %v13493_v43  ;;  %6762 = vmatprep.subr.mxu1 %v9240_v3 }
 0x656   :  { %7483 = vmatprep.mubr.msk.f32.mxu0 %vm6320_vm1, %v6319_v26  ;;  %7786 = vmatpush3.msra.mxu0 %v13407_v7  ;;  %v7490_v26 = vld [vmem:[%s14149_s7 + $0x70] sm:$0xff] }
 0x657   :  { %6763 = vmatpush1.msra.mxu1 %v13546_v35  ;;  %6476 = vmatmul.mubr.f32.gmra.mxu0 %v6318_v49  ;;  %v7498_v49 = vld [vmem:[%s14149_s7 + $0x98] sm:$0xff] }
 0x658   :  { %7787 = vmatprep.subr.mxu0 %v13491_v45  ;;  %6764 = vmatprep.subr.mxu1 %v9240_v3 }
 0x659   :  { %7788 = vmatpush3.msra.mxu0 %v13402_v4  ;;  %6765 = vmatpush1.msra.mxu1 %v13540_v40 }
 0x65a   :  { %7789 = vmatprep.subr.mxu0 %v13489_v32  ;;  %6766 = vmatprep.subr.mxu1 %v9240_v3 }
 0x65b   :  { %7790 = vmatpush3.msra.mxu0 %v13393_v62  ;;  %6560 = vmatprep.mubr.f32.mxu0 %v7485_v17  ;;  %v7497_v17 = vld [vmem:[%s14149_s7 + $0x90] sm:$0xff] }
 0x65c   :  { %6767 = vmatpush1.msra.mxu1 %v13531_v44  ;;  %6561 = vmatmul.mubr.f32.vlgmr.msra.gmra.mxu0 %v7484_v51  ;;  %v7502_v51 = vld [vmem:[%s14149_s7 + $0xb8] sm:$0xff] }
 0x65d   :  { %7797 = vmatprep.subr.mxu0 %v13522_v12  ;;  %6786 = vmatprep.subr.mxu1 %v9240_v3 }
 0x65e   :  { %7798 = vmatpush3.msra.mxu0 %v13483_v14  ;;  %7503 = vmatpush2.msk.msra.mxu1 %vm6327_vm2, %v13680_v38 }
 0x65f   :  { %7799 = vmatprep.subr.mxu0 %v13520_v23  ;;  %6788 = vmatprep.subr.mxu1 %v9240_v3 }
 0x660   :  { %7800 = vmatpush3.msra.mxu0 %v13476_v61  ;;  %6789 = vmatpush2.msra.mxu1 %v13670_v56 }
 0x661   :  { %7801 = vmatprep.subr.mxu0 %v13518_v1  ;;  %6790 = vmatprep.subr.mxu1 %v9240_v3 }
 0x662   :  { %7802 = vmatpush3.msra.mxu0 %v13470_v57  ;;  %6791 = vmatpush2.msra.mxu1 %v13660_v19 }
 0x663   :  { %7803 = vmatprep.subr.mxu0 %v13516_v2  ;;  %6792 = vmatprep.subr.mxu1 %v9240_v3 }
 0x664   :  { %7804 = vmatpush3.msra.mxu0 %v13464_v30  ;;  %6793 = vmatpush2.msra.mxu1 %v13650_v22 }
 0x665   :  { %7805 = vmatprep.subr.mxu0 %v13514_v29  ;;  %6794 = vmatprep.subr.mxu1 %v9240_v3 }
 0x666   :  { %7806 = vmatpush3.msra.mxu0 %v13458_v18  ;;  %6795 = vmatpush2.msra.mxu1 %v13634_v24 }
 0x667   :  { %7807 = vmatprep.subr.mxu0 %v13512_v31  ;;  %6796 = vmatprep.subr.mxu1 %v9240_v3 }
 0x668   :  { %7808 = vmatpush3.msra.mxu0 %v13452_v0  ;;  %6797 = vmatpush2.msra.mxu1 %v13624_v59 }
 0x669   :  { %7809 = vmatprep.subr.mxu0 %v13510_v47  ;;  %6798 = vmatprep.subr.mxu1 %v9240_v3 }
 0x66a   :  { %7810 = vmatpush3.msra.mxu0 %v13446_v63  ;;  %6799 = vmatpush2.msra.mxu1 %v13612_v15 }
 0x66b   :  { %7811 = vmatprep.subr.mxu0 %v13508_v36  ;;  %6565 = vmatprep.mubr.f32.mxu0 %v7489_v41  ;;  %v7501_v41 = vld [vmem:[%s14149_s7 + $0xb0] sm:$0xff] }
 0x66c   :  { %7812 = vmatpush3.msra.mxu0 %v13443_v21  ;;  %7494 = vmatprep.mubr.msk.f32.mxu1 %vm6320_vm1, %v7491_v33  ;;  %v7495_v33 = vld [vmem:[%s14149_s7 + $0x80] sm:$0xff] }
 0x66d   :  { %7813 = vmatprep.subr.mxu0 %v13506_v60  ;;  %6566 = vmatmul.mubr.f32.gmra.mxu0 %v7488_v42  ;;  %v7500_v42 = vld [vmem:[%s14149_s7 + $0xa8] sm:$0xff] }
 0x66e   :  { %7814 = vmatpush3.msra.mxu0 %v13438_v54  ;;  %6725 = vmatprep.mubr.f32.mxu0 %v7496_v5  ;;  %v7499_v5 = vld [vmem:[%s14149_s7 + $0xa0] sm:$0xff] }
 0x66f   :  { %7815 = vmatprep.subr.mxu0 %v13501_v6  ;;  %6641 = vmatmul.mubr.f32.gmra.mxu1 %v7490_v26  ;;  %v7507_v26 = vld [vmem:[%s14149_s7 + $0xc8] sm:$0xff] }
 0x670   :  { %7816 = vmatpush3.msra.mxu0 %v13432_v9  ;;  %7504 = vmatprep.mubr.msk.f32.mxu1 %vm6320_vm1, %v7498_v49  ;;  %v7027_v49 = vld [vmem:[%s14150_s8 + $0x98] sm:$0xff] }
 0x671   :  { %7817 = vmatprep.subr.mxu0 %v13499_v16  ;;  %7040 = vmatprep.subr.mxu1 %v9240_v3 }
 0x672   :  { %7818 = vmatpush3.msra.mxu0 %v13426_v11 }
 0x673   :  { %7819 = vmatprep.subr.mxu0 %v13497_v53  ;;  %6801 = vmatmul.mubr.f32.vlgmr.msra.gmra.mxu1 %v7497_v17  ;;  %v7026_v17 = vld [vmem:[%s14150_s8 + $0x90] sm:$0xff] }
 0x674   :  { %7820 = vmatpush3.msra.mxu0 %v13417_v28  ;;  %7505 = vmatprep.mubr.msk.f32.mxu1 %vm6320_vm1, %v7502_v51  ;;  %v7025_v51 = vld [vmem:[%s14150_s8 + $0x88] sm:$0xff] }
 0x675   :  { %7821 = vmatprep.subr.mxu0 %v13495_v55 }
 0x676   :  { %7822 = vmatpush3.msra.mxu0 %v13411_v8 }
 0x677   :  { %7823 = vmatprep.subr.mxu0 %v13493_v43  ;;  %6806 = vmatmul.mubr.f32.gmra.mxu1 %v7501_v41 }
 0x678   :  { %7824 = vmatpush3.msra.mxu0 %v13407_v7 }
 0x679   :  { %7825 = vmatprep.subr.mxu0 %v13491_v45 }
 0x67a   :  { %7826 = vmatpush3.msra.mxu0 %v13402_v4 }
 0x67b   :  { %7827 = vmatprep.subr.mxu0 %v13489_v32 }
 0x67c   :  { %7828 = vmatpush3.msra.mxu0 %v13393_v62 }
 0x67d   :  { %6726 = vmatmul.mubr.f32.vlgmr.msra.gmra.mxu0 %v7495_v33  ;;  %7835 = vmatprep.subr.mxu0 %v13522_v12 }
 0x67e   :  { %7836 = vmatpush3.msra.mxu0 %v13483_v14  ;;  %6730 = vmatprep.mubr.f32.mxu0 %v7500_v42 }
 0x67f   :  { %7837 = vmatprep.subr.mxu0 %v13520_v23 }
 0x680   :  { %7838 = vmatpush3.msra.mxu0 %v13476_v61 }
 0x681   :  { %7839 = vmatprep.subr.mxu0 %v13518_v1  ;;  %6731 = vmatmul.mubr.f32.gmra.mxu0 %v7499_v5  ;;  %v7024_v5 = vld [vmem:[%s14150_s8 + $0x80] sm:$0xff] }
 0x682   :  { %7840 = vmatpush3.msra.mxu0 %v13470_v57  ;;  %6890 = vmatprep.mubr.f32.mxu0 %v7507_v26 }
 0x683   :  { %7841 = vmatprep.subr.mxu0 %v13516_v2 }
 0x684   :  { %7842 = vmatpush3.msra.mxu0 %v13464_v30 }
 0x685   :  { %7843 = vmatprep.subr.mxu0 %v13514_v29 }
 0x686   :  { %7844 = vmatpush3.msra.mxu0 %v13458_v18 }
 0x687   :  { %7845 = vmatprep.subr.mxu0 %v13512_v31 }
 0x688   :  { %7846 = vmatpush3.msra.mxu0 %v13452_v0 }
 0x689   :  { %7847 = vmatprep.subr.mxu0 %v13510_v47 }
 0x68a   :  { %7848 = vmatpush3.msra.mxu0 %v13446_v63  ;;  %v7512_v63 = vld [vmem:[%s14149_s7 + $0xf0] sm:$0xff] }
 0x68b   :  { %7849 = vmatprep.subr.mxu0 %v13508_v36 }
 0x68c   :  { %7850 = vmatpush3.msra.mxu0 %v13443_v21  ;;  %v7513_v21 = vld [vmem:[%s14149_s7 + $0xf8] sm:$0xff] }
 0x68d   :  { %7851 = vmatprep.subr.mxu0 %v13506_v60 }
 0x68e   :  { %7852 = vmatpush3.msra.mxu0 %v13438_v54  ;;  %v7509_v54 = vld [vmem:[%s14149_s7 + $0xd8] sm:$0xff] }
 0x68f   :  { %7853 = vmatprep.subr.mxu0 %v13501_v6 }
 0x690   :  { %7854 = vmatpush3.msra.mxu0 %v13432_v9 }
 0x691   :  { %7855 = vmatprep.subr.mxu0 %v13499_v16 }
 0x692   :  { %7856 = vmatpush3.msra.mxu0 %v13426_v11  ;;  %v7506_v11 = vld [vmem:[%s14149_s7 + $0xc0] sm:$0xff] }
 0x693   :  { %7857 = vmatprep.subr.mxu0 %v13497_v53 }
 0x694   :  { %7858 = vmatpush3.msra.mxu0 %v13417_v28  ;;  %v7511_v28 = vld [vmem:[%s14149_s7 + $0xe8] sm:$0xff] }
 0x695   :  { %7859 = vmatprep.subr.mxu0 %v13495_v55 }
 0x696   :  { %7860 = vmatpush3.msra.mxu0 %v13411_v8 }
 0x697   :  { %7861 = vmatprep.subr.mxu0 %v13493_v43 }
 0x698   :  { %7862 = vmatpush3.msra.mxu0 %v13407_v7 }
 0x699   :  { %7863 = vmatprep.subr.mxu0 %v13491_v45 }
 0x69a   :  { %7864 = vmatpush3.msra.mxu0 %v13402_v4  ;;  %v7753_v9 = vpop.f32.mrf.mxu0  ;;  %v7510_v4 = vld [vmem:[%s14149_s7 + $0xe0] sm:$0xff] }
 0x69b   :  { %7865 = vmatprep.subr.mxu0 %v13489_v32 }
 0x69c   :  { %7866 = vmatpush3.msra.mxu0 %v13393_v62  ;;  %v7754_v8 = vpop.f32.mrf.mxu0  ;;  %v7508_v62 = vld [vmem:[%s14149_s7 + $0xd0] sm:$0xff] }
 0x69d   :  { %6901 = vmatprep.subr.mxu0 %v9240_v3  ;;  %6891 = vmatmul.mubr.f32.vlgmr.msra.gmra.mxu0 %v7506_v11  ;;  %v7755_v7 = vadd.f32 %v7754_v8, %v7753_v9  ;;  %v7129_v9 = vld [vmem:[%s14151_s10 + $0x60] sm:$0xf] }
 0x69e   :  { %6902 = vmatpush1.msra.mxu0 %v13604_v10  ;;  %6895 = vmatprep.mubr.f32.mxu0 %v7511_v28  ;;  %v7756_v0 = vpop.f32.mrf.mxu0  ;;  %v7015_v10 = vld [vmem:[%s14150_s8 + $0x38] sm:$0xff] }
 0x69f   :  { %6903 = vmatprep.subr.mxu0 %v9240_v3  ;;  %v7128_v28 = vld [vmem:[%s14151_s10 + $0x58] sm:$0xff] }
 0x6a0   :  { %6904 = vmatpush1.msra.mxu0 %v13602_v20  ;;  %v7757_v18 = vpop.f32.mrf.mxu0  ;;  %v7016_v20 = vld [vmem:[%s14150_s8 + $0x40] sm:$0xff] }
 0x6a1   :  { %6905 = vmatprep.subr.mxu0 %v9240_v3  ;;  %6896 = vmatmul.mubr.f32.gmra.mxu0 %v7510_v4  ;;  %v7758_v45 = vadd.f32 %v7757_v18, %v7756_v0  ;;  %v7125_v18 = vld [vmem:[%s14151_s10 + $0x40] sm:$0xff] }
 0x6a2   :  { %6906 = vmatpush1.msra.mxu0 %v13600_v39  ;;  %7515 = vmatprep.mubr.msk.f32.mxu0 %vm6320_vm1, %v7509_v54  ;;  %v7017_v39 = vld [vmem:[%s14150_s8 + $0x48] sm:$0xff] }
 0x6a3   :  { %6907 = vmatprep.subr.mxu0 %v9240_v3 }
 0x6a4   :  { %6908 = vmatpush1.msra.mxu0 %v13598_v52 }
 0x6a5   :  { %6909 = vmatprep.subr.mxu0 %v9240_v3 }
 0x6a6   :  { %6910 = vmatpush1.msra.mxu0 %v13596_v37  ;;  %v7018_v37 = vld [vmem:[%s14150_s8 + $0x50] sm:$0xff] }
 0x6a7   :  { %6911 = vmatprep.subr.mxu0 %v9240_v3 }
 0x6a8   :  { %6912 = vmatpush1.msra.mxu0 %v13594_v13  ;;  %v7019_v13 = vld [vmem:[%s14150_s8 + $0x58] sm:$0xff] }
 0x6a9   :  { %6913 = vmatprep.subr.mxu0 %v9240_v3 }
 0x6aa   :  { %6914 = vmatpush1.msra.mxu0 %v13592_v27 }
 0x6ab   :  { %6915 = vmatprep.subr.mxu0 %v9240_v3 }
 0x6ac   :  { %6916 = vmatpush1.msra.mxu0 %v13590_v50 }
 0x6ad   :  { %6917 = vmatprep.subr.mxu0 %v9240_v3 }
 0x6ae   :  { %6918 = vmatpush1.msra.mxu0 %v13588_v25  ;;  %v7020_v25 = vld [vmem:[%s14150_s8 + $0x60] sm:$0xff] }
 0x6af   :  { %6919 = vmatprep.subr.mxu0 %v9240_v3 }
 0x6b0   :  { %6920 = vmatpush1.msra.mxu0 %v13582_v58 }
 0x6b1   :  { %6921 = vmatprep.subr.mxu0 %v9240_v3 }
 0x6b2   :  { %6922 = vmatpush1.msra.mxu0 %v13571_v46 }
 0x6b3   :  { %6923 = vmatprep.subr.mxu0 %v9240_v3 }
 0x6b4   :  { %6924 = vmatpush1.msra.mxu0 %v13559_v34  ;;  %v7021_v34 = vld [vmem:[%s14150_s8 + $0x68] sm:$0xff] }
 0x6b5   :  { %6925 = vmatprep.subr.mxu0 %v9240_v3 }
 0x6b6   :  { %6926 = vmatpush1.msra.mxu0 %v13553_v48 }
 0x6b7   :  { %6927 = vmatprep.subr.mxu0 %v9240_v3 }
 0x6b8   :  { %6928 = vmatpush1.msra.mxu0 %v13546_v35  ;;  %v7022_v35 = vld [vmem:[%s14150_s8 + $0x70] sm:$0xff] }
 0x6b9   :  { %6929 = vmatprep.subr.mxu0 %v9240_v3 }
 0x6ba   :  { %6930 = vmatpush1.msra.mxu0 %v13540_v40  ;;  %v7023_v40 = vld [vmem:[%s14150_s8 + $0x78] sm:$0xff] }
 0x6bb   :  { %6931 = vmatprep.subr.mxu0 %v9240_v3  ;;  %7041 = vmatpush1.msra.mxu1 %v7023_v40  ;;  %v7120_v40 = vld [vmem:[%s14151_s10 + $0x18] sm:$0xff] }
 0x6bc   :  { %6932 = vmatpush1.msra.mxu0 %v13531_v44  ;;  %7042 = vmatprep.subr.mxu1 %v9240_v3 }
 0x6bd   :  { %6951 = vmatprep.subr.mxu0 %v9240_v3  ;;  %7043 = vmatpush1.msra.mxu1 %v7022_v35  ;;  %v7118_v35 = vld [vmem:[%s14151_s10 + $0x8] sm:$0xff] }
 0x6be   :  { %7514 = vmatpush2.msk.msra.mxu0 %vm6327_vm2, %v13680_v38  ;;  %7044 = vmatprep.subr.mxu1 %v9240_v3  ;;  %v7008_v38 = vld [vmem:[%s14150_s8] sm:$0xff] }
 0x6bf   :  { %6953 = vmatprep.subr.mxu0 %v9240_v3  ;;  %7045 = vmatpush1.msra.mxu1 %v7021_v34  ;;  %v7517_v34 = vld [vmem:[%s14152_s9] ss:$0 sm:$0xff] }
 0x6c0   :  { %6954 = vmatpush2.msra.mxu0 %v13670_v56  ;;  %7046 = vmatprep.subr.mxu1 %v9240_v3  ;;  %v7009_v56 = vld [vmem:[%s14150_s8 + $0x8] sm:$0xff] }
 0x6c1   :  { %6955 = vmatprep.subr.mxu0 %v9240_v3  ;;  %7047 = vmatpush1.msra.mxu1 %v7020_v25 }
 0x6c2   :  { %6956 = vmatpush2.msra.mxu0 %v13660_v19  ;;  %7048 = vmatprep.subr.mxu1 %v9240_v3  ;;  %v7010_v19 = vld [vmem:[%s14150_s8 + $0x10] sm:$0xff] }
 0x6c3   :  { %6957 = vmatprep.subr.mxu0 %v9240_v3  ;;  %7049 = vmatpush1.msra.mxu1 %v7019_v13 }
 0x6c4   :  { %6958 = vmatpush2.msra.mxu0 %v13650_v22  ;;  %7050 = vmatprep.subr.mxu1 %v9240_v3  ;;  %v7011_v22 = vld [vmem:[%s14150_s8 + $0x18] sm:$0xff] }
 0x6c5   :  { %6959 = vmatprep.subr.mxu0 %v9240_v3  ;;  %7051 = vmatpush1.msra.mxu1 %v7018_v37 }
 0x6c6   :  { %6960 = vmatpush2.msra.mxu0 %v13634_v24  ;;  %7052 = vmatprep.subr.mxu1 %v9240_v3  ;;  %v7012_v24 = vld [vmem:[%s14150_s8 + $0x20] sm:$0xff] }
 0x6c7   :  { %6961 = vmatprep.subr.mxu0 %v9240_v3  ;;  %7053 = vmatpush1.msra.mxu1 %v7017_v39  ;;  %v7520_v39 = vld [vmem:[%s14153_s11] ss:$0 sm:$0xff] }
 0x6c8   :  { %6962 = vmatpush2.msra.mxu0 %v13624_v59  ;;  %7054 = vmatprep.subr.mxu1 %v9240_v3  ;;  %v7013_v59 = vld [vmem:[%s14150_s8 + $0x28] sm:$0xff] }
 0x6c9   :  { %6963 = vmatprep.subr.mxu0 %v9240_v3  ;;  %7055 = vmatpush1.msra.mxu1 %v7016_v20 }
 0x6ca   :  { %6964 = vmatpush2.msra.mxu0 %v13612_v15  ;;  %7056 = vmatprep.subr.mxu1 %v9240_v3  ;;  %v7014_v15 = vld [vmem:[%s14150_s8 + $0x30] sm:$0xff] }
 0x6cb   :  { %6966 = vmatmul.mubr.f32.vlgmr.msra.gmra.mxu0 %v7508_v62  ;;  %7057 = vmatpush1.msra.mxu1 %v7015_v10 }
 0x6cc   :  { %7516 = vmatprep.mubr.msk.f32.mxu0 %vm6320_vm1, %v7513_v21  ;;  %7058 = vmatprep.subr.mxu1 %v9240_v3  ;;  %v7126_v21 = vld [vmem:[%s14151_s10 + $0x48] sm:$0xff] }
 0x6cd   :  { %7059 = vmatpush1.msra.mxu1 %v7014_v15  ;;  %8364 = vmatprep.subr.msk.mxu0 %vm1583_vm0, %v7129_v9 }
 0x6ce   :  { %7060 = vmatprep.subr.mxu1 %v9240_v3  ;;  %8365 = vmatpush3.msk.msra.mxu0 %vm1583_vm0, %v7129_v9  ;;  %vm7000_vm0 = vcmask 326656  }
 0x6cf   :  { %6971 = vmatmul.mubr.f32.gmra.mxu0 %v7512_v63  ;;  %7061 = vmatpush1.msra.mxu1 %v7013_v59 }
 0x6d0   :  { %7062 = vmatprep.subr.mxu1 %v9240_v3  ;;  %8366 = vmatprep.subr.mxu0 %v7128_v28 }
 0x6d1   :  { %7063 = vmatpush1.msra.mxu1 %v7012_v24  ;;  %8367 = vmatpush3.msra.mxu0 %v7128_v28 }
 0x6d2   :  { %7064 = vmatprep.subr.mxu1 %v9240_v3 }
 0x6d3   :  { %7065 = vmatpush1.msra.mxu1 %v7011_v22 }
 0x6d4   :  { %7066 = vmatprep.subr.mxu1 %v9240_v3 }
 0x6d5   :  { %7067 = vmatpush1.msra.mxu1 %v7010_v19 }
 0x6d6   :  { %7068 = vmatprep.subr.mxu1 %v9240_v3 }
 0x6d7   :  { %7069 = vmatpush1.msra.mxu1 %v7009_v56 }
 0x6d8   :  { %7070 = vmatprep.subr.mxu1 %v9240_v3 }
 0x6d9   :  { %7071 = vmatpush1.msra.mxu1 %v7008_v38 }
 0x6da   :  { %7096 = vmatprep.subr.mxu1 %v9240_v3 }
 0x6db   :  { %7097 = vmatpush2.msra.mxu1 %v7027_v49 }
 0x6dc   :  { %7098 = vmatprep.subr.mxu1 %v9240_v3 }
 0x6dd   :  { %7099 = vmatpush2.msra.mxu1 %v7026_v17 }
 0x6de   :  { %7100 = vmatprep.subr.mxu1 %v9240_v3 }
 0x6df   :  { %7101 = vmatpush2.msra.mxu1 %v7025_v51 }
 0x6e0   :  { %7102 = vmatprep.subr.mxu1 %v9240_v3 }
 0x6e1   :  { %7103 = vmatpush2.msra.mxu1 %v7024_v5 }
 0x6fb   :  { %v6472_v30 = vpop.f32.mrf.mxu0  ;;  %v6637_v57 = vpop.f32.mrf.mxu1 }
 0x6fc   :  { %v13987_v61 = vadd.f32 %v7755_v7, %v6472_v30  ;;  %v7127_v7 = vld [vmem:[%s14151_s10 + $0x50] sm:$0xff] }
 0x6fd   :  { %v6474_v14 = vpop.f32.mrf.mxu0  ;;  %v6639_v32 = vpop.f32.mrf.mxu1  ;;  %8368 = vmatprep.subr.mxu0 %v7127_v7 }
 0x6fe   :  { %8369 = vmatpush3.msra.mxu0 %v7127_v7 }
 0x6ff   :  { %8370 = vmatprep.subr.mxu0 %v7126_v21 }
 0x700   :  { %8371 = vmatpush3.msra.mxu0 %v7126_v21 }
 0x701   :  { %8372 = vmatprep.subr.mxu0 %v7125_v18 }
 0x702   :  { %8373 = vmatpush3.msra.mxu0 %v7125_v18 }
 0x717   :  { %v6477_v43 = vpop.f32.mrf.mxu0 }
 0x718   :  { %v13989_v55 = vadd.f32 %v7758_v45, %v6477_v43  ;;  %v7124_v45 = vld [vmem:[%s14151_s10 + $0x38] sm:$0xff]  ;;  %v7123_v43 = vld [vmem:[%s14151_s10 + $0x30] sm:$0xff] }
 0x719   :  { %v6479_v53 = vpop.f32.mrf.mxu0  ;;  %8374 = vmatprep.subr.mxu0 %v7124_v45 }
 0x71a   :  { %8375 = vmatpush3.msra.mxu0 %v7124_v45  ;;  %v7122_v53 = vld [vmem:[%s14151_s10 + $0x28] sm:$0xff] }
 0x71b   :  { %8376 = vmatprep.subr.mxu0 %v7123_v43 }
 0x71c   :  { %v7791_v16 = vpop.f32.mrf.mxu0  ;;  %8377 = vmatpush3.msra.mxu0 %v7123_v43 }
 0x71d   :  { %8378 = vmatprep.subr.mxu0 %v7122_v53 }
 0x71e   :  { %v7792_v6 = vpop.f32.mrf.mxu0  ;;  %8379 = vmatpush3.msra.mxu0 %v7122_v53 }
 0x71f   :  { %v7793_v60 = vadd.f32 %v7792_v6, %v7791_v16 }
 0x721   :  { %v6638_v36 = vadd.f32 %v7793_v60, %v6637_v57 }
 0x723   :  { %6978 = vrot.lane.b32.xlu0 %v6638_v36, %s9250_s24 }
 0x72d   :  { %v7794_v2 = vpop.f32.mrf.mxu0 }
 0x72f   :  { %v6642_v47 = vpop.f32.mrf.mxu1  ;;  %v7795_v12 = vpop.f32.mrf.mxu0 }
 0x730   :  { %v7796_v50 = vadd.f32 %v7795_v12, %v7794_v2 }
 0x731   :  { %v6644_v31 = vpop.f32.mrf.mxu1 }
 0x732   :  { %v6643_v52 = vadd.f32 %v7796_v50, %v6642_v47 }
 0x733   :  { %v6802_v29 = vpop.f32.mrf.mxu1 }
 0x735   :  { %v6804_v1 = vpop.f32.mrf.mxu1 }
 0x737   :  { %v13992_v23 = vpop.f32.mrf.mxu1 }
 0x739   :  { %v6809_v44 = vpop.f32.mrf.mxu1 }
 0x73d   :  { %v7829_v48 = vpop.f32.mrf.mxu0 }
 0x73f   :  { %v7830_v46 = vpop.f32.mrf.mxu0 }
 0x740   :  { %v7831_v58 = vadd.f32 %v7830_v46, %v7829_v48  ;;  %v7117_v48 = vld [vmem:[%s14151_s10] sm:$0xff] }
 0x741   :  { %v7832_v41 = vpop.f32.mrf.mxu0 }
 0x742   :  { %v6803_v27 = vadd.f32 %v7831_v58, %v6802_v29 }
 0x743   :  { %v7833_v33 = vpop.f32.mrf.mxu0 }
 0x744   :  { %6986 = vrot.lane.b32.xlu1 %v6803_v27, %s9251_s28  ;;  %v7834_v54 = vadd.f32 %v7833_v33, %v7832_v41 }
 0x746   :  { %v6808_v57 = vadd.f32 %v7834_v54, %v13992_v23 }
 0x748   :  { %6980 = vrot.lane.b32.xlu1 %v6643_v52, %s9250_s24 }
 0x75d   :  { %v7867_v42 = vpop.f32.mrf.mxu0 }
 0x75f   :  { %v7868_v26 = vpop.f32.mrf.mxu0 }
 0x760   :  { %v7869_v3 = vadd.f32 %v7868_v26, %v7867_v42 }
 0x761   :  { %v7870_v11 = vpop.f32.mrf.mxu0 }
 0x763   :  { %v7871_v8 = vpop.f32.mrf.mxu0 }
 0x764   :  { %v7872_v0 = vadd.f32 %v7871_v8, %v7870_v11 }
 0x78b   :  { %v6967_v4 = vpop.f32.mrf.mxu0 }
 0x78c   :  { %v6968_v62 = vadd.f32 %v7869_v3, %v6967_v4 }
 0x78d   :  { %v6969_v63 = vpop.f32.mrf.mxu0 }
 0x78e   :  { %6994 = vrot.lane.b32.xlu0 %v6968_v62, %s9248_s25 }
 0x78f   :  { %v6972_v30 = vpop.f32.mrf.mxu0 }
 0x790   :  { %v6973_v14 = vadd.f32 %v7872_v0, %v6972_v30 }
 0x791   :  { %v6974_v32 = vpop.f32.mrf.mxu0 }
 0x792   :  { %6988 = vrot.lane.b32.xlu0 %v6808_v57, %s9251_s28  ;;  %6996 = vrot.lane.b32.xlu1 %v6973_v14, %s9248_s25 }
 0x795   :  { %v6979_v6 = vpop.permute.xlu0 %6978 }
 0x796   :  { %v7001_v60 = vsel %vm7000_vm0, %v13987_v61, %v6979_v6  ;;  %v7121_v61 = vld [vmem:[%s14151_s10 + $0x20] sm:$0xff] }
 0x797   :  { %8380 = vmatprep.subr.mxu0 %v7121_v61 }
 0x798   :  { %8381 = vmatpush3.msra.mxu0 %v7121_v61 }
 0x799   :  { %8382 = vmatprep.subr.mxu0 %v7120_v40 }
 0x79a   :  { %8383 = vmatpush3.msra.mxu0 %v7120_v40 }
 0x7b6   :  { %v6987_v16 = vpop.permute.xlu1 %6986 }
 0x7b7   :  { %v7004_v36 = vsel %vm7003_vm3, %v7001_v60, %v6987_v16 }
 0x7ba   :  { %v6981_v47 = vpop.permute.xlu1 %6980 }
 0x7bb   :  { %v7002_v2 = vsel %vm7000_vm0, %v13989_v55, %v6981_v47  ;;  %v7119_v55 = vld [vmem:[%s14151_s10 + $0x10] sm:$0xff] }
 0x7bc   :  { %8384 = vmatprep.subr.mxu0 %v7119_v55 }
 0x7bd   :  { %8385 = vmatpush3.msra.mxu0 %v7119_v55 }
 0x7be   :  { %8386 = vmatprep.subr.mxu0 %v7118_v35 }
 0x7bf   :  { %8387 = vmatpush3.msra.mxu0 %v7118_v35 }
 0x7c0   :  { %8388 = vmatprep.subr.mxu0 %v7117_v48 }
 0x7c1   :  { %8389 = vmatpush3.msra.mxu0 %v7117_v48 }
 0x800   :  { %v6995_v31 = vpop.permute.xlu0 %6994 }
 0x801   :  { %v7006_v29 = vsel %vm4183_vm14, %v7004_v36, %v6995_v31  ;;  %7518 = vmatprep.mubr.msk.f32.mxu1 %vm7035_vm4, %v6995_v31 }
 0x802   :  { %7105 = vmatmul.mubr.f32.vlgmr.msra.gmra.mxu1 %v7006_v29 }
 0x804   :  { %v6989_v1 = vpop.permute.xlu0 %6988  ;;  %v6997_v23 = vpop.permute.xlu1 %6996 }
 0x805   :  { %v7005_v12 = vsel %vm7003_vm3, %v7002_v2, %v6989_v1  ;;  %7519 = vmatprep.mubr.msk.f32.mxu1 %vm7035_vm4, %v6997_v23 }
 0x806   :  { %v7007_v44 = vsel %vm4183_vm14, %v7005_v12, %v6997_v23 }
 0x807   :  { %7110 = vmatmul.mubr.f32.gmra.mxu1 %v7007_v44 }
 0x8c2   :  { %v7106_v46 = vpop.f32.mrf.mxu1 }
 0x8c3   :  { %v7107_v58 = vadd.f32 %v7517_v34, %v7106_v46 }
 0x8c4   :  { %v7108_v25 = vpop.f32.mrf.mxu1 }
 0x8c5   :  { %v7115_v50 = vmax.f32 %v7107_v58, 0.0 }
 0x8c7   :  { %v7111_v27 = vpop.f32.mrf.mxu1  ;;  %8390 = vmatprep.mubr.msk.f32.mxu0 %vm7137_vm5, %v7115_v50 }
 0x8c8   :  { %v7112_v13 = vadd.f32 %v7517_v34, %v7111_v27 }
 0x8c9   :  { %v7113_v37 = vpop.f32.mrf.mxu1 }
 0x8ca   :  { %v7116_v52 = vmax.f32 %v7112_v13, 0.0 }
 0x8cc   :  { %8391 = vmatmul.mubr.msk.f32.vlgmr.msra.gmra.mxu0 %vm7137_vm5, %v7116_v52 }
 0x98c   :  { %v8392_v20 = vpop.f32.mrf.mxu0 }
 0x98d   :  { %v7219_v10 = vadd.f32 %v8392_v20, %v7520_v39 }
 0x98e   :  { %v7213_v15 = vpop.f32.mrf.mxu0 }
 0x98f   :  { %v7214_v59 = vadd.f32 %v7520_v39, %v7213_v15  ;;  %v7226_v24 = vsel %vm7222_vm6, %v7219_v10, -inf }
 0x990   :  { %7227 = vmax.xlane.f32.xlu1 %v7226_v24 }
 0x991   :  { %v7223_v22 = vsel %vm7222_vm6, %v7214_v59, -inf }
 0x992   :  { %7224 = vmax.xlane.f32.xlu0 %v7223_v22 }
 0xa19   :  { %v7228_v19 = vpop.xlane.xlu1 %7227 }
 0xa1a   :  { %v7230_v56 = vsub.f32 %v7219_v10, %v7228_v19 }
 0xa1b   :  { %v7225_v38 = vpop.xlane.xlu0 %7224 }
 0xa1c   :  { %v7229_v49 = vsub.f32 %v7214_v59, %v7225_v38  ;;  %v7233_v17 = vmul.f32 1.442695, %v7230_v56 }
 0xa1e   :  { %v7231_v51 = vmul.f32 1.442695, %v7229_v49 }
 0xa20   :  { %9230 = vpow2.f32 %v7231_v51 }
 0xa21   :  { %9232 = vpow2.f32 %v7233_v17 }
 0xa2d   :  { %v9231_v41 = vpop.eup %9230 }
 0xa2e   :  { %v7235_v33 = vsel %vm7222_vm6, %v9231_v41, 0.0  ;;  %v9233_v42 = vpop.eup %9232 }
 0xa2f   :  { %7236 = vadd.xlane.f32.xlu0 %v7235_v33  ;;  %v7238_v5 = vsel %vm7222_vm6, %v9233_v42, 0.0 }
 0xa33   :  { %7239 = vadd.xlane.f32.xlu0 %v7238_v5 }
 0xab8   :  { %v7237_v26 = vpop.xlane.xlu0 %7236 }
 0xab9   :  { %9234 = vlog2.f32 %v7237_v26 }
 0xabc   :  { %v7240_v11 = vpop.xlane.xlu0 %7239 }
 0xabd   :  { %9236 = vlog2.f32 %v7240_v11 }
 0xac6   :  { %v9235_v9 = vpop.eup %9234 }
 0xac7   :  { %v7242_v28 = vmul.f32 0.6931472, %v9235_v9 }
 0xac9   :  { %v7245_v8 = vsub.f32 %v7229_v49, %v7242_v28 }
 0xaca   :  { %v9237_v3 = vpop.eup %9236 }
 0xacb   :  { %7247 = vst.msk [vmem:[%s14154_s12] sm:$0xff] %vm7222_vm6, %v7245_v8  ;;  %v7244_v7 = vmul.f32 0.6931472, %v9237_v3 }
 0xacd   :  { %v7246_v4 = vsub.f32 %v7230_v56, %v7244_v7 }
 0xacf   :  { %7248 = vst.msk [vmem:[%s14154_s12 + $0x8] sm:$0xff] %vm7222_vm6, %v7246_v4 }

</bundles_post_ra>
